<compile_context>
chip_gen: v6e
topology: v6e:2x2x1
jax: 0.10.0
libtpu: 0.0.40
codegen_flags: <defaults>
</compile_context>

<pallas_src>
import functools

import jax
import jax.numpy as jnp
from jax.experimental import pallas as pl
from jax.experimental.pallas import tpu as pltpu


POOL_INPUT_SIZE = 3072
HIDDEN = 1024
LANE = 128


def _mlp_kernel(x_ref, w6_ref, b6_ref, w7_ref, b7_ref, w8_ref, b8_ref, o_ref):
    # x tile arrives in f32 (single 4 B/elem HBM read); cast to bf16 in VMEM.
    xb = x_ref[...].astype(w6_ref.dtype)
    # fc6 + relu6  (dropout p=0.5 is identity in eval mode)
    h = jnp.dot(xb, w6_ref[...], preferred_element_type=jnp.float32)
    h = jnp.maximum(h + b6_ref[...], 0.0)
    # fc7 + relu7
    h = jnp.dot(h.astype(w7_ref.dtype), w7_ref[...], preferred_element_type=jnp.float32)
    h = jnp.maximum(h + b7_ref[...], 0.0)
    # fc8
    out = jnp.dot(h.astype(w8_ref.dtype), w8_ref[...], preferred_element_type=jnp.float32)
    o_ref[...] = (out + b8_ref[...]).astype(o_ref.dtype)


def _vmem_limit_bytes():
    """<= 3/4 of physical VMEM per TensorCore: ~96 MiB on v5e/v6e (128 MiB),
    ~48 MiB on v7x (64 MiB). Fallback is safe on every generation."""
    try:
        cap = pltpu.get_tpu_info().vmem_capacity_bytes
        return int(cap * 3 // 4)
    except Exception:
        return 48 * 1024 * 1024


def _pick_tile_m(M):
    # Small/medium problems: one block covering the full row extent (no (8,)
    # rule when block == full dim; avoids duplicating the weight stream across
    # cores for tiny grids). Large problems: 512-row tiles (multiple of 8,
    # ~3-6% per-step overhead on v6e/v7x, footprint well under the 48 MiB
    # v7x budget, >= 2 grid steps for megacore 'parallel' sharding).
    if M <= 512:
        return M
    return 512


def _build_pallas_call(M, feat, out_dim_p, tile_m, out_dtype, single_buffer_weights):
    # Constant-index operands (weights/biases) never change across the grid;
    # request single buffering so they are held resident once in VMEM.
    const_kw = dict(pipeline_mode=pl.Buffered(1)) if single_buffer_weights else {}
    in_specs = [
        pl.BlockSpec((tile_m, feat), lambda i: (i, 0)),                 # x rows (f32)
        pl.BlockSpec((feat, HIDDEN), lambda i: (0, 0), **const_kw),     # W6^T (bf16)
        pl.BlockSpec((1, HIDDEN), lambda i: (0, 0), **const_kw),        # b6
        pl.BlockSpec((HIDDEN, HIDDEN), lambda i: (0, 0), **const_kw),   # W7^T (bf16)
        pl.BlockSpec((1, HIDDEN), lambda i: (0, 0), **const_kw),        # b7
        pl.BlockSpec((HIDDEN, out_dim_p), lambda i: (0, 0), **const_kw),  # W8^T (bf16)
        pl.BlockSpec((1, out_dim_p), lambda i: (0, 0), **const_kw),     # b8
    ]
    out_specs = pl.BlockSpec((tile_m, out_dim_p), lambda i: (i, 0))
    return pl.pallas_call(
        _mlp_kernel,
        out_shape=jax.ShapeDtypeStruct((M, out_dim_p), out_dtype),
        grid_spec=pltpu.PrefetchScalarGridSpec(
            num_scalar_prefetch=0,
            grid=(pl.cdiv(M, tile_m),),
            in_specs=in_specs,
            out_specs=out_specs,
        ),
        compiler_params=pltpu.CompilerParams(
            dimension_semantics=("parallel",),
            vmem_limit_bytes=_vmem_limit_bytes(),
        ),
    )


@functools.lru_cache(maxsize=None)
def _single_buffer_weights_ok(M, feat, out_dim_p, tile_m, x_dtype, w_dtype, out_dtype):
    """One-time capability probe (lowering only, cached per config): does this
    configuration lower with Buffered(1) weight blocks? The real pallas_call is
    NOT wrapped in try/except, so genuine kernel/lowering bugs surface."""
    args = (
        jax.ShapeDtypeStruct((M, feat), jnp.dtype(x_dtype)),
        jax.ShapeDtypeStruct((feat, HIDDEN), jnp.dtype(w_dtype)),
        jax.ShapeDtypeStruct((1, HIDDEN), jnp.float32),
        jax.ShapeDtypeStruct((HIDDEN, HIDDEN), jnp.dtype(w_dtype)),
        jax.ShapeDtypeStruct((1, HIDDEN), jnp.float32),
        jax.ShapeDtypeStruct((HIDDEN, out_dim_p), jnp.dtype(w_dtype)),
        jax.ShapeDtypeStruct((1, out_dim_p), jnp.float32),
    )
    try:
        fn = _build_pallas_call(M, feat, out_dim_p, tile_m, jnp.dtype(out_dtype), True)
        jax.jit(fn).lower(*args)
        return True
    except Exception:
        return False


def _maybe_cast(a, dt):
    return a if a.dtype == jnp.dtype(dt) else a.astype(dt)


def prepare_params(params, compute_dtype=jnp.bfloat16):
    """One-time weight prep, hoisted out of the per-call path:
    weights -> bf16 (halves weight HBM/VMEM traffic, native MXU rate),
    biases -> f32 with shape (1, N). Call once and reuse across invocations."""
    w6, b6, w7, b7, w8, b8 = params
    return (
        jnp.asarray(w6, compute_dtype), jnp.asarray(b6, jnp.float32).reshape(1, -1),
        jnp.asarray(w7, compute_dtype), jnp.asarray(b7, jnp.float32).reshape(1, -1),
        jnp.asarray(w8, compute_dtype), jnp.asarray(b8, jnp.float32).reshape(1, -1),
    )


def vis_transform_layer(x, params, *, tile_m=None, compute_dtype=jnp.bfloat16):
    """x: (batch, seq, 3072) float32. params: (w6,b6,w7,b7,w8,b8) with weights
    pre-transposed to (in, out); pass them through prepare_params() once so the
    per-call wrapper work is just a free reshape of x.
    Returns (batch, seq, input_size) in x.dtype."""
    w6, b6, w7, b7, w8, b8 = params
    batch, seq, feat = x.shape
    assert feat == POOL_INPUT_SIZE
    out_dim = w8.shape[1]

    # Safety net for un-prepared params; all no-ops when prepare_params() was used.
    w6 = _maybe_cast(w6, compute_dtype)
    w7 = _maybe_cast(w7, compute_dtype)
    w8 = _maybe_cast(w8, compute_dtype)
    b6 = _maybe_cast(b6, jnp.float32).reshape(1, -1)
    b7 = _maybe_cast(b7, jnp.float32).reshape(1, -1)
    b8 = _maybe_cast(b8, jnp.float32).reshape(1, -1)

    # Lane-dense output: pad fc8 out-features to a multiple of 128 (rare case),
    # slice back in the wrapper. Avoids masked partial stores.
    pad = (-out_dim) % LANE
    if pad:
        w8 = jnp.pad(w8, ((0, 0), (0, pad)))
        b8 = jnp.pad(b8, ((0, 0), (0, pad)))
    out_dim_p = out_dim + pad

    M = batch * seq
    x2d = x.reshape(M, feat)  # free reshape; NO wrapper-side bf16 cast (kernel casts in VMEM)

    if tile_m is None:
        tile_m = _pick_tile_m(M)

    single = _single_buffer_weights_ok(
        M, feat, out_dim_p, tile_m, str(x2d.dtype), str(w6.dtype), str(x.dtype))
    fn = _build_pallas_call(M, feat, out_dim_p, tile_m, x.dtype, single)
    out2d = fn(x2d, w6, b6, w7, b7, w8, b8)

    if pad:
        out2d = out2d[:, :out_dim]
    return out2d.reshape(batch, seq, out_dim)


def init_params(key, input_size):
    """Parameter init mimicking nn.Linear default (uniform +/- 1/sqrt(fan_in)).
    Weights are returned already transposed to (in, out), in float32."""
    ks = jax.random.split(key, 6)

    def linear(kw, kb, fan_in, fan_out):
        bound = 1.0 / jnp.sqrt(fan_in)
        w = jax.random.uniform(kw, (fan_in, fan_out), jnp.float32, -bound, bound)
        b = jax.random.uniform(kb, (1, fan_out), jnp.float32, -bound, bound)
        return w, b

    w6, b6 = linear(ks[0], ks[1], POOL_INPUT_SIZE, HIDDEN)
    w7, b7 = linear(ks[2], ks[3], HIDDEN, HIDDEN)
    w8, b8 = linear(ks[4], ks[5], HIDDEN, input_size)
    return (w6, b6, w7, b7, w8, b8)


def _reference_mixed(x, params_f32, compute_dtype=jnp.bfloat16):
    """Plain-JAX reference with the same bf16-weight / f32-accumulate math."""
    w6, b6, w7, b7, w8, b8 = params_f32

    def lin(a, w, b):
        return jnp.dot(a.astype(compute_dtype), w.astype(compute_dtype),
                       preferred_element_type=jnp.float32) + b.reshape(1, -1)

    h = jnp.maximum(lin(x, w6, b6), 0.0)
    h = jnp.maximum(lin(h, w7, b7), 0.0)
    return lin(h, w8, b8)


def _reference_f32(x, params_f32):
    """Full-f32 reference matching the original PyTorch module in eval mode."""
    w6, b6, w7, b7, w8, b8 = params_f32
    h = jnp.maximum(x @ w6 + b6.reshape(1, -1), 0.0)
    h = jnp.maximum(h @ w7 + b7.reshape(1, -1), 0.0)
    return h @ w8 + b8.reshape(1, -1)


if __name__ == "__main__":
    key = jax.random.PRNGKey(0)
    k_x, k_p, k_x2 = jax.random.split(key, 3)

    batch, seq = 2, 8
    input_size = 128  # module's `input_size` (fc8 output features; lane-dense)

    x = jax.random.normal(k_x, (batch, seq, POOL_INPUT_SIZE), dtype=jnp.float32)
    params_f32 = init_params(k_p, input_size)
    params = prepare_params(params_f32)   # one-time bf16 cast, hoisted off the call path

    out = vis_transform_layer(x, params)
    out = jax.block_until_ready(out)
    assert out.shape == (batch, seq, input_size)

    # correctness vs. matching mixed-precision reference and vs. true f32 math
    ref_mixed = _reference_mixed(x, params_f32)
    ref_f32 = _reference_f32(x, params_f32)
    assert jnp.allclose(out, ref_mixed, atol=2e-2, rtol=2e-2), "mismatch vs mixed-precision reference"
    assert jnp.allclose(out, ref_f32, atol=6e-2, rtol=6e-2), "mismatch vs f32 reference"

    # tail-handling check: non-multiple M with a forced small tile
    # (M=20, tile_m=8 -> grid=(3,), partial last block must not leak).
    x_tail = jax.random.normal(k_x2, (2, 10, POOL_INPUT_SIZE), dtype=jnp.float32)
    out_tail = jax.block_until_ready(vis_transform_layer(x_tail, params, tile_m=8))
    ref_tail = _reference_mixed(x_tail, params_f32)
    assert out_tail.shape == (2, 10, input_size)
    assert jnp.allclose(out_tail, ref_tail, atol=2e-2, rtol=2e-2), "tail mismatch vs reference"

    print("KERNEL_OK")
</pallas_src>

<mosaic_0001>
module attributes {stable_mosaic.version = 11 : i64} {
  func.func @_mlp_kernel(%arg0: i32, %arg1: memref<16x3072xf32, #tpu.memory_space<vmem>>, %arg2: memref<3072x1024xbf16, #tpu.memory_space<vmem>>, %arg3: memref<1x1024xf32, #tpu.memory_space<vmem>>, %arg4: memref<1024x1024xbf16, #tpu.memory_space<vmem>>, %arg5: memref<1x1024xf32, #tpu.memory_space<vmem>>, %arg6: memref<1024x128xbf16, #tpu.memory_space<vmem>>, %arg7: memref<1x128xf32, #tpu.memory_space<vmem>>, %arg8: memref<16x128xf32, #tpu.memory_space<vmem>>) attributes {dimension_semantics = [#tpu.dimension_semantics<parallel>], iteration_bounds = array<i64: 1>, scalar_prefetch = 0 : i64, scratch_operands = 0 : i64, tpu.core_type = #tpu.core_type<tc>, window_params = [{transform_indices = @transform_0, window_bounds = array<i64: 16, 3072>}, {pipeline_mode = #tpu.pipeline_mode<synchronous>, transform_indices = @transform_1, window_bounds = array<i64: 3072, 1024>}, {pipeline_mode = #tpu.pipeline_mode<synchronous>, transform_indices = @transform_2, window_bounds = array<i64: 1, 1024>}, {pipeline_mode = #tpu.pipeline_mode<synchronous>, transform_indices = @transform_3, window_bounds = array<i64: 1024, 1024>}, {pipeline_mode = #tpu.pipeline_mode<synchronous>, transform_indices = @transform_4, window_bounds = array<i64: 1, 1024>}, {pipeline_mode = #tpu.pipeline_mode<synchronous>, transform_indices = @transform_5, window_bounds = array<i64: 1024, 128>}, {pipeline_mode = #tpu.pipeline_mode<synchronous>, transform_indices = @transform_6, window_bounds = array<i64: 1, 128>}, {transform_indices = @transform_7, window_bounds = array<i64: 16, 128>}]} {
    %c0 = arith.constant 0 : index
    %c0_0 = arith.constant 0 : index
    %0 = vector.load %arg1[%c0, %c0_0] : memref<16x3072xf32, #tpu.memory_space<vmem>>, vector<16x3072xf32>
    %1 = arith.truncf %0 : vector<16x3072xf32> to vector<16x3072xbf16>
    %c0_1 = arith.constant 0 : index
    %c0_2 = arith.constant 0 : index
    %2 = vector.load %arg2[%c0_1, %c0_2] : memref<3072x1024xbf16, #tpu.memory_space<vmem>>, vector<3072x1024xbf16>
    %cst = arith.constant dense<0.000000e+00> : vector<16x1024xf32>
    %3 = tpu.matmul %1, %2, %cst {dimension_numbers = #tpu.dot_dimension_numbers<[1], [0], [0], [1], [0, 0, 1, 1], [], []>} : vector<16x3072xbf16>, vector<3072x1024xbf16>, vector<16x1024xf32> -> vector<16x1024xf32>
    %c0_3 = arith.constant 0 : index
    %c0_4 = arith.constant 0 : index
    %4 = vector.load %arg3[%c0_3, %c0_4] : memref<1x1024xf32, #tpu.memory_space<vmem>>, vector<1x1024xf32>
    %5 = vector.broadcast %4 : vector<1x1024xf32> to vector<16x1024xf32>
    %6 = arith.addf %3, %5 : vector<16x1024xf32>
    %cst_5 = arith.constant 0.000000e+00 : f32
    %7 = vector.broadcast %cst_5 : f32 to vector<16x1024xf32>
    %8 = arith.maximumf %6, %7 : vector<16x1024xf32>
    %9 = arith.truncf %8 : vector<16x1024xf32> to vector<16x1024xbf16>
    %c0_6 = arith.constant 0 : index
    %c0_7 = arith.constant 0 : index
    %10 = vector.load %arg4[%c0_6, %c0_7] : memref<1024x1024xbf16, #tpu.memory_space<vmem>>, vector<1024x1024xbf16>
    %cst_8 = arith.constant dense<0.000000e+00> : vector<16x1024xf32>
    %11 = tpu.matmul %9, %10, %cst_8 {dimension_numbers = #tpu.dot_dimension_numbers<[1], [0], [0], [1], [0, 0, 1, 1], [], []>} : vector<16x1024xbf16>, vector<1024x1024xbf16>, vector<16x1024xf32> -> vector<16x1024xf32>
    %c0_9 = arith.constant 0 : index
    %c0_10 = arith.constant 0 : index
    %12 = vector.load %arg5[%c0_9, %c0_10] : memref<1x1024xf32, #tpu.memory_space<vmem>>, vector<1x1024xf32>
    %13 = vector.broadcast %12 : vector<1x1024xf32> to vector<16x1024xf32>
    %14 = arith.addf %11, %13 : vector<16x1024xf32>
    %cst_11 = arith.constant 0.000000e+00 : f32
    %15 = vector.broadcast %cst_11 : f32 to vector<16x1024xf32>
    %16 = arith.maximumf %14, %15 : vector<16x1024xf32>
    %17 = arith.truncf %16 : vector<16x1024xf32> to vector<16x1024xbf16>
    %c0_12 = arith.constant 0 : index
    %c0_13 = arith.constant 0 : index
    %18 = vector.load %arg6[%c0_12, %c0_13] : memref<1024x128xbf16, #tpu.memory_space<vmem>>, vector<1024x128xbf16>
    %cst_14 = arith.constant dense<0.000000e+00> : vector<16x128xf32>
    %19 = tpu.matmul %17, %18, %cst_14 {dimension_numbers = #tpu.dot_dimension_numbers<[1], [0], [0], [1], [0, 0, 1, 1], [], []>} : vector<16x1024xbf16>, vector<1024x128xbf16>, vector<16x128xf32> -> vector<16x128xf32>
    %c0_15 = arith.constant 0 : index
    %c0_16 = arith.constant 0 : index
    %20 = vector.load %arg7[%c0_15, %c0_16] : memref<1x128xf32, #tpu.memory_space<vmem>>, vector<1x128xf32>
    %21 = vector.broadcast %20 : vector<1x128xf32> to vector<16x128xf32>
    %22 = arith.addf %19, %21 : vector<16x128xf32>
    %c0_17 = arith.constant 0 : index
    %c0_18 = arith.constant 0 : index
    %23 = vector.load %arg8[%c0_17, %c0_18] : memref<16x128xf32, #tpu.memory_space<vmem>>, vector<16x128xf32>
    tpu.vector_store %arg8[%c0_17, %c0_18], %22 {strides = array<i32>} : memref<16x128xf32, #tpu.memory_space<vmem>>, vector<16x128xf32>,
    return
  }
  func.func @transform_0(%arg0: i32) -> (i32, i32) {
    %c0_i32 = arith.constant 0 : i32
    %c0_i32_0 = arith.constant 0 : i32
    return %arg0, %c0_i32 : i32, i32
  }
  func.func @transform_1(%arg0: i32) -> (i32, i32) {
    %c0_i32 = arith.constant 0 : i32
    %c0_i32_0 = arith.constant 0 : i32
    %c0_i32_1 = arith.constant 0 : i32
    return %c0_i32, %c0_i32_0 : i32, i32
  }
  func.func @transform_2(%arg0: i32) -> (i32, i32) {
    %c0_i32 = arith.constant 0 : i32
    %c0_i32_0 = arith.constant 0 : i32
    %c0_i32_1 = arith.constant 0 : i32
    return %c0_i32, %c0_i32_0 : i32, i32
  }
  func.func @transform_3(%arg0: i32) -> (i32, i32) {
    %c0_i32 = arith.constant 0 : i32
    %c0_i32_0 = arith.constant 0 : i32
    %c0_i32_1 = arith.constant 0 : i32
    return %c0_i32, %c0_i32_0 : i32, i32
  }
  func.func @transform_4(%arg0: i32) -> (i32, i32) {
    %c0_i32 = arith.constant 0 : i32
    %c0_i32_0 = arith.constant 0 : i32
    %c0_i32_1 = arith.constant 0 : i32
    return %c0_i32, %c0_i32_0 : i32, i32
  }
  func.func @transform_5(%arg0: i32) -> (i32, i32) {
    %c0_i32 = arith.constant 0 : i32
    %c0_i32_0 = arith.constant 0 : i32
    %c0_i32_1 = arith.constant 0 : i32
    return %c0_i32, %c0_i32_0 : i32, i32
  }
  func.func @transform_6(%arg0: i32) -> (i32, i32) {
    %c0_i32 = arith.constant 0 : i32
    %c0_i32_0 = arith.constant 0 : i32
    %c0_i32_1 = arith.constant 0 : i32
    return %c0_i32, %c0_i32_0 : i32, i32
  }
  func.func @transform_7(%arg0: i32) -> (i32, i32) {
    %c0_i32 = arith.constant 0 : i32
    %c0_i32_0 = arith.constant 0 : i32
    return %arg0, %c0_i32 : i32, i32
  }
}

</mosaic_0001>

<bundles_post_ra>
// kernel: tpu_custom_call.1
= control target key start
LH: loop header
LB: loop body
LE: loop exit
PB: predicated region body
PF: predicated region fallthrough
CT: control target
= control target key end

     0   :  { %12 = vsyncpa [#allocation3], 0  ;;  %s19284_s0 = inlined_call_operand.hbm [shape: f32[16,3072], index: 0, kind: input, shape index: {}]   ;;  %s19285_s1 = inlined_call_operand.hbm [shape: bf16[3072,1024], index: 1, kind: input, shape index: {}]   ;;  %s19286_s2 = inlined_call_operand.hbm [shape: f32[1,1024], index: 2, kind: input, shape index: {}]   ;;  %s19287_s3 = inlined_call_operand.hbm [shape: bf16[1024,1024], index: 3, kind: input, shape index: {}]   ;;  %s19288_s4 = inlined_call_operand.hbm [shape: f32[1,1024], index: 4, kind: input, shape index: {}]   ;;  %s19289_s5 = inlined_call_operand.hbm [shape: bf16[1024,128], index: 5, kind: input, shape index: {}]   ;;  %s19290_s6 = inlined_call_operand.hbm [shape: f32[1,128], index: 6, kind: input, shape index: {}]   ;;  %s19291_s7 = inlined_call_operand.hbm [shape: f32[16,128], index: 7, kind: output, shape index: {}]  }
   0x1   :  { %13 = vsyncpa [#allocation6], 0 }
   0x2   :  { %14 = vsyncpa [#allocation9], 0 }
   0x3   :  { %15 = vsyncpa [#allocation12], 0 }
   0x4   :  { %16 = vsyncpa [#allocation4], 0  ;;  %s18521_s24 = smov [#allocation5]  }
   0x5   :  { %s34_s25 = sshll.u32 %s18521_s24, 4  ;;  %s35_s25 = int_to_ptr.vmem [resolvable:$true] %s34_s25 }
   0x6   :  { %s18359_s26 = scalar_lea.vmem %s35_s25, 196608  ;;  %p18364_p1 = scmp.lt.s32.totalorder %s35_s25, %s35_s25 }
   0x7   :  { %p18360_p0 = scmp.ne.s32.totalorder %s35_s25, %s18359_s26  ;;  %p18365_p2 = scmp.lt.s32.totalorder %s18359_s26, %s18359_s26 }
   0x9   :  { %p18366_p3 = por %p18365_p2, %p18364_p1 }
   0xb   :  { %p18367_p4 = pnand %p18366_p3, %p18360_p0 }
   0xd   :  { %18370 = shalt.err (!%p18367_p4)
}
   0xe   :  { %s18522_s27 = smov 512   ;;  %s18523_s28 = smov 32  }
   0xf   :  { %40 = dma.hbm_to_vmem [thread:$0]  %s19285_s1, 196608, %s35_s25, [#allocation6], %s18522_s27, %s18522_s27, %s18523_s28  }
  0x10   :  { %s18524_s8 = smov [#allocation8]   ;;  %s18525_s10 = smov [#allocation11]  }
  0x11   :  { %s56_s9 = sshll.u32 %s18524_s8, 4  ;;  %s78_s11 = sshll.u32 %s18525_s10, 4  ;;  %s57_s9 = int_to_ptr.vmem [resolvable:$true] %s56_s9  ;;  %s79_s11 = int_to_ptr.vmem [resolvable:$true] %s78_s11 }
  0x12   :  { %s18379_s12 = scalar_lea.vmem %s57_s9, 65536  ;;  %p18384_p6 = scmp.lt.s32.totalorder %s57_s9, %s57_s9 }
  0x13   :  { %p18380_p5 = scmp.ne.s32.totalorder %s57_s9, %s18379_s12  ;;  %p18385_p7 = scmp.lt.s32.totalorder %s18379_s12, %s18379_s12 }
  0x15   :  { %p18386_p8 = por %p18385_p7, %p18384_p6 }
  0x17   :  { %p18387_p9 = pnand %p18386_p8, %p18380_p5 }
  0x19   :  { %18390 = shalt.err (!%p18387_p9)
}
  0x1a   :  { %62 = dma.hbm_to_vmem [thread:$0]  %s19287_s3, 65536, %s57_s9, [#allocation9], %s18522_s27, %s18522_s27, %s18523_s28  }
  0x1b   :  { %s18399_s15 = scalar_lea.vmem %s79_s11, 8192  ;;  %p18404_p11 = scmp.lt.s32.totalorder %s79_s11, %s79_s11 }
  0x1c   :  { %p18400_p10 = scmp.ne.s32.totalorder %s79_s11, %s18399_s15  ;;  %p18405_p12 = scmp.lt.s32.totalorder %s18399_s15, %s18399_s15 }
  0x1e   :  { %p18406_p13 = por %p18405_p12, %p18404_p11 }
  0x20   :  { %p18407_p0 = pnand %p18406_p13, %p18400_p10 }
  0x22   :  { %18410 = shalt.err (!%p18407_p0)
}
  0x23   :  { %s18526_s1 = smov 64   ;;  %s18527_s16 = smov 4  }
  0x24   :  { %84 = dma.hbm_to_vmem [thread:$0]  %s19289_s5, 8192, %s79_s11, [#allocation12], %s18526_s1, %s18526_s1, %s18527_s16  }
  0x25   :  { %s18528_s19 = smov [#allocation2]  }
  0x26   :  { %s22_s20 = sshll.u32 %s18528_s19, 4  ;;  %s23_s20 = int_to_ptr.vmem [resolvable:$true] %s22_s20 }
  0x27   :  { %s18419_s21 = scalar_lea.vmem %s23_s20, 6144  ;;  %p18424_p2 = scmp.lt.s32.totalorder %s23_s20, %s23_s20 }
  0x28   :  { %p18420_p1 = scmp.ne.s32.totalorder %s23_s20, %s18419_s21  ;;  %p18425_p3 = scmp.lt.s32.totalorder %s18419_s21, %s18419_s21 }
  0x2a   :  { %p18426_p4 = por %p18425_p3, %p18424_p2 }
  0x2c   :  { %p18427_p5 = pnand %p18426_p4, %p18420_p1 }
  0x2e   :  { %18430 = shalt.err (!%p18427_p5)
}
  0x2f   :  { %s18529_s3 = smov 3072   ;;  %s18530_s22 = smov 192  }
  0x30   :  { %28 = dma.hbm_to_vmem [thread:$0]  %s19284_s0, 6144, %s23_s20, [#allocation3], %s18529_s3, %s18529_s3, %s18530_s22  }
  0x31   :  { %s18531_s25 = smov [#allocation7]   ;;  %s18532_s27 = smov [#allocation10]  }
  0x32   :  { %s47_s26 = sshll.u32 %s18531_s25, 4  ;;  %s69_s5 = sshll.u32 %s18532_s27, 4  ;;  %s48_s26 = int_to_ptr.vmem [resolvable:$true] %s47_s26  ;;  %s70_s5 = int_to_ptr.vmem [resolvable:$true] %s69_s5 }
  0x33   :  { %s18439_s28 = scalar_lea.vmem %s48_s26, 128  ;;  %p18444_p7 = scmp.lt.s32.totalorder %s48_s26, %s48_s26 }
  0x34   :  { %p18440_p6 = scmp.ne.s32.totalorder %s48_s26, %s18439_s28  ;;  %p18445_p8 = scmp.lt.s32.totalorder %s18439_s28, %s18439_s28 }
  0x36   :  { %p18446_p9 = por %p18445_p8, %p18444_p7 }
  0x38   :  { %p18447_p10 = pnand %p18446_p9, %p18440_p6 }
  0x3a   :  { %18450 = shalt.err (!%p18447_p10)
}
  0x3b   :  { %50 = dma.hbm_to_vmem [thread:$0]  %s19286_s2, 128, %s48_s26, [#allocation6]  }
  0x3c   :  { %s18459_s8 = scalar_lea.vmem %s70_s5, 128  ;;  %p18464_p12 = scmp.lt.s32.totalorder %s70_s5, %s70_s5 }
  0x3d   :  { %p18460_p11 = scmp.ne.s32.totalorder %s70_s5, %s18459_s8  ;;  %p18465_p13 = scmp.lt.s32.totalorder %s18459_s8, %s18459_s8 }
  0x3f   :  { %p18466_p0 = por %p18465_p13, %p18464_p12 }
  0x41   :  { %p18467_p1 = pnand %p18466_p0, %p18460_p11 }
  0x43   :  { %18470 = shalt.err (!%p18467_p1)
}
  0x44   :  { %72 = dma.hbm_to_vmem [thread:$0]  %s19288_s4, 128, %s70_s5, [#allocation9]  }
  0x45   :  { %s18533_s10 = smov [#allocation13]  }
  0x46   :  { %s91_s11 = sshll.u32 %s18533_s10, 4  ;;  %s92_s11 = int_to_ptr.vmem [resolvable:$true] %s91_s11 }
  0x47   :  { %s18479_s12 = scalar_lea.vmem %s92_s11, 16  ;;  %s18483_s13 = scalar_lea.vmem %s92_s11, 32 }
  0x48   :  { %p18480_p2 = scmp.ne.s32.totalorder %s92_s11, %s18479_s12  ;;  %p18484_p3 = scmp.lt.s32.totalorder %s92_s11, %s92_s11 }
  0x49   :  { %p18485_p4 = scmp.lt.s32.totalorder %s18483_s13, %s18479_s12 }
  0x4b   :  { %p18486_p5 = por %p18485_p4, %p18484_p3 }
  0x4d   :  { %p18487_p6 = pnand %p18486_p5, %p18480_p2 }
  0x4f   :  { %18490 = shalt.err (!%p18487_p6)
}
  0x50   :  { %94 = dma.hbm_to_vmem [thread:$0]  %s19290_s6, 16, %s92_s11, [#allocation12]  }
  0x51   :  { %18511 = dma.done.wait [#allocation3], 6144  }
  0x52   :  { %18512 = vsyncadd [#allocation3], 4294961152 }
  0x53   :  { %18513 = dma.done.wait [#allocation6], 196736  }
  0x54   :  { %18514 = vsyncadd [#allocation6], 4294770560 }
  0x55   :  { %18515 = dma.done.wait [#allocation9], 65664  }
  0x56   :  { %18516 = vsyncadd [#allocation9], 4294901632 }
  0x57   :  { %18517 = dma.done.wait [#allocation12], 8208  }
  0x58   :  { %18518 = vsyncadd [#allocation12], 4294959088  ;;  %v245_v0 = vld [vmem:[#allocation5 + $0x1c0] sm:$0xff]  ;;  %v118_v54 = vld [vmem:[#allocation2 + $0x8] sm:$0xff]  ;;  %s18534_s4 = smov [#allocation14]  }
  0x59   :  { %v249_v1 = vld [vmem:[#allocation5 + $0x1e0] sm:$0xff]  ;;  %v142_v55 = vld [vmem:[#allocation2 + $0xc8] sm:$0xff]  ;;  %v120_v59 = vld [vmem:[#allocation2 + $0x18] sm:$0xff]  ;;  %s16051_s6 = sshll.u32 %s18534_s4, 4  ;;  %s16052_s6 = int_to_ptr.vmem [resolvable:$true] %s16051_s6 }
  0x5a   :  { %v373_v2 = vld [vmem:[#allocation5 + $0x5c0] sm:$0xff]  ;;  %v16123_v3 = vcombine.high %v245_v0, %v249_v1  ;;  %v16122_v5 = vcombine.low %v245_v0, %v249_v1  ;;  %v18598_v58 = vpack.c.bf16 %v142_v55, %v118_v54  ;;  %v144_v60 = vld [vmem:[#allocation2 + $0xd8] sm:$0xff]  ;;  %s18491_s15 = scalar_lea.vmem %s16052_s6, 256  ;;  %p18496_p8 = scmp.lt.s32.totalorder %s16052_s6, %s16052_s6 }
  0x5b   :  { %v377_v4 = vld [vmem:[#allocation5 + $0x5e0] sm:$0xff]  ;;  %v18600_v63 = vpack.c.bf16 %v144_v60, %v120_v59  ;;  %p18492_p7 = scmp.ne.s32.totalorder %s16052_s6, %s18491_s15  ;;  %p18497_p9 = scmp.lt.s32.totalorder %s18491_s15, %s18491_s15 }
  0x5c   :  { %v237_v6 = vld [vmem:[#allocation5 + $0x180] sm:$0xff]  ;;  %v16251_v8 = vcombine.high %v373_v2, %v377_v4  ;;  %v16250_v9 = vcombine.low %v373_v2, %v377_v4  ;;  %9447 = vmatprep.subr.bf16.mxu0 %v16123_v3  ;;  %9479 = vmatprep.mubr.bf16.mxu0 %v18598_v58 }
  0x5d   :  { %v241_v7 = vld [vmem:[#allocation5 + $0x1a0] sm:$0xff]  ;;  %9448 = vmatpush1.bf16.msra.mxu0 %v16122_v5  ;;  %9522 = vmatprep.mubr.bf16.mxu1 %v18600_v63  ;;  %p18498_p10 = por %p18497_p9, %p18496_p8 }
  0x5e   :  { %v16115_v10 = vcombine.high %v237_v6, %v241_v7  ;;  %v365_v11 = vld [vmem:[#allocation5 + $0x580] sm:$0xff]  ;;  %9490 = vmatprep.subr.bf16.mxu1 %v16251_v8  ;;  %v16114_v18 = vcombine.low %v237_v6, %v241_v7 }
  0x5f   :  { %v369_v12 = vld [vmem:[#allocation5 + $0x5a0] sm:$0xff]  ;;  %9491 = vmatpush1.bf16.msra.mxu1 %v16250_v9  ;;  %p18499_p11 = pnand %p18498_p10, %p18492_p7 }
  0x60   :  { %v229_v13 = vld [vmem:[#allocation5 + $0x140] sm:$0xff]  ;;  %v16243_v14 = vcombine.high %v365_v11, %v369_v12  ;;  %9449 = vmatprep.subr.bf16.mxu0 %v16115_v10  ;;  %v16242_v19 = vcombine.low %v365_v11, %v369_v12 }
  0x61   :  { %v233_v15 = vld [vmem:[#allocation5 + $0x160] sm:$0xff]  ;;  %9450 = vmatpush1.bf16.msra.mxu0 %v16114_v18 }
  0x62   :  { %v357_v16 = vld [vmem:[#allocation5 + $0x540] sm:$0xff]  ;;  %v16107_v20 = vcombine.high %v229_v13, %v233_v15  ;;  %9492 = vmatprep.subr.bf16.mxu1 %v16243_v14  ;;  %v16106_v26 = vcombine.low %v229_v13, %v233_v15 }
  0x63   :  { %v361_v17 = vld [vmem:[#allocation5 + $0x560] sm:$0xff]  ;;  %9493 = vmatpush1.bf16.msra.mxu1 %v16242_v19 }
  0x64   :  { %v16235_v21 = vcombine.high %v357_v16, %v361_v17  ;;  %v221_v22 = vld [vmem:[#allocation5 + $0x100] sm:$0xff]  ;;  %9451 = vmatprep.subr.bf16.mxu0 %v16107_v20  ;;  %v16234_v27 = vcombine.low %v357_v16, %v361_v17 }
  0x65   :  { %v225_v23 = vld [vmem:[#allocation5 + $0x120] sm:$0xff]  ;;  %9452 = vmatpush1.bf16.msra.mxu0 %v16106_v26 }
  0x66   :  { %v349_v24 = vld [vmem:[#allocation5 + $0x500] sm:$0xff]  ;;  %v16099_v28 = vcombine.high %v221_v22, %v225_v23  ;;  %9494 = vmatprep.subr.bf16.mxu1 %v16235_v21  ;;  %v16098_v34 = vcombine.low %v221_v22, %v225_v23 }
  0x67   :  { %v353_v25 = vld [vmem:[#allocation5 + $0x520] sm:$0xff]  ;;  %9495 = vmatpush1.bf16.msra.mxu1 %v16234_v27 }
  0x68   :  { %v16227_v29 = vcombine.high %v349_v24, %v353_v25  ;;  %v213_v30 = vld [vmem:[#allocation5 + $0xc0] sm:$0xff]  ;;  %9453 = vmatprep.subr.bf16.mxu0 %v16099_v28  ;;  %v16226_v35 = vcombine.low %v349_v24, %v353_v25 }
  0x69   :  { %v217_v31 = vld [vmem:[#allocation5 + $0xe0] sm:$0xff]  ;;  %9454 = vmatpush1.bf16.msra.mxu0 %v16098_v34 }
  0x6a   :  { %v341_v32 = vld [vmem:[#allocation5 + $0x4c0] sm:$0xff]  ;;  %v16091_v36 = vcombine.high %v213_v30, %v217_v31  ;;  %9496 = vmatprep.subr.bf16.mxu1 %v16227_v29  ;;  %v16090_v42 = vcombine.low %v213_v30, %v217_v31 }
  0x6b   :  { %v345_v33 = vld [vmem:[#allocation5 + $0x4e0] sm:$0xff]  ;;  %9497 = vmatpush1.bf16.msra.mxu1 %v16226_v35 }
  0x6c   :  { %v16219_v37 = vcombine.high %v341_v32, %v345_v33  ;;  %v205_v38 = vld [vmem:[#allocation5 + $0x80] sm:$0xff]  ;;  %9455 = vmatprep.subr.bf16.mxu0 %v16091_v36  ;;  %v16218_v43 = vcombine.low %v341_v32, %v345_v33 }
  0x6d   :  { %v209_v39 = vld [vmem:[#allocation5 + $0xa0] sm:$0xff]  ;;  %9456 = vmatpush1.bf16.msra.mxu0 %v16090_v42 }
  0x6e   :  { %v333_v40 = vld [vmem:[#allocation5 + $0x480] sm:$0xff]  ;;  %v16083_v44 = vcombine.high %v205_v38, %v209_v39  ;;  %9498 = vmatprep.subr.bf16.mxu1 %v16219_v37  ;;  %v16082_v50 = vcombine.low %v205_v38, %v209_v39 }
  0x6f   :  { %v337_v41 = vld [vmem:[#allocation5 + $0x4a0] sm:$0xff]  ;;  %9499 = vmatpush1.bf16.msra.mxu1 %v16218_v43 }
  0x70   :  { %v16211_v45 = vcombine.high %v333_v40, %v337_v41  ;;  %v197_v46 = vld [vmem:[#allocation5 + $0x40] sm:$0xff]  ;;  %9457 = vmatprep.subr.bf16.mxu0 %v16083_v44  ;;  %v16210_v51 = vcombine.low %v333_v40, %v337_v41 }
  0x71   :  { %v201_v47 = vld [vmem:[#allocation5 + $0x60] sm:$0xff]  ;;  %9458 = vmatpush1.bf16.msra.mxu0 %v16082_v50 }
  0x72   :  { %v325_v48 = vld [vmem:[#allocation5 + $0x440] sm:$0xff]  ;;  %v16075_v52 = vcombine.high %v197_v46, %v201_v47  ;;  %9500 = vmatprep.subr.bf16.mxu1 %v16211_v45  ;;  %v16074_v0 = vcombine.low %v197_v46, %v201_v47 }
  0x73   :  { %v329_v49 = vld [vmem:[#allocation5 + $0x460] sm:$0xff]  ;;  %9501 = vmatpush1.bf16.msra.mxu1 %v16210_v51 }
  0x74   :  { %v189_v53 = vld [vmem:[#allocation5] sm:$0xff]  ;;  %v16203_v56 = vcombine.high %v325_v48, %v329_v49  ;;  %9459 = vmatprep.subr.bf16.mxu0 %v16075_v52  ;;  %v16202_v1 = vcombine.low %v325_v48, %v329_v49 }
  0x75   :  { %v193_v57 = vld [vmem:[#allocation5 + $0x20] sm:$0xff]  ;;  %9460 = vmatpush1.bf16.msra.mxu0 %v16074_v0 }
  0x76   :  { %v317_v61 = vld [vmem:[#allocation5 + $0x400] sm:$0xff]  ;;  %v16067_v2 = vcombine.high %v189_v53, %v193_v57  ;;  %9502 = vmatprep.subr.bf16.mxu1 %v16203_v56  ;;  %v16066_v8 = vcombine.low %v189_v53, %v193_v57 }
  0x77   :  { %v321_v62 = vld [vmem:[#allocation5 + $0x420] sm:$0xff]  ;;  %9503 = vmatpush1.bf16.msra.mxu1 %v16202_v1 }
  0x78   :  { %v16195_v3 = vcombine.high %v317_v61, %v321_v62  ;;  %v309_v4 = vld [vmem:[#allocation5 + $0x3c0] sm:$0xff]  ;;  %9461 = vmatprep.subr.bf16.mxu0 %v16067_v2  ;;  %v16194_v9 = vcombine.low %v317_v61, %v321_v62 }
  0x79   :  { %v313_v5 = vld [vmem:[#allocation5 + $0x3e0] sm:$0xff]  ;;  %9462 = vmatpush1.bf16.msra.mxu0 %v16066_v8 }
  0x7a   :  { %v437_v6 = vld [vmem:[#allocation5 + $0x7c0] sm:$0xff]  ;;  %v16187_v10 = vcombine.high %v309_v4, %v313_v5  ;;  %9504 = vmatprep.subr.bf16.mxu1 %v16195_v3  ;;  %v16186_v16 = vcombine.low %v309_v4, %v313_v5 }
  0x7b   :  { %v441_v7 = vld [vmem:[#allocation5 + $0x7e0] sm:$0xff]  ;;  %9505 = vmatpush1.bf16.msra.mxu1 %v16194_v9 }
  0x7c   :  { %v16315_v11 = vcombine.high %v437_v6, %v441_v7  ;;  %v301_v12 = vld [vmem:[#allocation5 + $0x380] sm:$0xff]  ;;  %9463 = vmatprep.subr.bf16.mxu0 %v16187_v10  ;;  %v16314_v17 = vcombine.low %v437_v6, %v441_v7 }
  0x7d   :  { %v305_v13 = vld [vmem:[#allocation5 + $0x3a0] sm:$0xff]  ;;  %9464 = vmatpush2.bf16.msra.mxu0 %v16186_v16 }
  0x7e   :  { %v429_v14 = vld [vmem:[#allocation5 + $0x780] sm:$0xff]  ;;  %v16179_v18 = vcombine.high %v301_v12, %v305_v13  ;;  %9506 = vmatprep.subr.bf16.mxu1 %v16315_v11  ;;  %v16178_v24 = vcombine.low %v301_v12, %v305_v13 }
  0x7f   :  { %v433_v15 = vld [vmem:[#allocation5 + $0x7a0] sm:$0xff]  ;;  %9507 = vmatpush2.bf16.msra.mxu1 %v16314_v17 }
  0x80   :  { %v16307_v19 = vcombine.high %v429_v14, %v433_v15  ;;  %v293_v20 = vld [vmem:[#allocation5 + $0x340] sm:$0xff]  ;;  %9465 = vmatprep.subr.bf16.mxu0 %v16179_v18  ;;  %v16306_v25 = vcombine.low %v429_v14, %v433_v15  ;;  %v119_v14 = vld [vmem:[#allocation2 + $0x10] sm:$0xff] }
  0x81   :  { %v297_v21 = vld [vmem:[#allocation5 + $0x360] sm:$0xff]  ;;  %9466 = vmatpush2.bf16.msra.mxu0 %v16178_v24  ;;  %v143_v15 = vld [vmem:[#allocation2 + $0xd0] sm:$0xff]  ;;  %v146_v24 = vld [vmem:[#allocation2 + $0xe8] sm:$0xff] }
  0x82   :  { %v421_v22 = vld [vmem:[#allocation5 + $0x740] sm:$0xff]  ;;  %v16171_v26 = vcombine.high %v293_v20, %v297_v21  ;;  %9508 = vmatprep.subr.bf16.mxu1 %v16307_v19  ;;  %v16170_v32 = vcombine.low %v293_v20, %v297_v21 }
  0x83   :  { %v425_v23 = vld [vmem:[#allocation5 + $0x760] sm:$0xff]  ;;  %9509 = vmatpush2.bf16.msra.mxu1 %v16306_v25  ;;  %v18606_v25 = vpack.c.bf16 %v143_v15, %v119_v14 }
  0x84   :  { %v16299_v27 = vcombine.high %v421_v22, %v425_v23  ;;  %v285_v28 = vld [vmem:[#allocation5 + $0x300] sm:$0xff]  ;;  %9467 = vmatprep.subr.bf16.mxu0 %v16171_v26  ;;  %v16298_v33 = vcombine.low %v421_v22, %v425_v23  ;;  %v122_v23 = vld [vmem:[#allocation2 + $0x28] sm:$0xff] }
  0x85   :  { %v289_v29 = vld [vmem:[#allocation5 + $0x320] sm:$0xff]  ;;  %9468 = vmatpush2.bf16.msra.mxu0 %v16170_v32 }
  0x86   :  { %v413_v30 = vld [vmem:[#allocation5 + $0x700] sm:$0xff]  ;;  %v16163_v34 = vcombine.high %v285_v28, %v289_v29  ;;  %9510 = vmatprep.subr.bf16.mxu1 %v16299_v27  ;;  %v16162_v40 = vcombine.low %v285_v28, %v289_v29  ;;  %v124_v27 = vld [vmem:[#allocation2 + $0x38] sm:$0xff] }
  0x87   :  { %v417_v31 = vld [vmem:[#allocation5 + $0x720] sm:$0xff]  ;;  %9511 = vmatpush2.bf16.msra.mxu1 %v16298_v33  ;;  %v148_v28 = vld [vmem:[#allocation2 + $0xf8] sm:$0xff] }
  0x88   :  { %v16291_v35 = vcombine.high %v413_v30, %v417_v31  ;;  %v277_v36 = vld [vmem:[#allocation5 + $0x2c0] sm:$0xff]  ;;  %9469 = vmatprep.subr.bf16.mxu0 %v16163_v34  ;;  %v16290_v41 = vcombine.low %v413_v30, %v417_v31  ;;  %v18608_v34 = vpack.c.bf16 %v146_v24, %v122_v23 }
  0x89   :  { %v281_v37 = vld [vmem:[#allocation5 + $0x2e0] sm:$0xff]  ;;  %9470 = vmatpush2.bf16.msra.mxu0 %v16162_v40 }
  0x8a   :  { %v405_v38 = vld [vmem:[#allocation5 + $0x6c0] sm:$0xff]  ;;  %v16155_v42 = vcombine.high %v277_v36, %v281_v37  ;;  %9512 = vmatprep.subr.bf16.mxu1 %v16291_v35  ;;  %v16154_v48 = vcombine.low %v277_v36, %v281_v37  ;;  %v18611_v37 = vpack.c.bf16 %v148_v28, %v124_v27 }
  0x8b   :  { %v409_v39 = vld [vmem:[#allocation5 + $0x6e0] sm:$0xff]  ;;  %9513 = vmatpush2.bf16.msra.mxu1 %v16290_v41 }
  0x8c   :  { %v16283_v43 = vcombine.high %v405_v38, %v409_v39  ;;  %v269_v44 = vld [vmem:[#allocation5 + $0x280] sm:$0xff]  ;;  %9471 = vmatprep.subr.bf16.mxu0 %v16155_v42  ;;  %v16282_v49 = vcombine.low %v405_v38, %v409_v39 }
  0x8d   :  { %v273_v45 = vld [vmem:[#allocation5 + $0x2a0] sm:$0xff]  ;;  %9472 = vmatpush2.bf16.msra.mxu0 %v16154_v48 }
  0x8e   :  { %v397_v46 = vld [vmem:[#allocation5 + $0x680] sm:$0xff]  ;;  %v16147_v50 = vcombine.high %v269_v44, %v273_v45  ;;  %9514 = vmatprep.subr.bf16.mxu1 %v16283_v43  ;;  %v16146_v56 = vcombine.low %v269_v44, %v273_v45 }
  0x8f   :  { %v401_v47 = vld [vmem:[#allocation5 + $0x6a0] sm:$0xff]  ;;  %9515 = vmatpush2.bf16.msra.mxu1 %v16282_v49 }
  0x90   :  { %v16275_v51 = vcombine.high %v397_v46, %v401_v47  ;;  %v261_v52 = vld [vmem:[#allocation5 + $0x240] sm:$0xff]  ;;  %9473 = vmatprep.subr.bf16.mxu0 %v16147_v50  ;;  %v16274_v57 = vcombine.low %v397_v46, %v401_v47 }
  0x91   :  { %v265_v53 = vld [vmem:[#allocation5 + $0x260] sm:$0xff]  ;;  %9474 = vmatpush2.bf16.msra.mxu0 %v16146_v56 }
  0x92   :  { %v389_v54 = vld [vmem:[#allocation5 + $0x640] sm:$0xff]  ;;  %v16139_v59 = vcombine.high %v261_v52, %v265_v53  ;;  %9516 = vmatprep.subr.bf16.mxu1 %v16275_v51  ;;  %v16138_v2 = vcombine.low %v261_v52, %v265_v53 }
  0x93   :  { %v393_v55 = vld [vmem:[#allocation5 + $0x660] sm:$0xff]  ;;  %9517 = vmatpush2.bf16.msra.mxu1 %v16274_v57 }
  0x94   :  { %v16267_v60 = vcombine.high %v389_v54, %v393_v55  ;;  %v253_v61 = vld [vmem:[#allocation5 + $0x200] sm:$0xff]  ;;  %9475 = vmatprep.subr.bf16.mxu0 %v16139_v59  ;;  %v16266_v3 = vcombine.low %v389_v54, %v393_v55 }
  0x95   :  { %v257_v62 = vld [vmem:[#allocation5 + $0x220] sm:$0xff]  ;;  %9476 = vmatpush2.bf16.msra.mxu0 %v16138_v2 }
  0x96   :  { %v381_v0 = vld [vmem:[#allocation5 + $0x600] sm:$0xff]  ;;  %v16131_v4 = vcombine.high %v253_v61, %v257_v62  ;;  %9518 = vmatprep.subr.bf16.mxu1 %v16267_v60  ;;  %v16130_v10 = vcombine.low %v253_v61, %v257_v62 }
  0x97   :  { %v385_v1 = vld [vmem:[#allocation5 + $0x620] sm:$0xff]  ;;  %9519 = vmatpush2.bf16.msra.mxu1 %v16266_v3 }
  0x98   :  { %v16259_v5 = vcombine.high %v381_v0, %v385_v1  ;;  %v501_v6 = vld [vmem:[#allocation5 + $0x9c0] sm:$0xff]  ;;  %9477 = vmatprep.subr.bf16.mxu0 %v16131_v4  ;;  %v16258_v13 = vcombine.low %v381_v0, %v385_v1 }
  0x99   :  { %v505_v7 = vld [vmem:[#allocation5 + $0x9e0] sm:$0xff]  ;;  %9478 = vmatpush2.bf16.msra.mxu0 %v16130_v10 }
  0x9a   :  { %v629_v8 = vld [vmem:[#allocation5 + $0xdc0] sm:$0xff]  ;;  %v16379_v16 = vcombine.high %v501_v6, %v505_v7  ;;  %9520 = vmatprep.subr.bf16.mxu1 %v16259_v5  ;;  %v16378_v26 = vcombine.low %v501_v6, %v505_v7 }
  0x9b   :  { %v633_v9 = vld [vmem:[#allocation5 + $0xde0] sm:$0xff]  ;;  %9521 = vmatpush2.bf16.msra.mxu1 %v16258_v13 }
  0x9c   :  { %v117_v11 = vld [vmem:[#allocation2] sm:$0xff]  ;;  %v16507_v17 = vcombine.high %v629_v8, %v633_v9  ;;  %9533 = vmatprep.subr.bf16.mxu0 %v16379_v16  ;;  %v16506_v29 = vcombine.low %v629_v8, %v633_v9 }
  0x9d   :  { %v141_v12 = vld [vmem:[#allocation2 + $0xc0] sm:$0xff] }
  0x9e   :  { %v493_v18 = vld [vmem:[#allocation5 + $0x980] sm:$0xff]  ;;  %v18604_v21 = vpack.c.bf16 %v141_v12, %v117_v11  ;;  %9576 = vmatprep.subr.bf16.mxu1 %v16507_v17  ;;  %9523 = vmatmul.mubr.bf16.vlgmr.msra.gmra.mxu1 %v18606_v25 }
  0x9f   :  { %v497_v19 = vld [vmem:[#allocation5 + $0x9a0] sm:$0xff]  ;;  %9577 = vmatpush1.bf16.msra.mxu1 %v16506_v29  ;;  %9608 = vmatprep.mubr.bf16.mxu1 %v18611_v37 }
  0xa0   :  { %v621_v20 = vld [vmem:[#allocation5 + $0xd80] sm:$0xff]  ;;  %v16371_v30 = vcombine.high %v493_v18, %v497_v19  ;;  %9480 = vmatmul.mubr.bf16.vlgmr.msra.gmra.mxu0 %v18604_v21  ;;  %v16370_v38 = vcombine.low %v493_v18, %v497_v19 }
  0xa1   :  { %v625_v22 = vld [vmem:[#allocation5 + $0xda0] sm:$0xff]  ;;  %9534 = vmatpush1.bf16.msra.mxu0 %v16378_v26  ;;  %9565 = vmatprep.mubr.bf16.mxu0 %v18608_v34 }
  0xa2   :  { %v16499_v31 = vcombine.high %v621_v20, %v625_v22  ;;  %v485_v32 = vld [vmem:[#allocation5 + $0x940] sm:$0xff]  ;;  %9535 = vmatprep.subr.bf16.mxu0 %v16371_v30  ;;  %v16498_v39 = vcombine.low %v621_v20, %v625_v22 }
  0xa3   :  { %v489_v33 = vld [vmem:[#allocation5 + $0x960] sm:$0xff] }
  0xa4   :  { %v613_v35 = vld [vmem:[#allocation5 + $0xd40] sm:$0xff]  ;;  %v16363_v40 = vcombine.high %v485_v32, %v489_v33  ;;  %9578 = vmatprep.subr.bf16.mxu1 %v16499_v31  ;;  %v16362_v46 = vcombine.low %v485_v32, %v489_v33 }
  0xa5   :  { %v617_v36 = vld [vmem:[#allocation5 + $0xd60] sm:$0xff]  ;;  %9536 = vmatpush1.bf16.msra.mxu0 %v16370_v38  ;;  %9579 = vmatpush1.bf16.msra.mxu1 %v16498_v39 }
  0xa6   :  { %v16491_v41 = vcombine.high %v613_v35, %v617_v36  ;;  %v477_v42 = vld [vmem:[#allocation5 + $0x900] sm:$0xff]  ;;  %9537 = vmatprep.subr.bf16.mxu0 %v16363_v40  ;;  %v16490_v47 = vcombine.low %v613_v35, %v617_v36 }
  0xa7   :  { %v481_v43 = vld [vmem:[#allocation5 + $0x920] sm:$0xff] }
  0xa8   :  { %v605_v44 = vld [vmem:[#allocation5 + $0xd00] sm:$0xff]  ;;  %v16355_v48 = vcombine.high %v477_v42, %v481_v43  ;;  %9580 = vmatprep.subr.bf16.mxu1 %v16491_v41  ;;  %v16354_v54 = vcombine.low %v477_v42, %v481_v43 }
  0xa9   :  { %v609_v45 = vld [vmem:[#allocation5 + $0xd20] sm:$0xff]  ;;  %9538 = vmatpush1.bf16.msra.mxu0 %v16362_v46  ;;  %9581 = vmatpush1.bf16.msra.mxu1 %v16490_v47 }
  0xaa   :  { %v16483_v49 = vcombine.high %v605_v44, %v609_v45  ;;  %v469_v50 = vld [vmem:[#allocation5 + $0x8c0] sm:$0xff]  ;;  %9539 = vmatprep.subr.bf16.mxu0 %v16355_v48  ;;  %v16482_v55 = vcombine.low %v605_v44, %v609_v45 }
  0xab   :  { %v473_v51 = vld [vmem:[#allocation5 + $0x8e0] sm:$0xff] }
  0xac   :  { %v597_v52 = vld [vmem:[#allocation5 + $0xcc0] sm:$0xff]  ;;  %v16347_v56 = vcombine.high %v469_v50, %v473_v51  ;;  %9582 = vmatprep.subr.bf16.mxu1 %v16483_v49  ;;  %v16346_v0 = vcombine.low %v469_v50, %v473_v51 }
  0xad   :  { %v601_v53 = vld [vmem:[#allocation5 + $0xce0] sm:$0xff]  ;;  %9540 = vmatpush1.bf16.msra.mxu0 %v16354_v54  ;;  %9583 = vmatpush1.bf16.msra.mxu1 %v16482_v55 }
  0xae   :  { %v461_v57 = vld [vmem:[#allocation5 + $0x880] sm:$0xff]  ;;  %v16475_v61 = vcombine.high %v597_v52, %v601_v53  ;;  %9541 = vmatprep.subr.bf16.mxu0 %v16347_v56  ;;  %v16474_v1 = vcombine.low %v597_v52, %v601_v53 }
  0xaf   :  { %v465_v59 = vld [vmem:[#allocation5 + $0x8a0] sm:$0xff] }
  0xb0   :  { %v589_v60 = vld [vmem:[#allocation5 + $0xc80] sm:$0xff]  ;;  %v16339_v2 = vcombine.high %v461_v57, %v465_v59  ;;  %9584 = vmatprep.subr.bf16.mxu1 %v16475_v61  ;;  %v16338_v8 = vcombine.low %v461_v57, %v465_v59 }
  0xb1   :  { %v593_v62 = vld [vmem:[#allocation5 + $0xca0] sm:$0xff]  ;;  %9542 = vmatpush1.bf16.msra.mxu0 %v16346_v0  ;;  %9585 = vmatpush1.bf16.msra.mxu1 %v16474_v1 }
  0xb2   :  { %v453_v3 = vld [vmem:[#allocation5 + $0x840] sm:$0xff]  ;;  %v16467_v6 = vcombine.high %v589_v60, %v593_v62  ;;  %9543 = vmatprep.subr.bf16.mxu0 %v16339_v2  ;;  %v16466_v9 = vcombine.low %v589_v60, %v593_v62 }
  0xb3   :  { %v457_v4 = vld [vmem:[#allocation5 + $0x860] sm:$0xff] }
  0xb4   :  { %v581_v5 = vld [vmem:[#allocation5 + $0xc40] sm:$0xff]  ;;  %v16331_v10 = vcombine.high %v453_v3, %v457_v4  ;;  %9586 = vmatprep.subr.bf16.mxu1 %v16467_v6  ;;  %v16330_v16 = vcombine.low %v453_v3, %v457_v4 }
  0xb5   :  { %v585_v7 = vld [vmem:[#allocation5 + $0xc60] sm:$0xff]  ;;  %9544 = vmatpush1.bf16.msra.mxu0 %v16338_v8  ;;  %9587 = vmatpush1.bf16.msra.mxu1 %v16466_v9 }
  0xb6   :  { %v445_v11 = vld [vmem:[#allocation5 + $0x800] sm:$0xff]  ;;  %v16459_v14 = vcombine.high %v581_v5, %v585_v7  ;;  %9545 = vmatprep.subr.bf16.mxu0 %v16331_v10  ;;  %v16458_v17 = vcombine.low %v581_v5, %v585_v7 }
  0xb7   :  { %v449_v12 = vld [vmem:[#allocation5 + $0x820] sm:$0xff] }
  0xb8   :  { %v573_v13 = vld [vmem:[#allocation5 + $0xc00] sm:$0xff]  ;;  %v16323_v18 = vcombine.high %v445_v11, %v449_v12  ;;  %9588 = vmatprep.subr.bf16.mxu1 %v16459_v14  ;;  %v16322_v26 = vcombine.low %v445_v11, %v449_v12 }
  0xb9   :  { %v577_v15 = vld [vmem:[#allocation5 + $0xc20] sm:$0xff]  ;;  %9546 = vmatpush1.bf16.msra.mxu0 %v16330_v16  ;;  %9589 = vmatpush1.bf16.msra.mxu1 %v16458_v17 }
  0xba   :  { %v565_v19 = vld [vmem:[#allocation5 + $0xbc0] sm:$0xff]  ;;  %v16451_v23 = vcombine.high %v573_v13, %v577_v15  ;;  %9547 = vmatprep.subr.bf16.mxu0 %v16323_v18  ;;  %v16450_v27 = vcombine.low %v573_v13, %v577_v15 }
  0xbb   :  { %v569_v20 = vld [vmem:[#allocation5 + $0xbe0] sm:$0xff] }
  0xbc   :  { %v693_v22 = vld [vmem:[#allocation5 + $0xfc0] sm:$0xff]  ;;  %v16443_v28 = vcombine.high %v565_v19, %v569_v20  ;;  %9590 = vmatprep.subr.bf16.mxu1 %v16451_v23  ;;  %v16442_v35 = vcombine.low %v565_v19, %v569_v20 }
  0xbd   :  { %v697_v24 = vld [vmem:[#allocation5 + $0xfe0] sm:$0xff]  ;;  %9548 = vmatpush1.bf16.msra.mxu0 %v16322_v26  ;;  %9591 = vmatpush1.bf16.msra.mxu1 %v16450_v27 }
  0xbe   :  { %v557_v29 = vld [vmem:[#allocation5 + $0xb80] sm:$0xff]  ;;  %v16571_v32 = vcombine.high %v693_v22, %v697_v24  ;;  %9549 = vmatprep.subr.bf16.mxu0 %v16443_v28  ;;  %v16570_v36 = vcombine.low %v693_v22, %v697_v24 }
  0xbf   :  { %v561_v30 = vld [vmem:[#allocation5 + $0xba0] sm:$0xff] }
  0xc0   :  { %v685_v31 = vld [vmem:[#allocation5 + $0xf80] sm:$0xff]  ;;  %v16435_v38 = vcombine.high %v557_v29, %v561_v30  ;;  %9592 = vmatprep.subr.bf16.mxu1 %v16571_v32  ;;  %v16434_v44 = vcombine.low %v557_v29, %v561_v30 }
  0xc1   :  { %v689_v33 = vld [vmem:[#allocation5 + $0xfa0] sm:$0xff]  ;;  %9550 = vmatpush2.bf16.msra.mxu0 %v16442_v35  ;;  %9593 = vmatpush2.bf16.msra.mxu1 %v16570_v36  ;;  %v123_v35 = vld [vmem:[#allocation2 + $0x30] sm:$0xff] }
  0xc2   :  { %v549_v39 = vld [vmem:[#allocation5 + $0xb40] sm:$0xff]  ;;  %v16563_v42 = vcombine.high %v685_v31, %v689_v33  ;;  %9551 = vmatprep.subr.bf16.mxu0 %v16435_v38  ;;  %v16562_v45 = vcombine.low %v685_v31, %v689_v33  ;;  %v147_v36 = vld [vmem:[#allocation2 + $0xf0] sm:$0xff] }
  0xc3   :  { %v553_v40 = vld [vmem:[#allocation5 + $0xb60] sm:$0xff] }
  0xc4   :  { %v677_v41 = vld [vmem:[#allocation5 + $0xf40] sm:$0xff]  ;;  %v16427_v46 = vcombine.high %v549_v39, %v553_v40  ;;  %9594 = vmatprep.subr.bf16.mxu1 %v16563_v42  ;;  %v16426_v52 = vcombine.low %v549_v39, %v553_v40 }
  0xc5   :  { %v681_v43 = vld [vmem:[#allocation5 + $0xf60] sm:$0xff]  ;;  %9552 = vmatpush2.bf16.msra.mxu0 %v16434_v44  ;;  %9595 = vmatpush2.bf16.msra.mxu1 %v16562_v45  ;;  %v126_v45 = vld [vmem:[#allocation2 + $0x48] sm:$0xff] }
  0xc6   :  { %v541_v47 = vld [vmem:[#allocation5 + $0xb00] sm:$0xff]  ;;  %v16555_v50 = vcombine.high %v677_v41, %v681_v43  ;;  %9553 = vmatprep.subr.bf16.mxu0 %v16427_v46  ;;  %v16554_v53 = vcombine.low %v677_v41, %v681_v43 }
  0xc7   :  { %v545_v48 = vld [vmem:[#allocation5 + $0xb20] sm:$0xff] }
  0xc8   :  { %v669_v49 = vld [vmem:[#allocation5 + $0xf00] sm:$0xff]  ;;  %v16419_v54 = vcombine.high %v541_v47, %v545_v48  ;;  %9596 = vmatprep.subr.bf16.mxu1 %v16555_v50  ;;  %v16418_v61 = vcombine.low %v541_v47, %v545_v48  ;;  %v150_v47 = vld [vmem:[#allocation2 + $0x108] sm:$0xff] }
  0xc9   :  { %v673_v51 = vld [vmem:[#allocation5 + $0xf20] sm:$0xff]  ;;  %9554 = vmatpush2.bf16.msra.mxu0 %v16426_v52  ;;  %9597 = vmatpush2.bf16.msra.mxu1 %v16554_v53  ;;  %v152_v52 = vld [vmem:[#allocation2 + $0x118] sm:$0xff] }
  0xca   :  { %v533_v55 = vld [vmem:[#allocation5 + $0xac0] sm:$0xff]  ;;  %v16547_v59 = vcombine.high %v669_v49, %v673_v51  ;;  %9555 = vmatprep.subr.bf16.mxu0 %v16419_v54  ;;  %v16546_v62 = vcombine.low %v669_v49, %v673_v51  ;;  %v18618_v49 = vpack.c.bf16 %v147_v36, %v123_v35  ;;  %v128_v51 = vld [vmem:[#allocation2 + $0x58] sm:$0xff] }
  0xcb   :  { %v537_v56 = vld [vmem:[#allocation5 + $0xae0] sm:$0xff] }
  0xcc   :  { %v661_v57 = vld [vmem:[#allocation5 + $0xec0] sm:$0xff]  ;;  %v16411_v0 = vcombine.high %v533_v55, %v537_v56  ;;  %9598 = vmatprep.subr.bf16.mxu1 %v16547_v59  ;;  %v16410_v6 = vcombine.low %v533_v55, %v537_v56  ;;  %v18620_v59 = vpack.c.bf16 %v150_v47, %v126_v45 }
  0xcd   :  { %v665_v60 = vld [vmem:[#allocation5 + $0xee0] sm:$0xff]  ;;  %9556 = vmatpush2.bf16.msra.mxu0 %v16418_v61  ;;  %9599 = vmatpush2.bf16.msra.mxu1 %v16546_v62  ;;  %v18623_v62 = vpack.c.bf16 %v152_v52, %v128_v51 }
  0xce   :  { %v525_v1 = vld [vmem:[#allocation5 + $0xa80] sm:$0xff]  ;;  %v16539_v4 = vcombine.high %v661_v57, %v665_v60  ;;  %9557 = vmatprep.subr.bf16.mxu0 %v16411_v0  ;;  %v16538_v7 = vcombine.low %v661_v57, %v665_v60 }
  0xcf   :  { %v529_v2 = vld [vmem:[#allocation5 + $0xaa0] sm:$0xff] }
  0xd0   :  { %v653_v3 = vld [vmem:[#allocation5 + $0xe80] sm:$0xff]  ;;  %v16403_v8 = vcombine.high %v525_v1, %v529_v2  ;;  %9600 = vmatprep.subr.bf16.mxu1 %v16539_v4  ;;  %v16402_v14 = vcombine.low %v525_v1, %v529_v2 }
  0xd1   :  { %v657_v5 = vld [vmem:[#allocation5 + $0xea0] sm:$0xff]  ;;  %9558 = vmatpush2.bf16.msra.mxu0 %v16410_v6  ;;  %9601 = vmatpush2.bf16.msra.mxu1 %v16538_v7 }
  0xd2   :  { %v517_v9 = vld [vmem:[#allocation5 + $0xa40] sm:$0xff]  ;;  %v16531_v12 = vcombine.high %v653_v3, %v657_v5  ;;  %9559 = vmatprep.subr.bf16.mxu0 %v16403_v8  ;;  %v16530_v15 = vcombine.low %v653_v3, %v657_v5 }
  0xd3   :  { %v521_v10 = vld [vmem:[#allocation5 + $0xa60] sm:$0xff] }
  0xd4   :  { %v645_v11 = vld [vmem:[#allocation5 + $0xe40] sm:$0xff]  ;;  %v16395_v16 = vcombine.high %v517_v9, %v521_v10  ;;  %9602 = vmatprep.subr.bf16.mxu1 %v16531_v12  ;;  %v16394_v23 = vcombine.low %v517_v9, %v521_v10 }
  0xd5   :  { %v649_v13 = vld [vmem:[#allocation5 + $0xe60] sm:$0xff]  ;;  %9560 = vmatpush2.bf16.msra.mxu0 %v16402_v14  ;;  %9603 = vmatpush2.bf16.msra.mxu1 %v16530_v15 }
  0xd6   :  { %v509_v17 = vld [vmem:[#allocation5 + $0xa00] sm:$0xff]  ;;  %v16523_v20 = vcombine.high %v645_v11, %v649_v13  ;;  %9561 = vmatprep.subr.bf16.mxu0 %v16395_v16  ;;  %v16522_v24 = vcombine.low %v645_v11, %v649_v13 }
  0xd7   :  { %v513_v18 = vld [vmem:[#allocation5 + $0xa20] sm:$0xff] }
  0xd8   :  { %v637_v19 = vld [vmem:[#allocation5 + $0xe00] sm:$0xff]  ;;  %v16387_v26 = vcombine.high %v509_v17, %v513_v18  ;;  %9604 = vmatprep.subr.bf16.mxu1 %v16523_v20  ;;  %v16386_v38 = vcombine.low %v509_v17, %v513_v18 }
  0xd9   :  { %v641_v22 = vld [vmem:[#allocation5 + $0xe20] sm:$0xff]  ;;  %9562 = vmatpush2.bf16.msra.mxu0 %v16394_v23  ;;  %9605 = vmatpush2.bf16.msra.mxu1 %v16522_v24 }
  0xda   :  { %v757_v27 = vld [vmem:[#allocation5 + $0x11c0] sm:$0xff]  ;;  %v16515_v30 = vcombine.high %v637_v19, %v641_v22  ;;  %9563 = vmatprep.subr.bf16.mxu0 %v16387_v26  ;;  %v16514_v41 = vcombine.low %v637_v19, %v641_v22 }
  0xdb   :  { %v761_v28 = vld [vmem:[#allocation5 + $0x11e0] sm:$0xff] }
  0xdc   :  { %v885_v29 = vld [vmem:[#allocation5 + $0x15c0] sm:$0xff]  ;;  %v16635_v42 = vcombine.high %v757_v27, %v761_v28  ;;  %9606 = vmatprep.subr.bf16.mxu1 %v16515_v30  ;;  %v16634_v50 = vcombine.low %v757_v27, %v761_v28 }
  0xdd   :  { %v121_v31 = vld [vmem:[#allocation2 + $0x20] sm:$0xff]  ;;  %9564 = vmatpush2.bf16.msra.mxu0 %v16386_v38  ;;  %9607 = vmatpush2.bf16.msra.mxu1 %v16514_v41 }
  0xde   :  { %v145_v32 = vld [vmem:[#allocation2 + $0xe0] sm:$0xff]  ;;  %9619 = vmatprep.subr.bf16.mxu0 %v16635_v42 }
  0xdf   :  { %v889_v33 = vld [vmem:[#allocation5 + $0x15e0] sm:$0xff]  ;;  %v18616_v48 = vpack.c.bf16 %v145_v32, %v121_v31 }
  0xe0   :  { %v749_v39 = vld [vmem:[#allocation5 + $0x1180] sm:$0xff]  ;;  %v16763_v46 = vcombine.high %v885_v29, %v889_v33  ;;  %v16762_v53 = vcombine.low %v885_v29, %v889_v33  ;;  %9609 = vmatmul.mubr.bf16.vlgmr.msra.gmra.mxu1 %v18618_v49 }
  0xe1   :  { %v753_v40 = vld [vmem:[#allocation5 + $0x11a0] sm:$0xff]  ;;  %9566 = vmatmul.mubr.bf16.vlgmr.msra.gmra.mxu0 %v18616_v48  ;;  %9694 = vmatprep.mubr.bf16.mxu1 %v18623_v62 }
  0xe2   :  { %v877_v43 = vld [vmem:[#allocation5 + $0x1580] sm:$0xff]  ;;  %v16627_v54 = vcombine.high %v749_v39, %v753_v40  ;;  %9662 = vmatprep.subr.bf16.mxu1 %v16763_v46  ;;  %9620 = vmatpush1.bf16.msra.mxu0 %v16634_v50  ;;  %v16626_v0 = vcombine.low %v749_v39, %v753_v40 }
  0xe3   :  { %v881_v44 = vld [vmem:[#allocation5 + $0x15a0] sm:$0xff]  ;;  %9663 = vmatpush1.bf16.msra.mxu1 %v16762_v53  ;;  %9651 = vmatprep.mubr.bf16.mxu0 %v18620_v59 }
  0xe4   :  { %v16755_v55 = vcombine.high %v877_v43, %v881_v44  ;;  %v741_v56 = vld [vmem:[#allocation5 + $0x1140] sm:$0xff]  ;;  %9621 = vmatprep.subr.bf16.mxu0 %v16627_v54  ;;  %v16754_v1 = vcombine.low %v877_v43, %v881_v44 }
  0xe5   :  { %v745_v57 = vld [vmem:[#allocation5 + $0x1160] sm:$0xff] }
  0xe6   :  { %v869_v60 = vld [vmem:[#allocation5 + $0x1540] sm:$0xff]  ;;  %v16619_v2 = vcombine.high %v741_v56, %v745_v57  ;;  %9664 = vmatprep.subr.bf16.mxu1 %v16755_v55  ;;  %9622 = vmatpush1.bf16.msra.mxu0 %v16626_v0  ;;  %v16618_v8 = vcombine.low %v741_v56, %v745_v57 }
  0xe7   :  { %v873_v61 = vld [vmem:[#allocation5 + $0x1560] sm:$0xff]  ;;  %9665 = vmatpush1.bf16.msra.mxu1 %v16754_v1 }
  0xe8   :  { %v733_v3 = vld [vmem:[#allocation5 + $0x1100] sm:$0xff]  ;;  %v16747_v6 = vcombine.high %v869_v60, %v873_v61  ;;  %9623 = vmatprep.subr.bf16.mxu0 %v16619_v2  ;;  %v16746_v9 = vcombine.low %v869_v60, %v873_v61 }
  0xe9   :  { %v737_v4 = vld [vmem:[#allocation5 + $0x1120] sm:$0xff] }
  0xea   :  { %v861_v5 = vld [vmem:[#allocation5 + $0x1500] sm:$0xff]  ;;  %v16611_v10 = vcombine.high %v733_v3, %v737_v4  ;;  %9666 = vmatprep.subr.bf16.mxu1 %v16747_v6  ;;  %9624 = vmatpush1.bf16.msra.mxu0 %v16618_v8  ;;  %v16610_v16 = vcombine.low %v733_v3, %v737_v4 }
  0xeb   :  { %v865_v7 = vld [vmem:[#allocation5 + $0x1520] sm:$0xff]  ;;  %9667 = vmatpush1.bf16.msra.mxu1 %v16746_v9 }
  0xec   :  { %v725_v11 = vld [vmem:[#allocation5 + $0x10c0] sm:$0xff]  ;;  %v16739_v14 = vcombine.high %v861_v5, %v865_v7  ;;  %9625 = vmatprep.subr.bf16.mxu0 %v16611_v10  ;;  %v16738_v17 = vcombine.low %v861_v5, %v865_v7 }
  0xed   :  { %v729_v12 = vld [vmem:[#allocation5 + $0x10e0] sm:$0xff] }
  0xee   :  { %v853_v13 = vld [vmem:[#allocation5 + $0x14c0] sm:$0xff]  ;;  %v16603_v18 = vcombine.high %v725_v11, %v729_v12  ;;  %9668 = vmatprep.subr.bf16.mxu1 %v16739_v14  ;;  %9626 = vmatpush1.bf16.msra.mxu0 %v16610_v16  ;;  %v16602_v26 = vcombine.low %v725_v11, %v729_v12 }
  0xef   :  { %v857_v15 = vld [vmem:[#allocation5 + $0x14e0] sm:$0xff]  ;;  %9669 = vmatpush1.bf16.msra.mxu1 %v16738_v17 }
  0xf0   :  { %v717_v19 = vld [vmem:[#allocation5 + $0x1080] sm:$0xff]  ;;  %v16731_v23 = vcombine.high %v853_v13, %v857_v15  ;;  %9627 = vmatprep.subr.bf16.mxu0 %v16603_v18  ;;  %v16730_v27 = vcombine.low %v853_v13, %v857_v15 }
  0xf1   :  { %v721_v20 = vld [vmem:[#allocation5 + $0x10a0] sm:$0xff] }
  0xf2   :  { %v845_v22 = vld [vmem:[#allocation5 + $0x1480] sm:$0xff]  ;;  %v16595_v28 = vcombine.high %v717_v19, %v721_v20  ;;  %9670 = vmatprep.subr.bf16.mxu1 %v16731_v23  ;;  %9628 = vmatpush1.bf16.msra.mxu0 %v16602_v26  ;;  %v16594_v35 = vcombine.low %v717_v19, %v721_v20 }
  0xf3   :  { %v849_v24 = vld [vmem:[#allocation5 + $0x14a0] sm:$0xff]  ;;  %9671 = vmatpush1.bf16.msra.mxu1 %v16730_v27 }
  0xf4   :  { %v16723_v29 = vcombine.high %v845_v22, %v849_v24  ;;  %v709_v30 = vld [vmem:[#allocation5 + $0x1040] sm:$0xff]  ;;  %9629 = vmatprep.subr.bf16.mxu0 %v16595_v28  ;;  %v16722_v36 = vcombine.low %v845_v22, %v849_v24 }
  0xf5   :  { %v713_v31 = vld [vmem:[#allocation5 + $0x1060] sm:$0xff] }
  0xf6   :  { %v837_v32 = vld [vmem:[#allocation5 + $0x1440] sm:$0xff]  ;;  %v16587_v38 = vcombine.high %v709_v30, %v713_v31  ;;  %9672 = vmatprep.subr.bf16.mxu1 %v16723_v29  ;;  %9630 = vmatpush1.bf16.msra.mxu0 %v16594_v35  ;;  %v16586_v44 = vcombine.low %v709_v30, %v713_v31 }
  0xf7   :  { %v841_v33 = vld [vmem:[#allocation5 + $0x1460] sm:$0xff]  ;;  %9673 = vmatpush1.bf16.msra.mxu1 %v16722_v36 }
  0xf8   :  { %v16715_v39 = vcombine.high %v837_v32, %v841_v33  ;;  %v701_v40 = vld [vmem:[#allocation5 + $0x1000] sm:$0xff]  ;;  %9631 = vmatprep.subr.bf16.mxu0 %v16587_v38  ;;  %v16714_v45 = vcombine.low %v837_v32, %v841_v33 }
  0xf9   :  { %v705_v41 = vld [vmem:[#allocation5 + $0x1020] sm:$0xff] }
  0xfa   :  { %v829_v42 = vld [vmem:[#allocation5 + $0x1400] sm:$0xff]  ;;  %v16579_v46 = vcombine.high %v701_v40, %v705_v41  ;;  %9674 = vmatprep.subr.bf16.mxu1 %v16715_v39  ;;  %9632 = vmatpush1.bf16.msra.mxu0 %v16586_v44  ;;  %v16578_v54 = vcombine.low %v701_v40, %v705_v41 }
  0xfb   :  { %v833_v43 = vld [vmem:[#allocation5 + $0x1420] sm:$0xff]  ;;  %9675 = vmatpush1.bf16.msra.mxu1 %v16714_v45 }
  0xfc   :  { %v16707_v47 = vcombine.high %v829_v42, %v833_v43  ;;  %v821_v50 = vld [vmem:[#allocation5 + $0x13c0] sm:$0xff]  ;;  %9633 = vmatprep.subr.bf16.mxu0 %v16579_v46  ;;  %v16706_v55 = vcombine.low %v829_v42, %v833_v43 }
  0xfd   :  { %v825_v51 = vld [vmem:[#allocation5 + $0x13e0] sm:$0xff] }
  0xfe   :  { %v949_v52 = vld [vmem:[#allocation5 + $0x17c0] sm:$0xff]  ;;  %v16699_v56 = vcombine.high %v821_v50, %v825_v51  ;;  %9676 = vmatprep.subr.bf16.mxu1 %v16707_v47  ;;  %9634 = vmatpush1.bf16.msra.mxu0 %v16578_v54  ;;  %v16698_v2 = vcombine.low %v821_v50, %v825_v51 }
  0xff   :  { %v953_v53 = vld [vmem:[#allocation5 + $0x17e0] sm:$0xff]  ;;  %9677 = vmatpush1.bf16.msra.mxu1 %v16706_v55 }
 0x100   :  { %v16827_v57 = vcombine.high %v949_v52, %v953_v53  ;;  %v813_v60 = vld [vmem:[#allocation5 + $0x1380] sm:$0xff]  ;;  %9635 = vmatprep.subr.bf16.mxu0 %v16699_v56  ;;  %v16826_v3 = vcombine.low %v949_v52, %v953_v53 }
 0x101   :  { %v817_v61 = vld [vmem:[#allocation5 + $0x13a0] sm:$0xff] }
 0x102   :  { %v941_v0 = vld [vmem:[#allocation5 + $0x1780] sm:$0xff]  ;;  %v16691_v4 = vcombine.high %v813_v60, %v817_v61  ;;  %9678 = vmatprep.subr.bf16.mxu1 %v16827_v57  ;;  %9636 = vmatpush2.bf16.msra.mxu0 %v16698_v2  ;;  %v16690_v10 = vcombine.low %v813_v60, %v817_v61 }
 0x103   :  { %v945_v1 = vld [vmem:[#allocation5 + $0x17a0] sm:$0xff]  ;;  %9679 = vmatpush2.bf16.msra.mxu1 %v16826_v3 }
 0x104   :  { %v16819_v5 = vcombine.high %v941_v0, %v945_v1  ;;  %v805_v6 = vld [vmem:[#allocation5 + $0x1340] sm:$0xff]  ;;  %9637 = vmatprep.subr.bf16.mxu0 %v16691_v4  ;;  %v16818_v11 = vcombine.low %v941_v0, %v945_v1 }
 0x105   :  { %v809_v7 = vld [vmem:[#allocation5 + $0x1360] sm:$0xff] }
 0x106   :  { %v933_v8 = vld [vmem:[#allocation5 + $0x1740] sm:$0xff]  ;;  %v16683_v12 = vcombine.high %v805_v6, %v809_v7  ;;  %9680 = vmatprep.subr.bf16.mxu1 %v16819_v5  ;;  %9638 = vmatpush2.bf16.msra.mxu0 %v16690_v10  ;;  %v16682_v18 = vcombine.low %v805_v6, %v809_v7 }
 0x107   :  { %v937_v9 = vld [vmem:[#allocation5 + $0x1760] sm:$0xff]  ;;  %9681 = vmatpush2.bf16.msra.mxu1 %v16818_v11 }
 0x108   :  { %v16811_v13 = vcombine.high %v933_v8, %v937_v9  ;;  %v797_v14 = vld [vmem:[#allocation5 + $0x1300] sm:$0xff]  ;;  %9639 = vmatprep.subr.bf16.mxu0 %v16683_v12  ;;  %v16810_v19 = vcombine.low %v933_v8, %v937_v9  ;;  %v127_v8 = vld [vmem:[#allocation2 + $0x50] sm:$0xff] }
 0x109   :  { %v801_v15 = vld [vmem:[#allocation5 + $0x1320] sm:$0xff]  ;;  %v151_v9 = vld [vmem:[#allocation2 + $0x110] sm:$0xff] }
 0x10a   :  { %v925_v16 = vld [vmem:[#allocation5 + $0x1700] sm:$0xff]  ;;  %v16675_v20 = vcombine.high %v797_v14, %v801_v15  ;;  %9682 = vmatprep.subr.bf16.mxu1 %v16811_v13  ;;  %9640 = vmatpush2.bf16.msra.mxu0 %v16682_v18  ;;  %v16674_v28 = vcombine.low %v797_v14, %v801_v15  ;;  %v154_v18 = vld [vmem:[#allocation2 + $0x128] sm:$0xff] }
 0x10b   :  { %v929_v17 = vld [vmem:[#allocation5 + $0x1720] sm:$0xff]  ;;  %9683 = vmatpush2.bf16.msra.mxu1 %v16810_v19  ;;  %v18630_v19 = vpack.c.bf16 %v151_v9, %v127_v8 }
 0x10c   :  { %v16803_v22 = vcombine.high %v925_v16, %v929_v17  ;;  %v789_v23 = vld [vmem:[#allocation5 + $0x12c0] sm:$0xff]  ;;  %9641 = vmatprep.subr.bf16.mxu0 %v16675_v20  ;;  %v16802_v29 = vcombine.low %v925_v16, %v929_v17  ;;  %v130_v17 = vld [vmem:[#allocation2 + $0x68] sm:$0xff] }
 0x10d   :  { %v793_v24 = vld [vmem:[#allocation5 + $0x12e0] sm:$0xff] }
 0x10e   :  { %v917_v26 = vld [vmem:[#allocation5 + $0x16c0] sm:$0xff]  ;;  %v16667_v30 = vcombine.high %v789_v23, %v793_v24  ;;  %9684 = vmatprep.subr.bf16.mxu1 %v16803_v22  ;;  %9642 = vmatpush2.bf16.msra.mxu0 %v16674_v28  ;;  %v16666_v38 = vcombine.low %v789_v23, %v793_v24  ;;  %v132_v22 = vld [vmem:[#allocation2 + $0x78] sm:$0xff] }
 0x10f   :  { %v921_v27 = vld [vmem:[#allocation5 + $0x16e0] sm:$0xff]  ;;  %9685 = vmatpush2.bf16.msra.mxu1 %v16802_v29  ;;  %v156_v23 = vld [vmem:[#allocation2 + $0x138] sm:$0xff] }
 0x110   :  { %v16795_v31 = vcombine.high %v917_v26, %v921_v27  ;;  %v781_v32 = vld [vmem:[#allocation5 + $0x1280] sm:$0xff]  ;;  %9643 = vmatprep.subr.bf16.mxu0 %v16667_v30  ;;  %v16794_v39 = vcombine.low %v917_v26, %v921_v27  ;;  %v18632_v30 = vpack.c.bf16 %v154_v18, %v130_v17 }
 0x111   :  { %v785_v33 = vld [vmem:[#allocation5 + $0x12a0] sm:$0xff] }
 0x112   :  { %v909_v35 = vld [vmem:[#allocation5 + $0x1680] sm:$0xff]  ;;  %v16659_v40 = vcombine.high %v781_v32, %v785_v33  ;;  %9686 = vmatprep.subr.bf16.mxu1 %v16795_v31  ;;  %9644 = vmatpush2.bf16.msra.mxu0 %v16666_v38  ;;  %v16658_v46 = vcombine.low %v781_v32, %v785_v33  ;;  %v18635_v33 = vpack.c.bf16 %v156_v23, %v132_v22 }
 0x113   :  { %v913_v36 = vld [vmem:[#allocation5 + $0x16a0] sm:$0xff]  ;;  %9687 = vmatpush2.bf16.msra.mxu1 %v16794_v39 }
 0x114   :  { %v16787_v41 = vcombine.high %v909_v35, %v913_v36  ;;  %v773_v42 = vld [vmem:[#allocation5 + $0x1240] sm:$0xff]  ;;  %9645 = vmatprep.subr.bf16.mxu0 %v16659_v40  ;;  %v16786_v47 = vcombine.low %v909_v35, %v913_v36 }
 0x115   :  { %v777_v43 = vld [vmem:[#allocation5 + $0x1260] sm:$0xff] }
 0x116   :  { %v901_v44 = vld [vmem:[#allocation5 + $0x1640] sm:$0xff]  ;;  %v16651_v50 = vcombine.high %v773_v42, %v777_v43  ;;  %9688 = vmatprep.subr.bf16.mxu1 %v16787_v41  ;;  %9646 = vmatpush2.bf16.msra.mxu0 %v16658_v46  ;;  %v16650_v56 = vcombine.low %v773_v42, %v777_v43 }
 0x117   :  { %v905_v45 = vld [vmem:[#allocation5 + $0x1660] sm:$0xff]  ;;  %9689 = vmatpush2.bf16.msra.mxu1 %v16786_v47 }
 0x118   :  { %v16779_v51 = vcombine.high %v901_v44, %v905_v45  ;;  %v765_v52 = vld [vmem:[#allocation5 + $0x1200] sm:$0xff]  ;;  %9647 = vmatprep.subr.bf16.mxu0 %v16651_v50  ;;  %v16778_v57 = vcombine.low %v901_v44, %v905_v45 }
 0x119   :  { %v769_v53 = vld [vmem:[#allocation5 + $0x1220] sm:$0xff] }
 0x11a   :  { %v893_v54 = vld [vmem:[#allocation5 + $0x1600] sm:$0xff]  ;;  %v16643_v60 = vcombine.high %v765_v52, %v769_v53  ;;  %9690 = vmatprep.subr.bf16.mxu1 %v16779_v51  ;;  %9648 = vmatpush2.bf16.msra.mxu0 %v16650_v56  ;;  %v16642_v4 = vcombine.low %v765_v52, %v769_v53 }
 0x11b   :  { %v897_v55 = vld [vmem:[#allocation5 + $0x1620] sm:$0xff]  ;;  %9691 = vmatpush2.bf16.msra.mxu1 %v16778_v57 }
 0x11c   :  { %v16771_v61 = vcombine.high %v893_v54, %v897_v55  ;;  %v1013_v0 = vld [vmem:[#allocation5 + $0x19c0] sm:$0xff]  ;;  %9649 = vmatprep.subr.bf16.mxu0 %v16643_v60  ;;  %v16770_v7 = vcombine.low %v893_v54, %v897_v55 }
 0x11d   :  { %v1017_v1 = vld [vmem:[#allocation5 + $0x19e0] sm:$0xff] }
 0x11e   :  { %v1141_v2 = vld [vmem:[#allocation5 + $0x1dc0] sm:$0xff]  ;;  %v16891_v10 = vcombine.high %v1013_v0, %v1017_v1  ;;  %9692 = vmatprep.subr.bf16.mxu1 %v16771_v61  ;;  %9650 = vmatpush2.bf16.msra.mxu0 %v16642_v4  ;;  %v16890_v20 = vcombine.low %v1013_v0, %v1017_v1 }
 0x11f   :  { %v1145_v3 = vld [vmem:[#allocation5 + $0x1de0] sm:$0xff]  ;;  %9693 = vmatpush2.bf16.msra.mxu1 %v16770_v7 }
 0x120   :  { %v125_v5 = vld [vmem:[#allocation2 + $0x40] sm:$0xff]  ;;  %v17019_v11 = vcombine.high %v1141_v2, %v1145_v3  ;;  %9705 = vmatprep.subr.bf16.mxu0 %v16891_v10  ;;  %v17018_v24 = vcombine.low %v1141_v2, %v1145_v3 }
 0x121   :  { %v149_v6 = vld [vmem:[#allocation2 + $0x100] sm:$0xff] }
 0x122   :  { %v1005_v12 = vld [vmem:[#allocation5 + $0x1980] sm:$0xff]  ;;  %v18628_v15 = vpack.c.bf16 %v149_v6, %v125_v5  ;;  %9748 = vmatprep.subr.bf16.mxu1 %v17019_v11  ;;  %9695 = vmatmul.mubr.bf16.vlgmr.msra.gmra.mxu1 %v18630_v19 }
 0x123   :  { %v1009_v13 = vld [vmem:[#allocation5 + $0x19a0] sm:$0xff]  ;;  %9749 = vmatpush1.bf16.msra.mxu1 %v17018_v24  ;;  %9780 = vmatprep.mubr.bf16.mxu1 %v18635_v33 }
 0x124   :  { %v1133_v14 = vld [vmem:[#allocation5 + $0x1d80] sm:$0xff]  ;;  %v16883_v26 = vcombine.high %v1005_v12, %v1009_v13  ;;  %9652 = vmatmul.mubr.bf16.vlgmr.msra.gmra.mxu0 %v18628_v15  ;;  %v16882_v35 = vcombine.low %v1005_v12, %v1009_v13 }
 0x125   :  { %v1137_v16 = vld [vmem:[#allocation5 + $0x1da0] sm:$0xff]  ;;  %9706 = vmatpush1.bf16.msra.mxu0 %v16890_v20  ;;  %9737 = vmatprep.mubr.bf16.mxu0 %v18632_v30 }
 0x126   :  { %v17011_v27 = vcombine.high %v1133_v14, %v1137_v16  ;;  %v997_v28 = vld [vmem:[#allocation5 + $0x1940] sm:$0xff]  ;;  %9707 = vmatprep.subr.bf16.mxu0 %v16883_v26  ;;  %v17010_v36 = vcombine.low %v1133_v14, %v1137_v16 }
 0x127   :  { %v1001_v29 = vld [vmem:[#allocation5 + $0x1960] sm:$0xff] }
 0x128   :  { %v1125_v31 = vld [vmem:[#allocation5 + $0x1d40] sm:$0xff]  ;;  %v16875_v38 = vcombine.high %v997_v28, %v1001_v29  ;;  %9750 = vmatprep.subr.bf16.mxu1 %v17011_v27  ;;  %v16874_v44 = vcombine.low %v997_v28, %v1001_v29 }
 0x129   :  { %v1129_v32 = vld [vmem:[#allocation5 + $0x1d60] sm:$0xff]  ;;  %9708 = vmatpush1.bf16.msra.mxu0 %v16882_v35  ;;  %9751 = vmatpush1.bf16.msra.mxu1 %v17010_v36 }
 0x12a   :  { %v17003_v39 = vcombine.high %v1125_v31, %v1129_v32  ;;  %v989_v40 = vld [vmem:[#allocation5 + $0x1900] sm:$0xff]  ;;  %9709 = vmatprep.subr.bf16.mxu0 %v16875_v38  ;;  %v17002_v45 = vcombine.low %v1125_v31, %v1129_v32 }
 0x12b   :  { %v993_v41 = vld [vmem:[#allocation5 + $0x1920] sm:$0xff] }
 0x12c   :  { %v1117_v42 = vld [vmem:[#allocation5 + $0x1d00] sm:$0xff]  ;;  %v16867_v46 = vcombine.high %v989_v40, %v993_v41  ;;  %9752 = vmatprep.subr.bf16.mxu1 %v17003_v39  ;;  %v16866_v54 = vcombine.low %v989_v40, %v993_v41 }
 0x12d   :  { %v1121_v43 = vld [vmem:[#allocation5 + $0x1d20] sm:$0xff]  ;;  %9710 = vmatpush1.bf16.msra.mxu0 %v16874_v44  ;;  %9753 = vmatpush1.bf16.msra.mxu1 %v17002_v45 }
 0x12e   :  { %v16995_v47 = vcombine.high %v1117_v42, %v1121_v43  ;;  %v981_v50 = vld [vmem:[#allocation5 + $0x18c0] sm:$0xff]  ;;  %9711 = vmatprep.subr.bf16.mxu0 %v16867_v46  ;;  %v16994_v55 = vcombine.low %v1117_v42, %v1121_v43 }
 0x12f   :  { %v985_v51 = vld [vmem:[#allocation5 + $0x18e0] sm:$0xff] }
 0x130   :  { %v1109_v52 = vld [vmem:[#allocation5 + $0x1cc0] sm:$0xff]  ;;  %v16859_v56 = vcombine.high %v981_v50, %v985_v51  ;;  %9754 = vmatprep.subr.bf16.mxu1 %v16995_v47  ;;  %v16858_v2 = vcombine.low %v981_v50, %v985_v51 }
 0x131   :  { %v1113_v53 = vld [vmem:[#allocation5 + $0x1ce0] sm:$0xff]  ;;  %9712 = vmatpush1.bf16.msra.mxu0 %v16866_v54  ;;  %9755 = vmatpush1.bf16.msra.mxu1 %v16994_v55 }
 0x132   :  { %v16987_v57 = vcombine.high %v1109_v52, %v1113_v53  ;;  %v973_v60 = vld [vmem:[#allocation5 + $0x1880] sm:$0xff]  ;;  %9713 = vmatprep.subr.bf16.mxu0 %v16859_v56  ;;  %v16986_v3 = vcombine.low %v1109_v52, %v1113_v53 }
 0x133   :  { %v977_v61 = vld [vmem:[#allocation5 + $0x18a0] sm:$0xff] }
 0x134   :  { %v1101_v0 = vld [vmem:[#allocation5 + $0x1c80] sm:$0xff]  ;;  %v16851_v4 = vcombine.high %v973_v60, %v977_v61  ;;  %9756 = vmatprep.subr.bf16.mxu1 %v16987_v57  ;;  %v16850_v10 = vcombine.low %v973_v60, %v977_v61 }
 0x135   :  { %v1105_v1 = vld [vmem:[#allocation5 + $0x1ca0] sm:$0xff]  ;;  %9714 = vmatpush1.bf16.msra.mxu0 %v16858_v2  ;;  %9757 = vmatpush1.bf16.msra.mxu1 %v16986_v3 }
 0x136   :  { %v16979_v5 = vcombine.high %v1101_v0, %v1105_v1  ;;  %v965_v6 = vld [vmem:[#allocation5 + $0x1840] sm:$0xff]  ;;  %9715 = vmatprep.subr.bf16.mxu0 %v16851_v4  ;;  %v16978_v11 = vcombine.low %v1101_v0, %v1105_v1 }
 0x137   :  { %v969_v7 = vld [vmem:[#allocation5 + $0x1860] sm:$0xff] }
 0x138   :  { %v1093_v8 = vld [vmem:[#allocation5 + $0x1c40] sm:$0xff]  ;;  %v16843_v12 = vcombine.high %v965_v6, %v969_v7  ;;  %9758 = vmatprep.subr.bf16.mxu1 %v16979_v5  ;;  %v16842_v20 = vcombine.low %v965_v6, %v969_v7 }
 0x139   :  { %v1097_v9 = vld [vmem:[#allocation5 + $0x1c60] sm:$0xff]  ;;  %9716 = vmatpush1.bf16.msra.mxu0 %v16850_v10  ;;  %9759 = vmatpush1.bf16.msra.mxu1 %v16978_v11 }
 0x13a   :  { %v16971_v13 = vcombine.high %v1093_v8, %v1097_v9  ;;  %v957_v14 = vld [vmem:[#allocation5 + $0x1800] sm:$0xff]  ;;  %9717 = vmatprep.subr.bf16.mxu0 %v16843_v12  ;;  %v16970_v22 = vcombine.low %v1093_v8, %v1097_v9 }
 0x13b   :  { %v961_v16 = vld [vmem:[#allocation5 + $0x1820] sm:$0xff] }
 0x13c   :  { %v1085_v17 = vld [vmem:[#allocation5 + $0x1c00] sm:$0xff]  ;;  %v16835_v23 = vcombine.high %v957_v14, %v961_v16  ;;  %9760 = vmatprep.subr.bf16.mxu1 %v16971_v13  ;;  %v16834_v31 = vcombine.low %v957_v14, %v961_v16 }
 0x13d   :  { %v1089_v18 = vld [vmem:[#allocation5 + $0x1c20] sm:$0xff]  ;;  %9718 = vmatpush1.bf16.msra.mxu0 %v16842_v20  ;;  %9761 = vmatpush1.bf16.msra.mxu1 %v16970_v22 }
 0x13e   :  { %v16963_v24 = vcombine.high %v1085_v17, %v1089_v18  ;;  %v1077_v26 = vld [vmem:[#allocation5 + $0x1bc0] sm:$0xff]  ;;  %9719 = vmatprep.subr.bf16.mxu0 %v16835_v23  ;;  %v16962_v32 = vcombine.low %v1085_v17, %v1089_v18 }
 0x13f   :  { %v1081_v27 = vld [vmem:[#allocation5 + $0x1be0] sm:$0xff] }
 0x140   :  { %v1205_v28 = vld [vmem:[#allocation5 + $0x1fc0] sm:$0xff]  ;;  %v16955_v35 = vcombine.high %v1077_v26, %v1081_v27  ;;  %9762 = vmatprep.subr.bf16.mxu1 %v16963_v24  ;;  %v16954_v42 = vcombine.low %v1077_v26, %v1081_v27 }
 0x141   :  { %v1209_v29 = vld [vmem:[#allocation5 + $0x1fe0] sm:$0xff]  ;;  %9720 = vmatpush1.bf16.msra.mxu0 %v16834_v31  ;;  %9763 = vmatpush1.bf16.msra.mxu1 %v16962_v32 }
 0x142   :  { %v17083_v36 = vcombine.high %v1205_v28, %v1209_v29  ;;  %v1069_v38 = vld [vmem:[#allocation5 + $0x1b80] sm:$0xff]  ;;  %9721 = vmatprep.subr.bf16.mxu0 %v16955_v35  ;;  %v17082_v43 = vcombine.low %v1205_v28, %v1209_v29  ;;  %v1727_v29 = vlaneseq }
 0x143   :  { %v1073_v39 = vld [vmem:[#allocation5 + $0x1ba0] sm:$0xff] }
 0x144   :  { %v1197_v40 = vld [vmem:[#allocation5 + $0x1f80] sm:$0xff]  ;;  %v16947_v44 = vcombine.high %v1069_v38, %v1073_v39  ;;  %9764 = vmatprep.subr.bf16.mxu1 %v17083_v36  ;;  %v16946_v52 = vcombine.low %v1069_v38, %v1073_v39 }
 0x145   :  { %v1201_v41 = vld [vmem:[#allocation5 + $0x1fa0] sm:$0xff]  ;;  %9722 = vmatpush2.bf16.msra.mxu0 %v16954_v42  ;;  %9765 = vmatpush2.bf16.msra.mxu1 %v17082_v43  ;;  %v18640_v42 = vshrl.u32 %v1727_v29, 7 }
 0x146   :  { %v17075_v45 = vcombine.high %v1197_v40, %v1201_v41  ;;  %v1061_v46 = vld [vmem:[#allocation5 + $0x1b40] sm:$0xff]  ;;  %9723 = vmatprep.subr.bf16.mxu0 %v16947_v44  ;;  %v17074_v53 = vcombine.low %v1197_v40, %v1201_v41 }
 0x147   :  { %v1065_v47 = vld [vmem:[#allocation5 + $0x1b60] sm:$0xff] }
 0x148   :  { %v1189_v50 = vld [vmem:[#allocation5 + $0x1f40] sm:$0xff]  ;;  %v16939_v54 = vcombine.high %v1061_v46, %v1065_v47  ;;  %9766 = vmatprep.subr.bf16.mxu1 %v17075_v45  ;;  %v16938_v0 = vcombine.low %v1061_v46, %v1065_v47 }
 0x149   :  { %v1193_v51 = vld [vmem:[#allocation5 + $0x1f60] sm:$0xff]  ;;  %9724 = vmatpush2.bf16.msra.mxu0 %v16946_v52  ;;  %9767 = vmatpush2.bf16.msra.mxu1 %v17074_v53  ;;  %v19292_v53 = vsub.s32 0, %v18640_v42 }
 0x14a   :  { %v17067_v55 = vcombine.high %v1189_v50, %v1193_v51  ;;  %v1053_v56 = vld [vmem:[#allocation5 + $0x1b00] sm:$0xff]  ;;  %9725 = vmatprep.subr.bf16.mxu0 %v16939_v54  ;;  %v17066_v1 = vcombine.low %v1189_v50, %v1193_v51 }
 0x14b   :  { %v1057_v57 = vld [vmem:[#allocation5 + $0x1b20] sm:$0xff] }
 0x14c   :  { %v1181_v60 = vld [vmem:[#allocation5 + $0x1f00] sm:$0xff]  ;;  %v16931_v2 = vcombine.high %v1053_v56, %v1057_v57  ;;  %9768 = vmatprep.subr.bf16.mxu1 %v17067_v55  ;;  %v16930_v8 = vcombine.low %v1053_v56, %v1057_v57 }
 0x14d   :  { %v1185_v61 = vld [vmem:[#allocation5 + $0x1f20] sm:$0xff]  ;;  %9726 = vmatpush2.bf16.msra.mxu0 %v16938_v0  ;;  %9769 = vmatpush2.bf16.msra.mxu1 %v17066_v1 }
 0x14e   :  { %v17059_v3 = vcombine.high %v1181_v60, %v1185_v61  ;;  %v1045_v4 = vld [vmem:[#allocation5 + $0x1ac0] sm:$0xff]  ;;  %9727 = vmatprep.subr.bf16.mxu0 %v16931_v2  ;;  %v17058_v9 = vcombine.low %v1181_v60, %v1185_v61  ;;  %v131_v60 = vld [vmem:[#allocation2 + $0x70] sm:$0xff]  ;;  %v19293_v2 = vsub.s32 1, %v18640_v42 }
 0x14f   :  { %v1049_v5 = vld [vmem:[#allocation5 + $0x1ae0] sm:$0xff]  ;;  %v155_v61 = vld [vmem:[#allocation2 + $0x130] sm:$0xff] }
 0x150   :  { %v1173_v6 = vld [vmem:[#allocation5 + $0x1ec0] sm:$0xff]  ;;  %v16923_v10 = vcombine.high %v1045_v4, %v1049_v5  ;;  %9770 = vmatprep.subr.bf16.mxu1 %v17059_v3  ;;  %v16922_v17 = vcombine.low %v1045_v4, %v1049_v5 }
 0x151   :  { %v1177_v7 = vld [vmem:[#allocation5 + $0x1ee0] sm:$0xff]  ;;  %9728 = vmatpush2.bf16.msra.mxu0 %v16930_v8  ;;  %9771 = vmatpush2.bf16.msra.mxu1 %v17058_v9  ;;  %v134_v8 = vld [vmem:[#allocation2 + $0x88] sm:$0xff] }
 0x152   :  { %v17051_v11 = vcombine.high %v1173_v6, %v1177_v7  ;;  %v1037_v12 = vld [vmem:[#allocation5 + $0x1a80] sm:$0xff]  ;;  %9729 = vmatprep.subr.bf16.mxu0 %v16923_v10  ;;  %v17050_v18 = vcombine.low %v1173_v6, %v1177_v7  ;;  %v158_v9 = vld [vmem:[#allocation2 + $0x148] sm:$0xff] }
 0x153   :  { %v1041_v13 = vld [vmem:[#allocation5 + $0x1aa0] sm:$0xff] }
 0x154   :  { %v1165_v14 = vld [vmem:[#allocation5 + $0x1e80] sm:$0xff]  ;;  %v16915_v20 = vcombine.high %v1037_v12, %v1041_v13  ;;  %9772 = vmatprep.subr.bf16.mxu1 %v17051_v11  ;;  %v16914_v28 = vcombine.low %v1037_v12, %v1041_v13  ;;  %v18648_v11 = vpack.c.bf16 %v155_v61, %v131_v60  ;;  %v136_v13 = vld [vmem:[#allocation2 + $0x98] sm:$0xff] }
 0x155   :  { %v1169_v16 = vld [vmem:[#allocation5 + $0x1ea0] sm:$0xff]  ;;  %9730 = vmatpush2.bf16.msra.mxu0 %v16922_v17  ;;  %9773 = vmatpush2.bf16.msra.mxu1 %v17050_v18 }
 0x156   :  { %v17043_v22 = vcombine.high %v1165_v14, %v1169_v16  ;;  %v1029_v23 = vld [vmem:[#allocation5 + $0x1a40] sm:$0xff]  ;;  %9731 = vmatprep.subr.bf16.mxu0 %v16915_v20  ;;  %v17042_v31 = vcombine.low %v1165_v14, %v1169_v16  ;;  %v160_v14 = vld [vmem:[#allocation2 + $0x158] sm:$0xff] }
 0x157   :  { %v1033_v24 = vld [vmem:[#allocation5 + $0x1a60] sm:$0xff]  ;;  %v18657_v29 = vpack.c.bf16 %v160_v14, %v136_v13 }
 0x158   :  { %v1157_v26 = vld [vmem:[#allocation5 + $0x1e40] sm:$0xff]  ;;  %v16907_v32 = vcombine.high %v1029_v23, %v1033_v24  ;;  %9774 = vmatprep.subr.bf16.mxu1 %v17043_v22  ;;  %v16906_v41 = vcombine.low %v1029_v23, %v1033_v24  ;;  %v18654_v24 = vpack.c.bf16 %v158_v9, %v134_v8 }
 0x159   :  { %v1161_v27 = vld [vmem:[#allocation5 + $0x1e60] sm:$0xff]  ;;  %9732 = vmatpush2.bf16.msra.mxu0 %v16914_v28  ;;  %9775 = vmatpush2.bf16.msra.mxu1 %v17042_v31 }
 0x15a   :  { %v17035_v35 = vcombine.high %v1157_v26, %v1161_v27  ;;  %v1021_v36 = vld [vmem:[#allocation5 + $0x1a00] sm:$0xff]  ;;  %9733 = vmatprep.subr.bf16.mxu0 %v16907_v32  ;;  %v17034_v43 = vcombine.low %v1157_v26, %v1161_v27 }
 0x15b   :  { %v1025_v38 = vld [vmem:[#allocation5 + $0x1a20] sm:$0xff] }
 0x15c   :  { %v1149_v39 = vld [vmem:[#allocation5 + $0x1e00] sm:$0xff]  ;;  %v16899_v44 = vcombine.high %v1021_v36, %v1025_v38  ;;  %9776 = vmatprep.subr.bf16.mxu1 %v17035_v35  ;;  %v16898_v52 = vcombine.low %v1021_v36, %v1025_v38 }
 0x15d   :  { %v1153_v40 = vld [vmem:[#allocation5 + $0x1e20] sm:$0xff]  ;;  %9734 = vmatpush2.bf16.msra.mxu0 %v16906_v41  ;;  %9777 = vmatpush2.bf16.msra.mxu1 %v17034_v43 }
 0x15e   :  { %v17027_v45 = vcombine.high %v1149_v39, %v1153_v40  ;;  %v1269_v46 = vld [vmem:[#allocation5 + $0x21c0] sm:$0xff]  ;;  %9735 = vmatprep.subr.bf16.mxu0 %v16899_v44  ;;  %v17026_v56 = vcombine.low %v1149_v39, %v1153_v40  ;;  %v9524_v32 = vpop.f32.mrf.mxu1 }
 0x15f   :  { %v1273_v47 = vld [vmem:[#allocation5 + $0x21e0] sm:$0xff] }
 0x160   :  { %v1397_v50 = vld [vmem:[#allocation5 + $0x25c0] sm:$0xff]  ;;  %v17147_v0 = vcombine.high %v1269_v46, %v1273_v47  ;;  %9778 = vmatprep.subr.bf16.mxu1 %v17027_v45  ;;  %v17146_v12 = vcombine.low %v1269_v46, %v1273_v47  ;;  %v9481_v26 = vpop.f32.mrf.mxu0  ;;  %v9526_v43 = vpop.f32.mrf.mxu1 }
 0x161   :  { %v1401_v51 = vld [vmem:[#allocation5 + $0x25e0] sm:$0xff]  ;;  %9736 = vmatpush2.bf16.msra.mxu0 %v16898_v52  ;;  %9779 = vmatpush2.bf16.msra.mxu1 %v17026_v56 }
 0x162   :  { %v129_v54 = vld [vmem:[#allocation2 + $0x60] sm:$0xff]  ;;  %v17275_v1 = vcombine.high %v1397_v50, %v1401_v51  ;;  %9791 = vmatprep.subr.bf16.mxu0 %v17147_v0  ;;  %v17274_v16 = vcombine.low %v1397_v50, %v1401_v51  ;;  %v9483_v36 = vpop.f32.mrf.mxu0  ;;  %v9528_v56 = vpop.f32.mrf.mxu1 }
 0x163   :  { %v153_v55 = vld [vmem:[#allocation2 + $0x120] sm:$0xff] }
 0x164   :  { %v1725_v57 = vld [vmem:[#allocation7] sm:$0xff]  ;;  %v18644_v6 = vpack.c.bf16 %v153_v55, %v129_v54  ;;  %9834 = vmatprep.subr.bf16.mxu1 %v17275_v1  ;;  %9781 = vmatmul.mubr.bf16.vlgmr.msra.gmra.mxu1 %v18648_v11  ;;  %v9485_v47 = vpop.f32.mrf.mxu0 }
 0x165   :  { %v1261_v3 = vld [vmem:[#allocation5 + $0x2180] sm:$0xff]  ;;  %v1730_v10 = vrot.slane %v1725_v57, %v19292_v53  ;;  %v18652_v18 = vrot.slane %v1725_v57, %v19293_v2  ;;  %9835 = vmatpush1.bf16.msra.mxu1 %v17274_v16  ;;  %9866 = vmatprep.mubr.bf16.mxu1 %v18657_v29  ;;  %v602_v53 = vld [vmem:[#allocation5 + $0xce8] sm:$0xff] }
 0x166   :  { %v1265_v4 = vld [vmem:[#allocation5 + $0x21a0] sm:$0xff]  ;;  %9738 = vmatmul.mubr.bf16.vlgmr.msra.gmra.mxu0 %v18644_v6 }
 0x167   :  { %v1389_v5 = vld [vmem:[#allocation5 + $0x2580] sm:$0xff]  ;;  %v17139_v17 = vcombine.high %v1261_v3, %v1265_v4  ;;  %v9482_v31 = vadd.f32 %v9481_v26, %v1730_v10  ;;  %9792 = vmatpush1.bf16.msra.mxu0 %v17146_v12  ;;  %v17138_v35 = vcombine.low %v1261_v3, %v1265_v4  ;;  %v9484_v41 = vadd.f32 %v9483_v36, %v18652_v18 }
 0x168   :  { %v1393_v7 = vld [vmem:[#allocation5 + $0x25a0] sm:$0xff]  ;;  %9823 = vmatprep.mubr.bf16.mxu0 %v18654_v24  ;;  %v9486_v54 = vadd.f32 %v9485_v47, %v1730_v10 }
 0x169   :  { %v17267_v20 = vcombine.high %v1389_v5, %v1393_v7  ;;  %v1253_v22 = vld [vmem:[#allocation5 + $0x2140] sm:$0xff]  ;;  %9793 = vmatprep.subr.bf16.mxu0 %v17139_v17  ;;  %v17266_v38 = vcombine.low %v1389_v5, %v1393_v7  ;;  %v18660_v40 = vadd.f32 %v9524_v32, %v9482_v31  ;;  %v18665_v52 = vadd.f32 %v9526_v43, %v9484_v41 }
 0x16a   :  { %v1257_v23 = vld [vmem:[#allocation5 + $0x2160] sm:$0xff]  ;;  %v18667_v61 = vadd.f32 %v9528_v56, %v9486_v54 }
 0x16b   :  { %v1381_v27 = vld [vmem:[#allocation5 + $0x2540] sm:$0xff]  ;;  %v17131_v39 = vcombine.high %v1253_v22, %v1257_v23  ;;  %9836 = vmatprep.subr.bf16.mxu1 %v17267_v20  ;;  %9794 = vmatpush1.bf16.msra.mxu0 %v17138_v35  ;;  %v17130_v55 = vcombine.low %v1253_v22, %v1257_v23 }
 0x16c   :  { %v1385_v28 = vld [vmem:[#allocation5 + $0x2560] sm:$0xff]  ;;  %9837 = vmatpush1.bf16.msra.mxu1 %v17266_v38 }
 0x16d   :  { %v17259_v44 = vcombine.high %v1381_v27, %v1385_v28  ;;  %v1245_v45 = vld [vmem:[#allocation5 + $0x2100] sm:$0xff]  ;;  %9795 = vmatprep.subr.bf16.mxu0 %v17131_v39  ;;  %v17258_v57 = vcombine.low %v1381_v27, %v1385_v28 }
 0x16e   :  { %v1249_v46 = vld [vmem:[#allocation5 + $0x2120] sm:$0xff] }
 0x16f   :  { %v1373_v50 = vld [vmem:[#allocation5 + $0x2500] sm:$0xff]  ;;  %v17123_v60 = vcombine.high %v1245_v45, %v1249_v46  ;;  %9838 = vmatprep.subr.bf16.mxu1 %v17259_v44  ;;  %9796 = vmatpush1.bf16.msra.mxu0 %v17130_v55  ;;  %v17122_v7 = vcombine.low %v1245_v45, %v1249_v46 }
 0x170   :  { %v1377_v51 = vld [vmem:[#allocation5 + $0x2520] sm:$0xff]  ;;  %9839 = vmatpush1.bf16.msra.mxu1 %v17258_v57 }
 0x171   :  { %v17251_v0 = vcombine.high %v1373_v50, %v1377_v51  ;;  %v1237_v1 = vld [vmem:[#allocation5 + $0x20c0] sm:$0xff]  ;;  %9797 = vmatprep.subr.bf16.mxu0 %v17123_v60  ;;  %v17250_v8 = vcombine.low %v1373_v50, %v1377_v51 }
 0x172   :  { %v1241_v3 = vld [vmem:[#allocation5 + $0x20e0] sm:$0xff] }
 0x173   :  { %v1365_v4 = vld [vmem:[#allocation5 + $0x24c0] sm:$0xff]  ;;  %v17115_v9 = vcombine.high %v1237_v1, %v1241_v3  ;;  %9840 = vmatprep.subr.bf16.mxu1 %v17251_v0  ;;  %9798 = vmatpush1.bf16.msra.mxu0 %v17122_v7  ;;  %v17114_v17 = vcombine.low %v1237_v1, %v1241_v3 }
 0x174   :  { %v1369_v5 = vld [vmem:[#allocation5 + $0x24e0] sm:$0xff]  ;;  %9841 = vmatpush1.bf16.msra.mxu1 %v17250_v8 }
 0x175   :  { %v17243_v10 = vcombine.high %v1365_v4, %v1369_v5  ;;  %v1229_v12 = vld [vmem:[#allocation5 + $0x2080] sm:$0xff]  ;;  %9799 = vmatprep.subr.bf16.mxu0 %v17115_v9  ;;  %v17242_v20 = vcombine.low %v1365_v4, %v1369_v5 }
 0x176   :  { %v1233_v13 = vld [vmem:[#allocation5 + $0x20a0] sm:$0xff] }
 0x177   :  { %v1357_v14 = vld [vmem:[#allocation5 + $0x2480] sm:$0xff]  ;;  %v17107_v22 = vcombine.high %v1229_v12, %v1233_v13  ;;  %9842 = vmatprep.subr.bf16.mxu1 %v17243_v10  ;;  %9800 = vmatpush1.bf16.msra.mxu0 %v17114_v17  ;;  %v17106_v32 = vcombine.low %v1229_v12, %v1233_v13 }
 0x178   :  { %v1361_v16 = vld [vmem:[#allocation5 + $0x24a0] sm:$0xff]  ;;  %9843 = vmatpush1.bf16.msra.mxu1 %v17242_v20 }
 0x179   :  { %v17235_v23 = vcombine.high %v1357_v14, %v1361_v16  ;;  %v1221_v26 = vld [vmem:[#allocation5 + $0x2040] sm:$0xff]  ;;  %9801 = vmatprep.subr.bf16.mxu0 %v17107_v22  ;;  %v17234_v35 = vcombine.low %v1357_v14, %v1361_v16 }
 0x17a   :  { %v1225_v27 = vld [vmem:[#allocation5 + $0x2060] sm:$0xff] }
 0x17b   :  { %v1349_v28 = vld [vmem:[#allocation5 + $0x2440] sm:$0xff]  ;;  %v17099_v36 = vcombine.high %v1221_v26, %v1225_v27  ;;  %9844 = vmatprep.subr.bf16.mxu1 %v17235_v23  ;;  %9802 = vmatpush1.bf16.msra.mxu0 %v17106_v32  ;;  %v17098_v45 = vcombine.low %v1221_v26, %v1225_v27 }
 0x17c   :  { %v1353_v31 = vld [vmem:[#allocation5 + $0x2460] sm:$0xff]  ;;  %9845 = vmatpush1.bf16.msra.mxu1 %v17234_v35 }
 0x17d   :  { %v17227_v38 = vcombine.high %v1349_v28, %v1353_v31  ;;  %v1213_v39 = vld [vmem:[#allocation5 + $0x2000] sm:$0xff]  ;;  %9803 = vmatprep.subr.bf16.mxu0 %v17099_v36  ;;  %v17226_v46 = vcombine.low %v1349_v28, %v1353_v31 }
 0x17e   :  { %v1217_v41 = vld [vmem:[#allocation5 + $0x2020] sm:$0xff] }
 0x17f   :  { %v1341_v43 = vld [vmem:[#allocation5 + $0x2400] sm:$0xff]  ;;  %v17091_v47 = vcombine.high %v1213_v39, %v1217_v41  ;;  %9846 = vmatprep.subr.bf16.mxu1 %v17227_v38  ;;  %9804 = vmatpush1.bf16.msra.mxu0 %v17098_v45  ;;  %v17090_v57 = vcombine.low %v1213_v39, %v1217_v41 }
 0x180   :  { %v1345_v44 = vld [vmem:[#allocation5 + $0x2420] sm:$0xff]  ;;  %9847 = vmatpush1.bf16.msra.mxu1 %v17226_v46 }
 0x181   :  { %v17219_v50 = vcombine.high %v1341_v43, %v1345_v44  ;;  %v1333_v51 = vld [vmem:[#allocation5 + $0x23c0] sm:$0xff]  ;;  %9805 = vmatprep.subr.bf16.mxu0 %v17091_v47  ;;  %v17218_v60 = vcombine.low %v1341_v43, %v1345_v44 }
 0x182   :  { %v1337_v54 = vld [vmem:[#allocation5 + $0x23e0] sm:$0xff] }
 0x183   :  { %v1461_v55 = vld [vmem:[#allocation5 + $0x27c0] sm:$0xff]  ;;  %v17211_v0 = vcombine.high %v1333_v51, %v1337_v54  ;;  %9848 = vmatprep.subr.bf16.mxu1 %v17219_v50  ;;  %9806 = vmatpush1.bf16.msra.mxu0 %v17090_v57  ;;  %v17210_v8 = vcombine.low %v1333_v51, %v1337_v54 }
 0x184   :  { %v1465_v56 = vld [vmem:[#allocation5 + $0x27e0] sm:$0xff]  ;;  %9849 = vmatpush1.bf16.msra.mxu1 %v17218_v60 }
 0x185   :  { %v17339_v1 = vcombine.high %v1461_v55, %v1465_v56  ;;  %v1325_v3 = vld [vmem:[#allocation5 + $0x2380] sm:$0xff]  ;;  %9807 = vmatprep.subr.bf16.mxu0 %v17211_v0  ;;  %v17338_v9 = vcombine.low %v1461_v55, %v1465_v56 }
 0x186   :  { %v1329_v4 = vld [vmem:[#allocation5 + $0x23a0] sm:$0xff] }
 0x187   :  { %v1453_v5 = vld [vmem:[#allocation5 + $0x2780] sm:$0xff]  ;;  %v17203_v10 = vcombine.high %v1325_v3, %v1329_v4  ;;  %9850 = vmatprep.subr.bf16.mxu1 %v17339_v1  ;;  %9808 = vmatpush2.bf16.msra.mxu0 %v17210_v8  ;;  %v17202_v20 = vcombine.low %v1325_v3, %v1329_v4 }
 0x188   :  { %v1457_v7 = vld [vmem:[#allocation5 + $0x27a0] sm:$0xff]  ;;  %9851 = vmatpush2.bf16.msra.mxu1 %v17338_v9 }
 0x189   :  { %v17331_v12 = vcombine.high %v1453_v5, %v1457_v7  ;;  %v1317_v13 = vld [vmem:[#allocation5 + $0x2340] sm:$0xff]  ;;  %9809 = vmatprep.subr.bf16.mxu0 %v17203_v10  ;;  %v17330_v22 = vcombine.low %v1453_v5, %v1457_v7 }
 0x18a   :  { %v1321_v14 = vld [vmem:[#allocation5 + $0x2360] sm:$0xff] }
 0x18b   :  { %v1445_v16 = vld [vmem:[#allocation5 + $0x2740] sm:$0xff]  ;;  %v17195_v23 = vcombine.high %v1317_v13, %v1321_v14  ;;  %9852 = vmatprep.subr.bf16.mxu1 %v17331_v12  ;;  %9810 = vmatpush2.bf16.msra.mxu0 %v17202_v20  ;;  %v17194_v35 = vcombine.low %v1317_v13, %v1321_v14 }
 0x18c   :  { %v1449_v17 = vld [vmem:[#allocation5 + $0x2760] sm:$0xff]  ;;  %9853 = vmatpush2.bf16.msra.mxu1 %v17330_v22 }
 0x18d   :  { %v17323_v26 = vcombine.high %v1445_v16, %v1449_v17  ;;  %v1309_v27 = vld [vmem:[#allocation5 + $0x2300] sm:$0xff]  ;;  %9811 = vmatprep.subr.bf16.mxu0 %v17195_v23  ;;  %v17322_v36 = vcombine.low %v1445_v16, %v1449_v17 }
 0x18e   :  { %v1313_v28 = vld [vmem:[#allocation5 + $0x2320] sm:$0xff] }
 0x18f   :  { %v1437_v31 = vld [vmem:[#allocation5 + $0x2700] sm:$0xff]  ;;  %v17187_v38 = vcombine.high %v1309_v27, %v1313_v28  ;;  %9854 = vmatprep.subr.bf16.mxu1 %v17323_v26  ;;  %9812 = vmatpush2.bf16.msra.mxu0 %v17194_v35  ;;  %v17186_v46 = vcombine.low %v1309_v27, %v1313_v28 }
 0x190   :  { %v1441_v32 = vld [vmem:[#allocation5 + $0x2720] sm:$0xff]  ;;  %9855 = vmatpush2.bf16.msra.mxu1 %v17322_v36 }
 0x191   :  { %v17315_v39 = vcombine.high %v1437_v31, %v1441_v32  ;;  %v1301_v41 = vld [vmem:[#allocation5 + $0x22c0] sm:$0xff]  ;;  %9813 = vmatprep.subr.bf16.mxu0 %v17187_v38  ;;  %v17314_v47 = vcombine.low %v1437_v31, %v1441_v32 }
 0x192   :  { %v1305_v43 = vld [vmem:[#allocation5 + $0x22e0] sm:$0xff] }
 0x193   :  { %v1429_v44 = vld [vmem:[#allocation5 + $0x26c0] sm:$0xff]  ;;  %v17179_v50 = vcombine.high %v1301_v41, %v1305_v43  ;;  %9856 = vmatprep.subr.bf16.mxu1 %v17315_v39  ;;  %9814 = vmatpush2.bf16.msra.mxu0 %v17186_v46  ;;  %v17178_v60 = vcombine.low %v1301_v41, %v1305_v43  ;;  %v135_v43 = vld [vmem:[#allocation2 + $0x90] sm:$0xff] }
 0x194   :  { %v1433_v45 = vld [vmem:[#allocation5 + $0x26e0] sm:$0xff]  ;;  %9857 = vmatpush2.bf16.msra.mxu1 %v17314_v47 }
 0x195   :  { %v17307_v51 = vcombine.high %v1429_v44, %v1433_v45  ;;  %v1293_v54 = vld [vmem:[#allocation5 + $0x2280] sm:$0xff]  ;;  %9815 = vmatprep.subr.bf16.mxu0 %v17179_v50  ;;  %v17306_v0 = vcombine.low %v1429_v44, %v1433_v45  ;;  %v159_v44 = vld [vmem:[#allocation2 + $0x150] sm:$0xff] }
 0x196   :  { %v1297_v55 = vld [vmem:[#allocation5 + $0x22a0] sm:$0xff] }
 0x197   :  { %v1421_v56 = vld [vmem:[#allocation5 + $0x2680] sm:$0xff]  ;;  %v17171_v1 = vcombine.high %v1293_v54, %v1297_v55  ;;  %9858 = vmatprep.subr.bf16.mxu1 %v17307_v51  ;;  %9816 = vmatpush2.bf16.msra.mxu0 %v17178_v60  ;;  %v17170_v9 = vcombine.low %v1293_v54, %v1297_v55  ;;  %v18671_v60 = vpack.c.bf16 %v159_v44, %v135_v43 }
 0x198   :  { %v1425_v57 = vld [vmem:[#allocation5 + $0x26a0] sm:$0xff]  ;;  %9859 = vmatpush2.bf16.msra.mxu1 %v17306_v0 }
 0x199   :  { %v17299_v3 = vcombine.high %v1421_v56, %v1425_v57  ;;  %v1285_v4 = vld [vmem:[#allocation5 + $0x2240] sm:$0xff]  ;;  %9817 = vmatprep.subr.bf16.mxu0 %v17171_v1  ;;  %v17298_v10 = vcombine.low %v1421_v56, %v1425_v57  ;;  %v138_v56 = vld [vmem:[#allocation2 + $0xa8] sm:$0xff]  ;;  %v140_v1 = vld [vmem:[#allocation2 + $0xb8] sm:$0xff] }
 0x19a   :  { %v1289_v5 = vld [vmem:[#allocation5 + $0x2260] sm:$0xff]  ;;  %v162_v57 = vld [vmem:[#allocation2 + $0x168] sm:$0xff] }
 0x19b   :  { %v1413_v7 = vld [vmem:[#allocation5 + $0x2640] sm:$0xff]  ;;  %v17163_v12 = vcombine.high %v1285_v4, %v1289_v5  ;;  %9860 = vmatprep.subr.bf16.mxu1 %v17299_v3  ;;  %9818 = vmatpush2.bf16.msra.mxu0 %v17170_v9  ;;  %v17162_v22 = vcombine.low %v1285_v4, %v1289_v5  ;;  %v164_v3 = vld [vmem:[#allocation2 + $0x178] sm:$0xff]  ;;  %v18673_v4 = vpop.f32.mrf.mxu0 }
 0x19c   :  { %v1417_v8 = vld [vmem:[#allocation5 + $0x2660] sm:$0xff]  ;;  %9861 = vmatpush2.bf16.msra.mxu1 %v17298_v10 }
 0x19d   :  { %v17291_v13 = vcombine.high %v1413_v7, %v1417_v8  ;;  %v1277_v14 = vld [vmem:[#allocation5 + $0x2200] sm:$0xff]  ;;  %9819 = vmatprep.subr.bf16.mxu0 %v17163_v12  ;;  %v17290_v23 = vcombine.low %v1413_v7, %v1417_v8  ;;  %v18675_v8 = vpop.f32.mrf.mxu1 }
 0x19e   :  { %v1281_v16 = vld [vmem:[#allocation5 + $0x2220] sm:$0xff] }
 0x19f   :  { %v1405_v17 = vld [vmem:[#allocation5 + $0x2600] sm:$0xff]  ;;  %v17155_v26 = vcombine.high %v1277_v14, %v1281_v16  ;;  %9862 = vmatprep.subr.bf16.mxu1 %v17291_v13  ;;  %9820 = vmatpush2.bf16.msra.mxu0 %v17162_v22  ;;  %v17154_v36 = vcombine.low %v1277_v14, %v1281_v16  ;;  %v18677_v13 = vpack.c.bf16 %v162_v57, %v138_v56 }
 0x1a0   :  { %v1409_v20 = vld [vmem:[#allocation5 + $0x2620] sm:$0xff]  ;;  %9863 = vmatpush2.bf16.msra.mxu1 %v17290_v23  ;;  %v9610_v23 = vpop.f32.mrf.mxu1 }
 0x1a1   :  { %v17283_v27 = vcombine.high %v1405_v17, %v1409_v20  ;;  %v1525_v28 = vld [vmem:[#allocation5 + $0x29c0] sm:$0xff]  ;;  %9821 = vmatprep.subr.bf16.mxu0 %v17155_v26  ;;  %v17282_v41 = vcombine.low %v1405_v17, %v1409_v20  ;;  %v9567_v14 = vpop.f32.mrf.mxu0  ;;  %v18680_v20 = vpack.c.bf16 %v164_v3, %v140_v1 }
 0x1a2   :  { %v1529_v31 = vld [vmem:[#allocation5 + $0x29e0] sm:$0xff]  ;;  %v9568_v22 = vadd.f32 %v9567_v14, %v18660_v40 }
 0x1a3   :  { %v1653_v32 = vld [vmem:[#allocation5 + $0x2dc0] sm:$0xff]  ;;  %v17403_v45 = vcombine.high %v1525_v28, %v1529_v31  ;;  %9864 = vmatprep.subr.bf16.mxu1 %v17283_v27  ;;  %9822 = vmatpush2.bf16.msra.mxu0 %v17154_v36  ;;  %v17402_v0 = vcombine.low %v1525_v28, %v1529_v31  ;;  %v9569_v27 = vpop.f32.mrf.mxu0  ;;  %v9612_v36 = vpop.f32.mrf.mxu1 }
 0x1a4   :  { %v1657_v35 = vld [vmem:[#allocation5 + $0x2de0] sm:$0xff]  ;;  %9865 = vmatpush2.bf16.msra.mxu1 %v17282_v41 }
 0x1a5   :  { %v133_v38 = vld [vmem:[#allocation2 + $0x80] sm:$0xff]  ;;  %v17531_v46 = vcombine.high %v1653_v32, %v1657_v35  ;;  %9877 = vmatprep.subr.bf16.mxu0 %v17403_v45  ;;  %v17530_v5 = vcombine.low %v1653_v32, %v1657_v35  ;;  %v18684_v32 = vadd.f32 %v9610_v23, %v9568_v22  ;;  %v9570_v35 = vadd.f32 %v9569_v27, %v18665_v52  ;;  %v9571_v40 = vpop.f32.mrf.mxu0 }
 0x1a6   :  { %v157_v39 = vld [vmem:[#allocation2 + $0x140] sm:$0xff] }
 0x1a7   :  { %v1517_v47 = vld [vmem:[#allocation5 + $0x2980] sm:$0xff]  ;;  %v18669_v54 = vpack.c.bf16 %v157_v39, %v133_v38  ;;  %9920 = vmatprep.subr.bf16.mxu1 %v17531_v46  ;;  %9867 = vmatmul.mubr.bf16.vlgmr.msra.gmra.mxu1 %v18671_v60  ;;  %v18689_v45 = vadd.f32 %v9612_v36, %v9570_v35  ;;  %v9572_v46 = vadd.f32 %v9571_v40, %v18667_v61 }
 0x1a8   :  { %v1521_v50 = vld [vmem:[#allocation5 + $0x29a0] sm:$0xff]  ;;  %9921 = vmatpush1.bf16.msra.mxu1 %v17530_v5  ;;  %9952 = vmatprep.mubr.bf16.mxu1 %v18680_v20 }
 0x1a9   :  { %v1645_v51 = vld [vmem:[#allocation5 + $0x2d80] sm:$0xff]  ;;  %v17395_v7 = vcombine.high %v1517_v47, %v1521_v50  ;;  %9824 = vmatmul.mubr.bf16.vlgmr.msra.gmra.mxu0 %v18669_v54  ;;  %v17394_v26 = vcombine.low %v1517_v47, %v1521_v50  ;;  %19298 = vst [vmem:[#allocation20_spill] sm:$0xff] %v18689_v45  ;;  %v9614_v50 = vpop.f32.mrf.mxu1  ;;  %v227_v45 = vld [vmem:[#allocation5 + $0x130] sm:$0xff] }
 0x1aa   :  { %v1649_v55 = vld [vmem:[#allocation5 + $0x2da0] sm:$0xff]  ;;  %9878 = vmatpush1.bf16.msra.mxu0 %v17402_v0  ;;  %9909 = vmatprep.mubr.bf16.mxu0 %v18677_v13 }
 0x1ab   :  { %v17523_v9 = vcombine.high %v1645_v51, %v1649_v55  ;;  %v1509_v10 = vld [vmem:[#allocation5 + $0x2940] sm:$0xff]  ;;  %9879 = vmatprep.subr.bf16.mxu0 %v17395_v7  ;;  %v17522_v28 = vcombine.low %v1645_v51, %v1649_v55  ;;  %v18692_v55 = vadd.f32 %v9614_v50, %v9572_v46 }
 0x1ac   :  { %v1513_v12 = vld [vmem:[#allocation5 + $0x2960] sm:$0xff] }
 0x1ad   :  { %v1637_v16 = vld [vmem:[#allocation5 + $0x2d40] sm:$0xff]  ;;  %v17387_v31 = vcombine.high %v1509_v10, %v1513_v12  ;;  %9922 = vmatprep.subr.bf16.mxu1 %v17523_v9  ;;  %v17386_v47 = vcombine.low %v1509_v10, %v1513_v12 }
 0x1ae   :  { %v1641_v17 = vld [vmem:[#allocation5 + $0x2d60] sm:$0xff]  ;;  %9880 = vmatpush1.bf16.msra.mxu0 %v17394_v26  ;;  %9923 = vmatpush1.bf16.msra.mxu1 %v17522_v28 }
 0x1af   :  { %v17515_v38 = vcombine.high %v1637_v16, %v1641_v17  ;;  %v1501_v39 = vld [vmem:[#allocation5 + $0x2900] sm:$0xff]  ;;  %9881 = vmatprep.subr.bf16.mxu0 %v17387_v31  ;;  %v17514_v52 = vcombine.low %v1637_v16, %v1641_v17 }
 0x1b0   :  { %v1505_v41 = vld [vmem:[#allocation5 + $0x2920] sm:$0xff] }
 0x1b1   :  { %v1629_v43 = vld [vmem:[#allocation5 + $0x2d00] sm:$0xff]  ;;  %v17379_v51 = vcombine.high %v1501_v39, %v1505_v41  ;;  %9924 = vmatprep.subr.bf16.mxu1 %v17515_v38  ;;  %v17378_v5 = vcombine.low %v1501_v39, %v1505_v41 }
 0x1b2   :  { %v1633_v44 = vld [vmem:[#allocation5 + $0x2d20] sm:$0xff]  ;;  %9882 = vmatpush1.bf16.msra.mxu0 %v17386_v47  ;;  %9925 = vmatpush1.bf16.msra.mxu1 %v17514_v52 }
 0x1b3   :  { %v17507_v56 = vcombine.high %v1629_v43, %v1633_v44  ;;  %v1493_v57 = vld [vmem:[#allocation5 + $0x28c0] sm:$0xff]  ;;  %9883 = vmatprep.subr.bf16.mxu0 %v17379_v51  ;;  %v17506_v61 = vcombine.low %v1629_v43, %v1633_v44 }
 0x1b4   :  { %v1497_v0 = vld [vmem:[#allocation5 + $0x28e0] sm:$0xff] }
 0x1b5   :  { %v1621_v1 = vld [vmem:[#allocation5 + $0x2cc0] sm:$0xff]  ;;  %v17371_v7 = vcombine.high %v1493_v57, %v1497_v0  ;;  %9926 = vmatprep.subr.bf16.mxu1 %v17507_v56  ;;  %v17370_v17 = vcombine.low %v1493_v57, %v1497_v0 }
 0x1b6   :  { %v1625_v3 = vld [vmem:[#allocation5 + $0x2ce0] sm:$0xff]  ;;  %9884 = vmatpush1.bf16.msra.mxu0 %v17378_v5  ;;  %9927 = vmatpush1.bf16.msra.mxu1 %v17506_v61 }
 0x1b7   :  { %v17499_v9 = vcombine.high %v1621_v1, %v1625_v3  ;;  %v1485_v10 = vld [vmem:[#allocation5 + $0x2880] sm:$0xff]  ;;  %9885 = vmatprep.subr.bf16.mxu0 %v17371_v7  ;;  %v17498_v22 = vcombine.low %v1621_v1, %v1625_v3 }
 0x1b8   :  { %v1489_v12 = vld [vmem:[#allocation5 + $0x28a0] sm:$0xff] }
 0x1b9   :  { %v1613_v14 = vld [vmem:[#allocation5 + $0x2c80] sm:$0xff]  ;;  %v17363_v23 = vcombine.high %v1485_v10, %v1489_v12  ;;  %9928 = vmatprep.subr.bf16.mxu1 %v17499_v9  ;;  %v17362_v36 = vcombine.low %v1485_v10, %v1489_v12 }
 0x1ba   :  { %v1617_v16 = vld [vmem:[#allocation5 + $0x2ca0] sm:$0xff]  ;;  %9886 = vmatpush1.bf16.msra.mxu0 %v17370_v17  ;;  %9929 = vmatpush1.bf16.msra.mxu1 %v17498_v22 }
 0x1bb   :  { %v17491_v26 = vcombine.high %v1613_v14, %v1617_v16  ;;  %v1477_v27 = vld [vmem:[#allocation5 + $0x2840] sm:$0xff]  ;;  %9887 = vmatprep.subr.bf16.mxu0 %v17363_v23  ;;  %v17490_v38 = vcombine.low %v1613_v14, %v1617_v16 }
 0x1bc   :  { %v1481_v28 = vld [vmem:[#allocation5 + $0x2860] sm:$0xff] }
 0x1bd   :  { %v1605_v31 = vld [vmem:[#allocation5 + $0x2c40] sm:$0xff]  ;;  %v17355_v39 = vcombine.high %v1477_v27, %v1481_v28  ;;  %9930 = vmatprep.subr.bf16.mxu1 %v17491_v26  ;;  %v17354_v47 = vcombine.low %v1477_v27, %v1481_v28 }
 0x1be   :  { %v1609_v35 = vld [vmem:[#allocation5 + $0x2c60] sm:$0xff]  ;;  %9888 = vmatpush1.bf16.msra.mxu0 %v17362_v36  ;;  %9931 = vmatpush1.bf16.msra.mxu1 %v17490_v38 }
 0x1bf   :  { %v17483_v41 = vcombine.high %v1605_v31, %v1609_v35  ;;  %v1469_v40 = vld [vmem:[#allocation5 + $0x2800] sm:$0xff]  ;;  %9889 = vmatprep.subr.bf16.mxu0 %v17355_v39  ;;  %v17482_v50 = vcombine.low %v1605_v31, %v1609_v35 }
 0x1c0   :  { %v1473_v43 = vld [vmem:[#allocation5 + $0x2820] sm:$0xff] }
 0x1c1   :  { %v1597_v44 = vld [vmem:[#allocation5 + $0x2c00] sm:$0xff]  ;;  %v17347_v52 = vcombine.high %v1469_v40, %v1473_v43  ;;  %9932 = vmatprep.subr.bf16.mxu1 %v17483_v41  ;;  %v17346_v3 = vcombine.low %v1469_v40, %v1473_v43 }
 0x1c2   :  { %v1601_v46 = vld [vmem:[#allocation5 + $0x2c20] sm:$0xff]  ;;  %9890 = vmatpush1.bf16.msra.mxu0 %v17354_v47  ;;  %9933 = vmatpush1.bf16.msra.mxu1 %v17482_v50 }
 0x1c3   :  { %v17475_v51 = vcombine.high %v1597_v44, %v1601_v46  ;;  %v1589_v56 = vld [vmem:[#allocation5 + $0x2bc0] sm:$0xff]  ;;  %9891 = vmatprep.subr.bf16.mxu0 %v17347_v52  ;;  %v17474_v5 = vcombine.low %v1597_v44, %v1601_v46 }
 0x1c4   :  { %v1593_v57 = vld [vmem:[#allocation5 + $0x2be0] sm:$0xff] }
 0x1c5   :  { %v1717_v0 = vld [vmem:[#allocation5 + $0x2fc0] sm:$0xff]  ;;  %v17467_v61 = vcombine.high %v1589_v56, %v1593_v57  ;;  %9934 = vmatprep.subr.bf16.mxu1 %v17475_v51  ;;  %v17466_v16 = vcombine.low %v1589_v56, %v1593_v57 }
 0x1c6   :  { %v1721_v1 = vld [vmem:[#allocation5 + $0x2fe0] sm:$0xff]  ;;  %9892 = vmatpush1.bf16.msra.mxu0 %v17346_v3  ;;  %9935 = vmatpush1.bf16.msra.mxu1 %v17474_v5 }
 0x1c7   :  { %v17595_v7 = vcombine.high %v1717_v0, %v1721_v1  ;;  %v1581_v9 = vld [vmem:[#allocation5 + $0x2b80] sm:$0xff]  ;;  %9893 = vmatprep.subr.bf16.mxu0 %v17467_v61  ;;  %v17594_v17 = vcombine.low %v1717_v0, %v1721_v1 }
 0x1c8   :  { %v1585_v10 = vld [vmem:[#allocation5 + $0x2ba0] sm:$0xff] }
 0x1c9   :  { %v1709_v12 = vld [vmem:[#allocation5 + $0x2f80] sm:$0xff]  ;;  %v17459_v22 = vcombine.high %v1581_v9, %v1585_v10  ;;  %9936 = vmatprep.subr.bf16.mxu1 %v17595_v7  ;;  %v17458_v35 = vcombine.low %v1581_v9, %v1585_v10 }
 0x1ca   :  { %v1713_v14 = vld [vmem:[#allocation5 + $0x2fa0] sm:$0xff]  ;;  %9894 = vmatpush2.bf16.msra.mxu0 %v17466_v16  ;;  %9937 = vmatpush2.bf16.msra.mxu1 %v17594_v17 }
 0x1cb   :  { %v17587_v23 = vcombine.high %v1709_v12, %v1713_v14  ;;  %v1573_v26 = vld [vmem:[#allocation5 + $0x2b40] sm:$0xff]  ;;  %9895 = vmatprep.subr.bf16.mxu0 %v17459_v22  ;;  %v17586_v36 = vcombine.low %v1709_v12, %v1713_v14 }
 0x1cc   :  { %v1577_v27 = vld [vmem:[#allocation5 + $0x2b60] sm:$0xff] }
 0x1cd   :  { %v1701_v28 = vld [vmem:[#allocation5 + $0x2f40] sm:$0xff]  ;;  %v17451_v38 = vcombine.high %v1573_v26, %v1577_v27  ;;  %9938 = vmatprep.subr.bf16.mxu1 %v17587_v23  ;;  %v17450_v46 = vcombine.low %v1573_v26, %v1577_v27 }
 0x1ce   :  { %v1705_v31 = vld [vmem:[#allocation5 + $0x2f60] sm:$0xff]  ;;  %9896 = vmatpush2.bf16.msra.mxu0 %v17458_v35  ;;  %9939 = vmatpush2.bf16.msra.mxu1 %v17586_v36 }
 0x1cf   :  { %v17579_v39 = vcombine.high %v1701_v28, %v1705_v31  ;;  %v1565_v41 = vld [vmem:[#allocation5 + $0x2b00] sm:$0xff]  ;;  %9897 = vmatprep.subr.bf16.mxu0 %v17451_v38  ;;  %v17578_v47 = vcombine.low %v1701_v28, %v1705_v31 }
 0x1d0   :  { %v1569_v40 = vld [vmem:[#allocation5 + $0x2b20] sm:$0xff] }
 0x1d1   :  { %v1693_v43 = vld [vmem:[#allocation5 + $0x2f00] sm:$0xff]  ;;  %v17443_v50 = vcombine.high %v1565_v41, %v1569_v40  ;;  %9940 = vmatprep.subr.bf16.mxu1 %v17579_v39  ;;  %v17442_v1 = vcombine.low %v1565_v41, %v1569_v40 }
 0x1d2   :  { %v1697_v44 = vld [vmem:[#allocation5 + $0x2f20] sm:$0xff]  ;;  %9898 = vmatpush2.bf16.msra.mxu0 %v17450_v46  ;;  %9941 = vmatpush2.bf16.msra.mxu1 %v17578_v47 }
 0x1d3   :  { %v17571_v52 = vcombine.high %v1693_v43, %v1697_v44  ;;  %v1557_v51 = vld [vmem:[#allocation5 + $0x2ac0] sm:$0xff]  ;;  %9899 = vmatprep.subr.bf16.mxu0 %v17443_v50  ;;  %v17570_v3 = vcombine.low %v1693_v43, %v1697_v44 }
 0x1d4   :  { %v1561_v56 = vld [vmem:[#allocation5 + $0x2ae0] sm:$0xff] }
 0x1d5   :  { %v1685_v57 = vld [vmem:[#allocation5 + $0x2ec0] sm:$0xff]  ;;  %v17435_v5 = vcombine.high %v1557_v51, %v1561_v56  ;;  %9942 = vmatprep.subr.bf16.mxu1 %v17571_v52  ;;  %v17434_v14 = vcombine.low %v1557_v51, %v1561_v56  ;;  %v246_v52 = vld [vmem:[#allocation5 + $0x1c8] sm:$0xff] }
 0x1d6   :  { %v1689_v0 = vld [vmem:[#allocation5 + $0x2ee0] sm:$0xff]  ;;  %9900 = vmatpush2.bf16.msra.mxu0 %v17442_v1  ;;  %9943 = vmatpush2.bf16.msra.mxu1 %v17570_v3  ;;  %v250_v51 = vld [vmem:[#allocation5 + $0x1e8] sm:$0xff] }
 0x1d7   :  { %v17563_v61 = vcombine.high %v1685_v57, %v1689_v0  ;;  %v1549_v7 = vld [vmem:[#allocation5 + $0x2a80] sm:$0xff]  ;;  %9901 = vmatprep.subr.bf16.mxu0 %v17435_v5  ;;  %v17562_v16 = vcombine.low %v1685_v57, %v1689_v0  ;;  %v374_v56 = vld [vmem:[#allocation5 + $0x5c8] sm:$0xff] }
 0x1d8   :  { %v1553_v9 = vld [vmem:[#allocation5 + $0x2aa0] sm:$0xff]  ;;  %v378_v57 = vld [vmem:[#allocation5 + $0x5e8] sm:$0xff] }
 0x1d9   :  { %v1677_v10 = vld [vmem:[#allocation5 + $0x2e80] sm:$0xff]  ;;  %v17427_v17 = vcombine.high %v1549_v7, %v1553_v9  ;;  %9944 = vmatprep.subr.bf16.mxu1 %v17563_v61  ;;  %v17426_v31 = vcombine.low %v1549_v7, %v1553_v9  ;;  %v139_v61 = vld [vmem:[#allocation2 + $0xb0] sm:$0xff]  ;;  %v16125_v9 = vcombine.high %v246_v52, %v250_v51 }
 0x1da   :  { %v1681_v12 = vld [vmem:[#allocation5 + $0x2ea0] sm:$0xff]  ;;  %9902 = vmatpush2.bf16.msra.mxu0 %v17434_v14  ;;  %9945 = vmatpush2.bf16.msra.mxu1 %v17562_v16  ;;  %v163_v7 = vld [vmem:[#allocation2 + $0x170] sm:$0xff]  ;;  %v242_v14 = vld [vmem:[#allocation5 + $0x1a8] sm:$0xff] }
 0x1db   :  { %v17555_v22 = vcombine.high %v1677_v10, %v1681_v12  ;;  %v1541_v23 = vld [vmem:[#allocation5 + $0x2a40] sm:$0xff]  ;;  %9903 = vmatprep.subr.bf16.mxu0 %v17427_v17  ;;  %v17554_v35 = vcombine.low %v1677_v10, %v1681_v12  ;;  %v16253_v10 = vcombine.high %v374_v56, %v378_v57  ;;  %v238_v12 = vld [vmem:[#allocation5 + $0x188] sm:$0xff] }
 0x1dc   :  { %v1545_v26 = vld [vmem:[#allocation5 + $0x2a60] sm:$0xff]  ;;  %v366_v17 = vld [vmem:[#allocation5 + $0x588] sm:$0xff] }
 0x1dd   :  { %v1669_v27 = vld [vmem:[#allocation5 + $0x2e40] sm:$0xff]  ;;  %v17419_v36 = vcombine.high %v1541_v23, %v1545_v26  ;;  %9946 = vmatprep.subr.bf16.mxu1 %v17555_v22  ;;  %v17418_v44 = vcombine.low %v1541_v23, %v1545_v26  ;;  %v370_v22 = vld [vmem:[#allocation5 + $0x5a8] sm:$0xff]  ;;  %v18696_v23 = vpack.c.bf16 %v163_v7, %v139_v61  ;;  %v16124_v26 = vcombine.low %v246_v52, %v250_v51 }
 0x1de   :  { %v1673_v28 = vld [vmem:[#allocation5 + $0x2e60] sm:$0xff]  ;;  %9904 = vmatpush2.bf16.msra.mxu0 %v17426_v31  ;;  %9947 = vmatpush2.bf16.msra.mxu1 %v17554_v35  ;;  %v16117_v31 = vcombine.high %v238_v12, %v242_v14  ;;  %v18700_v35 = vpop.f32.mrf.mxu1  ;;  %v16244_v52 = vcombine.low %v366_v17, %v370_v22  ;;  %v354_v61 = vld [vmem:[#allocation5 + $0x528] sm:$0xff] }
 0x1df   :  { %v17547_v38 = vcombine.high %v1669_v27, %v1673_v28  ;;  %v1533_v39 = vld [vmem:[#allocation5 + $0x2a00] sm:$0xff]  ;;  %9905 = vmatprep.subr.bf16.mxu0 %v17419_v36  ;;  %v17546_v46 = vcombine.low %v1669_v27, %v1673_v28  ;;  %v18698_v27 = vpop.f32.mrf.mxu0  ;;  %v16252_v28 = vcombine.low %v374_v56, %v378_v57  ;;  %19299 = vst [vmem:[#allocation21_spill] sm:$0xff] %v18700_v35 }
 0x1e0   :  { %v1537_v41 = vld [vmem:[#allocation5 + $0x2a20] sm:$0xff]  ;;  %v16245_v36 = vcombine.high %v366_v17, %v370_v22 }
 0x1e1   :  { %v1661_v40 = vld [vmem:[#allocation5 + $0x2e00] sm:$0xff]  ;;  %v17411_v47 = vcombine.high %v1533_v39, %v1537_v41  ;;  %9948 = vmatprep.subr.bf16.mxu1 %v17547_v38  ;;  %v17410_v0 = vcombine.low %v1533_v39, %v1537_v41  ;;  %v230_v38 = vld [vmem:[#allocation5 + $0x148] sm:$0xff] }
 0x1e2   :  { %v1665_v43 = vld [vmem:[#allocation5 + $0x2e20] sm:$0xff]  ;;  %9906 = vmatpush2.bf16.msra.mxu0 %v17418_v44  ;;  %9949 = vmatpush2.bf16.msra.mxu1 %v17546_v46  ;;  %v234_v39 = vld [vmem:[#allocation5 + $0x168] sm:$0xff]  ;;  %v9696_v46 = vpop.f32.mrf.mxu1 }
 0x1e3   :  { %v17539_v50 = vcombine.high %v1661_v40, %v1665_v43  ;;  %v137_v1 = vld [vmem:[#allocation2 + $0xa0] sm:$0xff]  ;;  %9907 = vmatprep.subr.bf16.mxu0 %v17411_v47  ;;  %v17538_v5 = vcombine.low %v1661_v40, %v1665_v43  ;;  %v358_v40 = vld [vmem:[#allocation5 + $0x548] sm:$0xff]  ;;  %v16116_v47 = vcombine.low %v238_v12, %v242_v14  ;;  %v16109_v51 = vcombine.high %v230_v38, %v234_v39 }
 0x1e4   :  { %v161_v3 = vld [vmem:[#allocation2 + $0x160] sm:$0xff]  ;;  %v9653_v41 = vpop.f32.mrf.mxu0  ;;  %v362_v43 = vld [vmem:[#allocation5 + $0x568] sm:$0xff]  ;;  %v18709_v57 = vpop.f32.mrf.mxu1 }
 0x1e5   :  { %9950 = vmatprep.subr.bf16.mxu1 %v17539_v50  ;;  %v18694_v16 = vpack.c.bf16 %v161_v3, %v137_v1  ;;  %v9654_v44 = vadd.f32 %v9653_v41, %v18684_v32  ;;  %19301 = vst [vmem:[#allocation23_spill] sm:$0xff] %v18709_v57  ;;  %v222_v1 = vld [vmem:[#allocation5 + $0x108] sm:$0xff]  ;;  %v16236_v12 = vcombine.low %v358_v40, %v362_v43 }
 0x1e6   :  { %9908 = vmatpush2.bf16.msra.mxu0 %v17410_v0  ;;  %9951 = vmatpush2.bf16.msra.mxu1 %v17538_v5  ;;  %v18705_v50 = vpop.f32.mrf.mxu0  ;;  %v16237_v0 = vcombine.high %v358_v40, %v362_v43  ;;  %v226_v3 = vld [vmem:[#allocation5 + $0x128] sm:$0xff] }
 0x1e7   :  { %9963 = vmatprep.subr.bf16.mxu0 %v16125_v9  ;;  %10006 = vmatprep.subr.bf16.mxu1 %v16253_v10  ;;  %19300 = vst [vmem:[#allocation22_spill] sm:$0xff] %v18705_v50  ;;  %v18707_v56 = vadd.f32 %v9696_v46, %v9654_v44  ;;  %v350_v5 = vld [vmem:[#allocation5 + $0x508] sm:$0xff]  ;;  %v16108_v9 = vcombine.low %v230_v38, %v234_v39  ;;  %v9700_v10 = vpop.f32.mrf.mxu1 }
 0x1e8   :  { %v9657_v32 = vpop.f32.mrf.mxu0  ;;  %v16101_v14 = vcombine.high %v222_v1, %v226_v3  ;;  %v16229_v22 = vcombine.high %v350_v5, %v354_v61  ;;  %v16100_v41 = vcombine.low %v222_v1, %v226_v3  ;;  %v206_v39 = vld [vmem:[#allocation5 + $0x88] sm:$0xff] }
 0x1e9   :  { %9910 = vmatmul.mubr.bf16.vlgmr.msra.gmra.mxu0 %v18694_v16  ;;  %9953 = vmatmul.mubr.bf16.vlgmr.msra.gmra.mxu1 %v18696_v23  ;;  %v9658_v7 = vadd.f32 %v9657_v32, %v18692_v55  ;;  %v16228_v55 = vcombine.low %v350_v5, %v354_v61  ;;  %v210_v46 = vld [vmem:[#allocation5 + $0xa8] sm:$0xff] }
 0x1ea   :  { %9964 = vmatpush1.bf16.msra.mxu0 %v16124_v26  ;;  %10007 = vmatpush1.bf16.msra.mxu1 %v16252_v28  ;;  %v214_v26 = vld [vmem:[#allocation5 + $0xc8] sm:$0xff]  ;;  %v16084_v5 = vcombine.low %v206_v39, %v210_v46 }
 0x1eb   :  { %9965 = vmatprep.subr.bf16.mxu0 %v16117_v31  ;;  %10008 = vmatprep.subr.bf16.mxu1 %v16245_v36  ;;  %v18714_v17 = vadd.f32 %v9700_v10, %v9658_v7  ;;  %v218_v28 = vld [vmem:[#allocation5 + $0xe8] sm:$0xff] }
 0x1ec   :  { %9995 = vmatprep.mubr.bf16.mxu0 %v18598_v58  ;;  %10038 = vmatprep.mubr.bf16.mxu1 %v18600_v63  ;;  %v342_v31 = vld [vmem:[#allocation5 + $0x4c8] sm:$0xff]  ;;  %v16093_v44 = vcombine.high %v214_v26, %v218_v28 }
 0x1ed   :  { %v346_v36 = vld [vmem:[#allocation5 + $0x4e8] sm:$0xff] }
 0x1ee   :  { %9966 = vmatpush1.bf16.msra.mxu0 %v16116_v47  ;;  %10009 = vmatpush1.bf16.msra.mxu1 %v16244_v52  ;;  %v16221_v38 = vcombine.high %v342_v31, %v346_v36  ;;  %v334_v40 = vld [vmem:[#allocation5 + $0x488] sm:$0xff]  ;;  %v16092_v47 = vcombine.low %v214_v26, %v218_v28  ;;  %v16220_v52 = vcombine.low %v342_v31, %v346_v36 }
 0x1ef   :  { %9967 = vmatprep.subr.bf16.mxu0 %v16109_v51  ;;  %10010 = vmatprep.subr.bf16.mxu1 %v16237_v0  ;;  %v338_v43 = vld [vmem:[#allocation5 + $0x4a8] sm:$0xff]  ;;  %v16085_v51 = vcombine.high %v206_v39, %v210_v46 }
 0x1f0   :  { %v16213_v0 = vcombine.high %v334_v40, %v338_v43  ;;  %v198_v32 = vld [vmem:[#allocation5 + $0x48] sm:$0xff]  ;;  %v16212_v61 = vcombine.low %v334_v40, %v338_v43 }
 0x1f1   :  { %v202_v1 = vld [vmem:[#allocation5 + $0x68] sm:$0xff] }
 0x1f2   :  { %9968 = vmatpush1.bf16.msra.mxu0 %v16108_v9  ;;  %10011 = vmatpush1.bf16.msra.mxu1 %v16236_v12  ;;  %v326_v3 = vld [vmem:[#allocation5 + $0x448] sm:$0xff]  ;;  %v16077_v9 = vcombine.high %v198_v32, %v202_v1  ;;  %v16076_v28 = vcombine.low %v198_v32, %v202_v1 }
 0x1f3   :  { %9969 = vmatprep.subr.bf16.mxu0 %v16101_v14  ;;  %10012 = vmatprep.subr.bf16.mxu1 %v16229_v22  ;;  %v330_v7 = vld [vmem:[#allocation5 + $0x468] sm:$0xff] }
 0x1f4   :  { %v16205_v10 = vcombine.high %v326_v3, %v330_v7  ;;  %v190_v12 = vld [vmem:[#allocation5 + $0x8] sm:$0xff]  ;;  %v16204_v31 = vcombine.low %v326_v3, %v330_v7 }
 0x1f5   :  { %v194_v14 = vld [vmem:[#allocation5 + $0x28] sm:$0xff] }
 0x1f6   :  { %9970 = vmatpush1.bf16.msra.mxu0 %v16100_v41  ;;  %10013 = vmatpush1.bf16.msra.mxu1 %v16228_v55  ;;  %v318_v22 = vld [vmem:[#allocation5 + $0x408] sm:$0xff]  ;;  %v16069_v36 = vcombine.high %v190_v12, %v194_v14  ;;  %v16068_v46 = vcombine.low %v190_v12, %v194_v14 }
 0x1f7   :  { %9971 = vmatprep.subr.bf16.mxu0 %v16093_v44  ;;  %10014 = vmatprep.subr.bf16.mxu1 %v16221_v38  ;;  %v322_v26 = vld [vmem:[#allocation5 + $0x428] sm:$0xff] }
 0x1f8   :  { %v16197_v41 = vcombine.high %v318_v22, %v322_v26  ;;  %v310_v55 = vld [vmem:[#allocation5 + $0x3c8] sm:$0xff]  ;;  %v16196_v40 = vcombine.low %v318_v22, %v322_v26 }
 0x1f9   :  { %v314_v44 = vld [vmem:[#allocation5 + $0x3e8] sm:$0xff] }
 0x1fa   :  { %9972 = vmatpush1.bf16.msra.mxu0 %v16092_v47  ;;  %10015 = vmatpush1.bf16.msra.mxu1 %v16220_v52  ;;  %v438_v38 = vld [vmem:[#allocation5 + $0x7c8] sm:$0xff]  ;;  %v16189_v43 = vcombine.high %v310_v55, %v314_v44  ;;  %v16188_v1 = vcombine.low %v310_v55, %v314_v44 }
 0x1fb   :  { %9973 = vmatprep.subr.bf16.mxu0 %v16085_v51  ;;  %10016 = vmatprep.subr.bf16.mxu1 %v16213_v0  ;;  %v442_v39 = vld [vmem:[#allocation5 + $0x7e8] sm:$0xff] }
 0x1fc   :  { %v16317_v47 = vcombine.high %v438_v38, %v442_v39  ;;  %v302_v52 = vld [vmem:[#allocation5 + $0x388] sm:$0xff]  ;;  %v16316_v3 = vcombine.low %v438_v38, %v442_v39 }
 0x1fd   :  { %v306_v51 = vld [vmem:[#allocation5 + $0x3a8] sm:$0xff] }
 0x1fe   :  { %9974 = vmatpush1.bf16.msra.mxu0 %v16084_v5  ;;  %10017 = vmatpush1.bf16.msra.mxu1 %v16212_v61  ;;  %v430_v0 = vld [vmem:[#allocation5 + $0x788] sm:$0xff]  ;;  %v16181_v7 = vcombine.high %v302_v52, %v306_v51  ;;  %v16180_v14 = vcombine.low %v302_v52, %v306_v51 }
 0x1ff   :  { %9975 = vmatprep.subr.bf16.mxu0 %v16077_v9  ;;  %10018 = vmatprep.subr.bf16.mxu1 %v16205_v10  ;;  %v434_v32 = vld [vmem:[#allocation5 + $0x7a8] sm:$0xff] }
 0x200   :  { %v16309_v5 = vcombine.high %v430_v0, %v434_v32  ;;  %v294_v61 = vld [vmem:[#allocation5 + $0x348] sm:$0xff]  ;;  %v16308_v22 = vcombine.low %v430_v0, %v434_v32 }
 0x201   :  { %v298_v9 = vld [vmem:[#allocation5 + $0x368] sm:$0xff] }
 0x202   :  { %9976 = vmatpush1.bf16.msra.mxu0 %v16076_v28  ;;  %10019 = vmatpush1.bf16.msra.mxu1 %v16204_v31  ;;  %v422_v10 = vld [vmem:[#allocation5 + $0x748] sm:$0xff]  ;;  %v16173_v26 = vcombine.high %v294_v61, %v298_v9  ;;  %v16172_v44 = vcombine.low %v294_v61, %v298_v9 }
 0x203   :  { %9977 = vmatprep.subr.bf16.mxu0 %v16069_v36  ;;  %10020 = vmatprep.subr.bf16.mxu1 %v16197_v41  ;;  %v426_v12 = vld [vmem:[#allocation5 + $0x768] sm:$0xff] }
 0x204   :  { %v16301_v28 = vcombine.high %v422_v10, %v426_v12  ;;  %v286_v31 = vld [vmem:[#allocation5 + $0x308] sm:$0xff]  ;;  %v16300_v38 = vcombine.low %v422_v10, %v426_v12 }
 0x205   :  { %v290_v36 = vld [vmem:[#allocation5 + $0x328] sm:$0xff] }
 0x206   :  { %9978 = vmatpush1.bf16.msra.mxu0 %v16068_v46  ;;  %10021 = vmatpush1.bf16.msra.mxu1 %v16196_v40  ;;  %v414_v41 = vld [vmem:[#allocation5 + $0x708] sm:$0xff]  ;;  %v16165_v39 = vcombine.high %v286_v31, %v290_v36  ;;  %v16164_v51 = vcombine.low %v286_v31, %v290_v36 }
 0x207   :  { %9979 = vmatprep.subr.bf16.mxu0 %v16189_v43  ;;  %10022 = vmatprep.subr.bf16.mxu1 %v16317_v47  ;;  %v418_v55 = vld [vmem:[#allocation5 + $0x728] sm:$0xff] }
 0x208   :  { %v16293_v46 = vcombine.high %v414_v41, %v418_v55  ;;  %v278_v40 = vld [vmem:[#allocation5 + $0x2c8] sm:$0xff]  ;;  %v16292_v0 = vcombine.low %v414_v41, %v418_v55 }
 0x209   :  { %v282_v43 = vld [vmem:[#allocation5 + $0x2e8] sm:$0xff] }
 0x20a   :  { %9980 = vmatpush2.bf16.msra.mxu0 %v16188_v1  ;;  %10023 = vmatpush2.bf16.msra.mxu1 %v16316_v3  ;;  %v406_v47 = vld [vmem:[#allocation5 + $0x6c8] sm:$0xff]  ;;  %v16157_v32 = vcombine.high %v278_v40, %v282_v43  ;;  %v16156_v9 = vcombine.low %v278_v40, %v282_v43 }
 0x20b   :  { %9981 = vmatprep.subr.bf16.mxu0 %v16181_v7  ;;  %10024 = vmatprep.subr.bf16.mxu1 %v16309_v5  ;;  %v410_v52 = vld [vmem:[#allocation5 + $0x6e8] sm:$0xff] }
 0x20c   :  { %v16285_v1 = vcombine.high %v406_v47, %v410_v52  ;;  %v270_v3 = vld [vmem:[#allocation5 + $0x288] sm:$0xff]  ;;  %v16284_v10 = vcombine.low %v406_v47, %v410_v52 }
 0x20d   :  { %v274_v7 = vld [vmem:[#allocation5 + $0x2a8] sm:$0xff] }
 0x20e   :  { %9982 = vmatpush2.bf16.msra.mxu0 %v16180_v14  ;;  %10025 = vmatpush2.bf16.msra.mxu1 %v16308_v22  ;;  %v398_v5 = vld [vmem:[#allocation5 + $0x688] sm:$0xff]  ;;  %v16149_v12 = vcombine.high %v270_v3, %v274_v7  ;;  %v16148_v36 = vcombine.low %v270_v3, %v274_v7 }
 0x20f   :  { %9983 = vmatprep.subr.bf16.mxu0 %v16173_v26  ;;  %10026 = vmatprep.subr.bf16.mxu1 %v16301_v28  ;;  %v402_v61 = vld [vmem:[#allocation5 + $0x6a8] sm:$0xff] }
 0x210   :  { %v16277_v14 = vcombine.high %v398_v5, %v402_v61  ;;  %v262_v22 = vld [vmem:[#allocation5 + $0x248] sm:$0xff]  ;;  %v16276_v41 = vcombine.low %v398_v5, %v402_v61 }
 0x211   :  { %v266_v26 = vld [vmem:[#allocation5 + $0x268] sm:$0xff] }
 0x212   :  { %9984 = vmatpush2.bf16.msra.mxu0 %v16172_v44  ;;  %10027 = vmatpush2.bf16.msra.mxu1 %v16300_v38  ;;  %v390_v28 = vld [vmem:[#allocation5 + $0x648] sm:$0xff]  ;;  %v16141_v55 = vcombine.high %v262_v22, %v266_v26  ;;  %v16140_v43 = vcombine.low %v262_v22, %v266_v26 }
 0x213   :  { %9985 = vmatprep.subr.bf16.mxu0 %v16165_v39  ;;  %10028 = vmatprep.subr.bf16.mxu1 %v16293_v46  ;;  %v394_v31 = vld [vmem:[#allocation5 + $0x668] sm:$0xff] }
 0x214   :  { %v16269_v44 = vcombine.high %v390_v28, %v394_v31  ;;  %v254_v38 = vld [vmem:[#allocation5 + $0x208] sm:$0xff]  ;;  %v16268_v47 = vcombine.low %v390_v28, %v394_v31  ;;  %v18716_v28 = vpop.f32.mrf.mxu0 }
 0x215   :  { %v258_v39 = vld [vmem:[#allocation5 + $0x228] sm:$0xff]  ;;  %19302 = vst [vmem:[#allocation24_spill] sm:$0xff] %v18716_v28 }
 0x216   :  { %9986 = vmatpush2.bf16.msra.mxu0 %v16164_v51  ;;  %10029 = vmatpush2.bf16.msra.mxu1 %v16292_v0  ;;  %v382_v46 = vld [vmem:[#allocation5 + $0x608] sm:$0xff]  ;;  %v16133_v52 = vcombine.high %v254_v38, %v258_v39  ;;  %v16132_v7 = vcombine.low %v254_v38, %v258_v39 }
 0x217   :  { %9987 = vmatprep.subr.bf16.mxu0 %v16157_v32  ;;  %10030 = vmatprep.subr.bf16.mxu1 %v16285_v1  ;;  %v386_v40 = vld [vmem:[#allocation5 + $0x628] sm:$0xff] }
 0x218   :  { %v16261_v51 = vcombine.high %v382_v46, %v386_v40  ;;  %v502_v0 = vld [vmem:[#allocation5 + $0x9c8] sm:$0xff]  ;;  %v16260_v5 = vcombine.low %v382_v46, %v386_v40 }
 0x219   :  { %v506_v32 = vld [vmem:[#allocation5 + $0x9e8] sm:$0xff] }
 0x21a   :  { %9988 = vmatpush2.bf16.msra.mxu0 %v16156_v9  ;;  %10031 = vmatpush2.bf16.msra.mxu1 %v16284_v10  ;;  %v630_v1 = vld [vmem:[#allocation5 + $0xdc8] sm:$0xff]  ;;  %v16381_v61 = vcombine.high %v502_v0, %v506_v32  ;;  %v16380_v26 = vcombine.low %v502_v0, %v506_v32 }
 0x21b   :  { %9989 = vmatprep.subr.bf16.mxu0 %v16149_v12  ;;  %10032 = vmatprep.subr.bf16.mxu1 %v16277_v14  ;;  %v634_v3 = vld [vmem:[#allocation5 + $0xde8] sm:$0xff] }
 0x21c   :  { %v16509_v9 = vcombine.high %v630_v1, %v634_v3  ;;  %v494_v10 = vld [vmem:[#allocation5 + $0x988] sm:$0xff]  ;;  %v16508_v31 = vcombine.low %v630_v1, %v634_v3 }
 0x21d   :  { %v498_v12 = vld [vmem:[#allocation5 + $0x9a8] sm:$0xff] }
 0x21e   :  { %9990 = vmatpush2.bf16.msra.mxu0 %v16148_v36  ;;  %10033 = vmatpush2.bf16.msra.mxu1 %v16276_v41  ;;  %v622_v14 = vld [vmem:[#allocation5 + $0xd88] sm:$0xff]  ;;  %v16373_v36 = vcombine.high %v494_v10, %v498_v12  ;;  %v18718_v41 = vpop.f32.mrf.mxu1 }
 0x21f   :  { %9991 = vmatprep.subr.bf16.mxu0 %v16141_v55  ;;  %10034 = vmatprep.subr.bf16.mxu1 %v16269_v44  ;;  %v626_v22 = vld [vmem:[#allocation5 + $0xda8] sm:$0xff]  ;;  %19303 = vst [vmem:[#allocation25_spill] sm:$0xff] %v18718_v41 }
 0x220   :  { %v16501_v55 = vcombine.high %v622_v14, %v626_v22  ;;  %v486_v44 = vld [vmem:[#allocation5 + $0x948] sm:$0xff]  ;;  %v16500_v0 = vcombine.low %v622_v14, %v626_v22 }
 0x221   :  { %v490_v38 = vld [vmem:[#allocation5 + $0x968] sm:$0xff] }
 0x222   :  { %9992 = vmatpush2.bf16.msra.mxu0 %v16140_v43  ;;  %10035 = vmatpush2.bf16.msra.mxu1 %v16268_v47  ;;  %v614_v46 = vld [vmem:[#allocation5 + $0xd48] sm:$0xff]  ;;  %v16365_v32 = vcombine.high %v486_v44, %v490_v38 }
 0x223   :  { %9993 = vmatprep.subr.bf16.mxu0 %v16133_v52  ;;  %10036 = vmatprep.subr.bf16.mxu1 %v16261_v51  ;;  %v618_v40 = vld [vmem:[#allocation5 + $0xd68] sm:$0xff]  ;;  %v16372_v52 = vcombine.low %v494_v10, %v498_v12  ;;  %v16364_v12 = vcombine.low %v486_v44, %v490_v38 }
 0x224   :  { %v9782_v47 = vpop.f32.mrf.mxu1  ;;  %v16492_v22 = vcombine.low %v614_v46, %v618_v40  ;;  %v462_v38 = vld [vmem:[#allocation5 + $0x888] sm:$0xff] }
 0x225   :  { %v1506_v57 = vld [vmem:[#allocation5 + $0x2928] sm:$0xff] }
 0x226   :  { %9994 = vmatpush2.bf16.msra.mxu0 %v16132_v7  ;;  %10037 = vmatpush2.bf16.msra.mxu1 %v16260_v5  ;;  %v9739_v39 = vpop.f32.mrf.mxu0  ;;  %v18727_v3 = vpop.f32.mrf.mxu1  ;;  %v16493_v7 = vcombine.high %v614_v46, %v618_v40  ;;  %v478_v5 = vld [vmem:[#allocation5 + $0x908] sm:$0xff] }
 0x227   :  { %10049 = vmatprep.subr.bf16.mxu0 %v16381_v61  ;;  %10092 = vmatprep.subr.bf16.mxu1 %v16509_v9  ;;  %v9740_v43 = vadd.f32 %v9739_v39, %v18707_v56  ;;  %19305 = vst [vmem:[#allocation27_spill] sm:$0xff] %v18727_v3  ;;  %v482_v61 = vld [vmem:[#allocation5 + $0x928] sm:$0xff] }
 0x228   :  { %v18723_v51 = vpop.f32.mrf.mxu0  ;;  %v606_v9 = vld [vmem:[#allocation5 + $0xd08] sm:$0xff]  ;;  %v9786_v14 = vpop.f32.mrf.mxu1  ;;  %v16356_v2 = vcombine.low %v478_v5, %v482_v61 }
 0x229   :  { %9996 = vmatmul.mubr.bf16.vlgmr.msra.gmra.mxu0 %v18604_v21  ;;  %10039 = vmatmul.mubr.bf16.vlgmr.msra.gmra.mxu1 %v18606_v25  ;;  %19304 = vst [vmem:[#allocation26_spill] sm:$0xff] %v18723_v51  ;;  %v18725_v1 = vadd.f32 %v9782_v47, %v9740_v43  ;;  %v470_v39 = vld [vmem:[#allocation5 + $0x8c8] sm:$0xff] }
 0x22a   :  { %10050 = vmatpush1.bf16.msra.mxu0 %v16380_v26  ;;  %10093 = vmatpush1.bf16.msra.mxu1 %v16508_v31  ;;  %v9743_v56 = vpop.f32.mrf.mxu0  ;;  %v610_v26 = vld [vmem:[#allocation5 + $0xd28] sm:$0xff]  ;;  %v16357_v31 = vcombine.high %v478_v5, %v482_v61 }
 0x22b   :  { %10051 = vmatprep.subr.bf16.mxu0 %v16373_v36  ;;  %10094 = vmatprep.subr.bf16.mxu1 %v16501_v55  ;;  %v9744_v10 = vadd.f32 %v9743_v56, %v18714_v17  ;;  %v16485_v55 = vcombine.high %v606_v9, %v610_v26  ;;  %v474_v43 = vld [vmem:[#allocation5 + $0x8e8] sm:$0xff]  ;;  %v16484_v17 = vcombine.low %v606_v9, %v610_v26 }
 0x22c   :  { %10081 = vmatprep.mubr.bf16.mxu0 %v18608_v34  ;;  %10124 = vmatprep.mubr.bf16.mxu1 %v18611_v37  ;;  %v598_v47 = vld [vmem:[#allocation5 + $0xcc8] sm:$0xff] }
 0x22d   :  { %v18732_v36 = vadd.f32 %v9786_v14, %v9744_v10  ;;  %v16477_v44 = vcombine.high %v598_v47, %v602_v53  ;;  %v590_v46 = vld [vmem:[#allocation5 + $0xc88] sm:$0xff] }
 0x22e   :  { %10052 = vmatpush1.bf16.msra.mxu0 %v16372_v52  ;;  %10095 = vmatpush1.bf16.msra.mxu1 %v16500_v0  ;;  %v16349_v52 = vcombine.high %v470_v39, %v474_v43  ;;  %v466_v0 = vld [vmem:[#allocation5 + $0x8a8] sm:$0xff] }
 0x22f   :  { %10053 = vmatprep.subr.bf16.mxu0 %v16365_v32  ;;  %10096 = vmatprep.subr.bf16.mxu1 %v16493_v7  ;;  %v594_v40 = vld [vmem:[#allocation5 + $0xca8] sm:$0xff]  ;;  %v16348_v32 = vcombine.low %v470_v39, %v474_v43  ;;  %v16476_v7 = vcombine.low %v598_v47, %v602_v53  ;;  %v16341_v56 = vcombine.high %v462_v38, %v466_v0 }
 0x230   :  { %v16469_v10 = vcombine.high %v590_v46, %v594_v40  ;;  %v458_v5 = vld [vmem:[#allocation5 + $0x868] sm:$0xff]  ;;  %v16340_v9 = vcombine.low %v462_v38, %v466_v0  ;;  %v16468_v26 = vcombine.low %v590_v46, %v594_v40 }
 0x231   :  { %v582_v61 = vld [vmem:[#allocation5 + $0xc48] sm:$0xff] }
 0x232   :  { %10054 = vmatpush1.bf16.msra.mxu0 %v16364_v12  ;;  %10097 = vmatpush1.bf16.msra.mxu1 %v16492_v22  ;;  %v454_v12 = vld [vmem:[#allocation5 + $0x848] sm:$0xff] }
 0x233   :  { %10055 = vmatprep.subr.bf16.mxu0 %v16357_v31  ;;  %10098 = vmatprep.subr.bf16.mxu1 %v16485_v55  ;;  %v586_v14 = vld [vmem:[#allocation5 + $0xc68] sm:$0xff]  ;;  %v16333_v22 = vcombine.high %v454_v12, %v458_v5  ;;  %v16332_v53 = vcombine.low %v454_v12, %v458_v5 }
 0x234   :  { %v16461_v31 = vcombine.high %v582_v61, %v586_v14  ;;  %v450_v55 = vld [vmem:[#allocation5 + $0x828] sm:$0xff]  ;;  %v16460_v47 = vcombine.low %v582_v61, %v586_v14 }
 0x235   :  { %v574_v39 = vld [vmem:[#allocation5 + $0xc08] sm:$0xff] }
 0x236   :  { %10056 = vmatpush1.bf16.msra.mxu0 %v16356_v2  ;;  %10099 = vmatpush1.bf16.msra.mxu1 %v16484_v17  ;;  %v446_v2 = vld [vmem:[#allocation5 + $0x808] sm:$0xff] }
 0x237   :  { %10057 = vmatprep.subr.bf16.mxu0 %v16349_v52  ;;  %10100 = vmatprep.subr.bf16.mxu1 %v16477_v44  ;;  %v578_v43 = vld [vmem:[#allocation5 + $0xc28] sm:$0xff]  ;;  %v16325_v17 = vcombine.high %v446_v2, %v450_v55  ;;  %v16324_v46 = vcombine.low %v446_v2, %v450_v55 }
 0x238   :  { %v16453_v52 = vcombine.high %v574_v39, %v578_v43  ;;  %v566_v44 = vld [vmem:[#allocation5 + $0xbc8] sm:$0xff]  ;;  %v16452_v40 = vcombine.low %v574_v39, %v578_v43 }
 0x239   :  { %v570_v38 = vld [vmem:[#allocation5 + $0xbe8] sm:$0xff] }
 0x23a   :  { %10058 = vmatpush1.bf16.msra.mxu0 %v16348_v32  ;;  %10101 = vmatpush1.bf16.msra.mxu1 %v16476_v7  ;;  %v694_v0 = vld [vmem:[#allocation5 + $0xfc8] sm:$0xff]  ;;  %v16445_v7 = vcombine.high %v566_v44, %v570_v38  ;;  %v16444_v61 = vcombine.low %v566_v44, %v570_v38 }
 0x23b   :  { %10059 = vmatprep.subr.bf16.mxu0 %v16341_v56  ;;  %10102 = vmatprep.subr.bf16.mxu1 %v16469_v10  ;;  %v698_v32 = vld [vmem:[#allocation5 + $0xfe8] sm:$0xff] }
 0x23c   :  { %v16573_v56 = vcombine.high %v694_v0, %v698_v32  ;;  %v558_v10 = vld [vmem:[#allocation5 + $0xb88] sm:$0xff]  ;;  %v16572_v14 = vcombine.low %v694_v0, %v698_v32 }
 0x23d   :  { %v562_v12 = vld [vmem:[#allocation5 + $0xba8] sm:$0xff] }
 0x23e   :  { %10060 = vmatpush1.bf16.msra.mxu0 %v16340_v9  ;;  %10103 = vmatpush1.bf16.msra.mxu1 %v16468_v26  ;;  %v686_v5 = vld [vmem:[#allocation5 + $0xf88] sm:$0xff]  ;;  %v16437_v26 = vcombine.high %v558_v10, %v562_v12  ;;  %v16436_v39 = vcombine.low %v558_v10, %v562_v12 }
 0x23f   :  { %10061 = vmatprep.subr.bf16.mxu0 %v16333_v22  ;;  %10104 = vmatprep.subr.bf16.mxu1 %v16461_v31  ;;  %v690_v9 = vld [vmem:[#allocation5 + $0xfa8] sm:$0xff] }
 0x240   :  { %v16565_v22 = vcombine.high %v686_v5, %v690_v9  ;;  %v550_v31 = vld [vmem:[#allocation5 + $0xb48] sm:$0xff]  ;;  %v16564_v43 = vcombine.low %v686_v5, %v690_v9 }
 0x241   :  { %v554_v2 = vld [vmem:[#allocation5 + $0xb68] sm:$0xff] }
 0x242   :  { %10062 = vmatpush1.bf16.msra.mxu0 %v16332_v53  ;;  %10105 = vmatpush1.bf16.msra.mxu1 %v16460_v47  ;;  %v678_v55 = vld [vmem:[#allocation5 + $0xf48] sm:$0xff]  ;;  %v16429_v47 = vcombine.high %v550_v31, %v554_v2  ;;  %v16428_v0 = vcombine.low %v550_v31, %v554_v2 }
 0x243   :  { %10063 = vmatprep.subr.bf16.mxu0 %v16325_v17  ;;  %10106 = vmatprep.subr.bf16.mxu1 %v16453_v52  ;;  %v682_v53 = vld [vmem:[#allocation5 + $0xf68] sm:$0xff] }
 0x244   :  { %v16557_v17 = vcombine.high %v678_v55, %v682_v53  ;;  %v542_v52 = vld [vmem:[#allocation5 + $0xb08] sm:$0xff]  ;;  %v16556_v32 = vcombine.low %v678_v55, %v682_v53 }
 0x245   :  { %v546_v44 = vld [vmem:[#allocation5 + $0xb28] sm:$0xff] }
 0x246   :  { %10064 = vmatpush1.bf16.msra.mxu0 %v16324_v46  ;;  %10107 = vmatpush1.bf16.msra.mxu1 %v16452_v40  ;;  %v670_v38 = vld [vmem:[#allocation5 + $0xf08] sm:$0xff]  ;;  %v16421_v40 = vcombine.high %v542_v52, %v546_v44  ;;  %v16420_v5 = vcombine.low %v542_v52, %v546_v44 }
 0x247   :  { %10065 = vmatprep.subr.bf16.mxu0 %v16445_v7  ;;  %10108 = vmatprep.subr.bf16.mxu1 %v16573_v56  ;;  %v674_v46 = vld [vmem:[#allocation5 + $0xf28] sm:$0xff] }
 0x248   :  { %v16549_v7 = vcombine.high %v670_v38, %v674_v46  ;;  %v534_v56 = vld [vmem:[#allocation5 + $0xac8] sm:$0xff]  ;;  %v16548_v9 = vcombine.low %v670_v38, %v674_v46 }
 0x249   :  { %v538_v10 = vld [vmem:[#allocation5 + $0xae8] sm:$0xff] }
 0x24a   :  { %10066 = vmatpush2.bf16.msra.mxu0 %v16444_v61  ;;  %10109 = vmatpush2.bf16.msra.mxu1 %v16572_v14  ;;  %v662_v12 = vld [vmem:[#allocation5 + $0xec8] sm:$0xff]  ;;  %v16413_v14 = vcombine.high %v534_v56, %v538_v10  ;;  %v16412_v55 = vcombine.low %v534_v56, %v538_v10 }
 0x24b   :  { %10067 = vmatprep.subr.bf16.mxu0 %v16437_v26  ;;  %10110 = vmatprep.subr.bf16.mxu1 %v16565_v22  ;;  %v666_v61 = vld [vmem:[#allocation5 + $0xee8] sm:$0xff] }
 0x24c   :  { %v16541_v26 = vcombine.high %v662_v12, %v666_v61  ;;  %v526_v22 = vld [vmem:[#allocation5 + $0xa88] sm:$0xff]  ;;  %v16540_v53 = vcombine.low %v662_v12, %v666_v61 }
 0x24d   :  { %v530_v31 = vld [vmem:[#allocation5 + $0xaa8] sm:$0xff] }
 0x24e   :  { %10068 = vmatpush2.bf16.msra.mxu0 %v16436_v39  ;;  %10111 = vmatpush2.bf16.msra.mxu1 %v16564_v43  ;;  %v654_v2 = vld [vmem:[#allocation5 + $0xe88] sm:$0xff]  ;;  %v16405_v43 = vcombine.high %v526_v22, %v530_v31  ;;  %v16404_v38 = vcombine.low %v526_v22, %v530_v31 }
 0x24f   :  { %10069 = vmatprep.subr.bf16.mxu0 %v16429_v47  ;;  %10112 = vmatprep.subr.bf16.mxu1 %v16557_v17  ;;  %v658_v39 = vld [vmem:[#allocation5 + $0xea8] sm:$0xff] }
 0x250   :  { %v16533_v47 = vcombine.high %v654_v2, %v658_v39  ;;  %v518_v17 = vld [vmem:[#allocation5 + $0xa48] sm:$0xff]  ;;  %v16532_v46 = vcombine.low %v654_v2, %v658_v39 }
 0x251   :  { %v522_v52 = vld [vmem:[#allocation5 + $0xa68] sm:$0xff] }
 0x252   :  { %10070 = vmatpush2.bf16.msra.mxu0 %v16428_v0  ;;  %10113 = vmatpush2.bf16.msra.mxu1 %v16556_v32  ;;  %v646_v44 = vld [vmem:[#allocation5 + $0xe48] sm:$0xff]  ;;  %v16397_v32 = vcombine.high %v518_v17, %v522_v52  ;;  %v16396_v12 = vcombine.low %v518_v17, %v522_v52 }
 0x253   :  { %10071 = vmatprep.subr.bf16.mxu0 %v16421_v40  ;;  %10114 = vmatprep.subr.bf16.mxu1 %v16549_v7  ;;  %v650_v0 = vld [vmem:[#allocation5 + $0xe68] sm:$0xff] }
 0x254   :  { %v16525_v40 = vcombine.high %v646_v44, %v650_v0  ;;  %v510_v7 = vld [vmem:[#allocation5 + $0xa08] sm:$0xff]  ;;  %v16524_v61 = vcombine.low %v646_v44, %v650_v0  ;;  %v18734_v0 = vpop.f32.mrf.mxu0 }
 0x255   :  { %v514_v56 = vld [vmem:[#allocation5 + $0xa28] sm:$0xff]  ;;  %19306 = vst [vmem:[#allocation28_spill] sm:$0xff] %v18734_v0 }
 0x256   :  { %10072 = vmatpush2.bf16.msra.mxu0 %v16420_v5  ;;  %10115 = vmatpush2.bf16.msra.mxu1 %v16548_v9  ;;  %v638_v10 = vld [vmem:[#allocation5 + $0xe08] sm:$0xff]  ;;  %v16389_v9 = vcombine.high %v510_v7, %v514_v56  ;;  %v16388_v2 = vcombine.low %v510_v7, %v514_v56 }
 0x257   :  { %10073 = vmatprep.subr.bf16.mxu0 %v16413_v14  ;;  %10116 = vmatprep.subr.bf16.mxu1 %v16541_v26  ;;  %v642_v5 = vld [vmem:[#allocation5 + $0xe28] sm:$0xff] }
 0x258   :  { %v16517_v14 = vcombine.high %v638_v10, %v642_v5  ;;  %v758_v26 = vld [vmem:[#allocation5 + $0x11c8] sm:$0xff]  ;;  %v16516_v39 = vcombine.low %v638_v10, %v642_v5 }
 0x259   :  { %v762_v22 = vld [vmem:[#allocation5 + $0x11e8] sm:$0xff] }
 0x25a   :  { %10074 = vmatpush2.bf16.msra.mxu0 %v16412_v55  ;;  %10117 = vmatpush2.bf16.msra.mxu1 %v16540_v53  ;;  %v886_v31 = vld [vmem:[#allocation5 + $0x15c8] sm:$0xff]  ;;  %v16637_v53 = vcombine.high %v758_v26, %v762_v22  ;;  %v16636_v44 = vcombine.low %v758_v26, %v762_v22 }
 0x25b   :  { %10075 = vmatprep.subr.bf16.mxu0 %v16405_v43  ;;  %10118 = vmatprep.subr.bf16.mxu1 %v16533_v47  ;;  %v890_v55 = vld [vmem:[#allocation5 + $0x15e8] sm:$0xff] }
 0x25c   :  { %v16765_v43 = vcombine.high %v886_v31, %v890_v55  ;;  %v750_v47 = vld [vmem:[#allocation5 + $0x1188] sm:$0xff] }
 0x25d   :  { %v754_v17 = vld [vmem:[#allocation5 + $0x11a8] sm:$0xff] }
 0x25e   :  { %10076 = vmatpush2.bf16.msra.mxu0 %v16404_v38  ;;  %10119 = vmatpush2.bf16.msra.mxu1 %v16532_v46  ;;  %v878_v52 = vld [vmem:[#allocation5 + $0x1588] sm:$0xff]  ;;  %v16764_v46 = vcombine.low %v886_v31, %v890_v55  ;;  %v16628_v26 = vcombine.low %v750_v47, %v754_v17 }
 0x25f   :  { %10077 = vmatprep.subr.bf16.mxu0 %v16397_v32  ;;  %10120 = vmatprep.subr.bf16.mxu1 %v16525_v40  ;;  %v882_v38 = vld [vmem:[#allocation5 + $0x15a8] sm:$0xff]  ;;  %v16629_v32 = vcombine.high %v750_v47, %v754_v17  ;;  %v18736_v40 = vpop.f32.mrf.mxu1 }
 0x260   :  { %19307 = vst [vmem:[#allocation29_spill] sm:$0xff] %v18736_v40  ;;  %v16757_v7 = vcombine.high %v878_v52, %v882_v38  ;;  %v742_v56 = vld [vmem:[#allocation5 + $0x1148] sm:$0xff]  ;;  %v16756_v31 = vcombine.low %v878_v52, %v882_v38 }
 0x261   :  { %v746_v10 = vld [vmem:[#allocation5 + $0x1168] sm:$0xff] }
 0x262   :  { %10078 = vmatpush2.bf16.msra.mxu0 %v16396_v12  ;;  %10121 = vmatpush2.bf16.msra.mxu1 %v16524_v61  ;;  %v870_v12 = vld [vmem:[#allocation5 + $0x1548] sm:$0xff]  ;;  %v16621_v55 = vcombine.high %v742_v56, %v746_v10  ;;  %v16620_v17 = vcombine.low %v742_v56, %v746_v10 }
 0x263   :  { %10079 = vmatprep.subr.bf16.mxu0 %v16389_v9  ;;  %10122 = vmatprep.subr.bf16.mxu1 %v16517_v14  ;;  %v874_v61 = vld [vmem:[#allocation5 + $0x1568] sm:$0xff] }
 0x264   :  { %v738_v3 = vld [vmem:[#allocation5 + $0x1128] sm:$0xff]  ;;  %v16748_v38 = vcombine.low %v870_v12, %v874_v61 }
 0x265   :  { %v718_v10 = vld [vmem:[#allocation5 + $0x1088] sm:$0xff] }
 0x266   :  { %10080 = vmatpush2.bf16.msra.mxu0 %v16388_v2  ;;  %10123 = vmatpush2.bf16.msra.mxu1 %v16516_v39  ;;  %v1622_v41 = vld [vmem:[#allocation5 + $0x2cc8] sm:$0xff] }
 0x267   :  { %10135 = vmatprep.subr.bf16.mxu0 %v16637_v53  ;;  %10178 = vmatprep.subr.bf16.mxu1 %v16765_v43  ;;  %v9868_v14 = vpop.f32.mrf.mxu1  ;;  %v16749_v53 = vcombine.high %v870_v12, %v874_v61  ;;  %v734_v43 = vld [vmem:[#allocation5 + $0x1108] sm:$0xff] }
 0x268   :  { %v16612_v40 = vcombine.low %v734_v43, %v738_v3  ;;  %v846_v12 = vld [vmem:[#allocation5 + $0x1488] sm:$0xff] }
 0x269   :  { %v9825_v5 = vpop.f32.mrf.mxu0  ;;  %10082 = vmatmul.mubr.bf16.vlgmr.msra.gmra.mxu0 %v18616_v48  ;;  %10125 = vmatmul.mubr.bf16.vlgmr.msra.gmra.mxu1 %v18618_v49  ;;  %v18745_v39 = vpop.f32.mrf.mxu1  ;;  %v850_v61 = vld [vmem:[#allocation5 + $0x14a8] sm:$0xff] }
 0x26a   :  { %v9826_v9 = vadd.f32 %v9825_v5, %v18725_v1  ;;  %10136 = vmatpush1.bf16.msra.mxu0 %v16636_v44  ;;  %10179 = vmatpush1.bf16.msra.mxu1 %v16764_v46  ;;  %19309 = vst [vmem:[#allocation31_spill] sm:$0xff] %v18745_v39  ;;  %v862_v5 = vld [vmem:[#allocation5 + $0x1508] sm:$0xff]  ;;  %v16613_v46 = vcombine.high %v734_v43, %v738_v3 }
 0x26b   :  { %v18741_v22 = vpop.f32.mrf.mxu0  ;;  %10137 = vmatprep.subr.bf16.mxu0 %v16629_v32  ;;  %10180 = vmatprep.subr.bf16.mxu1 %v16757_v7  ;;  %v866_v44 = vld [vmem:[#allocation5 + $0x1528] sm:$0xff]  ;;  %v9872_v52 = vpop.f32.mrf.mxu1 }
 0x26c   :  { %19308 = vst [vmem:[#allocation30_spill] sm:$0xff] %v18741_v22  ;;  %v18743_v2 = vadd.f32 %v9868_v14, %v9826_v9  ;;  %10167 = vmatprep.mubr.bf16.mxu0 %v18620_v59  ;;  %10210 = vmatprep.mubr.bf16.mxu1 %v18623_v62  ;;  %v16741_v7 = vcombine.high %v862_v5, %v866_v44  ;;  %v726_v9 = vld [vmem:[#allocation5 + $0x10c8] sm:$0xff] }
 0x26d   :  { %v9829_v1 = vpop.f32.mrf.mxu0  ;;  %v730_v14 = vld [vmem:[#allocation5 + $0x10e8] sm:$0xff] }
 0x26e   :  { %v9830_v47 = vadd.f32 %v9829_v1, %v18732_v36  ;;  %10138 = vmatpush1.bf16.msra.mxu0 %v16628_v26  ;;  %10181 = vmatpush1.bf16.msra.mxu1 %v16756_v31  ;;  %v854_v39 = vld [vmem:[#allocation5 + $0x14c8] sm:$0xff]  ;;  %v16740_v36 = vcombine.low %v862_v5, %v866_v44  ;;  %v16605_v26 = vcombine.high %v726_v9, %v730_v14 }
 0x26f   :  { %10139 = vmatprep.subr.bf16.mxu0 %v16621_v55  ;;  %10182 = vmatprep.subr.bf16.mxu1 %v16749_v53  ;;  %v858_v22 = vld [vmem:[#allocation5 + $0x14e8] sm:$0xff]  ;;  %v16604_v55 = vcombine.low %v726_v9, %v730_v14  ;;  %v16724_v44 = vcombine.low %v846_v12, %v850_v61 }
 0x270   :  { %v18750_v32 = vadd.f32 %v9872_v52, %v9830_v47  ;;  %v16733_v56 = vcombine.high %v854_v39, %v858_v22  ;;  %v722_v31 = vld [vmem:[#allocation5 + $0x10a8] sm:$0xff]  ;;  %v16732_v53 = vcombine.low %v854_v39, %v858_v22  ;;  %v16725_v47 = vcombine.high %v846_v12, %v850_v61 }
 0x271   :  { %v16597_v1 = vcombine.high %v718_v10, %v722_v31  ;;  %v714_v3 = vld [vmem:[#allocation5 + $0x1068] sm:$0xff]  ;;  %v16596_v5 = vcombine.low %v718_v10, %v722_v31 }
 0x272   :  { %10140 = vmatpush1.bf16.msra.mxu0 %v16620_v17  ;;  %10183 = vmatpush1.bf16.msra.mxu1 %v16748_v38  ;;  %v710_v17 = vld [vmem:[#allocation5 + $0x1048] sm:$0xff] }
 0x273   :  { %10141 = vmatprep.subr.bf16.mxu0 %v16613_v46  ;;  %10184 = vmatprep.subr.bf16.mxu1 %v16741_v7  ;;  %v838_v43 = vld [vmem:[#allocation5 + $0x1448] sm:$0xff]  ;;  %v16589_v38 = vcombine.high %v710_v17, %v714_v3  ;;  %v16588_v22 = vcombine.low %v710_v17, %v714_v3 }
 0x274   :  { %v842_v52 = vld [vmem:[#allocation5 + $0x1468] sm:$0xff] }
 0x275   :  { %v16717_v46 = vcombine.high %v838_v43, %v842_v52  ;;  %v706_v7 = vld [vmem:[#allocation5 + $0x1028] sm:$0xff]  ;;  %v16716_v39 = vcombine.low %v838_v43, %v842_v52 }
 0x276   :  { %10142 = vmatpush1.bf16.msra.mxu0 %v16612_v40  ;;  %10185 = vmatpush1.bf16.msra.mxu1 %v16740_v36  ;;  %v702_v40 = vld [vmem:[#allocation5 + $0x1008] sm:$0xff] }
 0x277   :  { %10143 = vmatprep.subr.bf16.mxu0 %v16605_v26  ;;  %10186 = vmatprep.subr.bf16.mxu1 %v16733_v56  ;;  %v830_v9 = vld [vmem:[#allocation5 + $0x1408] sm:$0xff]  ;;  %v16581_v36 = vcombine.high %v702_v40, %v706_v7  ;;  %v16580_v12 = vcombine.low %v702_v40, %v706_v7 }
 0x278   :  { %v834_v14 = vld [vmem:[#allocation5 + $0x1428] sm:$0xff] }
 0x279   :  { %v16709_v26 = vcombine.high %v830_v9, %v834_v14  ;;  %v822_v56 = vld [vmem:[#allocation5 + $0x13c8] sm:$0xff]  ;;  %v16708_v61 = vcombine.low %v830_v9, %v834_v14 }
 0x27a   :  { %10144 = vmatpush1.bf16.msra.mxu0 %v16604_v55  ;;  %10187 = vmatpush1.bf16.msra.mxu1 %v16732_v53  ;;  %v826_v10 = vld [vmem:[#allocation5 + $0x13e8] sm:$0xff] }
 0x27b   :  { %10145 = vmatprep.subr.bf16.mxu0 %v16597_v1  ;;  %10188 = vmatprep.subr.bf16.mxu1 %v16725_v47  ;;  %v950_v31 = vld [vmem:[#allocation5 + $0x17c8] sm:$0xff]  ;;  %v16701_v53 = vcombine.high %v822_v56, %v826_v10  ;;  %v16700_v43 = vcombine.low %v822_v56, %v826_v10 }
 0x27c   :  { %v954_v55 = vld [vmem:[#allocation5 + $0x17e8] sm:$0xff] }
 0x27d   :  { %v16829_v1 = vcombine.high %v950_v31, %v954_v55  ;;  %v814_v47 = vld [vmem:[#allocation5 + $0x1388] sm:$0xff]  ;;  %v16828_v52 = vcombine.low %v950_v31, %v954_v55 }
 0x27e   :  { %10146 = vmatpush1.bf16.msra.mxu0 %v16596_v5  ;;  %10189 = vmatpush1.bf16.msra.mxu1 %v16724_v44  ;;  %v818_v17 = vld [vmem:[#allocation5 + $0x13a8] sm:$0xff] }
 0x27f   :  { %10147 = vmatprep.subr.bf16.mxu0 %v16589_v38  ;;  %10190 = vmatprep.subr.bf16.mxu1 %v16717_v46  ;;  %v942_v3 = vld [vmem:[#allocation5 + $0x1788] sm:$0xff]  ;;  %v16693_v44 = vcombine.high %v814_v47, %v818_v17  ;;  %v16692_v9 = vcombine.low %v814_v47, %v818_v17 }
 0x280   :  { %v946_v5 = vld [vmem:[#allocation5 + $0x17a8] sm:$0xff] }
 0x281   :  { %v16821_v38 = vcombine.high %v942_v3, %v946_v5  ;;  %v806_v46 = vld [vmem:[#allocation5 + $0x1348] sm:$0xff]  ;;  %v16820_v14 = vcombine.low %v942_v3, %v946_v5 }
 0x282   :  { %10148 = vmatpush1.bf16.msra.mxu0 %v16588_v22  ;;  %10191 = vmatpush1.bf16.msra.mxu1 %v16716_v39  ;;  %v810_v40 = vld [vmem:[#allocation5 + $0x1368] sm:$0xff] }
 0x283   :  { %10149 = vmatprep.subr.bf16.mxu0 %v16581_v36  ;;  %10192 = vmatprep.subr.bf16.mxu1 %v16709_v26  ;;  %v934_v7 = vld [vmem:[#allocation5 + $0x1748] sm:$0xff]  ;;  %v16685_v39 = vcombine.high %v806_v46, %v810_v40  ;;  %v16684_v31 = vcombine.low %v806_v46, %v810_v40 }
 0x284   :  { %v938_v22 = vld [vmem:[#allocation5 + $0x1768] sm:$0xff] }
 0x285   :  { %v16813_v36 = vcombine.high %v934_v7, %v938_v22  ;;  %v798_v26 = vld [vmem:[#allocation5 + $0x1308] sm:$0xff]  ;;  %v16812_v55 = vcombine.low %v934_v7, %v938_v22 }
 0x286   :  { %10150 = vmatpush1.bf16.msra.mxu0 %v16580_v12  ;;  %10193 = vmatpush1.bf16.msra.mxu1 %v16708_v61  ;;  %v802_v56 = vld [vmem:[#allocation5 + $0x1328] sm:$0xff] }
 0x287   :  { %10151 = vmatprep.subr.bf16.mxu0 %v16701_v53  ;;  %10194 = vmatprep.subr.bf16.mxu1 %v16829_v1  ;;  %v926_v10 = vld [vmem:[#allocation5 + $0x1708] sm:$0xff]  ;;  %v16677_v61 = vcombine.high %v798_v26, %v802_v56  ;;  %v16676_v3 = vcombine.low %v798_v26, %v802_v56 }
 0x288   :  { %v930_v12 = vld [vmem:[#allocation5 + $0x1728] sm:$0xff] }
 0x289   :  { %v16805_v53 = vcombine.high %v926_v10, %v930_v12  ;;  %v790_v1 = vld [vmem:[#allocation5 + $0x12c8] sm:$0xff]  ;;  %v16804_v5 = vcombine.low %v926_v10, %v930_v12 }
 0x28a   :  { %10152 = vmatpush2.bf16.msra.mxu0 %v16700_v43  ;;  %10195 = vmatpush2.bf16.msra.mxu1 %v16828_v52  ;;  %v794_v47 = vld [vmem:[#allocation5 + $0x12e8] sm:$0xff] }
 0x28b   :  { %10153 = vmatprep.subr.bf16.mxu0 %v16693_v44  ;;  %10196 = vmatprep.subr.bf16.mxu1 %v16821_v38  ;;  %v918_v17 = vld [vmem:[#allocation5 + $0x16c8] sm:$0xff]  ;;  %v16669_v52 = vcombine.high %v790_v1, %v794_v47  ;;  %v16668_v7 = vcombine.low %v790_v1, %v794_v47 }
 0x28c   :  { %v922_v43 = vld [vmem:[#allocation5 + $0x16e8] sm:$0xff] }
 0x28d   :  { %v16797_v44 = vcombine.high %v918_v17, %v922_v43  ;;  %v782_v38 = vld [vmem:[#allocation5 + $0x1288] sm:$0xff]  ;;  %v16796_v22 = vcombine.low %v918_v17, %v922_v43 }
 0x28e   :  { %10154 = vmatpush2.bf16.msra.mxu0 %v16692_v9  ;;  %10197 = vmatpush2.bf16.msra.mxu1 %v16820_v14  ;;  %v786_v46 = vld [vmem:[#allocation5 + $0x12a8] sm:$0xff] }
 0x28f   :  { %10155 = vmatprep.subr.bf16.mxu0 %v16685_v39  ;;  %10198 = vmatprep.subr.bf16.mxu1 %v16813_v36  ;;  %v910_v40 = vld [vmem:[#allocation5 + $0x1688] sm:$0xff]  ;;  %v16661_v14 = vcombine.high %v782_v38, %v786_v46  ;;  %v16660_v10 = vcombine.low %v782_v38, %v786_v46 }
 0x290   :  { %v914_v9 = vld [vmem:[#allocation5 + $0x16a8] sm:$0xff] }
 0x291   :  { %v16789_v39 = vcombine.high %v910_v40, %v914_v9  ;;  %v774_v36 = vld [vmem:[#allocation5 + $0x1248] sm:$0xff]  ;;  %v16788_v12 = vcombine.low %v910_v40, %v914_v9 }
 0x292   :  { %10156 = vmatpush2.bf16.msra.mxu0 %v16684_v31  ;;  %10199 = vmatpush2.bf16.msra.mxu1 %v16812_v55  ;;  %v778_v26 = vld [vmem:[#allocation5 + $0x1268] sm:$0xff] }
 0x293   :  { %10157 = vmatprep.subr.bf16.mxu0 %v16677_v61  ;;  %10200 = vmatprep.subr.bf16.mxu1 %v16805_v53  ;;  %v902_v56 = vld [vmem:[#allocation5 + $0x1648] sm:$0xff]  ;;  %v16653_v55 = vcombine.high %v774_v36, %v778_v26  ;;  %v16652_v17 = vcombine.low %v774_v36, %v778_v26 }
 0x294   :  { %v906_v31 = vld [vmem:[#allocation5 + $0x1668] sm:$0xff] }
 0x295   :  { %v16781_v61 = vcombine.high %v902_v56, %v906_v31  ;;  %v766_v53 = vld [vmem:[#allocation5 + $0x1208] sm:$0xff]  ;;  %v16780_v43 = vcombine.low %v902_v56, %v906_v31  ;;  %v18752_v31 = vpop.f32.mrf.mxu0 }
 0x296   :  { %10158 = vmatpush2.bf16.msra.mxu0 %v16676_v3  ;;  %10201 = vmatpush2.bf16.msra.mxu1 %v16804_v5  ;;  %v770_v1 = vld [vmem:[#allocation5 + $0x1228] sm:$0xff]  ;;  %19310 = vst [vmem:[#allocation32_spill] sm:$0xff] %v18752_v31 }
 0x297   :  { %10159 = vmatprep.subr.bf16.mxu0 %v16669_v52  ;;  %10202 = vmatprep.subr.bf16.mxu1 %v16797_v44  ;;  %v894_v47 = vld [vmem:[#allocation5 + $0x1608] sm:$0xff]  ;;  %v16645_v5 = vcombine.high %v766_v53, %v770_v1  ;;  %v16644_v40 = vcombine.low %v766_v53, %v770_v1 }
 0x298   :  { %v898_v3 = vld [vmem:[#allocation5 + $0x1628] sm:$0xff] }
 0x299   :  { %v16773_v52 = vcombine.high %v894_v47, %v898_v3  ;;  %v1014_v44 = vld [vmem:[#allocation5 + $0x19c8] sm:$0xff]  ;;  %v16772_v9 = vcombine.low %v894_v47, %v898_v3 }
 0x29a   :  { %10160 = vmatpush2.bf16.msra.mxu0 %v16668_v7  ;;  %10203 = vmatpush2.bf16.msra.mxu1 %v16796_v22  ;;  %v1018_v38 = vld [vmem:[#allocation5 + $0x19e8] sm:$0xff] }
 0x29b   :  { %10161 = vmatprep.subr.bf16.mxu0 %v16661_v14  ;;  %10204 = vmatprep.subr.bf16.mxu1 %v16789_v39  ;;  %v1142_v46 = vld [vmem:[#allocation5 + $0x1dc8] sm:$0xff]  ;;  %v16893_v22 = vcombine.high %v1014_v44, %v1018_v38  ;;  %v16892_v56 = vcombine.low %v1014_v44, %v1018_v38 }
 0x29c   :  { %v1146_v7 = vld [vmem:[#allocation5 + $0x1de8] sm:$0xff] }
 0x29d   :  { %v17021_v14 = vcombine.high %v1142_v46, %v1146_v7  ;;  %v1006_v39 = vld [vmem:[#allocation5 + $0x1988] sm:$0xff] }
 0x29e   :  { %10162 = vmatpush2.bf16.msra.mxu0 %v16660_v10  ;;  %10205 = vmatpush2.bf16.msra.mxu1 %v16788_v12  ;;  %v1010_v36 = vld [vmem:[#allocation5 + $0x19a8] sm:$0xff]  ;;  %v17020_v12 = vcombine.low %v1142_v46, %v1146_v7 }
 0x29f   :  { %10163 = vmatprep.subr.bf16.mxu0 %v16653_v55  ;;  %10206 = vmatprep.subr.bf16.mxu1 %v16781_v61  ;;  %v1134_v26 = vld [vmem:[#allocation5 + $0x1d88] sm:$0xff]  ;;  %v16885_v55 = vcombine.high %v1006_v39, %v1010_v36  ;;  %v18754_v61 = vpop.f32.mrf.mxu1  ;;  %v16884_v44 = vcombine.low %v1006_v39, %v1010_v36 }
 0x2a0   :  { %v1138_v10 = vld [vmem:[#allocation5 + $0x1da8] sm:$0xff]  ;;  %19311 = vst [vmem:[#allocation33_spill] sm:$0xff] %v18754_v61 }
 0x2a1   :  { %v17013_v53 = vcombine.high %v1134_v26, %v1138_v10  ;;  %v998_v1 = vld [vmem:[#allocation5 + $0x1948] sm:$0xff]  ;;  %v17012_v46 = vcombine.low %v1134_v26, %v1138_v10 }
 0x2a2   :  { %10164 = vmatpush2.bf16.msra.mxu0 %v16652_v17  ;;  %10207 = vmatpush2.bf16.msra.mxu1 %v16780_v43  ;;  %v1002_v47 = vld [vmem:[#allocation5 + $0x1968] sm:$0xff] }
 0x2a3   :  { %10165 = vmatprep.subr.bf16.mxu0 %v16645_v5  ;;  %10208 = vmatprep.subr.bf16.mxu1 %v16773_v52  ;;  %v1126_v17 = vld [vmem:[#allocation5 + $0x1d48] sm:$0xff]  ;;  %v16877_v7 = vcombine.high %v998_v1, %v1002_v47  ;;  %v16876_v36 = vcombine.low %v998_v1, %v1002_v47 }
 0x2a4   :  { %v1130_v43 = vld [vmem:[#allocation5 + $0x1d68] sm:$0xff] }
 0x2a5   :  { %v994_v61 = vld [vmem:[#allocation5 + $0x1928] sm:$0xff]  ;;  %v17004_v10 = vcombine.low %v1126_v17, %v1130_v43 }
 0x2a6   :  { %10166 = vmatpush2.bf16.msra.mxu0 %v16644_v40  ;;  %10209 = vmatpush2.bf16.msra.mxu1 %v16772_v9  ;;  %v1122_v31 = vld [vmem:[#allocation5 + $0x1d28] sm:$0xff] }
 0x2a7   :  { %10221 = vmatprep.subr.bf16.mxu0 %v16893_v22  ;;  %10264 = vmatprep.subr.bf16.mxu1 %v17021_v14  ;;  %v17005_v22 = vcombine.high %v1126_v17, %v1130_v43  ;;  %v990_v14 = vld [vmem:[#allocation5 + $0x1908] sm:$0xff] }
 0x2a8   :  { %v16868_v0 = vcombine.low %v990_v14, %v994_v61  ;;  %v974_v43 = vld [vmem:[#allocation5 + $0x1888] sm:$0xff] }
 0x2a9   :  { %v9911_v3 = vpop.f32.mrf.mxu0  ;;  %10168 = vmatmul.mubr.bf16.vlgmr.msra.gmra.mxu0 %v18628_v15  ;;  %v9954_v52 = vpop.f32.mrf.mxu1  ;;  %10211 = vmatmul.mubr.bf16.vlgmr.msra.gmra.mxu1 %v18630_v19 }
 0x2aa   :  { %v9912_v5 = vadd.f32 %v9911_v3, %v18743_v2  ;;  %10222 = vmatpush1.bf16.msra.mxu0 %v16892_v56  ;;  %10265 = vmatpush1.bf16.msra.mxu1 %v17020_v12  ;;  %v1118_v3 = vld [vmem:[#allocation5 + $0x1d08] sm:$0xff]  ;;  %v16869_v56 = vcombine.high %v990_v14, %v994_v61 }
 0x2ab   :  { %v18759_v38 = vpop.f32.mrf.mxu0  ;;  %10223 = vmatprep.subr.bf16.mxu0 %v16885_v55  ;;  %v18761_v9 = vpop.f32.mrf.mxu1  ;;  %10266 = vmatprep.subr.bf16.mxu1 %v17013_v53  ;;  %v16997_v55 = vcombine.high %v1118_v3, %v1122_v31  ;;  %v982_v53 = vld [vmem:[#allocation5 + $0x18c8] sm:$0xff] }
 0x2ac   :  { %19312 = vst [vmem:[#allocation34_spill] sm:$0xff] %v18759_v38  ;;  %v9955_v40 = vadd.f32 %v9954_v52, %v9912_v5  ;;  %19313 = vst [vmem:[#allocation35_spill] sm:$0xff] %v18761_v9  ;;  %10253 = vmatprep.mubr.bf16.mxu0 %v18632_v30  ;;  %10296 = vmatprep.mubr.bf16.mxu1 %v18635_v33  ;;  %v986_v5 = vld [vmem:[#allocation5 + $0x18e8] sm:$0xff] }
 0x2ad   :  { %v9915_v2 = vpop.f32.mrf.mxu0  ;;  %v9958_v26 = vpop.f32.mrf.mxu1  ;;  %v1110_v52 = vld [vmem:[#allocation5 + $0x1cc8] sm:$0xff]  ;;  %v16861_v1 = vcombine.high %v982_v53, %v986_v5 }
 0x2ae   :  { %v9916_v39 = vadd.f32 %v9915_v2, %v18750_v32  ;;  %10224 = vmatpush1.bf16.msra.mxu0 %v16884_v44  ;;  %10267 = vmatpush1.bf16.msra.mxu1 %v17012_v46  ;;  %v1114_v9 = vld [vmem:[#allocation5 + $0x1ce8] sm:$0xff]  ;;  %v11511_v38 = vmax.f32 %v9955_v40, 0.0  ;;  %v16996_v32 = vcombine.low %v1118_v3, %v1122_v31 }
 0x2af   :  { %10225 = vmatprep.subr.bf16.mxu0 %v16877_v7  ;;  %10268 = vmatprep.subr.bf16.mxu1 %v17005_v22  ;;  %v16989_v17 = vcombine.high %v1110_v52, %v1114_v9  ;;  %v978_v44 = vld [vmem:[#allocation5 + $0x18a8] sm:$0xff]  ;;  %v16860_v22 = vcombine.low %v982_v53, %v986_v5  ;;  %v16988_v40 = vcombine.low %v1110_v52, %v1114_v9 }
 0x2b0   :  { %v9959_v12 = vadd.f32 %v9958_v26, %v9916_v39  ;;  %v1102_v46 = vld [vmem:[#allocation5 + $0x1c88] sm:$0xff]  ;;  %v16853_v2 = vcombine.high %v974_v43, %v978_v44 }
 0x2b1   :  { %v1106_v7 = vld [vmem:[#allocation5 + $0x1ca8] sm:$0xff] }
 0x2b2   :  { %v11519_v51 = vmax.f32 %v9959_v12, 0.0  ;;  %10226 = vmatpush1.bf16.msra.mxu0 %v16876_v36  ;;  %10269 = vmatpush1.bf16.msra.mxu1 %v17004_v10  ;;  %v16981_v61 = vcombine.high %v1102_v46, %v1106_v7  ;;  %v966_v14 = vld [vmem:[#allocation5 + $0x1848] sm:$0xff] }
 0x2b3   :  { %10227 = vmatprep.subr.bf16.mxu0 %v16869_v56  ;;  %10270 = vmatprep.subr.bf16.mxu1 %v16997_v55  ;;  %v970_v39 = vld [vmem:[#allocation5 + $0x1868] sm:$0xff] }
 0x2b4   :  { %v18766_v47 = vpack.c.bf16 %v11519_v51, %v11511_v38  ;;  %v1094_v31 = vld [vmem:[#allocation5 + $0x1c48] sm:$0xff]  ;;  %v16852_v51 = vcombine.low %v974_v43, %v978_v44  ;;  %v16980_v38 = vcombine.low %v1102_v46, %v1106_v7  ;;  %v16845_v36 = vcombine.high %v966_v14, %v970_v39 }
 0x2b5   :  { %v1098_v3 = vld [vmem:[#allocation5 + $0x1c68] sm:$0xff]  ;;  %v16844_v9 = vcombine.low %v966_v14, %v970_v39 }
 0x2b6   :  { %19314 = vst [vmem:[#allocation36_spill] sm:$0xff] %v18766_v47  ;;  %10228 = vmatpush1.bf16.msra.mxu0 %v16868_v0  ;;  %10271 = vmatpush1.bf16.msra.mxu1 %v16996_v32  ;;  %v16973_v26 = vcombine.high %v1094_v31, %v1098_v3  ;;  %v958_v0 = vld [vmem:[#allocation5 + $0x1808] sm:$0xff]  ;;  %v16972_v55 = vcombine.low %v1094_v31, %v1098_v3 }
 0x2b7   :  { %10229 = vmatprep.subr.bf16.mxu0 %v16861_v1  ;;  %10272 = vmatprep.subr.bf16.mxu1 %v16989_v17  ;;  %v962_v10 = vld [vmem:[#allocation5 + $0x1828] sm:$0xff] }
 0x2b8   :  { %v1086_v56 = vld [vmem:[#allocation5 + $0x1c08] sm:$0xff]  ;;  %v16837_v53 = vcombine.high %v958_v0, %v962_v10  ;;  %v16836_v43 = vcombine.low %v958_v0, %v962_v10 }
 0x2b9   :  { %v1090_v12 = vld [vmem:[#allocation5 + $0x1c28] sm:$0xff] }
 0x2ba   :  { %10230 = vmatpush1.bf16.msra.mxu0 %v16860_v22  ;;  %10273 = vmatpush1.bf16.msra.mxu1 %v16988_v40  ;;  %v16965_v5 = vcombine.high %v1086_v56, %v1090_v12  ;;  %v1078_v52 = vld [vmem:[#allocation5 + $0x1bc8] sm:$0xff]  ;;  %v16964_v44 = vcombine.low %v1086_v56, %v1090_v12 }
 0x2bb   :  { %10231 = vmatprep.subr.bf16.mxu0 %v16853_v2  ;;  %10274 = vmatprep.subr.bf16.mxu1 %v16981_v61  ;;  %v1082_v32 = vld [vmem:[#allocation5 + $0x1be8] sm:$0xff] }
 0x2bc   :  { %v1206_v1 = vld [vmem:[#allocation5 + $0x1fc8] sm:$0xff]  ;;  %v16957_v46 = vcombine.high %v1078_v52, %v1082_v32  ;;  %v16956_v14 = vcombine.low %v1078_v52, %v1082_v32 }
 0x2bd   :  { %v1210_v17 = vld [vmem:[#allocation5 + $0x1fe8] sm:$0xff] }
 0x2be   :  { %10232 = vmatpush1.bf16.msra.mxu0 %v16852_v51  ;;  %10275 = vmatpush1.bf16.msra.mxu1 %v16980_v38  ;;  %v17085_v7 = vcombine.high %v1206_v1, %v1210_v17  ;;  %v1070_v22 = vld [vmem:[#allocation5 + $0x1b88] sm:$0xff]  ;;  %v17084_v39 = vcombine.low %v1206_v1, %v1210_v17 }
 0x2bf   :  { %10233 = vmatprep.subr.bf16.mxu0 %v16845_v36  ;;  %10276 = vmatprep.subr.bf16.mxu1 %v16973_v26  ;;  %v1074_v40 = vld [vmem:[#allocation5 + $0x1ba8] sm:$0xff] }
 0x2c0   :  { %v1198_v2 = vld [vmem:[#allocation5 + $0x1f88] sm:$0xff]  ;;  %v16949_v31 = vcombine.high %v1070_v22, %v1074_v40  ;;  %v16948_v0 = vcombine.low %v1070_v22, %v1074_v40 }
 0x2c1   :  { %v1202_v61 = vld [vmem:[#allocation5 + $0x1fa8] sm:$0xff] }
 0x2c2   :  { %10234 = vmatpush1.bf16.msra.mxu0 %v16844_v9  ;;  %10277 = vmatpush1.bf16.msra.mxu1 %v16972_v55  ;;  %v17077_v3 = vcombine.high %v1198_v2, %v1202_v61  ;;  %v1062_v51 = vld [vmem:[#allocation5 + $0x1b48] sm:$0xff]  ;;  %v17076_v10 = vcombine.low %v1198_v2, %v1202_v61 }
 0x2c3   :  { %10235 = vmatprep.subr.bf16.mxu0 %v16837_v53  ;;  %10278 = vmatprep.subr.bf16.mxu1 %v16965_v5  ;;  %v1066_v38 = vld [vmem:[#allocation5 + $0x1b68] sm:$0xff] }
 0x2c4   :  { %v1190_v36 = vld [vmem:[#allocation5 + $0x1f48] sm:$0xff]  ;;  %v16941_v56 = vcombine.high %v1062_v51, %v1066_v38  ;;  %v16940_v52 = vcombine.low %v1062_v51, %v1066_v38 }
 0x2c5   :  { %v1194_v26 = vld [vmem:[#allocation5 + $0x1f68] sm:$0xff] }
 0x2c6   :  { %10236 = vmatpush1.bf16.msra.mxu0 %v16836_v43  ;;  %10279 = vmatpush1.bf16.msra.mxu1 %v16964_v44  ;;  %v17069_v12 = vcombine.high %v1190_v36, %v1194_v26  ;;  %v1054_v9 = vld [vmem:[#allocation5 + $0x1b08] sm:$0xff]  ;;  %v17068_v32 = vcombine.low %v1190_v36, %v1194_v26 }
 0x2c7   :  { %10237 = vmatprep.subr.bf16.mxu0 %v16957_v46  ;;  %10280 = vmatprep.subr.bf16.mxu1 %v17085_v7  ;;  %v1058_v55 = vld [vmem:[#allocation5 + $0x1b28] sm:$0xff] }
 0x2c8   :  { %v1182_v53 = vld [vmem:[#allocation5 + $0x1f08] sm:$0xff]  ;;  %v16933_v1 = vcombine.high %v1054_v9, %v1058_v55  ;;  %v16932_v22 = vcombine.low %v1054_v9, %v1058_v55 }
 0x2c9   :  { %v1186_v5 = vld [vmem:[#allocation5 + $0x1f28] sm:$0xff] }
 0x2ca   :  { %10238 = vmatpush2.bf16.msra.mxu0 %v16956_v14  ;;  %10281 = vmatpush2.bf16.msra.mxu1 %v17084_v39  ;;  %v17061_v17 = vcombine.high %v1182_v53, %v1186_v5  ;;  %v1046_v43 = vld [vmem:[#allocation5 + $0x1ac8] sm:$0xff]  ;;  %v17060_v40 = vcombine.low %v1182_v53, %v1186_v5 }
 0x2cb   :  { %10239 = vmatprep.subr.bf16.mxu0 %v16949_v31  ;;  %10282 = vmatprep.subr.bf16.mxu1 %v17077_v3  ;;  %v1050_v44 = vld [vmem:[#allocation5 + $0x1ae8] sm:$0xff] }
 0x2cc   :  { %v1174_v46 = vld [vmem:[#allocation5 + $0x1ec8] sm:$0xff]  ;;  %v16925_v2 = vcombine.high %v1046_v43, %v1050_v44  ;;  %v16924_v51 = vcombine.low %v1046_v43, %v1050_v44 }
 0x2cd   :  { %v1178_v7 = vld [vmem:[#allocation5 + $0x1ee8] sm:$0xff] }
 0x2ce   :  { %10240 = vmatpush2.bf16.msra.mxu0 %v16948_v0  ;;  %10283 = vmatpush2.bf16.msra.mxu1 %v17076_v10  ;;  %v17053_v61 = vcombine.high %v1174_v46, %v1178_v7  ;;  %v1038_v14 = vld [vmem:[#allocation5 + $0x1a88] sm:$0xff]  ;;  %v17052_v38 = vcombine.low %v1174_v46, %v1178_v7 }
 0x2cf   :  { %10241 = vmatprep.subr.bf16.mxu0 %v16941_v56  ;;  %10284 = vmatprep.subr.bf16.mxu1 %v17069_v12  ;;  %v1042_v39 = vld [vmem:[#allocation5 + $0x1aa8] sm:$0xff] }
 0x2d0   :  { %v1166_v31 = vld [vmem:[#allocation5 + $0x1e88] sm:$0xff]  ;;  %v16917_v36 = vcombine.high %v1038_v14, %v1042_v39  ;;  %v16916_v9 = vcombine.low %v1038_v14, %v1042_v39  ;;  %v19294_v39 = vsub.s32 2, %v18640_v42 }
 0x2d1   :  { %v1170_v3 = vld [vmem:[#allocation5 + $0x1ea8] sm:$0xff] }
 0x2d2   :  { %10242 = vmatpush2.bf16.msra.mxu0 %v16940_v52  ;;  %10285 = vmatpush2.bf16.msra.mxu1 %v17068_v32  ;;  %v17045_v26 = vcombine.high %v1166_v31, %v1170_v3  ;;  %v1030_v0 = vld [vmem:[#allocation5 + $0x1a48] sm:$0xff]  ;;  %v17044_v55 = vcombine.low %v1166_v31, %v1170_v3 }
 0x2d3   :  { %10243 = vmatprep.subr.bf16.mxu0 %v16933_v1  ;;  %10286 = vmatprep.subr.bf16.mxu1 %v17061_v17  ;;  %v1034_v10 = vld [vmem:[#allocation5 + $0x1a68] sm:$0xff] }
 0x2d4   :  { %v1158_v56 = vld [vmem:[#allocation5 + $0x1e48] sm:$0xff]  ;;  %v16909_v53 = vcombine.high %v1030_v0, %v1034_v10  ;;  %v16908_v43 = vcombine.low %v1030_v0, %v1034_v10  ;;  %v18347_v10 = vld [vmem:[#allocation7] sm:$0xff] }
 0x2d5   :  { %v1162_v12 = vld [vmem:[#allocation5 + $0x1e68] sm:$0xff] }
 0x2d6   :  { %10244 = vmatpush2.bf16.msra.mxu0 %v16932_v22  ;;  %10287 = vmatpush2.bf16.msra.mxu1 %v17060_v40  ;;  %v17037_v5 = vcombine.high %v1158_v56, %v1162_v12  ;;  %v1022_v52 = vld [vmem:[#allocation5 + $0x1a08] sm:$0xff]  ;;  %v17036_v44 = vcombine.low %v1158_v56, %v1162_v12  ;;  %v1738_v56 = vrot.slane %v18347_v10, %v19294_v39 }
 0x2d7   :  { %10245 = vmatprep.subr.bf16.mxu0 %v16925_v2  ;;  %10288 = vmatprep.subr.bf16.mxu1 %v17053_v61  ;;  %v1026_v32 = vld [vmem:[#allocation5 + $0x1a28] sm:$0xff] }
 0x2d8   :  { %v1150_v1 = vld [vmem:[#allocation5 + $0x1e08] sm:$0xff]  ;;  %v16901_v46 = vcombine.high %v1022_v52, %v1026_v32  ;;  %v16900_v14 = vcombine.low %v1022_v52, %v1026_v32 }
 0x2d9   :  { %v1154_v17 = vld [vmem:[#allocation5 + $0x1e28] sm:$0xff] }
 0x2da   :  { %10246 = vmatpush2.bf16.msra.mxu0 %v16924_v51  ;;  %10289 = vmatpush2.bf16.msra.mxu1 %v17052_v38  ;;  %v17029_v7 = vcombine.high %v1150_v1, %v1154_v17  ;;  %v1270_v22 = vld [vmem:[#allocation5 + $0x21c8] sm:$0xff]  ;;  %v17028_v31 = vcombine.low %v1150_v1, %v1154_v17 }
 0x2db   :  { %10247 = vmatprep.subr.bf16.mxu0 %v16917_v36  ;;  %10290 = vmatprep.subr.bf16.mxu1 %v17045_v26  ;;  %v1274_v40 = vld [vmem:[#allocation5 + $0x21e8] sm:$0xff] }
 0x2dc   :  { %v1398_v2 = vld [vmem:[#allocation5 + $0x25c8] sm:$0xff]  ;;  %v17149_v3 = vcombine.high %v1270_v22, %v1274_v40  ;;  %v17148_v12 = vcombine.low %v1270_v22, %v1274_v40 }
 0x2dd   :  { %v1402_v61 = vld [vmem:[#allocation5 + $0x25e8] sm:$0xff] }
 0x2de   :  { %10248 = vmatpush2.bf16.msra.mxu0 %v16916_v9  ;;  %10291 = vmatpush2.bf16.msra.mxu1 %v17044_v55  ;;  %v17277_v51 = vcombine.high %v1398_v2, %v1402_v61  ;;  %v1262_v38 = vld [vmem:[#allocation5 + $0x2188] sm:$0xff]  ;;  %v18771_v9 = vpop.f32.mrf.mxu0  ;;  %v17276_v55 = vcombine.low %v1398_v2, %v1402_v61 }
 0x2df   :  { %10249 = vmatprep.subr.bf16.mxu0 %v16909_v53  ;;  %10292 = vmatprep.subr.bf16.mxu1 %v17037_v5  ;;  %v1266_v36 = vld [vmem:[#allocation5 + $0x21a8] sm:$0xff]  ;;  %19315 = vst [vmem:[#allocation37_spill] sm:$0xff] %v18771_v9  ;;  %v18773_v5 = vpop.f32.mrf.mxu1 }
 0x2e0   :  { %v1390_v26 = vld [vmem:[#allocation5 + $0x2588] sm:$0xff]  ;;  %v17141_v53 = vcombine.high %v1262_v38, %v1266_v36  ;;  %19316 = vst [vmem:[#allocation38_spill] sm:$0xff] %v18773_v5  ;;  %v17140_v22 = vcombine.low %v1262_v38, %v1266_v36 }
 0x2e1   :  { %v1394_v0 = vld [vmem:[#allocation5 + $0x25a8] sm:$0xff] }
 0x2e2   :  { %10250 = vmatpush2.bf16.msra.mxu0 %v16908_v43  ;;  %10293 = vmatpush2.bf16.msra.mxu1 %v17036_v44  ;;  %v17269_v52 = vcombine.high %v1390_v26, %v1394_v0  ;;  %v1254_v32 = vld [vmem:[#allocation5 + $0x2148] sm:$0xff]  ;;  %v17268_v2 = vcombine.low %v1390_v26, %v1394_v0 }
 0x2e3   :  { %10251 = vmatprep.subr.bf16.mxu0 %v16901_v46  ;;  %10294 = vmatprep.subr.bf16.mxu1 %v17029_v7  ;;  %v1258_v1 = vld [vmem:[#allocation5 + $0x2168] sm:$0xff] }
 0x2e4   :  { %v1382_v43 = vld [vmem:[#allocation5 + $0x2548] sm:$0xff]  ;;  %v17133_v61 = vcombine.high %v1254_v32, %v1258_v1  ;;  %v17132_v36 = vcombine.low %v1254_v32, %v1258_v1 }
 0x2e5   :  { %v1386_v44 = vld [vmem:[#allocation5 + $0x2568] sm:$0xff] }
 0x2e6   :  { %10252 = vmatpush2.bf16.msra.mxu0 %v16900_v14  ;;  %10295 = vmatpush2.bf16.msra.mxu1 %v17028_v31  ;;  %v1250_v10 = vld [vmem:[#allocation5 + $0x2128] sm:$0xff]  ;;  %v17260_v0 = vcombine.low %v1382_v43, %v1386_v44 }
 0x2e7   :  { %10307 = vmatprep.subr.bf16.mxu0 %v17149_v3  ;;  %10350 = vmatprep.subr.bf16.mxu1 %v17277_v51  ;;  %v17261_v3 = vcombine.high %v1382_v43, %v1386_v44  ;;  %v1246_v51 = vld [vmem:[#allocation5 + $0x2108] sm:$0xff] }
 0x2e8   :  { %v1374_v39 = vld [vmem:[#allocation5 + $0x2508] sm:$0xff]  ;;  %v17124_v9 = vcombine.low %v1246_v51, %v1250_v10 }
 0x2e9   :  { %v9997_v17 = vpop.f32.mrf.mxu0  ;;  %10254 = vmatmul.mubr.bf16.vlgmr.msra.gmra.mxu0 %v18644_v6  ;;  %v10040_v7 = vpop.f32.mrf.mxu1  ;;  %10297 = vmatmul.mubr.bf16.vlgmr.msra.gmra.mxu1 %v18648_v11  ;;  %v1366_v47 = vld [vmem:[#allocation5 + $0x24c8] sm:$0xff] }
 0x2ea   :  { %v9998_v46 = vadd.f32 %v9997_v17, %v1738_v56  ;;  %10308 = vmatpush1.bf16.msra.mxu0 %v17148_v12  ;;  %10351 = vmatpush1.bf16.msra.mxu1 %v17276_v55  ;;  %v1378_v12 = vld [vmem:[#allocation5 + $0x2528] sm:$0xff]  ;;  %v17125_v55 = vcombine.high %v1246_v51, %v1250_v10 }
 0x2eb   :  { %v18777_v40 = vpop.f32.mrf.mxu0  ;;  %10309 = vmatprep.subr.bf16.mxu0 %v17141_v53  ;;  %v18781_v31 = vpop.f32.mrf.mxu1  ;;  %10352 = vmatprep.subr.bf16.mxu1 %v17269_v52  ;;  %v17253_v52 = vcombine.high %v1374_v39, %v1378_v12  ;;  %v1370_v5 = vld [vmem:[#allocation5 + $0x24e8] sm:$0xff] }
 0x2ec   :  { %v18779_v14 = vadd.f32 %v10040_v7, %v9998_v46  ;;  %10339 = vmatprep.mubr.bf16.mxu0 %v18654_v24  ;;  %10382 = vmatprep.mubr.bf16.mxu1 %v18657_v29  ;;  %v1238_v46 = vld [vmem:[#allocation5 + $0x20c8] sm:$0xff]  ;;  %v17245_v32 = vcombine.high %v1366_v47, %v1370_v5 }
 0x2ed   :  { %v10001_v17 = vpop.f32.mrf.mxu0  ;;  %v10044_v26 = vpop.f32.mrf.mxu1  ;;  %v1242_v7 = vld [vmem:[#allocation5 + $0x20e8] sm:$0xff] }
 0x2ee   :  { %v10002_v38 = vadd.f32 %v10001_v17, %v1738_v56  ;;  %10310 = vmatpush1.bf16.msra.mxu0 %v17140_v22  ;;  %10353 = vmatpush1.bf16.msra.mxu1 %v17268_v2  ;;  %v17252_v56 = vcombine.low %v1374_v39, %v1378_v12  ;;  %v17117_v22 = vcombine.high %v1238_v46, %v1242_v7  ;;  %v1230_v1 = vld [vmem:[#allocation5 + $0x2088] sm:$0xff] }
 0x2ef   :  { %10311 = vmatprep.subr.bf16.mxu0 %v17133_v61  ;;  %10354 = vmatprep.subr.bf16.mxu1 %v17261_v3  ;;  %v1234_v2 = vld [vmem:[#allocation5 + $0x20a8] sm:$0xff]  ;;  %v17116_v61 = vcombine.low %v1238_v46, %v1242_v7  ;;  %v17244_v3 = vcombine.low %v1366_v47, %v1370_v5 }
 0x2f0   :  { %v18785_v53 = vadd.f32 %v10044_v26, %v10002_v38  ;;  %v1358_v43 = vld [vmem:[#allocation5 + $0x2488] sm:$0xff]  ;;  %v17109_v17 = vcombine.high %v1230_v1, %v1234_v2  ;;  %v17108_v39 = vcombine.low %v1230_v1, %v1234_v2 }
 0x2f1   :  { %v1362_v44 = vld [vmem:[#allocation5 + $0x24a8] sm:$0xff] }
 0x2f2   :  { %10312 = vmatpush1.bf16.msra.mxu0 %v17132_v36  ;;  %10355 = vmatpush1.bf16.msra.mxu1 %v17260_v0  ;;  %v17237_v38 = vcombine.high %v1358_v43, %v1362_v44  ;;  %v1222_v36 = vld [vmem:[#allocation5 + $0x2048] sm:$0xff]  ;;  %v17236_v12 = vcombine.low %v1358_v43, %v1362_v44 }
 0x2f3   :  { %10313 = vmatprep.subr.bf16.mxu0 %v17125_v55  ;;  %10356 = vmatprep.subr.bf16.mxu1 %v17253_v52  ;;  %v1226_v51 = vld [vmem:[#allocation5 + $0x2068] sm:$0xff] }
 0x2f4   :  { %v1350_v10 = vld [vmem:[#allocation5 + $0x2448] sm:$0xff]  ;;  %v17101_v0 = vcombine.high %v1222_v36, %v1226_v51  ;;  %v17100_v47 = vcombine.low %v1222_v36, %v1226_v51 }
 0x2f5   :  { %v1354_v26 = vld [vmem:[#allocation5 + $0x2468] sm:$0xff] }
 0x2f6   :  { %10314 = vmatpush1.bf16.msra.mxu0 %v17124_v9  ;;  %10357 = vmatpush1.bf16.msra.mxu1 %v17252_v56  ;;  %v17229_v55 = vcombine.high %v1350_v10, %v1354_v26  ;;  %v1214_v9 = vld [vmem:[#allocation5 + $0x2008] sm:$0xff]  ;;  %v17228_v5 = vcombine.low %v1350_v10, %v1354_v26 }
 0x2f7   :  { %10315 = vmatprep.subr.bf16.mxu0 %v17117_v22  ;;  %10358 = vmatprep.subr.bf16.mxu1 %v17245_v32  ;;  %v1218_v52 = vld [vmem:[#allocation5 + $0x2028] sm:$0xff] }
 0x2f8   :  { %v1342_v46 = vld [vmem:[#allocation5 + $0x2408] sm:$0xff]  ;;  %v17093_v56 = vcombine.high %v1214_v9, %v1218_v52  ;;  %v17092_v43 = vcombine.low %v1214_v9, %v1218_v52 }
 0x2f9   :  { %v1346_v7 = vld [vmem:[#allocation5 + $0x2428] sm:$0xff] }
 0x2fa   :  { %10316 = vmatpush1.bf16.msra.mxu0 %v17116_v61  ;;  %10359 = vmatpush1.bf16.msra.mxu1 %v17244_v3  ;;  %v17221_v22 = vcombine.high %v1342_v46, %v1346_v7  ;;  %v1334_v32 = vld [vmem:[#allocation5 + $0x23c8] sm:$0xff]  ;;  %v17220_v44 = vcombine.low %v1342_v46, %v1346_v7 }
 0x2fb   :  { %10317 = vmatprep.subr.bf16.mxu0 %v17109_v17  ;;  %10360 = vmatprep.subr.bf16.mxu1 %v17237_v38  ;;  %v1338_v1 = vld [vmem:[#allocation5 + $0x23e8] sm:$0xff] }
 0x2fc   :  { %v1462_v2 = vld [vmem:[#allocation5 + $0x27c8] sm:$0xff]  ;;  %v17213_v3 = vcombine.high %v1334_v32, %v1338_v1  ;;  %v17212_v10 = vcombine.low %v1334_v32, %v1338_v1 }
 0x2fd   :  { %v1466_v61 = vld [vmem:[#allocation5 + $0x27e8] sm:$0xff] }
 0x2fe   :  { %10318 = vmatpush1.bf16.msra.mxu0 %v17108_v39  ;;  %10361 = vmatpush1.bf16.msra.mxu1 %v17236_v12  ;;  %v17341_v17 = vcombine.high %v1462_v2, %v1466_v61  ;;  %v1326_v38 = vld [vmem:[#allocation5 + $0x2388] sm:$0xff]  ;;  %v17340_v26 = vcombine.low %v1462_v2, %v1466_v61 }
 0x2ff   :  { %10319 = vmatprep.subr.bf16.mxu0 %v17101_v0  ;;  %10362 = vmatprep.subr.bf16.mxu1 %v17229_v55  ;;  %v1330_v36 = vld [vmem:[#allocation5 + $0x23a8] sm:$0xff] }
 0x300   :  { %v1454_v51 = vld [vmem:[#allocation5 + $0x2788] sm:$0xff]  ;;  %v17205_v12 = vcombine.high %v1326_v38, %v1330_v36  ;;  %v17204_v46 = vcombine.low %v1326_v38, %v1330_v36 }
 0x301   :  { %v1458_v39 = vld [vmem:[#allocation5 + $0x27a8] sm:$0xff] }
 0x302   :  { %10320 = vmatpush1.bf16.msra.mxu0 %v17100_v47  ;;  %10363 = vmatpush1.bf16.msra.mxu1 %v17228_v5  ;;  %v17333_v0 = vcombine.high %v1454_v51, %v1458_v39  ;;  %v1318_v55 = vld [vmem:[#allocation5 + $0x2348] sm:$0xff]  ;;  %v17332_v7 = vcombine.low %v1454_v51, %v1458_v39 }
 0x303   :  { %10321 = vmatprep.subr.bf16.mxu0 %v17093_v56  ;;  %10364 = vmatprep.subr.bf16.mxu1 %v17221_v22  ;;  %v1322_v9 = vld [vmem:[#allocation5 + $0x2368] sm:$0xff] }
 0x304   :  { %v1446_v52 = vld [vmem:[#allocation5 + $0x2748] sm:$0xff]  ;;  %v17197_v5 = vcombine.high %v1318_v55, %v1322_v9  ;;  %v17196_v2 = vcombine.low %v1318_v55, %v1322_v9 }
 0x305   :  { %v1450_v47 = vld [vmem:[#allocation5 + $0x2768] sm:$0xff] }
 0x306   :  { %10322 = vmatpush1.bf16.msra.mxu0 %v17092_v43  ;;  %10365 = vmatpush1.bf16.msra.mxu1 %v17220_v44  ;;  %v17325_v56 = vcombine.high %v1446_v52, %v1450_v47  ;;  %v1310_v22 = vld [vmem:[#allocation5 + $0x2308] sm:$0xff]  ;;  %v17324_v61 = vcombine.low %v1446_v52, %v1450_v47 }
 0x307   :  { %10323 = vmatprep.subr.bf16.mxu0 %v17213_v3  ;;  %10366 = vmatprep.subr.bf16.mxu1 %v17341_v17  ;;  %v1314_v32 = vld [vmem:[#allocation5 + $0x2328] sm:$0xff] }
 0x308   :  { %v1438_v1 = vld [vmem:[#allocation5 + $0x2708] sm:$0xff]  ;;  %v17189_v44 = vcombine.high %v1310_v22, %v1314_v32  ;;  %v17188_v51 = vcombine.low %v1310_v22, %v1314_v32 }
 0x309   :  { %v1442_v43 = vld [vmem:[#allocation5 + $0x2728] sm:$0xff] }
 0x30a   :  { %10324 = vmatpush2.bf16.msra.mxu0 %v17212_v10  ;;  %10367 = vmatpush2.bf16.msra.mxu1 %v17340_v26  ;;  %v17317_v3 = vcombine.high %v1438_v1, %v1442_v43  ;;  %v1302_v17 = vld [vmem:[#allocation5 + $0x22c8] sm:$0xff]  ;;  %v17316_v39 = vcombine.low %v1438_v1, %v1442_v43 }
 0x30b   :  { %10325 = vmatprep.subr.bf16.mxu0 %v17205_v12  ;;  %10368 = vmatprep.subr.bf16.mxu1 %v17333_v0  ;;  %v1306_v38 = vld [vmem:[#allocation5 + $0x22e8] sm:$0xff] }
 0x30c   :  { %v1430_v36 = vld [vmem:[#allocation5 + $0x26c8] sm:$0xff]  ;;  %v17181_v26 = vcombine.high %v1302_v17, %v1306_v38  ;;  %v17180_v52 = vcombine.low %v1302_v17, %v1306_v38 }
 0x30d   :  { %v1434_v10 = vld [vmem:[#allocation5 + $0x26e8] sm:$0xff] }
 0x30e   :  { %10326 = vmatpush2.bf16.msra.mxu0 %v17204_v46  ;;  %10369 = vmatpush2.bf16.msra.mxu1 %v17332_v7  ;;  %v17309_v12 = vcombine.high %v1430_v36, %v1434_v10  ;;  %v1294_v0 = vld [vmem:[#allocation5 + $0x2288] sm:$0xff]  ;;  %v17308_v47 = vcombine.low %v1430_v36, %v1434_v10 }
 0x30f   :  { %10327 = vmatprep.subr.bf16.mxu0 %v17197_v5  ;;  %10370 = vmatprep.subr.bf16.mxu1 %v17325_v56  ;;  %v1298_v55 = vld [vmem:[#allocation5 + $0x22a8] sm:$0xff] }
 0x310   :  { %v1422_v9 = vld [vmem:[#allocation5 + $0x2688] sm:$0xff]  ;;  %v17173_v7 = vcombine.high %v1294_v0, %v1298_v55  ;;  %v17172_v1 = vcombine.low %v1294_v0, %v1298_v55 }
 0x311   :  { %v1426_v46 = vld [vmem:[#allocation5 + $0x26a8] sm:$0xff] }
 0x312   :  { %10328 = vmatpush2.bf16.msra.mxu0 %v17196_v2  ;;  %10371 = vmatpush2.bf16.msra.mxu1 %v17324_v61  ;;  %v17301_v5 = vcombine.high %v1422_v9, %v1426_v46  ;;  %v1286_v56 = vld [vmem:[#allocation5 + $0x2248] sm:$0xff]  ;;  %v17300_v43 = vcombine.low %v1422_v9, %v1426_v46 }
 0x313   :  { %10329 = vmatprep.subr.bf16.mxu0 %v17189_v44  ;;  %10372 = vmatprep.subr.bf16.mxu1 %v17317_v3  ;;  %v1290_v22 = vld [vmem:[#allocation5 + $0x2268] sm:$0xff] }
 0x314   :  { %v1414_v32 = vld [vmem:[#allocation5 + $0x2648] sm:$0xff]  ;;  %v17165_v61 = vcombine.high %v1286_v56, %v1290_v22  ;;  %v17164_v36 = vcombine.low %v1286_v56, %v1290_v22 }
 0x315   :  { %v1418_v2 = vld [vmem:[#allocation5 + $0x2668] sm:$0xff] }
 0x316   :  { %10330 = vmatpush2.bf16.msra.mxu0 %v17188_v51  ;;  %10373 = vmatpush2.bf16.msra.mxu1 %v17316_v39  ;;  %v17293_v44 = vcombine.high %v1414_v32, %v1418_v2  ;;  %v1278_v3 = vld [vmem:[#allocation5 + $0x2208] sm:$0xff]  ;;  %v17292_v10 = vcombine.low %v1414_v32, %v1418_v2  ;;  %v18787_v2 = vpop.f32.mrf.mxu0 }
 0x317   :  { %10331 = vmatprep.subr.bf16.mxu0 %v17181_v26  ;;  %10374 = vmatprep.subr.bf16.mxu1 %v17309_v12  ;;  %v1282_v17 = vld [vmem:[#allocation5 + $0x2228] sm:$0xff] }
 0x318   :  { %v1406_v38 = vld [vmem:[#allocation5 + $0x2608] sm:$0xff]  ;;  %v17157_v39 = vcombine.high %v1278_v3, %v1282_v17  ;;  %v17156_v9 = vcombine.low %v1278_v3, %v1282_v17 }
 0x319   :  { %v1410_v51 = vld [vmem:[#allocation5 + $0x2628] sm:$0xff] }
 0x31a   :  { %10332 = vmatpush2.bf16.msra.mxu0 %v17180_v52  ;;  %10375 = vmatpush2.bf16.msra.mxu1 %v17308_v47  ;;  %v17285_v26 = vcombine.high %v1406_v38, %v1410_v51  ;;  %v1526_v12 = vld [vmem:[#allocation5 + $0x29c8] sm:$0xff]  ;;  %v17284_v46 = vcombine.low %v1406_v38, %v1410_v51 }
 0x31b   :  { %10333 = vmatprep.subr.bf16.mxu0 %v17173_v7  ;;  %10376 = vmatprep.subr.bf16.mxu1 %v17301_v5  ;;  %v1530_v0 = vld [vmem:[#allocation5 + $0x29e8] sm:$0xff] }
 0x31c   :  { %v1654_v55 = vld [vmem:[#allocation5 + $0x2dc8] sm:$0xff]  ;;  %v17405_v47 = vcombine.high %v1526_v12, %v1530_v0  ;;  %v17404_v32 = vcombine.low %v1526_v12, %v1530_v0 }
 0x31d   :  { %v1658_v52 = vld [vmem:[#allocation5 + $0x2de8] sm:$0xff] }
 0x31e   :  { %10334 = vmatpush2.bf16.msra.mxu0 %v17172_v1  ;;  %10377 = vmatpush2.bf16.msra.mxu1 %v17300_v43  ;;  %v17533_v7 = vcombine.high %v1654_v55, %v1658_v52  ;;  %v1518_v5 = vld [vmem:[#allocation5 + $0x2988] sm:$0xff]  ;;  %v17532_v43 = vcombine.low %v1654_v55, %v1658_v52 }
 0x31f   :  { %10335 = vmatprep.subr.bf16.mxu0 %v17165_v61  ;;  %10378 = vmatprep.subr.bf16.mxu1 %v17293_v44  ;;  %v1522_v56 = vld [vmem:[#allocation5 + $0x29a8] sm:$0xff]  ;;  %v18789_v44 = vpop.f32.mrf.mxu1 }
 0x320   :  { %v1646_v22 = vld [vmem:[#allocation5 + $0x2d88] sm:$0xff]  ;;  %v17397_v61 = vcombine.high %v1518_v5, %v1522_v56  ;;  %v17396_v12 = vcombine.low %v1518_v5, %v1522_v56 }
 0x321   :  { %v1650_v1 = vld [vmem:[#allocation5 + $0x2da8] sm:$0xff] }
 0x322   :  { %10336 = vmatpush2.bf16.msra.mxu0 %v17164_v36  ;;  %10379 = vmatpush2.bf16.msra.mxu1 %v17292_v10  ;;  %v17525_v3 = vcombine.high %v1646_v22, %v1650_v1  ;;  %v1510_v17 = vld [vmem:[#allocation5 + $0x2948] sm:$0xff]  ;;  %v17524_v55 = vcombine.low %v1646_v22, %v1650_v1 }
 0x323   :  { %10337 = vmatprep.subr.bf16.mxu0 %v17157_v39  ;;  %10380 = vmatprep.subr.bf16.mxu1 %v17285_v26  ;;  %v1514_v38 = vld [vmem:[#allocation5 + $0x2968] sm:$0xff] }
 0x324   :  { %v1638_v36 = vld [vmem:[#allocation5 + $0x2d48] sm:$0xff]  ;;  %v17389_v52 = vcombine.high %v1510_v17, %v1514_v38  ;;  %v17388_v56 = vcombine.low %v1510_v17, %v1514_v38 }
 0x325   :  { %v1642_v10 = vld [vmem:[#allocation5 + $0x2d68] sm:$0xff] }
 0x326   :  { %10338 = vmatpush2.bf16.msra.mxu0 %v17156_v9  ;;  %10381 = vmatpush2.bf16.msra.mxu1 %v17284_v46  ;;  %v17516_v1 = vcombine.low %v1638_v36, %v1642_v10  ;;  %v1486_v38 = vld [vmem:[#allocation5 + $0x2888] sm:$0xff] }
 0x327   :  { %10393 = vmatprep.subr.bf16.mxu0 %v17405_v47  ;;  %10436 = vmatprep.subr.bf16.mxu1 %v17533_v7  ;;  %v17517_v47 = vcombine.high %v1638_v36, %v1642_v10  ;;  %v1502_v7 = vld [vmem:[#allocation5 + $0x2908] sm:$0xff] }
 0x328   :  { %v17380_v50 = vcombine.low %v1502_v7, %v1506_v57  ;;  %v1614_v36 = vld [vmem:[#allocation5 + $0x2c88] sm:$0xff] }
 0x329   :  { %v10083_v51 = vpop.f32.mrf.mxu0  ;;  %10340 = vmatmul.mubr.bf16.vlgmr.msra.gmra.mxu0 %v18669_v54  ;;  %v10126_v26 = vpop.f32.mrf.mxu1  ;;  %10383 = vmatmul.mubr.bf16.vlgmr.msra.gmra.mxu1 %v18671_v60  ;;  %v1618_v10 = vld [vmem:[#allocation5 + $0x2ca8] sm:$0xff] }
 0x32a   :  { %v10084_v39 = vadd.f32 %v10083_v51, %v18779_v14  ;;  %10394 = vmatpush1.bf16.msra.mxu0 %v17404_v32  ;;  %10437 = vmatpush1.bf16.msra.mxu1 %v17532_v43  ;;  %v1630_v51 = vld [vmem:[#allocation5 + $0x2d08] sm:$0xff]  ;;  %v17381_v43 = vcombine.high %v1502_v7, %v1506_v57 }
 0x32b   :  { %v18794_v0 = vpop.f32.mrf.mxu0  ;;  %10395 = vmatprep.subr.bf16.mxu0 %v17397_v61  ;;  %v18798_v46 = vpop.f32.mrf.mxu1  ;;  %10438 = vmatprep.subr.bf16.mxu1 %v17525_v3  ;;  %v1634_v32 = vld [vmem:[#allocation5 + $0x2d28] sm:$0xff] }
 0x32c   :  { %v18796_v9 = vadd.f32 %v10126_v26, %v10084_v39  ;;  %19317 = vst [vmem:[#allocation39_spill] sm:$0xff] %v18798_v46  ;;  %10425 = vmatprep.mubr.bf16.mxu0 %v18677_v13  ;;  %10468 = vmatprep.mubr.bf16.mxu1 %v18680_v20  ;;  %v17509_v3 = vcombine.high %v1630_v51, %v1634_v32  ;;  %v1494_v39 = vld [vmem:[#allocation5 + $0x28c8] sm:$0xff] }
 0x32d   :  { %v10087_v14 = vpop.f32.mrf.mxu0  ;;  %v10130_v22 = vpop.f32.mrf.mxu1  ;;  %v1498_v26 = vld [vmem:[#allocation5 + $0x28e8] sm:$0xff] }
 0x32e   :  { %v10088_v5 = vadd.f32 %v10087_v14, %v18785_v53  ;;  %10396 = vmatpush1.bf16.msra.mxu0 %v17396_v12  ;;  %10439 = vmatpush1.bf16.msra.mxu1 %v17524_v55  ;;  %v1626_v46 = vld [vmem:[#allocation5 + $0x2ce8] sm:$0xff]  ;;  %v17508_v53 = vcombine.low %v1630_v51, %v1634_v32  ;;  %v17373_v12 = vcombine.high %v1494_v39, %v1498_v26 }
 0x32f   :  { %10397 = vmatprep.subr.bf16.mxu0 %v17389_v52  ;;  %10440 = vmatprep.subr.bf16.mxu1 %v17517_v47  ;;  %v17501_v17 = vcombine.high %v1622_v41, %v1626_v46  ;;  %v1490_v55 = vld [vmem:[#allocation5 + $0x28a8] sm:$0xff]  ;;  %v17372_v52 = vcombine.low %v1494_v39, %v1498_v26  ;;  %v17500_v47 = vcombine.low %v1622_v41, %v1626_v46 }
 0x330   :  { %v18803_v61 = vadd.f32 %v10130_v22, %v10088_v5  ;;  %v17365_v14 = vcombine.high %v1486_v38, %v1490_v55  ;;  %v17493_v5 = vcombine.high %v1614_v36, %v1618_v10  ;;  %v1482_v57 = vld [vmem:[#allocation5 + $0x2868] sm:$0xff]  ;;  %v17364_v51 = vcombine.low %v1486_v38, %v1490_v55 }
 0x331   :  { %v1606_v7 = vld [vmem:[#allocation5 + $0x2c48] sm:$0xff]  ;;  %v17492_v32 = vcombine.low %v1614_v36, %v1618_v10 }
 0x332   :  { %10398 = vmatpush1.bf16.msra.mxu0 %v17388_v56  ;;  %10441 = vmatpush1.bf16.msra.mxu1 %v17516_v1  ;;  %v1478_v56 = vld [vmem:[#allocation5 + $0x2848] sm:$0xff] }
 0x333   :  { %10399 = vmatprep.subr.bf16.mxu0 %v17381_v43  ;;  %10442 = vmatprep.subr.bf16.mxu1 %v17509_v3  ;;  %v1610_v22 = vld [vmem:[#allocation5 + $0x2c68] sm:$0xff]  ;;  %v17357_v1 = vcombine.high %v1478_v56, %v1482_v57  ;;  %v17356_v41 = vcombine.low %v1478_v56, %v1482_v57 }
 0x334   :  { %v17485_v43 = vcombine.high %v1606_v7, %v1610_v22  ;;  %v1474_v3 = vld [vmem:[#allocation5 + $0x2828] sm:$0xff]  ;;  %v17484_v46 = vcombine.low %v1606_v7, %v1610_v22 }
 0x335   :  { %v1598_v39 = vld [vmem:[#allocation5 + $0x2c08] sm:$0xff] }
 0x336   :  { %10400 = vmatpush1.bf16.msra.mxu0 %v17380_v50  ;;  %10443 = vmatpush1.bf16.msra.mxu1 %v17508_v53  ;;  %v1470_v50 = vld [vmem:[#allocation5 + $0x2808] sm:$0xff] }
 0x337   :  { %10401 = vmatprep.subr.bf16.mxu0 %v17373_v12  ;;  %10444 = vmatprep.subr.bf16.mxu1 %v17501_v17  ;;  %v1602_v26 = vld [vmem:[#allocation5 + $0x2c28] sm:$0xff]  ;;  %v17349_v53 = vcombine.high %v1470_v50, %v1474_v3  ;;  %v17348_v36 = vcombine.low %v1470_v50, %v1474_v3 }
 0x338   :  { %v17477_v12 = vcombine.high %v1598_v39, %v1602_v26  ;;  %v1590_v17 = vld [vmem:[#allocation5 + $0x2bc8] sm:$0xff]  ;;  %v17476_v10 = vcombine.low %v1598_v39, %v1602_v26 }
 0x339   :  { %v1594_v38 = vld [vmem:[#allocation5 + $0x2be8] sm:$0xff] }
 0x33a   :  { %10402 = vmatpush1.bf16.msra.mxu0 %v17372_v52  ;;  %10445 = vmatpush1.bf16.msra.mxu1 %v17500_v47  ;;  %v1718_v55 = vld [vmem:[#allocation5 + $0x2fc8] sm:$0xff]  ;;  %v17469_v47 = vcombine.high %v1590_v17, %v1594_v38  ;;  %v17468_v7 = vcombine.low %v1590_v17, %v1594_v38 }
 0x33b   :  { %10403 = vmatprep.subr.bf16.mxu0 %v17365_v14  ;;  %10446 = vmatprep.subr.bf16.mxu1 %v17493_v5  ;;  %v1722_v52 = vld [vmem:[#allocation5 + $0x2fe8] sm:$0xff] }
 0x33c   :  { %v17597_v14 = vcombine.high %v1718_v55, %v1722_v52  ;;  %v1582_v5 = vld [vmem:[#allocation5 + $0x2b88] sm:$0xff]  ;;  %v17596_v22 = vcombine.low %v1718_v55, %v1722_v52 }
 0x33d   :  { %v1586_v56 = vld [vmem:[#allocation5 + $0x2ba8] sm:$0xff] }
 0x33e   :  { %10404 = vmatpush1.bf16.msra.mxu0 %v17364_v51  ;;  %10447 = vmatpush1.bf16.msra.mxu1 %v17492_v32  ;;  %v1710_v57 = vld [vmem:[#allocation5 + $0x2f88] sm:$0xff]  ;;  %v17461_v32 = vcombine.high %v1582_v5, %v1586_v56  ;;  %v17460_v39 = vcombine.low %v1582_v5, %v1586_v56 }
 0x33f   :  { %10405 = vmatprep.subr.bf16.mxu0 %v17357_v1  ;;  %10448 = vmatprep.subr.bf16.mxu1 %v17485_v43  ;;  %v1714_v51 = vld [vmem:[#allocation5 + $0x2fa8] sm:$0xff] }
 0x340   :  { %v17589_v1 = vcombine.high %v1710_v57, %v1714_v51  ;;  %v1574_v43 = vld [vmem:[#allocation5 + $0x2b48] sm:$0xff]  ;;  %v17588_v26 = vcombine.low %v1710_v57, %v1714_v51 }
 0x341   :  { %v1578_v50 = vld [vmem:[#allocation5 + $0x2b68] sm:$0xff] }
 0x342   :  { %10406 = vmatpush1.bf16.msra.mxu0 %v17356_v41  ;;  %10449 = vmatpush1.bf16.msra.mxu1 %v17484_v46  ;;  %v1702_v3 = vld [vmem:[#allocation5 + $0x2f48] sm:$0xff]  ;;  %v17453_v46 = vcombine.high %v1574_v43, %v1578_v50  ;;  %v17452_v55 = vcombine.low %v1574_v43, %v1578_v50 }
 0x343   :  { %10407 = vmatprep.subr.bf16.mxu0 %v17349_v53  ;;  %10450 = vmatprep.subr.bf16.mxu1 %v17477_v12  ;;  %v1706_v41 = vld [vmem:[#allocation5 + $0x2f68] sm:$0xff] }
 0x344   :  { %v17581_v53 = vcombine.high %v1702_v3, %v1706_v41  ;;  %v1566_v12 = vld [vmem:[#allocation5 + $0x2b08] sm:$0xff]  ;;  %v17580_v52 = vcombine.low %v1702_v3, %v1706_v41 }
 0x345   :  { %v1570_v17 = vld [vmem:[#allocation5 + $0x2b28] sm:$0xff] }
 0x346   :  { %10408 = vmatpush1.bf16.msra.mxu0 %v17348_v36  ;;  %10451 = vmatpush1.bf16.msra.mxu1 %v17476_v10  ;;  %v1694_v38 = vld [vmem:[#allocation5 + $0x2f08] sm:$0xff]  ;;  %v17445_v10 = vcombine.high %v1566_v12, %v1570_v17  ;;  %v17444_v57 = vcombine.low %v1566_v12, %v1570_v17 }
 0x347   :  { %10409 = vmatprep.subr.bf16.mxu0 %v17469_v47  ;;  %10452 = vmatprep.subr.bf16.mxu1 %v17597_v14  ;;  %v1698_v36 = vld [vmem:[#allocation5 + $0x2f28] sm:$0xff] }
 0x348   :  { %v17573_v47 = vcombine.high %v1694_v38, %v1698_v36  ;;  %v1558_v14 = vld [vmem:[#allocation5 + $0x2ac8] sm:$0xff]  ;;  %v17572_v51 = vcombine.low %v1694_v38, %v1698_v36 }
 0x349   :  { %v1562_v5 = vld [vmem:[#allocation5 + $0x2ae8] sm:$0xff] }
 0x34a   :  { %10410 = vmatpush2.bf16.msra.mxu0 %v17468_v7  ;;  %10453 = vmatpush2.bf16.msra.mxu1 %v17596_v22  ;;  %v1686_v56 = vld [vmem:[#allocation5 + $0x2ec8] sm:$0xff]  ;;  %v17437_v22 = vcombine.high %v1558_v14, %v1562_v5  ;;  %v17436_v3 = vcombine.low %v1558_v14, %v1562_v5 }
 0x34b   :  { %10411 = vmatprep.subr.bf16.mxu0 %v17461_v32  ;;  %10454 = vmatprep.subr.bf16.mxu1 %v17589_v1  ;;  %v1690_v7 = vld [vmem:[#allocation5 + $0x2ee8] sm:$0xff] }
 0x34c   :  { %v17565_v32 = vcombine.high %v1686_v56, %v1690_v7  ;;  %v1550_v1 = vld [vmem:[#allocation5 + $0x2a88] sm:$0xff]  ;;  %v17564_v41 = vcombine.low %v1686_v56, %v1690_v7 }
 0x34d   :  { %v1554_v43 = vld [vmem:[#allocation5 + $0x2aa8] sm:$0xff] }
 0x34e   :  { %10412 = vmatpush2.bf16.msra.mxu0 %v17460_v39  ;;  %10455 = vmatpush2.bf16.msra.mxu1 %v17588_v26  ;;  %v1678_v50 = vld [vmem:[#allocation5 + $0x2e88] sm:$0xff]  ;;  %v17429_v26 = vcombine.high %v1550_v1, %v1554_v43  ;;  %v17428_v38 = vcombine.low %v1550_v1, %v1554_v43  ;;  %v251_v1 = vld [vmem:[#allocation5 + $0x1f0] sm:$0xff] }
 0x34f   :  { %10413 = vmatprep.subr.bf16.mxu0 %v17453_v46  ;;  %10456 = vmatprep.subr.bf16.mxu1 %v17581_v53  ;;  %v1682_v39 = vld [vmem:[#allocation5 + $0x2ea8] sm:$0xff]  ;;  %v375_v43 = vld [vmem:[#allocation5 + $0x5d0] sm:$0xff] }
 0x350   :  { %v17557_v46 = vcombine.high %v1678_v50, %v1682_v39  ;;  %v1542_v53 = vld [vmem:[#allocation5 + $0x2a48] sm:$0xff]  ;;  %v17556_v36 = vcombine.low %v1678_v50, %v1682_v39 }
 0x351   :  { %v1546_v12 = vld [vmem:[#allocation5 + $0x2a68] sm:$0xff] }
 0x352   :  { %10414 = vmatpush2.bf16.msra.mxu0 %v17452_v55  ;;  %10457 = vmatpush2.bf16.msra.mxu1 %v17580_v52  ;;  %v1670_v17 = vld [vmem:[#allocation5 + $0x2e48] sm:$0xff]  ;;  %v17421_v52 = vcombine.high %v1542_v53, %v1546_v12  ;;  %v17420_v56 = vcombine.low %v1542_v53, %v1546_v12  ;;  %v243_v53 = vld [vmem:[#allocation5 + $0x1b0] sm:$0xff] }
 0x353   :  { %10415 = vmatprep.subr.bf16.mxu0 %v17445_v10  ;;  %10458 = vmatprep.subr.bf16.mxu1 %v17573_v47  ;;  %v1674_v55 = vld [vmem:[#allocation5 + $0x2e68] sm:$0xff]  ;;  %v367_v12 = vld [vmem:[#allocation5 + $0x590] sm:$0xff] }
 0x354   :  { %v17549_v10 = vcombine.high %v1670_v17, %v1674_v55  ;;  %v1534_v47 = vld [vmem:[#allocation5 + $0x2a08] sm:$0xff]  ;;  %v17548_v7 = vcombine.low %v1670_v17, %v1674_v55  ;;  %v18805_v55 = vpop.f32.mrf.mxu0 }
 0x355   :  { %v1538_v14 = vld [vmem:[#allocation5 + $0x2a28] sm:$0xff] }
 0x356   :  { %10416 = vmatpush2.bf16.msra.mxu0 %v17444_v57  ;;  %10459 = vmatpush2.bf16.msra.mxu1 %v17572_v51  ;;  %v1662_v5 = vld [vmem:[#allocation5 + $0x2e08] sm:$0xff]  ;;  %v17413_v51 = vcombine.high %v1534_v47, %v1538_v14  ;;  %v17412_v50 = vcombine.low %v1534_v47, %v1538_v14  ;;  %v231_v14 = vld [vmem:[#allocation5 + $0x150] sm:$0xff] }
 0x357   :  { %10417 = vmatprep.subr.bf16.mxu0 %v17437_v22  ;;  %10460 = vmatprep.subr.bf16.mxu1 %v17565_v32  ;;  %v1666_v57 = vld [vmem:[#allocation5 + $0x2e28] sm:$0xff]  ;;  %v247_v32 = vld [vmem:[#allocation5 + $0x1d0] sm:$0xff] }
 0x358   :  { %v17541_v22 = vcombine.high %v1662_v5, %v1666_v57  ;;  %v17540_v39 = vcombine.low %v1662_v5, %v1666_v57  ;;  %v16126_v17 = vcombine.low %v247_v32, %v251_v1  ;;  %v235_v5 = vld [vmem:[#allocation5 + $0x170] sm:$0xff] }
 0x35a   :  { %10418 = vmatpush2.bf16.msra.mxu0 %v17436_v3  ;;  %10461 = vmatpush2.bf16.msra.mxu1 %v17564_v41  ;;  %v379_v3 = vld [vmem:[#allocation5 + $0x5f0] sm:$0xff]  ;;  %v16127_v41 = vcombine.high %v247_v32, %v251_v1 }
 0x35b   :  { %10419 = vmatprep.subr.bf16.mxu0 %v17429_v26  ;;  %10462 = vmatprep.subr.bf16.mxu1 %v17557_v46  ;;  %v16255_v26 = vcombine.high %v375_v43, %v379_v3  ;;  %v239_v46 = vld [vmem:[#allocation5 + $0x190] sm:$0xff] }
 0x35c   :  { %v16118_v32 = vcombine.low %v239_v46, %v243_v53 }
 0x35e   :  { %10420 = vmatpush2.bf16.msra.mxu0 %v17428_v38  ;;  %10463 = vmatpush2.bf16.msra.mxu1 %v17556_v36  ;;  %v371_v38 = vld [vmem:[#allocation5 + $0x5b0] sm:$0xff]  ;;  %v16254_v36 = vcombine.low %v375_v43, %v379_v3  ;;  %v16111_v3 = vcombine.high %v231_v14, %v235_v5 }
 0x35f   :  { %10421 = vmatprep.subr.bf16.mxu0 %v17421_v52  ;;  %10464 = vmatprep.subr.bf16.mxu1 %v17549_v10  ;;  %v16119_v52 = vcombine.high %v239_v46, %v243_v53  ;;  %v18807_v10 = vpop.f32.mrf.mxu1  ;;  %v16247_v47 = vcombine.high %v367_v12, %v371_v38  ;;  %v16246_v43 = vcombine.low %v367_v12, %v371_v38 }
 0x360   :  { %19318 = vst [vmem:[#allocation40_spill] sm:$0xff] %v18807_v10  ;;  %v16110_v53 = vcombine.low %v231_v14, %v235_v5  ;;  %v207_v5 = vld [vmem:[#allocation5 + $0x90] sm:$0xff] }
 0x362   :  { %10422 = vmatpush2.bf16.msra.mxu0 %v17420_v56  ;;  %10465 = vmatpush2.bf16.msra.mxu1 %v17548_v7  ;;  %v359_v56 = vld [vmem:[#allocation5 + $0x550] sm:$0xff] }
 0x363   :  { %10423 = vmatprep.subr.bf16.mxu0 %v17413_v51  ;;  %10466 = vmatprep.subr.bf16.mxu1 %v17541_v22  ;;  %v363_v7 = vld [vmem:[#allocation5 + $0x570] sm:$0xff] }
 0x364   :  { %v16238_v38 = vcombine.low %v359_v56, %v363_v7 }
 0x366   :  { %10424 = vmatpush2.bf16.msra.mxu0 %v17412_v50  ;;  %10467 = vmatpush2.bf16.msra.mxu1 %v17540_v39 }
 0x367   :  { %10479 = vmatprep.subr.bf16.mxu0 %v16127_v41  ;;  %10522 = vmatprep.subr.bf16.mxu1 %v16255_v26  ;;  %v16239_v41 = vcombine.high %v359_v56, %v363_v7  ;;  %v223_v26 = vld [vmem:[#allocation5 + $0x110] sm:$0xff] }
 0x368   :  { %v16102_v28 = vcombine.low %v223_v26, %v227_v45  ;;  %v335_v56 = vld [vmem:[#allocation5 + $0x490] sm:$0xff] }
 0x369   :  { %v10169_v57 = vpop.f32.mrf.mxu0  ;;  %10426 = vmatmul.mubr.bf16.vlgmr.msra.gmra.mxu0 %v18694_v16  ;;  %v10212_v22 = vpop.f32.mrf.mxu1  ;;  %10469 = vmatmul.mubr.bf16.vlgmr.msra.gmra.mxu1 %v18696_v23  ;;  %v339_v7 = vld [vmem:[#allocation5 + $0x4b0] sm:$0xff] }
 0x36a   :  { %v10170_v51 = vadd.f32 %v10169_v57, %v18796_v9  ;;  %10480 = vmatpush1.bf16.msra.mxu0 %v16126_v17  ;;  %10523 = vmatpush1.bf16.msra.mxu1 %v16254_v36  ;;  %v351_v57 = vld [vmem:[#allocation5 + $0x510] sm:$0xff]  ;;  %v16103_v36 = vcombine.high %v223_v26, %v227_v45 }
 0x36b   :  { %v18812_v1 = vpop.f32.mrf.mxu0  ;;  %10481 = vmatprep.subr.bf16.mxu0 %v16119_v52  ;;  %v18816_v39 = vpop.f32.mrf.mxu1  ;;  %10524 = vmatprep.subr.bf16.mxu1 %v16247_v47  ;;  %v355_v17 = vld [vmem:[#allocation5 + $0x530] sm:$0xff] }
 0x36c   :  { %19319 = vst [vmem:[#allocation41_spill] sm:$0xff] %v18812_v1  ;;  %v18814_v50 = vadd.f32 %v10212_v22, %v10170_v51  ;;  %19320 = vst [vmem:[#allocation42_spill] sm:$0xff] %v18816_v39  ;;  %10511 = vmatprep.mubr.bf16.mxu0 %v18598_v58  ;;  %10554 = vmatprep.mubr.bf16.mxu1 %v18600_v63  ;;  %v16231_v47 = vcombine.high %v351_v57, %v355_v17  ;;  %v215_v51 = vld [vmem:[#allocation5 + $0xd0] sm:$0xff] }
 0x36d   :  { %v10173_v9 = vpop.f32.mrf.mxu0  ;;  %v10216_v12 = vpop.f32.mrf.mxu1  ;;  %v219_v22 = vld [vmem:[#allocation5 + $0xf0] sm:$0xff] }
 0x36e   :  { %v10174_v46 = vadd.f32 %v10173_v9, %v18803_v61  ;;  %10482 = vmatpush1.bf16.msra.mxu0 %v16118_v32  ;;  %10525 = vmatpush1.bf16.msra.mxu1 %v16246_v43  ;;  %v343_v39 = vld [vmem:[#allocation5 + $0x4d0] sm:$0xff]  ;;  %v16230_v61 = vcombine.low %v351_v57, %v355_v17  ;;  %v16095_v32 = vcombine.high %v215_v51, %v219_v22 }
 0x36f   :  { %10483 = vmatprep.subr.bf16.mxu0 %v16111_v3  ;;  %10526 = vmatprep.subr.bf16.mxu1 %v16239_v41  ;;  %v347_v1 = vld [vmem:[#allocation5 + $0x4f0] sm:$0xff]  ;;  %v16094_v3 = vcombine.low %v215_v51, %v219_v22  ;;  %v16214_v17 = vcombine.low %v335_v56, %v339_v7 }
 0x370   :  { %v18821_v52 = vadd.f32 %v10216_v12, %v10174_v46  ;;  %v16223_v14 = vcombine.high %v343_v39, %v347_v1  ;;  %v211_v43 = vld [vmem:[#allocation5 + $0xb0] sm:$0xff]  ;;  %v16222_v41 = vcombine.low %v343_v39, %v347_v1  ;;  %v16215_v46 = vcombine.high %v335_v56, %v339_v7 }
 0x371   :  { %v16087_v9 = vcombine.high %v207_v5, %v211_v43  ;;  %v203_v45 = vld [vmem:[#allocation5 + $0x70] sm:$0xff]  ;;  %v16086_v57 = vcombine.low %v207_v5, %v211_v43 }
 0x372   :  { %10484 = vmatpush1.bf16.msra.mxu0 %v16110_v53  ;;  %10527 = vmatpush1.bf16.msra.mxu1 %v16238_v38  ;;  %v199_v53 = vld [vmem:[#allocation5 + $0x50] sm:$0xff] }
 0x373   :  { %10485 = vmatprep.subr.bf16.mxu0 %v16103_v36  ;;  %10528 = vmatprep.subr.bf16.mxu1 %v16231_v47  ;;  %v327_v26 = vld [vmem:[#allocation5 + $0x450] sm:$0xff]  ;;  %v16079_v38 = vcombine.high %v199_v53, %v203_v45  ;;  %v16078_v1 = vcombine.low %v199_v53, %v203_v45 }
 0x374   :  { %v331_v12 = vld [vmem:[#allocation5 + $0x470] sm:$0xff] }
 0x375   :  { %v16207_v36 = vcombine.high %v327_v26, %v331_v12  ;;  %v195_v47 = vld [vmem:[#allocation5 + $0x30] sm:$0xff]  ;;  %v16206_v39 = vcombine.low %v327_v26, %v331_v12 }
 0x376   :  { %10486 = vmatpush1.bf16.msra.mxu0 %v16102_v28  ;;  %10529 = vmatpush1.bf16.msra.mxu1 %v16230_v61  ;;  %v191_v28 = vld [vmem:[#allocation5 + $0x10] sm:$0xff] }
 0x377   :  { %10487 = vmatprep.subr.bf16.mxu0 %v16095_v32  ;;  %10530 = vmatprep.subr.bf16.mxu1 %v16223_v14  ;;  %v319_v51 = vld [vmem:[#allocation5 + $0x410] sm:$0xff]  ;;  %v16071_v61 = vcombine.high %v191_v28, %v195_v47  ;;  %v16070_v56 = vcombine.low %v191_v28, %v195_v47 }
 0x378   :  { %v323_v22 = vld [vmem:[#allocation5 + $0x430] sm:$0xff] }
 0x379   :  { %v16199_v32 = vcombine.high %v319_v51, %v323_v22  ;;  %v311_v14 = vld [vmem:[#allocation5 + $0x3d0] sm:$0xff]  ;;  %v16198_v7 = vcombine.low %v319_v51, %v323_v22 }
 0x37a   :  { %10488 = vmatpush1.bf16.msra.mxu0 %v16094_v3  ;;  %10531 = vmatpush1.bf16.msra.mxu1 %v16222_v41  ;;  %v315_v5 = vld [vmem:[#allocation5 + $0x3f0] sm:$0xff] }
 0x37b   :  { %10489 = vmatprep.subr.bf16.mxu0 %v16087_v9  ;;  %10532 = vmatprep.subr.bf16.mxu1 %v16215_v46  ;;  %v439_v43 = vld [vmem:[#allocation5 + $0x7d0] sm:$0xff]  ;;  %v16191_v41 = vcombine.high %v311_v14, %v315_v5  ;;  %v16190_v26 = vcombine.low %v311_v14, %v315_v5 }
 0x37c   :  { %v443_v3 = vld [vmem:[#allocation5 + $0x7f0] sm:$0xff] }
 0x37d   :  { %v16319_v9 = vcombine.high %v439_v43, %v443_v3  ;;  %v303_v46 = vld [vmem:[#allocation5 + $0x390] sm:$0xff]  ;;  %v16318_v12 = vcombine.low %v439_v43, %v443_v3 }
 0x37e   :  { %10490 = vmatpush1.bf16.msra.mxu0 %v16086_v57  ;;  %10533 = vmatpush1.bf16.msra.mxu1 %v16214_v17  ;;  %v307_v53 = vld [vmem:[#allocation5 + $0x3b0] sm:$0xff] }
 0x37f   :  { %10491 = vmatprep.subr.bf16.mxu0 %v16079_v38  ;;  %10534 = vmatprep.subr.bf16.mxu1 %v16207_v36  ;;  %v431_v45 = vld [vmem:[#allocation5 + $0x790] sm:$0xff]  ;;  %v16183_v17 = vcombine.high %v303_v46, %v307_v53  ;;  %v16182_v51 = vcombine.low %v303_v46, %v307_v53 }
 0x380   :  { %v435_v57 = vld [vmem:[#allocation5 + $0x7b0] sm:$0xff] }
 0x381   :  { %v16311_v38 = vcombine.high %v431_v45, %v435_v57  ;;  %v295_v36 = vld [vmem:[#allocation5 + $0x350] sm:$0xff]  ;;  %v16310_v22 = vcombine.low %v431_v45, %v435_v57 }
 0x382   :  { %10492 = vmatpush1.bf16.msra.mxu0 %v16078_v1  ;;  %10535 = vmatpush1.bf16.msra.mxu1 %v16206_v39  ;;  %v299_v28 = vld [vmem:[#allocation5 + $0x370] sm:$0xff] }
 0x383   :  { %10493 = vmatprep.subr.bf16.mxu0 %v16071_v61  ;;  %10536 = vmatprep.subr.bf16.mxu1 %v16199_v32  ;;  %v423_v47 = vld [vmem:[#allocation5 + $0x750] sm:$0xff]  ;;  %v16175_v39 = vcombine.high %v295_v36, %v299_v28  ;;  %v16174_v43 = vcombine.low %v295_v36, %v299_v28 }
 0x384   :  { %v427_v1 = vld [vmem:[#allocation5 + $0x770] sm:$0xff] }
 0x385   :  { %v16303_v61 = vcombine.high %v423_v47, %v427_v1  ;;  %v287_v32 = vld [vmem:[#allocation5 + $0x310] sm:$0xff]  ;;  %v16302_v3 = vcombine.low %v423_v47, %v427_v1 }
 0x386   :  { %10494 = vmatpush1.bf16.msra.mxu0 %v16070_v56  ;;  %10537 = vmatpush1.bf16.msra.mxu1 %v16198_v7  ;;  %v291_v14 = vld [vmem:[#allocation5 + $0x330] sm:$0xff] }
 0x387   :  { %10495 = vmatprep.subr.bf16.mxu0 %v16191_v41  ;;  %10538 = vmatprep.subr.bf16.mxu1 %v16319_v9  ;;  %v415_v5 = vld [vmem:[#allocation5 + $0x710] sm:$0xff]  ;;  %v16167_v7 = vcombine.high %v287_v32, %v291_v14  ;;  %v16166_v45 = vcombine.low %v287_v32, %v291_v14 }
 0x388   :  { %v419_v56 = vld [vmem:[#allocation5 + $0x730] sm:$0xff] }
 0x389   :  { %v16295_v41 = vcombine.high %v415_v5, %v419_v56  ;;  %v279_v9 = vld [vmem:[#allocation5 + $0x2d0] sm:$0xff]  ;;  %v16294_v57 = vcombine.low %v415_v5, %v419_v56 }
 0x38a   :  { %10496 = vmatpush2.bf16.msra.mxu0 %v16190_v26  ;;  %10539 = vmatpush2.bf16.msra.mxu1 %v16318_v12  ;;  %v283_v46 = vld [vmem:[#allocation5 + $0x2f0] sm:$0xff] }
 0x38b   :  { %10497 = vmatprep.subr.bf16.mxu0 %v16183_v17  ;;  %10540 = vmatprep.subr.bf16.mxu1 %v16311_v38  ;;  %v407_v53 = vld [vmem:[#allocation5 + $0x6d0] sm:$0xff]  ;;  %v16159_v12 = vcombine.high %v279_v9, %v283_v46  ;;  %v16158_v47 = vcombine.low %v279_v9, %v283_v46 }
 0x38c   :  { %v411_v26 = vld [vmem:[#allocation5 + $0x6f0] sm:$0xff] }
 0x38d   :  { %v16287_v17 = vcombine.high %v407_v53, %v411_v26  ;;  %v271_v38 = vld [vmem:[#allocation5 + $0x290] sm:$0xff]  ;;  %v16286_v1 = vcombine.low %v407_v53, %v411_v26 }
 0x38e   :  { %10498 = vmatpush2.bf16.msra.mxu0 %v16182_v51  ;;  %10541 = vmatpush2.bf16.msra.mxu1 %v16310_v22  ;;  %v275_v36 = vld [vmem:[#allocation5 + $0x2b0] sm:$0xff] }
 0x38f   :  { %10499 = vmatprep.subr.bf16.mxu0 %v16175_v39  ;;  %10542 = vmatprep.subr.bf16.mxu1 %v16303_v61  ;;  %v399_v28 = vld [vmem:[#allocation5 + $0x690] sm:$0xff]  ;;  %v16151_v22 = vcombine.high %v271_v38, %v275_v36  ;;  %v16150_v5 = vcombine.low %v271_v38, %v275_v36 }
 0x390   :  { %v403_v51 = vld [vmem:[#allocation5 + $0x6b0] sm:$0xff] }
 0x391   :  { %v16279_v39 = vcombine.high %v399_v28, %v403_v51  ;;  %v263_v61 = vld [vmem:[#allocation5 + $0x250] sm:$0xff]  ;;  %v16278_v56 = vcombine.low %v399_v28, %v403_v51 }
 0x392   :  { %10500 = vmatpush2.bf16.msra.mxu0 %v16174_v43  ;;  %10543 = vmatpush2.bf16.msra.mxu1 %v16302_v3  ;;  %v267_v32 = vld [vmem:[#allocation5 + $0x270] sm:$0xff] }
 0x393   :  { %10501 = vmatprep.subr.bf16.mxu0 %v16167_v7  ;;  %10544 = vmatprep.subr.bf16.mxu1 %v16295_v41  ;;  %v391_v14 = vld [vmem:[#allocation5 + $0x650] sm:$0xff]  ;;  %v16143_v3 = vcombine.high %v263_v61, %v267_v32  ;;  %v16142_v53 = vcombine.low %v263_v61, %v267_v32 }
 0x394   :  { %v395_v43 = vld [vmem:[#allocation5 + $0x670] sm:$0xff] }
 0x395   :  { %v16271_v7 = vcombine.high %v391_v14, %v395_v43  ;;  %v255_v41 = vld [vmem:[#allocation5 + $0x210] sm:$0xff]  ;;  %v16270_v26 = vcombine.low %v391_v14, %v395_v43  ;;  %v18823_v43 = vpop.f32.mrf.mxu0 }
 0x396   :  { %10502 = vmatpush2.bf16.msra.mxu0 %v16166_v45  ;;  %10545 = vmatpush2.bf16.msra.mxu1 %v16294_v57  ;;  %v259_v9 = vld [vmem:[#allocation5 + $0x230] sm:$0xff]  ;;  %19321 = vst [vmem:[#allocation43_spill] sm:$0xff] %v18823_v43 }
 0x397   :  { %10503 = vmatprep.subr.bf16.mxu0 %v16159_v12  ;;  %10546 = vmatprep.subr.bf16.mxu1 %v16287_v17  ;;  %v383_v46 = vld [vmem:[#allocation5 + $0x610] sm:$0xff]  ;;  %v16135_v57 = vcombine.high %v255_v41, %v259_v9  ;;  %v16134_v28 = vcombine.low %v255_v41, %v259_v9 }
 0x398   :  { %v387_v45 = vld [vmem:[#allocation5 + $0x630] sm:$0xff] }
 0x399   :  { %v16263_v12 = vcombine.high %v383_v46, %v387_v45  ;;  %v503_v17 = vld [vmem:[#allocation5 + $0x9d0] sm:$0xff]  ;;  %v16262_v51 = vcombine.low %v383_v46, %v387_v45 }
 0x39a   :  { %10504 = vmatpush2.bf16.msra.mxu0 %v16158_v47  ;;  %10547 = vmatpush2.bf16.msra.mxu1 %v16286_v1  ;;  %v507_v38 = vld [vmem:[#allocation5 + $0x9f0] sm:$0xff] }
 0x39b   :  { %10505 = vmatprep.subr.bf16.mxu0 %v16151_v22  ;;  %10548 = vmatprep.subr.bf16.mxu1 %v16279_v39  ;;  %v631_v36 = vld [vmem:[#allocation5 + $0xdd0] sm:$0xff]  ;;  %v16383_v1 = vcombine.high %v503_v17, %v507_v38  ;;  %v16382_v14 = vcombine.low %v503_v17, %v507_v38 }
 0x39c   :  { %v635_v47 = vld [vmem:[#allocation5 + $0xdf0] sm:$0xff] }
 0x39d   :  { %v16511_v22 = vcombine.high %v631_v36, %v635_v47  ;;  %v495_v39 = vld [vmem:[#allocation5 + $0x990] sm:$0xff] }
 0x39e   :  { %10506 = vmatpush2.bf16.msra.mxu0 %v16150_v5  ;;  %10549 = vmatpush2.bf16.msra.mxu1 %v16278_v56  ;;  %v499_v61 = vld [vmem:[#allocation5 + $0x9b0] sm:$0xff]  ;;  %v16510_v56 = vcombine.low %v631_v36, %v635_v47 }
 0x39f   :  { %10507 = vmatprep.subr.bf16.mxu0 %v16143_v3  ;;  %10550 = vmatprep.subr.bf16.mxu1 %v16271_v7  ;;  %v623_v32 = vld [vmem:[#allocation5 + $0xd90] sm:$0xff]  ;;  %v16375_v3 = vcombine.high %v495_v39, %v499_v61  ;;  %v18825_v7 = vpop.f32.mrf.mxu1  ;;  %v16374_v17 = vcombine.low %v495_v39, %v499_v61 }
 0x3a0   :  { %v627_v5 = vld [vmem:[#allocation5 + $0xdb0] sm:$0xff]  ;;  %19322 = vst [vmem:[#allocation44_spill] sm:$0xff] %v18825_v7 }
 0x3a1   :  { %v16503_v41 = vcombine.high %v623_v32, %v627_v5  ;;  %v487_v9 = vld [vmem:[#allocation5 + $0x950] sm:$0xff]  ;;  %v16502_v36 = vcombine.low %v623_v32, %v627_v5 }
 0x3a2   :  { %10508 = vmatpush2.bf16.msra.mxu0 %v16142_v53  ;;  %10551 = vmatpush2.bf16.msra.mxu1 %v16270_v26  ;;  %v491_v46 = vld [vmem:[#allocation5 + $0x970] sm:$0xff] }
 0x3a3   :  { %10509 = vmatprep.subr.bf16.mxu0 %v16135_v57  ;;  %10552 = vmatprep.subr.bf16.mxu1 %v16263_v12  ;;  %v615_v53 = vld [vmem:[#allocation5 + $0xd50] sm:$0xff]  ;;  %v16367_v47 = vcombine.high %v487_v9, %v491_v46  ;;  %v16366_v61 = vcombine.low %v487_v9, %v491_v46 }
 0x3a4   :  { %v619_v26 = vld [vmem:[#allocation5 + $0xd70] sm:$0xff] }
 0x3a5   :  { %v483_v7 = vld [vmem:[#allocation5 + $0x930] sm:$0xff]  ;;  %v16494_v5 = vcombine.low %v615_v53, %v619_v26 }
 0x3a6   :  { %10510 = vmatpush2.bf16.msra.mxu0 %v16134_v28  ;;  %10553 = vmatpush2.bf16.msra.mxu1 %v16262_v51  ;;  %v463_v46 = vld [vmem:[#allocation5 + $0x890] sm:$0xff] }
 0x3a7   :  { %10565 = vmatprep.subr.bf16.mxu0 %v16383_v1  ;;  %10608 = vmatprep.subr.bf16.mxu1 %v16511_v22  ;;  %v16495_v1 = vcombine.high %v615_v53, %v619_v26  ;;  %v479_v22 = vld [vmem:[#allocation5 + $0x910] sm:$0xff] }
 0x3a8   :  { %v16358_v43 = vcombine.low %v479_v22, %v483_v7  ;;  %v591_v53 = vld [vmem:[#allocation5 + $0xc90] sm:$0xff] }
 0x3a9   :  { %v10255_v45 = vpop.f32.mrf.mxu0  ;;  %10512 = vmatmul.mubr.bf16.vlgmr.msra.gmra.mxu0 %v18604_v21  ;;  %v10298_v12 = vpop.f32.mrf.mxu1  ;;  %10555 = vmatmul.mubr.bf16.vlgmr.msra.gmra.mxu1 %v18606_v25  ;;  %v595_v26 = vld [vmem:[#allocation5 + $0xcb0] sm:$0xff] }
 0x3aa   :  { %v10256_v57 = vadd.f32 %v10255_v45, %v18814_v50  ;;  %10566 = vmatpush1.bf16.msra.mxu0 %v16382_v14  ;;  %10609 = vmatpush1.bf16.msra.mxu1 %v16510_v56  ;;  %v607_v45 = vld [vmem:[#allocation5 + $0xd10] sm:$0xff]  ;;  %v16359_v56 = vcombine.high %v479_v22, %v483_v7 }
 0x3ab   :  { %v18830_v38 = vpop.f32.mrf.mxu0  ;;  %10567 = vmatprep.subr.bf16.mxu0 %v16375_v3  ;;  %v18834_v51 = vpop.f32.mrf.mxu1  ;;  %10610 = vmatprep.subr.bf16.mxu1 %v16503_v41  ;;  %v611_v14 = vld [vmem:[#allocation5 + $0xd30] sm:$0xff] }
 0x3ac   :  { %19323 = vst [vmem:[#allocation45_spill] sm:$0xff] %v18830_v38  ;;  %v18832_v28 = vadd.f32 %v10298_v12, %v10256_v57  ;;  %19324 = vst [vmem:[#allocation46_spill] sm:$0xff] %v18834_v51  ;;  %10597 = vmatprep.mubr.bf16.mxu0 %v18608_v34  ;;  %10640 = vmatprep.mubr.bf16.mxu1 %v18611_v37  ;;  %v16487_v41 = vcombine.high %v607_v45, %v611_v14  ;;  %v471_v57 = vld [vmem:[#allocation5 + $0x8d0] sm:$0xff] }
 0x3ad   :  { %v10259_v50 = vpop.f32.mrf.mxu0  ;;  %v10302_v32 = vpop.f32.mrf.mxu1  ;;  %v475_v12 = vld [vmem:[#allocation5 + $0x8f0] sm:$0xff] }
 0x3ae   :  { %v10260_v39 = vadd.f32 %v10259_v50, %v18821_v52  ;;  %10568 = vmatpush1.bf16.msra.mxu0 %v16374_v17  ;;  %10611 = vmatpush1.bf16.msra.mxu1 %v16502_v36  ;;  %v599_v51 = vld [vmem:[#allocation5 + $0xcd0] sm:$0xff]  ;;  %v16486_v52 = vcombine.low %v607_v45, %v611_v14  ;;  %v16351_v17 = vcombine.high %v471_v57, %v475_v12 }
 0x3af   :  { %10569 = vmatprep.subr.bf16.mxu0 %v16367_v47  ;;  %10612 = vmatprep.subr.bf16.mxu1 %v16495_v1  ;;  %v603_v38 = vld [vmem:[#allocation5 + $0xcf0] sm:$0xff]  ;;  %v16350_v47 = vcombine.low %v471_v57, %v475_v12  ;;  %v16470_v14 = vcombine.low %v591_v53, %v595_v26 }
 0x3b0   :  { %v18839_v3 = vadd.f32 %v10302_v32, %v10260_v39  ;;  %v16479_v9 = vcombine.high %v599_v51, %v603_v38  ;;  %v467_v36 = vld [vmem:[#allocation5 + $0x8b0] sm:$0xff]  ;;  %v16478_v1 = vcombine.low %v599_v51, %v603_v38  ;;  %v16471_v39 = vcombine.high %v591_v53, %v595_v26 }
 0x3b1   :  { %v16343_v50 = vcombine.high %v463_v46, %v467_v36  ;;  %v459_v7 = vld [vmem:[#allocation5 + $0x870] sm:$0xff]  ;;  %v16342_v45 = vcombine.low %v463_v46, %v467_v36 }
 0x3b2   :  { %10570 = vmatpush1.bf16.msra.mxu0 %v16366_v61  ;;  %10613 = vmatpush1.bf16.msra.mxu1 %v16494_v5  ;;  %v455_v61 = vld [vmem:[#allocation5 + $0x850] sm:$0xff] }
 0x3b3   :  { %10571 = vmatprep.subr.bf16.mxu0 %v16359_v56  ;;  %10614 = vmatprep.subr.bf16.mxu1 %v16487_v41  ;;  %v583_v22 = vld [vmem:[#allocation5 + $0xc50] sm:$0xff]  ;;  %v16335_v5 = vcombine.high %v455_v61, %v459_v7  ;;  %v16334_v38 = vcombine.low %v455_v61, %v459_v7 }
 0x3b4   :  { %v587_v32 = vld [vmem:[#allocation5 + $0xc70] sm:$0xff] }
 0x3b5   :  { %v16463_v56 = vcombine.high %v583_v22, %v587_v32  ;;  %v451_v41 = vld [vmem:[#allocation5 + $0x830] sm:$0xff]  ;;  %v16462_v51 = vcombine.low %v583_v22, %v587_v32 }
 0x3b6   :  { %10572 = vmatpush1.bf16.msra.mxu0 %v16358_v43  ;;  %10615 = vmatpush1.bf16.msra.mxu1 %v16486_v52  ;;  %v447_v43 = vld [vmem:[#allocation5 + $0x810] sm:$0xff] }
 0x3b7   :  { %10573 = vmatprep.subr.bf16.mxu0 %v16351_v17  ;;  %10616 = vmatprep.subr.bf16.mxu1 %v16479_v9  ;;  %v575_v57 = vld [vmem:[#allocation5 + $0xc10] sm:$0xff]  ;;  %v16327_v52 = vcombine.high %v447_v43, %v451_v41  ;;  %v16326_v53 = vcombine.low %v447_v43, %v451_v41 }
 0x3b8   :  { %v579_v12 = vld [vmem:[#allocation5 + $0xc30] sm:$0xff] }
 0x3b9   :  { %v16455_v17 = vcombine.high %v575_v57, %v579_v12  ;;  %v567_v9 = vld [vmem:[#allocation5 + $0xbd0] sm:$0xff]  ;;  %v16454_v26 = vcombine.low %v575_v57, %v579_v12 }
 0x3ba   :  { %10574 = vmatpush1.bf16.msra.mxu0 %v16350_v47  ;;  %10617 = vmatpush1.bf16.msra.mxu1 %v16478_v1  ;;  %v571_v46 = vld [vmem:[#allocation5 + $0xbf0] sm:$0xff] }
 0x3bb   :  { %10575 = vmatprep.subr.bf16.mxu0 %v16343_v50  ;;  %10618 = vmatprep.subr.bf16.mxu1 %v16471_v39  ;;  %v695_v36 = vld [vmem:[#allocation5 + $0xfd0] sm:$0xff]  ;;  %v16447_v1 = vcombine.high %v567_v9, %v571_v46  ;;  %v16446_v22 = vcombine.low %v567_v9, %v571_v46 }
 0x3bc   :  { %v699_v47 = vld [vmem:[#allocation5 + $0xff0] sm:$0xff] }
 0x3bd   :  { %v16575_v50 = vcombine.high %v695_v36, %v699_v47  ;;  %v559_v39 = vld [vmem:[#allocation5 + $0xb90] sm:$0xff]  ;;  %v16574_v32 = vcombine.low %v695_v36, %v699_v47 }
 0x3be   :  { %10576 = vmatpush1.bf16.msra.mxu0 %v16342_v45  ;;  %10619 = vmatpush1.bf16.msra.mxu1 %v16470_v14  ;;  %v563_v61 = vld [vmem:[#allocation5 + $0xbb0] sm:$0xff] }
 0x3bf   :  { %10577 = vmatprep.subr.bf16.mxu0 %v16335_v5  ;;  %10620 = vmatprep.subr.bf16.mxu1 %v16463_v56  ;;  %v687_v7 = vld [vmem:[#allocation5 + $0xf90] sm:$0xff]  ;;  %v16439_v14 = vcombine.high %v559_v39, %v563_v61  ;;  %v16438_v57 = vcombine.low %v559_v39, %v563_v61 }
 0x3c0   :  { %v691_v45 = vld [vmem:[#allocation5 + $0xfb0] sm:$0xff] }
 0x3c1   :  { %v16567_v5 = vcombine.high %v687_v7, %v691_v45  ;;  %v551_v56 = vld [vmem:[#allocation5 + $0xb50] sm:$0xff]  ;;  %v16566_v12 = vcombine.low %v687_v7, %v691_v45 }
 0x3c2   :  { %10578 = vmatpush1.bf16.msra.mxu0 %v16334_v38  ;;  %10621 = vmatpush1.bf16.msra.mxu1 %v16462_v51  ;;  %v555_v43 = vld [vmem:[#allocation5 + $0xb70] sm:$0xff] }
 0x3c3   :  { %10579 = vmatprep.subr.bf16.mxu0 %v16327_v52  ;;  %10622 = vmatprep.subr.bf16.mxu1 %v16455_v17  ;;  %v679_v41 = vld [vmem:[#allocation5 + $0xf50] sm:$0xff]  ;;  %v16431_v51 = vcombine.high %v551_v56, %v555_v43  ;;  %v16430_v36 = vcombine.low %v551_v56, %v555_v43 }
 0x3c4   :  { %v683_v38 = vld [vmem:[#allocation5 + $0xf70] sm:$0xff] }
 0x3c5   :  { %v16559_v52 = vcombine.high %v679_v41, %v683_v38  ;;  %v543_v17 = vld [vmem:[#allocation5 + $0xb10] sm:$0xff]  ;;  %v16558_v47 = vcombine.low %v679_v41, %v683_v38 }
 0x3c6   :  { %10580 = vmatpush1.bf16.msra.mxu0 %v16326_v53  ;;  %10623 = vmatpush1.bf16.msra.mxu1 %v16454_v26  ;;  %v547_v9 = vld [vmem:[#allocation5 + $0xb30] sm:$0xff] }
 0x3c7   :  { %10581 = vmatprep.subr.bf16.mxu0 %v16447_v1  ;;  %10624 = vmatprep.subr.bf16.mxu1 %v16575_v50  ;;  %v671_v46 = vld [vmem:[#allocation5 + $0xf10] sm:$0xff]  ;;  %v16423_v26 = vcombine.high %v543_v17, %v547_v9  ;;  %v16422_v7 = vcombine.low %v543_v17, %v547_v9 }
 0x3c8   :  { %v675_v53 = vld [vmem:[#allocation5 + $0xf30] sm:$0xff] }
 0x3c9   :  { %v16551_v1 = vcombine.high %v671_v46, %v675_v53  ;;  %v535_v50 = vld [vmem:[#allocation5 + $0xad0] sm:$0xff]  ;;  %v16550_v45 = vcombine.low %v671_v46, %v675_v53 }
 0x3ca   :  { %10582 = vmatpush2.bf16.msra.mxu0 %v16446_v22  ;;  %10625 = vmatpush2.bf16.msra.mxu1 %v16574_v32  ;;  %v539_v39 = vld [vmem:[#allocation5 + $0xaf0] sm:$0xff] }
 0x3cb   :  { %10583 = vmatprep.subr.bf16.mxu0 %v16439_v14  ;;  %10626 = vmatprep.subr.bf16.mxu1 %v16567_v5  ;;  %v663_v61 = vld [vmem:[#allocation5 + $0xed0] sm:$0xff]  ;;  %v16415_v32 = vcombine.high %v535_v50, %v539_v39  ;;  %v16414_v41 = vcombine.low %v535_v50, %v539_v39 }
 0x3cc   :  { %v667_v22 = vld [vmem:[#allocation5 + $0xef0] sm:$0xff] }
 0x3cd   :  { %v16543_v14 = vcombine.high %v663_v61, %v667_v22  ;;  %v527_v5 = vld [vmem:[#allocation5 + $0xa90] sm:$0xff]  ;;  %v16542_v38 = vcombine.low %v663_v61, %v667_v22 }
 0x3ce   :  { %10584 = vmatpush2.bf16.msra.mxu0 %v16438_v57  ;;  %10627 = vmatpush2.bf16.msra.mxu1 %v16566_v12  ;;  %v531_v56 = vld [vmem:[#allocation5 + $0xab0] sm:$0xff] }
 0x3cf   :  { %10585 = vmatprep.subr.bf16.mxu0 %v16431_v51  ;;  %10628 = vmatprep.subr.bf16.mxu1 %v16559_v52  ;;  %v655_v43 = vld [vmem:[#allocation5 + $0xe90] sm:$0xff]  ;;  %v16407_v12 = vcombine.high %v527_v5, %v531_v56  ;;  %v16406_v46 = vcombine.low %v527_v5, %v531_v56 }
 0x3d0   :  { %v659_v57 = vld [vmem:[#allocation5 + $0xeb0] sm:$0xff] }
 0x3d1   :  { %v16535_v51 = vcombine.high %v655_v43, %v659_v57  ;;  %v519_v52 = vld [vmem:[#allocation5 + $0xa50] sm:$0xff]  ;;  %v16534_v53 = vcombine.low %v655_v43, %v659_v57 }
 0x3d2   :  { %10586 = vmatpush2.bf16.msra.mxu0 %v16430_v36  ;;  %10629 = vmatpush2.bf16.msra.mxu1 %v16558_v47  ;;  %v523_v17 = vld [vmem:[#allocation5 + $0xa70] sm:$0xff] }
 0x3d3   :  { %10587 = vmatprep.subr.bf16.mxu0 %v16423_v26  ;;  %10630 = vmatprep.subr.bf16.mxu1 %v16551_v1  ;;  %v647_v9 = vld [vmem:[#allocation5 + $0xe50] sm:$0xff]  ;;  %v16399_v47 = vcombine.high %v519_v52, %v523_v17  ;;  %v16398_v61 = vcombine.low %v519_v52, %v523_v17 }
 0x3d4   :  { %v651_v36 = vld [vmem:[#allocation5 + $0xe70] sm:$0xff] }
 0x3d5   :  { %v16527_v26 = vcombine.high %v647_v9, %v651_v36  ;;  %v511_v1 = vld [vmem:[#allocation5 + $0xa10] sm:$0xff]  ;;  %v16526_v22 = vcombine.low %v647_v9, %v651_v36  ;;  %v18841_v36 = vpop.f32.mrf.mxu0 }
 0x3d6   :  { %10588 = vmatpush2.bf16.msra.mxu0 %v16422_v7  ;;  %10631 = vmatpush2.bf16.msra.mxu1 %v16550_v45  ;;  %v515_v50 = vld [vmem:[#allocation5 + $0xa30] sm:$0xff]  ;;  %19325 = vst [vmem:[#allocation47_spill] sm:$0xff] %v18841_v36 }
 0x3d7   :  { %10589 = vmatprep.subr.bf16.mxu0 %v16415_v32  ;;  %10632 = vmatprep.subr.bf16.mxu1 %v16543_v14  ;;  %v639_v39 = vld [vmem:[#allocation5 + $0xe10] sm:$0xff]  ;;  %v16391_v45 = vcombine.high %v511_v1, %v515_v50  ;;  %v16390_v43 = vcombine.low %v511_v1, %v515_v50 }
 0x3d8   :  { %v643_v7 = vld [vmem:[#allocation5 + $0xe30] sm:$0xff] }
 0x3d9   :  { %v16519_v32 = vcombine.high %v639_v39, %v643_v7  ;;  %v759_v14 = vld [vmem:[#allocation5 + $0x11d0] sm:$0xff]  ;;  %v16518_v57 = vcombine.low %v639_v39, %v643_v7 }
 0x3da   :  { %10590 = vmatpush2.bf16.msra.mxu0 %v16414_v41  ;;  %10633 = vmatpush2.bf16.msra.mxu1 %v16542_v38  ;;  %v763_v5 = vld [vmem:[#allocation5 + $0x11f0] sm:$0xff] }
 0x3db   :  { %10591 = vmatprep.subr.bf16.mxu0 %v16407_v12  ;;  %10634 = vmatprep.subr.bf16.mxu1 %v16535_v51  ;;  %v887_v56 = vld [vmem:[#allocation5 + $0x15d0] sm:$0xff]  ;;  %v16639_v38 = vcombine.high %v759_v14, %v763_v5  ;;  %v16638_v9 = vcombine.low %v759_v14, %v763_v5 }
 0x3dc   :  { %v891_v41 = vld [vmem:[#allocation5 + $0x15f0] sm:$0xff] }
 0x3dd   :  { %v16767_v12 = vcombine.high %v887_v56, %v891_v41  ;;  %v751_v51 = vld [vmem:[#allocation5 + $0x1190] sm:$0xff] }
 0x3de   :  { %10592 = vmatpush2.bf16.msra.mxu0 %v16406_v46  ;;  %10635 = vmatpush2.bf16.msra.mxu1 %v16534_v53  ;;  %v755_v52 = vld [vmem:[#allocation5 + $0x11b0] sm:$0xff]  ;;  %v16766_v53 = vcombine.low %v887_v56, %v891_v41 }
 0x3df   :  { %10593 = vmatprep.subr.bf16.mxu0 %v16399_v47  ;;  %10636 = vmatprep.subr.bf16.mxu1 %v16527_v26  ;;  %v879_v17 = vld [vmem:[#allocation5 + $0x1590] sm:$0xff]  ;;  %v16631_v47 = vcombine.high %v751_v51, %v755_v52  ;;  %v18843_v26 = vpop.f32.mrf.mxu1  ;;  %v16630_v14 = vcombine.low %v751_v51, %v755_v52 }
 0x3e0   :  { %v883_v46 = vld [vmem:[#allocation5 + $0x15b0] sm:$0xff]  ;;  %19326 = vst [vmem:[#allocation48_spill] sm:$0xff] %v18843_v26 }
 0x3e1   :  { %v16759_v1 = vcombine.high %v879_v17, %v883_v46  ;;  %v743_v50 = vld [vmem:[#allocation5 + $0x1150] sm:$0xff]  ;;  %v16758_v56 = vcombine.low %v879_v17, %v883_v46 }
 0x3e2   :  { %10594 = vmatpush2.bf16.msra.mxu0 %v16398_v61  ;;  %10637 = vmatpush2.bf16.msra.mxu1 %v16526_v22  ;;  %v747_v39 = vld [vmem:[#allocation5 + $0x1170] sm:$0xff] }
 0x3e3   :  { %10595 = vmatprep.subr.bf16.mxu0 %v16391_v45  ;;  %10638 = vmatprep.subr.bf16.mxu1 %v16519_v32  ;;  %v871_v61 = vld [vmem:[#allocation5 + $0x1550] sm:$0xff]  ;;  %v16623_v41 = vcombine.high %v743_v50, %v747_v39  ;;  %v16622_v52 = vcombine.low %v743_v50, %v747_v39 }
 0x3e4   :  { %v875_v22 = vld [vmem:[#allocation5 + $0x1570] sm:$0xff] }
 0x3e5   :  { %v739_v26 = vld [vmem:[#allocation5 + $0x1130] sm:$0xff]  ;;  %v16750_v46 = vcombine.low %v871_v61, %v875_v22 }
 0x3e6   :  { %10596 = vmatpush2.bf16.msra.mxu0 %v16390_v43  ;;  %10639 = vmatpush2.bf16.msra.mxu1 %v16518_v57  ;;  %v719_v39 = vld [vmem:[#allocation5 + $0x1090] sm:$0xff] }
 0x3e7   :  { %10651 = vmatprep.subr.bf16.mxu0 %v16639_v38  ;;  %10694 = vmatprep.subr.bf16.mxu1 %v16767_v12  ;;  %v16751_v38 = vcombine.high %v871_v61, %v875_v22  ;;  %v735_v12 = vld [vmem:[#allocation5 + $0x1110] sm:$0xff] }
 0x3e8   :  { %v16614_v36 = vcombine.low %v735_v12, %v739_v26  ;;  %v847_v61 = vld [vmem:[#allocation5 + $0x1490] sm:$0xff] }
 0x3e9   :  { %v10341_v7 = vpop.f32.mrf.mxu0  ;;  %10598 = vmatmul.mubr.bf16.vlgmr.msra.gmra.mxu0 %v18616_v48  ;;  %v10384_v32 = vpop.f32.mrf.mxu1  ;;  %10641 = vmatmul.mubr.bf16.vlgmr.msra.gmra.mxu1 %v18618_v49  ;;  %v851_v22 = vld [vmem:[#allocation5 + $0x14b0] sm:$0xff] }
 0x3ea   :  { %v10342_v45 = vadd.f32 %v10341_v7, %v18832_v28  ;;  %10652 = vmatpush1.bf16.msra.mxu0 %v16638_v9  ;;  %10695 = vmatpush1.bf16.msra.mxu1 %v16766_v53  ;;  %v863_v7 = vld [vmem:[#allocation5 + $0x1510] sm:$0xff]  ;;  %v16615_v53 = vcombine.high %v735_v12, %v739_v26 }
 0x3eb   :  { %v18848_v5 = vpop.f32.mrf.mxu0  ;;  %10653 = vmatprep.subr.bf16.mxu0 %v16631_v47  ;;  %v18852_v57 = vpop.f32.mrf.mxu1  ;;  %10696 = vmatprep.subr.bf16.mxu1 %v16759_v1  ;;  %v867_v9 = vld [vmem:[#allocation5 + $0x1530] sm:$0xff] }
 0x3ec   :  { %19327 = vst [vmem:[#allocation49_spill] sm:$0xff] %v18848_v5  ;;  %v18850_v43 = vadd.f32 %v10384_v32, %v10342_v45  ;;  %19328 = vst [vmem:[#allocation50_spill] sm:$0xff] %v18852_v57  ;;  %10683 = vmatprep.mubr.bf16.mxu0 %v18620_v59  ;;  %10726 = vmatprep.mubr.bf16.mxu1 %v18623_v62  ;;  %v16743_v1 = vcombine.high %v863_v7, %v867_v9  ;;  %v727_v45 = vld [vmem:[#allocation5 + $0x10d0] sm:$0xff] }
 0x3ed   :  { %v10345_v28 = vpop.f32.mrf.mxu0  ;;  %v10388_v17 = vpop.f32.mrf.mxu1  ;;  %v731_v32 = vld [vmem:[#allocation5 + $0x10f0] sm:$0xff] }
 0x3ee   :  { %v10346_v51 = vadd.f32 %v10345_v28, %v18839_v3  ;;  %10654 = vmatpush1.bf16.msra.mxu0 %v16630_v14  ;;  %10697 = vmatpush1.bf16.msra.mxu1 %v16758_v56  ;;  %v855_v57 = vld [vmem:[#allocation5 + $0x14d0] sm:$0xff]  ;;  %v16742_v3 = vcombine.low %v863_v7, %v867_v9  ;;  %v16607_v14 = vcombine.high %v727_v45, %v731_v32 }
 0x3ef   :  { %10655 = vmatprep.subr.bf16.mxu0 %v16623_v41  ;;  %10698 = vmatprep.subr.bf16.mxu1 %v16751_v38  ;;  %v859_v5 = vld [vmem:[#allocation5 + $0x14f0] sm:$0xff]  ;;  %v16606_v41 = vcombine.low %v727_v45, %v731_v32  ;;  %v16726_v9 = vcombine.low %v847_v61, %v851_v22 }
 0x3f0   :  { %v18857_v47 = vadd.f32 %v10388_v17, %v10346_v51  ;;  %v16735_v50 = vcombine.high %v855_v57, %v859_v5  ;;  %v723_v56 = vld [vmem:[#allocation5 + $0x10b0] sm:$0xff]  ;;  %v16734_v38 = vcombine.low %v855_v57, %v859_v5  ;;  %v16727_v51 = vcombine.high %v847_v61, %v851_v22 }
 0x3f1   :  { %v16599_v28 = vcombine.high %v719_v39, %v723_v56  ;;  %v715_v26 = vld [vmem:[#allocation5 + $0x1070] sm:$0xff]  ;;  %v16598_v7 = vcombine.low %v719_v39, %v723_v56 }
 0x3f2   :  { %10656 = vmatpush1.bf16.msra.mxu0 %v16622_v52  ;;  %10699 = vmatpush1.bf16.msra.mxu1 %v16750_v46  ;;  %v711_v52 = vld [vmem:[#allocation5 + $0x1050] sm:$0xff] }
 0x3f3   :  { %10657 = vmatprep.subr.bf16.mxu0 %v16615_v53  ;;  %10700 = vmatprep.subr.bf16.mxu1 %v16743_v1  ;;  %v839_v12 = vld [vmem:[#allocation5 + $0x1450] sm:$0xff]  ;;  %v16591_v46 = vcombine.high %v711_v52, %v715_v26  ;;  %v16590_v5 = vcombine.low %v711_v52, %v715_v26 }
 0x3f4   :  { %v843_v17 = vld [vmem:[#allocation5 + $0x1470] sm:$0xff] }
 0x3f5   :  { %v16719_v53 = vcombine.high %v839_v12, %v843_v17  ;;  %v707_v1 = vld [vmem:[#allocation5 + $0x1030] sm:$0xff]  ;;  %v16718_v57 = vcombine.low %v839_v12, %v843_v17 }
 0x3f6   :  { %10658 = vmatpush1.bf16.msra.mxu0 %v16614_v36  ;;  %10701 = vmatpush1.bf16.msra.mxu1 %v16742_v3  ;;  %v703_v36 = vld [vmem:[#allocation5 + $0x1010] sm:$0xff] }
 0x3f7   :  { %10659 = vmatprep.subr.bf16.mxu0 %v16607_v14  ;;  %10702 = vmatprep.subr.bf16.mxu1 %v16735_v50  ;;  %v831_v45 = vld [vmem:[#allocation5 + $0x1410] sm:$0xff]  ;;  %v16583_v3 = vcombine.high %v703_v36, %v707_v1  ;;  %v16582_v61 = vcombine.low %v703_v36, %v707_v1 }
 0x3f8   :  { %v835_v32 = vld [vmem:[#allocation5 + $0x1430] sm:$0xff] }
 0x3f9   :  { %v16711_v14 = vcombine.high %v831_v45, %v835_v32  ;;  %v823_v50 = vld [vmem:[#allocation5 + $0x13d0] sm:$0xff]  ;;  %v16710_v22 = vcombine.low %v831_v45, %v835_v32 }
 0x3fa   :  { %10660 = vmatpush1.bf16.msra.mxu0 %v16606_v41  ;;  %10703 = vmatpush1.bf16.msra.mxu1 %v16734_v38  ;;  %v827_v39 = vld [vmem:[#allocation5 + $0x13f0] sm:$0xff] }
 0x3fb   :  { %10661 = vmatprep.subr.bf16.mxu0 %v16599_v28  ;;  %10704 = vmatprep.subr.bf16.mxu1 %v16727_v51  ;;  %v951_v56 = vld [vmem:[#allocation5 + $0x17d0] sm:$0xff]  ;;  %v16703_v38 = vcombine.high %v823_v50, %v827_v39  ;;  %v16702_v12 = vcombine.low %v823_v50, %v827_v39 }
 0x3fc   :  { %v955_v41 = vld [vmem:[#allocation5 + $0x17f0] sm:$0xff] }
 0x3fd   :  { %v16831_v28 = vcombine.high %v951_v56, %v955_v41  ;;  %v815_v51 = vld [vmem:[#allocation5 + $0x1390] sm:$0xff]  ;;  %v16830_v17 = vcombine.low %v951_v56, %v955_v41 }
 0x3fe   :  { %10662 = vmatpush1.bf16.msra.mxu0 %v16598_v7  ;;  %10705 = vmatpush1.bf16.msra.mxu1 %v16726_v9  ;;  %v819_v52 = vld [vmem:[#allocation5 + $0x13b0] sm:$0xff] }
 0x3ff   :  { %10663 = vmatprep.subr.bf16.mxu0 %v16591_v46  ;;  %10706 = vmatprep.subr.bf16.mxu1 %v16719_v53  ;;  %v943_v26 = vld [vmem:[#allocation5 + $0x1790] sm:$0xff]  ;;  %v16695_v9 = vcombine.high %v815_v51, %v819_v52  ;;  %v16694_v45 = vcombine.low %v815_v51, %v819_v52 }
 0x400   :  { %v947_v7 = vld [vmem:[#allocation5 + $0x17b0] sm:$0xff] }
 0x401   :  { %v16823_v46 = vcombine.high %v943_v26, %v947_v7  ;;  %v807_v53 = vld [vmem:[#allocation5 + $0x1350] sm:$0xff]  ;;  %v16822_v32 = vcombine.low %v943_v26, %v947_v7 }
 0x402   :  { %10664 = vmatpush1.bf16.msra.mxu0 %v16590_v5  ;;  %10707 = vmatpush1.bf16.msra.mxu1 %v16718_v57  ;;  %v811_v36 = vld [vmem:[#allocation5 + $0x1370] sm:$0xff] }
 0x403   :  { %10665 = vmatprep.subr.bf16.mxu0 %v16583_v3  ;;  %10708 = vmatprep.subr.bf16.mxu1 %v16711_v14  ;;  %v935_v1 = vld [vmem:[#allocation5 + $0x1750] sm:$0xff]  ;;  %v16687_v57 = vcombine.high %v807_v53, %v811_v36  ;;  %v16686_v56 = vcombine.low %v807_v53, %v811_v36 }
 0x404   :  { %v939_v5 = vld [vmem:[#allocation5 + $0x1770] sm:$0xff] }
 0x405   :  { %v16815_v3 = vcombine.high %v935_v1, %v939_v5  ;;  %v799_v14 = vld [vmem:[#allocation5 + $0x1310] sm:$0xff]  ;;  %v16814_v41 = vcombine.low %v935_v1, %v939_v5 }
 0x406   :  { %10666 = vmatpush1.bf16.msra.mxu0 %v16582_v61  ;;  %10709 = vmatpush1.bf16.msra.mxu1 %v16710_v22  ;;  %v803_v50 = vld [vmem:[#allocation5 + $0x1330] sm:$0xff] }
 0x407   :  { %10667 = vmatprep.subr.bf16.mxu0 %v16703_v38  ;;  %10710 = vmatprep.subr.bf16.mxu1 %v16831_v28  ;;  %v927_v39 = vld [vmem:[#allocation5 + $0x1710] sm:$0xff]  ;;  %v16679_v22 = vcombine.high %v799_v14, %v803_v50  ;;  %v16678_v26 = vcombine.low %v799_v14, %v803_v50 }
 0x408   :  { %v931_v61 = vld [vmem:[#allocation5 + $0x1730] sm:$0xff] }
 0x409   :  { %v16807_v38 = vcombine.high %v927_v39, %v931_v61  ;;  %v791_v28 = vld [vmem:[#allocation5 + $0x12d0] sm:$0xff]  ;;  %v16806_v7 = vcombine.low %v927_v39, %v931_v61 }
 0x40a   :  { %10668 = vmatpush2.bf16.msra.mxu0 %v16702_v12  ;;  %10711 = vmatpush2.bf16.msra.mxu1 %v16830_v17  ;;  %v795_v51 = vld [vmem:[#allocation5 + $0x12f0] sm:$0xff] }
 0x40b   :  { %10669 = vmatprep.subr.bf16.mxu0 %v16695_v9  ;;  %10712 = vmatprep.subr.bf16.mxu1 %v16823_v46  ;;  %v919_v52 = vld [vmem:[#allocation5 + $0x16d0] sm:$0xff]  ;;  %v16671_v17 = vcombine.high %v791_v28, %v795_v51  ;;  %v16670_v1 = vcombine.low %v791_v28, %v795_v51 }
 0x40c   :  { %v923_v12 = vld [vmem:[#allocation5 + $0x16f0] sm:$0xff] }
 0x40d   :  { %v16799_v9 = vcombine.high %v919_v52, %v923_v12  ;;  %v783_v46 = vld [vmem:[#allocation5 + $0x1290] sm:$0xff]  ;;  %v16798_v5 = vcombine.low %v919_v52, %v923_v12 }
 0x40e   :  { %10670 = vmatpush2.bf16.msra.mxu0 %v16694_v45  ;;  %10713 = vmatpush2.bf16.msra.mxu1 %v16822_v32  ;;  %v787_v53 = vld [vmem:[#allocation5 + $0x12b0] sm:$0xff] }
 0x40f   :  { %10671 = vmatprep.subr.bf16.mxu0 %v16687_v57  ;;  %10714 = vmatprep.subr.bf16.mxu1 %v16815_v3  ;;  %v911_v36 = vld [vmem:[#allocation5 + $0x1690] sm:$0xff]  ;;  %v16663_v32 = vcombine.high %v783_v46, %v787_v53  ;;  %v16662_v39 = vcombine.low %v783_v46, %v787_v53 }
 0x410   :  { %v915_v45 = vld [vmem:[#allocation5 + $0x16b0] sm:$0xff] }
 0x411   :  { %v16791_v57 = vcombine.high %v911_v36, %v915_v45  ;;  %v775_v3 = vld [vmem:[#allocation5 + $0x1250] sm:$0xff]  ;;  %v16790_v61 = vcombine.low %v911_v36, %v915_v45 }
 0x412   :  { %10672 = vmatpush2.bf16.msra.mxu0 %v16686_v56  ;;  %10715 = vmatpush2.bf16.msra.mxu1 %v16814_v41  ;;  %v779_v14 = vld [vmem:[#allocation5 + $0x1270] sm:$0xff] }
 0x413   :  { %10673 = vmatprep.subr.bf16.mxu0 %v16679_v22  ;;  %10716 = vmatprep.subr.bf16.mxu1 %v16807_v38  ;;  %v903_v50 = vld [vmem:[#allocation5 + $0x1650] sm:$0xff]  ;;  %v16655_v41 = vcombine.high %v775_v3, %v779_v14  ;;  %v16654_v52 = vcombine.low %v775_v3, %v779_v14 }
 0x414   :  { %v907_v56 = vld [vmem:[#allocation5 + $0x1670] sm:$0xff] }
 0x415   :  { %v16783_v22 = vcombine.high %v903_v50, %v907_v56  ;;  %v767_v38 = vld [vmem:[#allocation5 + $0x1210] sm:$0xff]  ;;  %v16782_v12 = vcombine.low %v903_v50, %v907_v56  ;;  %v18859_v56 = vpop.f32.mrf.mxu0 }
 0x416   :  { %10674 = vmatpush2.bf16.msra.mxu0 %v16678_v26  ;;  %10717 = vmatpush2.bf16.msra.mxu1 %v16806_v7  ;;  %v771_v28 = vld [vmem:[#allocation5 + $0x1230] sm:$0xff]  ;;  %19329 = vst [vmem:[#allocation51_spill] sm:$0xff] %v18859_v56 }
 0x417   :  { %10675 = vmatprep.subr.bf16.mxu0 %v16671_v17  ;;  %10718 = vmatprep.subr.bf16.mxu1 %v16799_v9  ;;  %v895_v51 = vld [vmem:[#allocation5 + $0x1610] sm:$0xff]  ;;  %v16647_v7 = vcombine.high %v767_v38, %v771_v28  ;;  %v16646_v36 = vcombine.low %v767_v38, %v771_v28 }
 0x418   :  { %v899_v26 = vld [vmem:[#allocation5 + $0x1630] sm:$0xff] }
 0x419   :  { %v16775_v17 = vcombine.high %v895_v51, %v899_v26  ;;  %v1015_v9 = vld [vmem:[#allocation5 + $0x19d0] sm:$0xff]  ;;  %v16774_v45 = vcombine.low %v895_v51, %v899_v26 }
 0x41a   :  { %10676 = vmatpush2.bf16.msra.mxu0 %v16670_v1  ;;  %10719 = vmatpush2.bf16.msra.mxu1 %v16798_v5  ;;  %v1019_v46 = vld [vmem:[#allocation5 + $0x19f0] sm:$0xff] }
 0x41b   :  { %10677 = vmatprep.subr.bf16.mxu0 %v16663_v32  ;;  %10720 = vmatprep.subr.bf16.mxu1 %v16791_v57  ;;  %v1143_v53 = vld [vmem:[#allocation5 + $0x1dd0] sm:$0xff]  ;;  %v16895_v5 = vcombine.high %v1015_v9, %v1019_v46  ;;  %v16894_v50 = vcombine.low %v1015_v9, %v1019_v46 }
 0x41c   :  { %v1147_v1 = vld [vmem:[#allocation5 + $0x1df0] sm:$0xff] }
 0x41d   :  { %v17023_v32 = vcombine.high %v1143_v53, %v1147_v1  ;;  %v1007_v57 = vld [vmem:[#allocation5 + $0x1990] sm:$0xff] }
 0x41e   :  { %10678 = vmatpush2.bf16.msra.mxu0 %v16662_v39  ;;  %10721 = vmatpush2.bf16.msra.mxu1 %v16790_v61  ;;  %v1011_v3 = vld [vmem:[#allocation5 + $0x19b0] sm:$0xff]  ;;  %v17022_v61 = vcombine.low %v1143_v53, %v1147_v1 }
 0x41f   :  { %10679 = vmatprep.subr.bf16.mxu0 %v16655_v41  ;;  %10722 = vmatprep.subr.bf16.mxu1 %v16783_v22  ;;  %v1135_v14 = vld [vmem:[#allocation5 + $0x1d90] sm:$0xff]  ;;  %v16887_v41 = vcombine.high %v1007_v57, %v1011_v3  ;;  %v18861_v22 = vpop.f32.mrf.mxu1  ;;  %v16886_v9 = vcombine.low %v1007_v57, %v1011_v3 }
 0x420   :  { %v1139_v39 = vld [vmem:[#allocation5 + $0x1db0] sm:$0xff]  ;;  %19330 = vst [vmem:[#allocation52_spill] sm:$0xff] %v18861_v22 }
 0x421   :  { %v17015_v38 = vcombine.high %v1135_v14, %v1139_v39  ;;  %v999_v28 = vld [vmem:[#allocation5 + $0x1950] sm:$0xff]  ;;  %v17014_v53 = vcombine.low %v1135_v14, %v1139_v39 }
 0x422   :  { %10680 = vmatpush2.bf16.msra.mxu0 %v16654_v52  ;;  %10723 = vmatpush2.bf16.msra.mxu1 %v16782_v12  ;;  %v1003_v51 = vld [vmem:[#allocation5 + $0x1970] sm:$0xff] }
 0x423   :  { %10681 = vmatprep.subr.bf16.mxu0 %v16647_v7  ;;  %10724 = vmatprep.subr.bf16.mxu1 %v16775_v17  ;;  %v1127_v52 = vld [vmem:[#allocation5 + $0x1d50] sm:$0xff]  ;;  %v16879_v1 = vcombine.high %v999_v28, %v1003_v51  ;;  %v16878_v3 = vcombine.low %v999_v28, %v1003_v51 }
 0x424   :  { %v1131_v12 = vld [vmem:[#allocation5 + $0x1d70] sm:$0xff] }
 0x425   :  { %v995_v22 = vld [vmem:[#allocation5 + $0x1930] sm:$0xff]  ;;  %v17006_v39 = vcombine.low %v1127_v52, %v1131_v12 }
 0x426   :  { %10682 = vmatpush2.bf16.msra.mxu0 %v16646_v36  ;;  %10725 = vmatpush2.bf16.msra.mxu1 %v16774_v45  ;;  %v1123_v56 = vld [vmem:[#allocation5 + $0x1d30] sm:$0xff] }
 0x427   :  { %10737 = vmatprep.subr.bf16.mxu0 %v16895_v5  ;;  %10780 = vmatprep.subr.bf16.mxu1 %v17023_v32  ;;  %v17007_v5 = vcombine.high %v1127_v52, %v1131_v12  ;;  %v991_v32 = vld [vmem:[#allocation5 + $0x1910] sm:$0xff] }
 0x428   :  { %v16870_v35 = vcombine.low %v991_v32, %v995_v22  ;;  %v975_v12 = vld [vmem:[#allocation5 + $0x1890] sm:$0xff] }
 0x429   :  { %v10427_v26 = vpop.f32.mrf.mxu0  ;;  %10684 = vmatmul.mubr.bf16.vlgmr.msra.gmra.mxu0 %v18628_v15  ;;  %v10470_v17 = vpop.f32.mrf.mxu1  ;;  %10727 = vmatmul.mubr.bf16.vlgmr.msra.gmra.mxu1 %v18630_v19 }
 0x42a   :  { %v10428_v7 = vadd.f32 %v10427_v26, %v18850_v43  ;;  %10738 = vmatpush1.bf16.msra.mxu0 %v16894_v50  ;;  %10781 = vmatpush1.bf16.msra.mxu1 %v17022_v61  ;;  %v1119_v26 = vld [vmem:[#allocation5 + $0x1d10] sm:$0xff]  ;;  %v16871_v50 = vcombine.high %v991_v32, %v995_v22 }
 0x42b   :  { %v18866_v46 = vpop.f32.mrf.mxu0  ;;  %10739 = vmatprep.subr.bf16.mxu0 %v16887_v41  ;;  %v18868_v45 = vpop.f32.mrf.mxu1  ;;  %10782 = vmatprep.subr.bf16.mxu1 %v17015_v38  ;;  %v16999_v41 = vcombine.high %v1119_v26, %v1123_v56  ;;  %v983_v38 = vld [vmem:[#allocation5 + $0x18d0] sm:$0xff] }
 0x42c   :  { %19331 = vst [vmem:[#allocation53_spill] sm:$0xff] %v18866_v46  ;;  %v10471_v36 = vadd.f32 %v10470_v17, %v10428_v7  ;;  %19332 = vst [vmem:[#allocation54_spill] sm:$0xff] %v18868_v45  ;;  %10769 = vmatprep.mubr.bf16.mxu0 %v18632_v30  ;;  %10812 = vmatprep.mubr.bf16.mxu1 %v18635_v33  ;;  %v987_v7 = vld [vmem:[#allocation5 + $0x18f0] sm:$0xff] }
 0x42d   :  { %v10431_v43 = vpop.f32.mrf.mxu0  ;;  %v10474_v14 = vpop.f32.mrf.mxu1  ;;  %v1111_v17 = vld [vmem:[#allocation5 + $0x1cd0] sm:$0xff]  ;;  %v16863_v28 = vcombine.high %v983_v38, %v987_v7 }
 0x42e   :  { %v10432_v57 = vadd.f32 %v10431_v43, %v18857_v47  ;;  %10740 = vmatpush1.bf16.msra.mxu0 %v16886_v9  ;;  %10783 = vmatpush1.bf16.msra.mxu1 %v17014_v53  ;;  %v1115_v45 = vld [vmem:[#allocation5 + $0x1cf0] sm:$0xff]  ;;  %v11513_v46 = vmax.f32 %v10471_v36, 0.0  ;;  %v16998_v47 = vcombine.low %v1119_v26, %v1123_v56 }
 0x42f   :  { %10741 = vmatprep.subr.bf16.mxu0 %v16879_v1  ;;  %10784 = vmatprep.subr.bf16.mxu1 %v17007_v5  ;;  %v16991_v52 = vcombine.high %v1111_v17, %v1115_v45  ;;  %v979_v9 = vld [vmem:[#allocation5 + $0x18b0] sm:$0xff]  ;;  %v16862_v5 = vcombine.low %v983_v38, %v987_v7  ;;  %v16990_v36 = vcombine.low %v1111_v17, %v1115_v45 }
 0x430   :  { %v10475_v61 = vadd.f32 %v10474_v14, %v10432_v57  ;;  %v1103_v53 = vld [vmem:[#allocation5 + $0x1c90] sm:$0xff]  ;;  %v16855_v43 = vcombine.high %v975_v12, %v979_v9 }
 0x431   :  { %v1107_v1 = vld [vmem:[#allocation5 + $0x1cb0] sm:$0xff] }
 0x432   :  { %v11521_v10 = vmax.f32 %v10475_v61, 0.0  ;;  %10742 = vmatpush1.bf16.msra.mxu0 %v16878_v3  ;;  %10785 = vmatpush1.bf16.msra.mxu1 %v17006_v39  ;;  %v16983_v22 = vcombine.high %v1103_v53, %v1107_v1  ;;  %v967_v32 = vld [vmem:[#allocation5 + $0x1850] sm:$0xff] }
 0x433   :  { %10743 = vmatprep.subr.bf16.mxu0 %v16871_v50  ;;  %10786 = vmatprep.subr.bf16.mxu1 %v16999_v41  ;;  %v971_v57 = vld [vmem:[#allocation5 + $0x1870] sm:$0xff] }
 0x434   :  { %v18873_v51 = vpack.c.bf16 %v11521_v10, %v11513_v46  ;;  %v1095_v56 = vld [vmem:[#allocation5 + $0x1c50] sm:$0xff]  ;;  %v16854_v10 = vcombine.low %v975_v12, %v979_v9  ;;  %v16982_v46 = vcombine.low %v1103_v53, %v1107_v1  ;;  %v16847_v3 = vcombine.high %v967_v32, %v971_v57 }
 0x435   :  { %v1099_v26 = vld [vmem:[#allocation5 + $0x1c70] sm:$0xff]  ;;  %v16846_v45 = vcombine.low %v967_v32, %v971_v57 }
 0x436   :  { %19333 = vst [vmem:[#allocation55_spill] sm:$0xff] %v18873_v51  ;;  %10744 = vmatpush1.bf16.msra.mxu0 %v16870_v35  ;;  %10787 = vmatpush1.bf16.msra.mxu1 %v16998_v47  ;;  %v16975_v14 = vcombine.high %v1095_v56, %v1099_v26  ;;  %v959_v35 = vld [vmem:[#allocation5 + $0x1810] sm:$0xff]  ;;  %v16974_v41 = vcombine.low %v1095_v56, %v1099_v26 }
 0x437   :  { %10745 = vmatprep.subr.bf16.mxu0 %v16863_v28  ;;  %10788 = vmatprep.subr.bf16.mxu1 %v16991_v52  ;;  %v963_v39 = vld [vmem:[#allocation5 + $0x1830] sm:$0xff] }
 0x438   :  { %v1087_v50 = vld [vmem:[#allocation5 + $0x1c10] sm:$0xff]  ;;  %v16839_v38 = vcombine.high %v959_v35, %v963_v39  ;;  %v16838_v12 = vcombine.low %v959_v35, %v963_v39 }
 0x439   :  { %v1091_v61 = vld [vmem:[#allocation5 + $0x1c30] sm:$0xff] }
 0x43a   :  { %10746 = vmatpush1.bf16.msra.mxu0 %v16862_v5  ;;  %10789 = vmatpush1.bf16.msra.mxu1 %v16990_v36  ;;  %v16967_v7 = vcombine.high %v1087_v50, %v1091_v61  ;;  %v1079_v17 = vld [vmem:[#allocation5 + $0x1bd0] sm:$0xff]  ;;  %v16966_v9 = vcombine.low %v1087_v50, %v1091_v61 }
 0x43b   :  { %10747 = vmatprep.subr.bf16.mxu0 %v16855_v43  ;;  %10790 = vmatprep.subr.bf16.mxu1 %v16983_v22  ;;  %v1083_v47 = vld [vmem:[#allocation5 + $0x1bf0] sm:$0xff] }
 0x43c   :  { %v1207_v28 = vld [vmem:[#allocation5 + $0x1fd0] sm:$0xff]  ;;  %v16959_v53 = vcombine.high %v1079_v17, %v1083_v47  ;;  %v16958_v32 = vcombine.low %v1079_v17, %v1083_v47 }
 0x43d   :  { %v1211_v52 = vld [vmem:[#allocation5 + $0x1ff0] sm:$0xff] }
 0x43e   :  { %10748 = vmatpush1.bf16.msra.mxu0 %v16854_v10  ;;  %10791 = vmatpush1.bf16.msra.mxu1 %v16982_v46  ;;  %v17087_v1 = vcombine.high %v1207_v28, %v1211_v52  ;;  %v1071_v5 = vld [vmem:[#allocation5 + $0x1b90] sm:$0xff]  ;;  %v17086_v57 = vcombine.low %v1207_v28, %v1211_v52 }
 0x43f   :  { %10749 = vmatprep.subr.bf16.mxu0 %v16847_v3  ;;  %10792 = vmatprep.subr.bf16.mxu1 %v16975_v14  ;;  %v1075_v36 = vld [vmem:[#allocation5 + $0x1bb0] sm:$0xff] }
 0x440   :  { %v1199_v43 = vld [vmem:[#allocation5 + $0x1f90] sm:$0xff]  ;;  %v16951_v56 = vcombine.high %v1071_v5, %v1075_v36  ;;  %v16950_v35 = vcombine.low %v1071_v5, %v1075_v36 }
 0x441   :  { %v1203_v22 = vld [vmem:[#allocation5 + $0x1fb0] sm:$0xff] }
 0x442   :  { %10750 = vmatpush1.bf16.msra.mxu0 %v16846_v45  ;;  %10793 = vmatpush1.bf16.msra.mxu1 %v16974_v41  ;;  %v17079_v26 = vcombine.high %v1199_v43, %v1203_v22  ;;  %v1063_v10 = vld [vmem:[#allocation5 + $0x1b50] sm:$0xff]  ;;  %v17078_v39 = vcombine.low %v1199_v43, %v1203_v22 }
 0x443   :  { %10751 = vmatprep.subr.bf16.mxu0 %v16839_v38  ;;  %10794 = vmatprep.subr.bf16.mxu1 %v16967_v7  ;;  %v1067_v46 = vld [vmem:[#allocation5 + $0x1b70] sm:$0xff] }
 0x444   :  { %v1191_v3 = vld [vmem:[#allocation5 + $0x1f50] sm:$0xff]  ;;  %v16943_v50 = vcombine.high %v1063_v10, %v1067_v46  ;;  %v16942_v17 = vcombine.low %v1063_v10, %v1067_v46 }
 0x445   :  { %v1195_v14 = vld [vmem:[#allocation5 + $0x1f70] sm:$0xff] }
 0x446   :  { %10752 = vmatpush1.bf16.msra.mxu0 %v16838_v12  ;;  %10795 = vmatpush1.bf16.msra.mxu1 %v16966_v9  ;;  %v17071_v61 = vcombine.high %v1191_v3, %v1195_v14  ;;  %v1055_v45 = vld [vmem:[#allocation5 + $0x1b10] sm:$0xff]  ;;  %v17070_v47 = vcombine.low %v1191_v3, %v1195_v14 }
 0x447   :  { %10753 = vmatprep.subr.bf16.mxu0 %v16959_v53  ;;  %10796 = vmatprep.subr.bf16.mxu1 %v17087_v1  ;;  %v1059_v41 = vld [vmem:[#allocation5 + $0x1b30] sm:$0xff] }
 0x448   :  { %v1183_v38 = vld [vmem:[#allocation5 + $0x1f10] sm:$0xff]  ;;  %v16935_v28 = vcombine.high %v1055_v45, %v1059_v41  ;;  %v16934_v5 = vcombine.low %v1055_v45, %v1059_v41 }
 0x449   :  { %v1187_v7 = vld [vmem:[#allocation5 + $0x1f30] sm:$0xff] }
 0x44a   :  { %10754 = vmatpush2.bf16.msra.mxu0 %v16958_v32  ;;  %10797 = vmatpush2.bf16.msra.mxu1 %v17086_v57  ;;  %v17063_v52 = vcombine.high %v1183_v38, %v1187_v7  ;;  %v1047_v12 = vld [vmem:[#allocation5 + $0x1ad0] sm:$0xff]  ;;  %v17062_v36 = vcombine.low %v1183_v38, %v1187_v7 }
 0x44b   :  { %10755 = vmatprep.subr.bf16.mxu0 %v16951_v56  ;;  %10798 = vmatprep.subr.bf16.mxu1 %v17079_v26  ;;  %v1051_v9 = vld [vmem:[#allocation5 + $0x1af0] sm:$0xff] }
 0x44c   :  { %v1175_v53 = vld [vmem:[#allocation5 + $0x1ed0] sm:$0xff]  ;;  %v16927_v43 = vcombine.high %v1047_v12, %v1051_v9  ;;  %v16926_v10 = vcombine.low %v1047_v12, %v1051_v9 }
 0x44d   :  { %v1179_v1 = vld [vmem:[#allocation5 + $0x1ef0] sm:$0xff] }
 0x44e   :  { %10756 = vmatpush2.bf16.msra.mxu0 %v16950_v35  ;;  %10799 = vmatpush2.bf16.msra.mxu1 %v17078_v39  ;;  %v17055_v22 = vcombine.high %v1175_v53, %v1179_v1  ;;  %v1039_v32 = vld [vmem:[#allocation5 + $0x1a90] sm:$0xff]  ;;  %v17054_v46 = vcombine.low %v1175_v53, %v1179_v1 }
 0x44f   :  { %10757 = vmatprep.subr.bf16.mxu0 %v16943_v50  ;;  %10800 = vmatprep.subr.bf16.mxu1 %v17071_v61  ;;  %v1043_v57 = vld [vmem:[#allocation5 + $0x1ab0] sm:$0xff] }
 0x450   :  { %v1167_v56 = vld [vmem:[#allocation5 + $0x1e90] sm:$0xff]  ;;  %v16919_v3 = vcombine.high %v1039_v32, %v1043_v57  ;;  %v16918_v45 = vcombine.low %v1039_v32, %v1043_v57  ;;  %v19296_v57 = vsub.s32 4, %v18640_v42 }
 0x451   :  { %v1171_v26 = vld [vmem:[#allocation5 + $0x1eb0] sm:$0xff] }
 0x452   :  { %10758 = vmatpush2.bf16.msra.mxu0 %v16942_v17  ;;  %10801 = vmatpush2.bf16.msra.mxu1 %v17070_v47  ;;  %v17047_v14 = vcombine.high %v1167_v56, %v1171_v26  ;;  %v1031_v35 = vld [vmem:[#allocation5 + $0x1a50] sm:$0xff]  ;;  %v17046_v41 = vcombine.low %v1167_v56, %v1171_v26 }
 0x453   :  { %10759 = vmatprep.subr.bf16.mxu0 %v16935_v28  ;;  %10802 = vmatprep.subr.bf16.mxu1 %v17063_v52  ;;  %v1035_v39 = vld [vmem:[#allocation5 + $0x1a70] sm:$0xff] }
 0x454   :  { %v1159_v50 = vld [vmem:[#allocation5 + $0x1e50] sm:$0xff]  ;;  %v16911_v38 = vcombine.high %v1031_v35, %v1035_v39  ;;  %v16910_v12 = vcombine.low %v1031_v35, %v1035_v39  ;;  %v18348_v39 = vld [vmem:[#allocation7] sm:$0xff] }
 0x455   :  { %v1163_v61 = vld [vmem:[#allocation5 + $0x1e70] sm:$0xff] }
 0x456   :  { %10760 = vmatpush2.bf16.msra.mxu0 %v16934_v5  ;;  %10803 = vmatpush2.bf16.msra.mxu1 %v17062_v36  ;;  %v17039_v7 = vcombine.high %v1159_v50, %v1163_v61  ;;  %v1023_v17 = vld [vmem:[#allocation5 + $0x1a10] sm:$0xff]  ;;  %v17038_v9 = vcombine.low %v1159_v50, %v1163_v61  ;;  %v1746_v50 = vrot.slane %v18348_v39, %v19296_v57 }
 0x457   :  { %10761 = vmatprep.subr.bf16.mxu0 %v16927_v43  ;;  %10804 = vmatprep.subr.bf16.mxu1 %v17055_v22  ;;  %v1027_v47 = vld [vmem:[#allocation5 + $0x1a30] sm:$0xff] }
 0x458   :  { %v1151_v28 = vld [vmem:[#allocation5 + $0x1e10] sm:$0xff]  ;;  %v16903_v53 = vcombine.high %v1023_v17, %v1027_v47  ;;  %v16902_v32 = vcombine.low %v1023_v17, %v1027_v47 }
 0x459   :  { %v1155_v52 = vld [vmem:[#allocation5 + $0x1e30] sm:$0xff] }
 0x45a   :  { %10762 = vmatpush2.bf16.msra.mxu0 %v16926_v10  ;;  %10805 = vmatpush2.bf16.msra.mxu1 %v17054_v46  ;;  %v17031_v1 = vcombine.high %v1151_v28, %v1155_v52  ;;  %v1271_v5 = vld [vmem:[#allocation5 + $0x21d0] sm:$0xff]  ;;  %v17030_v56 = vcombine.low %v1151_v28, %v1155_v52 }
 0x45b   :  { %10763 = vmatprep.subr.bf16.mxu0 %v16919_v3  ;;  %10806 = vmatprep.subr.bf16.mxu1 %v17047_v14  ;;  %v1275_v36 = vld [vmem:[#allocation5 + $0x21f0] sm:$0xff] }
 0x45c   :  { %v1399_v43 = vld [vmem:[#allocation5 + $0x25d0] sm:$0xff]  ;;  %v17151_v26 = vcombine.high %v1271_v5, %v1275_v36  ;;  %v17150_v61 = vcombine.low %v1271_v5, %v1275_v36 }
 0x45d   :  { %v1403_v22 = vld [vmem:[#allocation5 + $0x25f0] sm:$0xff] }
 0x45e   :  { %10764 = vmatpush2.bf16.msra.mxu0 %v16918_v45  ;;  %10807 = vmatpush2.bf16.msra.mxu1 %v17046_v41  ;;  %v17279_v10 = vcombine.high %v1399_v43, %v1403_v22  ;;  %v1263_v46 = vld [vmem:[#allocation5 + $0x2190] sm:$0xff]  ;;  %v18878_v45 = vpop.f32.mrf.mxu0  ;;  %v17278_v41 = vcombine.low %v1399_v43, %v1403_v22 }
 0x45f   :  { %10765 = vmatprep.subr.bf16.mxu0 %v16911_v38  ;;  %10808 = vmatprep.subr.bf16.mxu1 %v17039_v7  ;;  %v1267_v3 = vld [vmem:[#allocation5 + $0x21b0] sm:$0xff]  ;;  %v18880_v7 = vpop.f32.mrf.mxu1 }
 0x460   :  { %v1391_v14 = vld [vmem:[#allocation5 + $0x2590] sm:$0xff]  ;;  %v17143_v38 = vcombine.high %v1263_v46, %v1267_v3  ;;  %v17142_v5 = vcombine.low %v1263_v46, %v1267_v3 }
 0x461   :  { %v1395_v35 = vld [vmem:[#allocation5 + $0x25b0] sm:$0xff] }
 0x462   :  { %10766 = vmatpush2.bf16.msra.mxu0 %v16910_v12  ;;  %10809 = vmatpush2.bf16.msra.mxu1 %v17038_v9  ;;  %v17271_v17 = vcombine.high %v1391_v14, %v1395_v35  ;;  %v1255_v47 = vld [vmem:[#allocation5 + $0x2150] sm:$0xff]  ;;  %v17270_v43 = vcombine.low %v1391_v14, %v1395_v35 }
 0x463   :  { %10767 = vmatprep.subr.bf16.mxu0 %v16903_v53  ;;  %10810 = vmatprep.subr.bf16.mxu1 %v17031_v1  ;;  %v1259_v28 = vld [vmem:[#allocation5 + $0x2170] sm:$0xff] }
 0x464   :  { %v1383_v12 = vld [vmem:[#allocation5 + $0x2550] sm:$0xff]  ;;  %v17135_v22 = vcombine.high %v1255_v47, %v1259_v28  ;;  %v17134_v3 = vcombine.low %v1255_v47, %v1259_v28 }
 0x465   :  { %v1387_v9 = vld [vmem:[#allocation5 + $0x2570] sm:$0xff] }
 0x466   :  { %10768 = vmatpush2.bf16.msra.mxu0 %v16902_v32  ;;  %10811 = vmatpush2.bf16.msra.mxu1 %v17030_v56  ;;  %v1251_v39 = vld [vmem:[#allocation5 + $0x2130] sm:$0xff]  ;;  %v17262_v35 = vcombine.low %v1383_v12, %v1387_v9 }
 0x467   :  { %10823 = vmatprep.subr.bf16.mxu0 %v17151_v26  ;;  %10866 = vmatprep.subr.bf16.mxu1 %v17279_v10  ;;  %v17263_v26 = vcombine.high %v1383_v12, %v1387_v9  ;;  %v1247_v10 = vld [vmem:[#allocation5 + $0x2110] sm:$0xff] }
 0x468   :  { %v1375_v57 = vld [vmem:[#allocation5 + $0x2510] sm:$0xff] }
 0x469   :  { %v10513_v52 = vpop.f32.mrf.mxu0  ;;  %10770 = vmatmul.mubr.bf16.vlgmr.msra.gmra.mxu0 %v18644_v6  ;;  %v10556_v1 = vpop.f32.mrf.mxu1  ;;  %10813 = vmatmul.mubr.bf16.vlgmr.msra.gmra.mxu1 %v18648_v11  ;;  %v1367_v51 = vld [vmem:[#allocation5 + $0x24d0] sm:$0xff] }
 0x46a   :  { %v10514_v53 = vadd.f32 %v10513_v52, %v1746_v50  ;;  %10824 = vmatpush1.bf16.msra.mxu0 %v17150_v61  ;;  %10867 = vmatpush1.bf16.msra.mxu1 %v17278_v41  ;;  %v1379_v61 = vld [vmem:[#allocation5 + $0x2530] sm:$0xff]  ;;  %v17127_v41 = vcombine.high %v1247_v10, %v1251_v39 }
 0x46b   :  { %v18884_v36 = vpop.f32.mrf.mxu0  ;;  %10825 = vmatprep.subr.bf16.mxu0 %v17143_v38  ;;  %v18888_v56 = vpop.f32.mrf.mxu1  ;;  %10868 = vmatprep.subr.bf16.mxu1 %v17271_v17  ;;  %v17255_v17 = vcombine.high %v1375_v57, %v1379_v61  ;;  %v1231_v28 = vld [vmem:[#allocation5 + $0x2090] sm:$0xff] }
 0x46c   :  { %19334 = vst [vmem:[#allocation56_spill] sm:$0xff] %v18884_v36  ;;  %v18886_v32 = vadd.f32 %v10556_v1, %v10514_v53  ;;  %19335 = vst [vmem:[#allocation57_spill] sm:$0xff] %v18888_v56  ;;  %10855 = vmatprep.mubr.bf16.mxu0 %v18654_v24  ;;  %10898 = vmatprep.mubr.bf16.mxu1 %v18657_v29  ;;  %v1239_v53 = vld [vmem:[#allocation5 + $0x20d0] sm:$0xff]  ;;  %v17126_v36 = vcombine.low %v1247_v10, %v1251_v39 }
 0x46d   :  { %v10517_v52 = vpop.f32.mrf.mxu0  ;;  %v10560_v14 = vpop.f32.mrf.mxu1  ;;  %v1243_v1 = vld [vmem:[#allocation5 + $0x20f0] sm:$0xff] }
 0x46e   :  { %v10518_v46 = vadd.f32 %v10517_v52, %v1746_v50  ;;  %10826 = vmatpush1.bf16.msra.mxu0 %v17142_v5  ;;  %10869 = vmatpush1.bf16.msra.mxu1 %v17270_v43  ;;  %v1371_v56 = vld [vmem:[#allocation5 + $0x24f0] sm:$0xff]  ;;  %v17254_v50 = vcombine.low %v1375_v57, %v1379_v61  ;;  %v17119_v5 = vcombine.high %v1239_v53, %v1243_v1 }
 0x46f   :  { %10827 = vmatprep.subr.bf16.mxu0 %v17135_v22  ;;  %10870 = vmatprep.subr.bf16.mxu1 %v17263_v26  ;;  %v17247_v47 = vcombine.high %v1367_v51, %v1371_v56  ;;  %v1235_v43 = vld [vmem:[#allocation5 + $0x20b0] sm:$0xff]  ;;  %v17118_v22 = vcombine.low %v1239_v53, %v1243_v1  ;;  %v17246_v26 = vcombine.low %v1367_v51, %v1371_v56 }
 0x470   :  { %v18892_v38 = vadd.f32 %v10560_v14, %v10518_v46  ;;  %v1359_v12 = vld [vmem:[#allocation5 + $0x2490] sm:$0xff]  ;;  %v17111_v52 = vcombine.high %v1231_v28, %v1235_v43  ;;  %v17110_v57 = vcombine.low %v1231_v28, %v1235_v43 }
 0x471   :  { %v1363_v9 = vld [vmem:[#allocation5 + $0x24b0] sm:$0xff] }
 0x472   :  { %10828 = vmatpush1.bf16.msra.mxu0 %v17134_v3  ;;  %10871 = vmatpush1.bf16.msra.mxu1 %v17262_v35  ;;  %v17239_v46 = vcombine.high %v1359_v12, %v1363_v9  ;;  %v1223_v3 = vld [vmem:[#allocation5 + $0x2050] sm:$0xff]  ;;  %v17238_v61 = vcombine.low %v1359_v12, %v1363_v9 }
 0x473   :  { %10829 = vmatprep.subr.bf16.mxu0 %v17127_v41  ;;  %10872 = vmatprep.subr.bf16.mxu1 %v17255_v17  ;;  %v1227_v10 = vld [vmem:[#allocation5 + $0x2070] sm:$0xff] }
 0x474   :  { %v1351_v39 = vld [vmem:[#allocation5 + $0x2450] sm:$0xff]  ;;  %v17103_v35 = vcombine.high %v1223_v3, %v1227_v10  ;;  %v17102_v51 = vcombine.low %v1223_v3, %v1227_v10 }
 0x475   :  { %v1355_v14 = vld [vmem:[#allocation5 + $0x2470] sm:$0xff] }
 0x476   :  { %10830 = vmatpush1.bf16.msra.mxu0 %v17126_v36  ;;  %10873 = vmatpush1.bf16.msra.mxu1 %v17254_v50  ;;  %v17231_v41 = vcombine.high %v1351_v39, %v1355_v14  ;;  %v1215_v36 = vld [vmem:[#allocation5 + $0x2010] sm:$0xff]  ;;  %v17230_v56 = vcombine.low %v1351_v39, %v1355_v14 }
 0x477   :  { %10831 = vmatprep.subr.bf16.mxu0 %v17119_v5  ;;  %10874 = vmatprep.subr.bf16.mxu1 %v17247_v47  ;;  %v1219_v17 = vld [vmem:[#allocation5 + $0x2030] sm:$0xff] }
 0x478   :  { %v1343_v53 = vld [vmem:[#allocation5 + $0x2410] sm:$0xff]  ;;  %v17095_v50 = vcombine.high %v1215_v36, %v1219_v17  ;;  %v17094_v12 = vcombine.low %v1215_v36, %v1219_v17 }
 0x479   :  { %v1347_v1 = vld [vmem:[#allocation5 + $0x2430] sm:$0xff] }
 0x47a   :  { %10832 = vmatpush1.bf16.msra.mxu0 %v17118_v22  ;;  %10875 = vmatpush1.bf16.msra.mxu1 %v17246_v26  ;;  %v17223_v5 = vcombine.high %v1343_v53, %v1347_v1  ;;  %v1335_v47 = vld [vmem:[#allocation5 + $0x23d0] sm:$0xff]  ;;  %v17222_v9 = vcombine.low %v1343_v53, %v1347_v1 }
 0x47b   :  { %10833 = vmatprep.subr.bf16.mxu0 %v17111_v52  ;;  %10876 = vmatprep.subr.bf16.mxu1 %v17239_v46  ;;  %v1339_v28 = vld [vmem:[#allocation5 + $0x23f0] sm:$0xff] }
 0x47c   :  { %v1463_v43 = vld [vmem:[#allocation5 + $0x27d0] sm:$0xff]  ;;  %v17215_v26 = vcombine.high %v1335_v47, %v1339_v28  ;;  %v17214_v39 = vcombine.low %v1335_v47, %v1339_v28 }
 0x47d   :  { %v1467_v22 = vld [vmem:[#allocation5 + $0x27f0] sm:$0xff] }
 0x47e   :  { %10834 = vmatpush1.bf16.msra.mxu0 %v17110_v57  ;;  %10877 = vmatpush1.bf16.msra.mxu1 %v17238_v61  ;;  %v17343_v52 = vcombine.high %v1463_v43, %v1467_v22  ;;  %v1327_v46 = vld [vmem:[#allocation5 + $0x2390] sm:$0xff]  ;;  %v17342_v14 = vcombine.low %v1463_v43, %v1467_v22 }
 0x47f   :  { %10835 = vmatprep.subr.bf16.mxu0 %v17103_v35  ;;  %10878 = vmatprep.subr.bf16.mxu1 %v17231_v41  ;;  %v1331_v3 = vld [vmem:[#allocation5 + $0x23b0] sm:$0xff] }
 0x480   :  { %v1455_v10 = vld [vmem:[#allocation5 + $0x2790] sm:$0xff]  ;;  %v17207_v61 = vcombine.high %v1327_v46, %v1331_v3  ;;  %v17206_v53 = vcombine.low %v1327_v46, %v1331_v3 }
 0x481   :  { %v1459_v57 = vld [vmem:[#allocation5 + $0x27b0] sm:$0xff] }
 0x482   :  { %10836 = vmatpush1.bf16.msra.mxu0 %v17102_v51  ;;  %10879 = vmatpush1.bf16.msra.mxu1 %v17230_v56  ;;  %v17335_v35 = vcombine.high %v1455_v10, %v1459_v57  ;;  %v1319_v41 = vld [vmem:[#allocation5 + $0x2350] sm:$0xff]  ;;  %v17334_v1 = vcombine.low %v1455_v10, %v1459_v57 }
 0x483   :  { %10837 = vmatprep.subr.bf16.mxu0 %v17095_v50  ;;  %10880 = vmatprep.subr.bf16.mxu1 %v17223_v5  ;;  %v1323_v36 = vld [vmem:[#allocation5 + $0x2370] sm:$0xff] }
 0x484   :  { %v1447_v17 = vld [vmem:[#allocation5 + $0x2750] sm:$0xff]  ;;  %v17199_v56 = vcombine.high %v1319_v41, %v1323_v36  ;;  %v17198_v43 = vcombine.low %v1319_v41, %v1323_v36 }
 0x485   :  { %v1451_v51 = vld [vmem:[#allocation5 + $0x2770] sm:$0xff] }
 0x486   :  { %10838 = vmatpush1.bf16.msra.mxu0 %v17094_v12  ;;  %10881 = vmatpush1.bf16.msra.mxu1 %v17222_v9  ;;  %v17327_v50 = vcombine.high %v1447_v17, %v1451_v51  ;;  %v1311_v5 = vld [vmem:[#allocation5 + $0x2310] sm:$0xff]  ;;  %v17326_v22 = vcombine.low %v1447_v17, %v1451_v51 }
 0x487   :  { %10839 = vmatprep.subr.bf16.mxu0 %v17215_v26  ;;  %10882 = vmatprep.subr.bf16.mxu1 %v17343_v52  ;;  %v1315_v47 = vld [vmem:[#allocation5 + $0x2330] sm:$0xff] }
 0x488   :  { %v1439_v28 = vld [vmem:[#allocation5 + $0x2710] sm:$0xff]  ;;  %v17191_v9 = vcombine.high %v1311_v5, %v1315_v47  ;;  %v17190_v10 = vcombine.low %v1311_v5, %v1315_v47 }
 0x489   :  { %v1443_v12 = vld [vmem:[#allocation5 + $0x2730] sm:$0xff] }
 0x48a   :  { %10840 = vmatpush2.bf16.msra.mxu0 %v17214_v39  ;;  %10883 = vmatpush2.bf16.msra.mxu1 %v17342_v14  ;;  %v17319_v26 = vcombine.high %v1439_v28, %v1443_v12  ;;  %v1303_v52 = vld [vmem:[#allocation5 + $0x22d0] sm:$0xff]  ;;  %v17318_v57 = vcombine.low %v1439_v28, %v1443_v12 }
 0x48b   :  { %10841 = vmatprep.subr.bf16.mxu0 %v17207_v61  ;;  %10884 = vmatprep.subr.bf16.mxu1 %v17335_v35  ;;  %v1307_v46 = vld [vmem:[#allocation5 + $0x22f0] sm:$0xff] }
 0x48c   :  { %v1431_v3 = vld [vmem:[#allocation5 + $0x26d0] sm:$0xff]  ;;  %v17183_v14 = vcombine.high %v1303_v52, %v1307_v46  ;;  %v17182_v17 = vcombine.low %v1303_v52, %v1307_v46 }
 0x48d   :  { %v1435_v39 = vld [vmem:[#allocation5 + $0x26f0] sm:$0xff] }
 0x48e   :  { %10842 = vmatpush2.bf16.msra.mxu0 %v17206_v53  ;;  %10885 = vmatpush2.bf16.msra.mxu1 %v17334_v1  ;;  %v17311_v61 = vcombine.high %v1431_v3, %v1435_v39  ;;  %v1295_v35 = vld [vmem:[#allocation5 + $0x2290] sm:$0xff]  ;;  %v17310_v51 = vcombine.low %v1431_v3, %v1435_v39 }
 0x48f   :  { %10843 = vmatprep.subr.bf16.mxu0 %v17199_v56  ;;  %10886 = vmatprep.subr.bf16.mxu1 %v17327_v50  ;;  %v1299_v41 = vld [vmem:[#allocation5 + $0x22b0] sm:$0xff] }
 0x490   :  { %v1423_v36 = vld [vmem:[#allocation5 + $0x2690] sm:$0xff]  ;;  %v17175_v1 = vcombine.high %v1295_v35, %v1299_v41  ;;  %v17174_v28 = vcombine.low %v1295_v35, %v1299_v41 }
 0x491   :  { %v1427_v53 = vld [vmem:[#allocation5 + $0x26b0] sm:$0xff] }
 0x492   :  { %10844 = vmatpush2.bf16.msra.mxu0 %v17198_v43  ;;  %10887 = vmatpush2.bf16.msra.mxu1 %v17326_v22  ;;  %v17303_v56 = vcombine.high %v1423_v36, %v1427_v53  ;;  %v1287_v50 = vld [vmem:[#allocation5 + $0x2250] sm:$0xff]  ;;  %v17302_v12 = vcombine.low %v1423_v36, %v1427_v53 }
 0x493   :  { %10845 = vmatprep.subr.bf16.mxu0 %v17191_v9  ;;  %10888 = vmatprep.subr.bf16.mxu1 %v17319_v26  ;;  %v1291_v5 = vld [vmem:[#allocation5 + $0x2270] sm:$0xff] }
 0x494   :  { %v1415_v47 = vld [vmem:[#allocation5 + $0x2650] sm:$0xff]  ;;  %v17167_v22 = vcombine.high %v1287_v50, %v1291_v5  ;;  %v17166_v3 = vcombine.low %v1287_v50, %v1291_v5 }
 0x495   :  { %v1419_v43 = vld [vmem:[#allocation5 + $0x2670] sm:$0xff] }
 0x496   :  { %10846 = vmatpush2.bf16.msra.mxu0 %v17190_v10  ;;  %10889 = vmatpush2.bf16.msra.mxu1 %v17318_v57  ;;  %v17295_v9 = vcombine.high %v1415_v47, %v1419_v43  ;;  %v1279_v26 = vld [vmem:[#allocation5 + $0x2210] sm:$0xff]  ;;  %v17294_v39 = vcombine.low %v1415_v47, %v1419_v43  ;;  %v18894_v43 = vpop.f32.mrf.mxu0 }
 0x497   :  { %10847 = vmatprep.subr.bf16.mxu0 %v17183_v14  ;;  %10890 = vmatprep.subr.bf16.mxu1 %v17311_v61  ;;  %v1283_v52 = vld [vmem:[#allocation5 + $0x2230] sm:$0xff]  ;;  %19336 = vst [vmem:[#allocation58_spill] sm:$0xff] %v18894_v43 }
 0x498   :  { %v1407_v46 = vld [vmem:[#allocation5 + $0x2610] sm:$0xff]  ;;  %v17159_v57 = vcombine.high %v1279_v26, %v1283_v52  ;;  %v17158_v36 = vcombine.low %v1279_v26, %v1283_v52 }
 0x499   :  { %v1411_v10 = vld [vmem:[#allocation5 + $0x2630] sm:$0xff] }
 0x49a   :  { %10848 = vmatpush2.bf16.msra.mxu0 %v17182_v17  ;;  %10891 = vmatpush2.bf16.msra.mxu1 %v17310_v51  ;;  %v17287_v14 = vcombine.high %v1407_v46, %v1411_v10  ;;  %v1527_v61 = vld [vmem:[#allocation5 + $0x29d0] sm:$0xff]  ;;  %v17286_v53 = vcombine.low %v1407_v46, %v1411_v10 }
 0x49b   :  { %10849 = vmatprep.subr.bf16.mxu0 %v17175_v1  ;;  %10892 = vmatprep.subr.bf16.mxu1 %v17303_v56  ;;  %v1531_v35 = vld [vmem:[#allocation5 + $0x29f0] sm:$0xff] }
 0x49c   :  { %v1655_v41 = vld [vmem:[#allocation5 + $0x2dd0] sm:$0xff]  ;;  %v17407_v51 = vcombine.high %v1527_v61, %v1531_v35  ;;  %v17406_v47 = vcombine.low %v1527_v61, %v1531_v35 }
 0x49d   :  { %v1659_v17 = vld [vmem:[#allocation5 + $0x2df0] sm:$0xff] }
 0x49e   :  { %10850 = vmatpush2.bf16.msra.mxu0 %v17174_v28  ;;  %10893 = vmatpush2.bf16.msra.mxu1 %v17302_v12  ;;  %v17535_v1 = vcombine.high %v1655_v41, %v1659_v17  ;;  %v1519_v56 = vld [vmem:[#allocation5 + $0x2990] sm:$0xff]  ;;  %v17534_v12 = vcombine.low %v1655_v41, %v1659_v17 }
 0x49f   :  { %10851 = vmatprep.subr.bf16.mxu0 %v17167_v22  ;;  %10894 = vmatprep.subr.bf16.mxu1 %v17295_v9  ;;  %v1523_v50 = vld [vmem:[#allocation5 + $0x29b0] sm:$0xff]  ;;  %v18896_v9 = vpop.f32.mrf.mxu1 }
 0x4a0   :  { %v1647_v5 = vld [vmem:[#allocation5 + $0x2d90] sm:$0xff]  ;;  %v17399_v22 = vcombine.high %v1519_v56, %v1523_v50  ;;  %19337 = vst [vmem:[#allocation59_spill] sm:$0xff] %v18896_v9  ;;  %v17398_v61 = vcombine.low %v1519_v56, %v1523_v50 }
 0x4a1   :  { %v1651_v28 = vld [vmem:[#allocation5 + $0x2db0] sm:$0xff] }
 0x4a2   :  { %10852 = vmatpush2.bf16.msra.mxu0 %v17166_v3  ;;  %10895 = vmatpush2.bf16.msra.mxu1 %v17294_v39  ;;  %v17527_v26 = vcombine.high %v1647_v5, %v1651_v28  ;;  %v1511_v52 = vld [vmem:[#allocation5 + $0x2950] sm:$0xff]  ;;  %v17526_v41 = vcombine.low %v1647_v5, %v1651_v28 }
 0x4a3   :  { %10853 = vmatprep.subr.bf16.mxu0 %v17159_v57  ;;  %10896 = vmatprep.subr.bf16.mxu1 %v17287_v14  ;;  %v1515_v46 = vld [vmem:[#allocation5 + $0x2970] sm:$0xff] }
 0x4a4   :  { %v1639_v3 = vld [vmem:[#allocation5 + $0x2d50] sm:$0xff]  ;;  %v17391_v17 = vcombine.high %v1511_v52, %v1515_v46  ;;  %v17390_v50 = vcombine.low %v1511_v52, %v1515_v46 }
 0x4a5   :  { %v1643_v39 = vld [vmem:[#allocation5 + $0x2d70] sm:$0xff] }
 0x4a6   :  { %10854 = vmatpush2.bf16.msra.mxu0 %v17158_v36  ;;  %10897 = vmatpush2.bf16.msra.mxu1 %v17286_v53  ;;  %v1507_v9 = vld [vmem:[#allocation5 + $0x2930] sm:$0xff]  ;;  %v17518_v28 = vcombine.low %v1639_v3, %v1643_v39 }
 0x4a7   :  { %10909 = vmatprep.subr.bf16.mxu0 %v17407_v51  ;;  %10952 = vmatprep.subr.bf16.mxu1 %v17535_v1  ;;  %v17519_v51 = vcombine.high %v1639_v3, %v1643_v39  ;;  %v1503_v1 = vld [vmem:[#allocation5 + $0x2910] sm:$0xff] }
 0x4a8   :  { %v17382_v43 = vcombine.low %v1503_v1, %v1507_v9  ;;  %v1487_v46 = vld [vmem:[#allocation5 + $0x2890] sm:$0xff] }
 0x4a9   :  { %v10599_v10 = vpop.f32.mrf.mxu0  ;;  %10856 = vmatmul.mubr.bf16.vlgmr.msra.gmra.mxu0 %v18669_v54  ;;  %v10642_v14 = vpop.f32.mrf.mxu1  ;;  %10899 = vmatmul.mubr.bf16.vlgmr.msra.gmra.mxu1 %v18671_v60  ;;  %v1615_v3 = vld [vmem:[#allocation5 + $0x2c90] sm:$0xff] }
 0x4aa   :  { %v10600_v57 = vadd.f32 %v10599_v10, %v18886_v32  ;;  %10910 = vmatpush1.bf16.msra.mxu0 %v17406_v47  ;;  %10953 = vmatpush1.bf16.msra.mxu1 %v17534_v12  ;;  %v1631_v10 = vld [vmem:[#allocation5 + $0x2d10] sm:$0xff]  ;;  %v17383_v12 = vcombine.high %v1503_v1, %v1507_v9 }
 0x4ab   :  { %v18901_v35 = vpop.f32.mrf.mxu0  ;;  %10911 = vmatprep.subr.bf16.mxu0 %v17399_v22  ;;  %v18905_v53 = vpop.f32.mrf.mxu1  ;;  %10954 = vmatprep.subr.bf16.mxu1 %v17527_v26  ;;  %v1635_v47 = vld [vmem:[#allocation5 + $0x2d30] sm:$0xff] }
 0x4ac   :  { %19338 = vst [vmem:[#allocation60_spill] sm:$0xff] %v18901_v35  ;;  %v18903_v36 = vadd.f32 %v10642_v14, %v10600_v57  ;;  %19339 = vst [vmem:[#allocation61_spill] sm:$0xff] %v18905_v53  ;;  %10941 = vmatprep.mubr.bf16.mxu0 %v18677_v13  ;;  %10984 = vmatprep.mubr.bf16.mxu1 %v18680_v20  ;;  %v17511_v26 = vcombine.high %v1631_v10, %v1635_v47  ;;  %v1495_v57 = vld [vmem:[#allocation5 + $0x28d0] sm:$0xff] }
 0x4ad   :  { %v10603_v32 = vpop.f32.mrf.mxu0  ;;  %v10646_v5 = vpop.f32.mrf.mxu1  ;;  %v1499_v14 = vld [vmem:[#allocation5 + $0x28f0] sm:$0xff] }
 0x4ae   :  { %v10604_v56 = vadd.f32 %v10603_v32, %v18892_v38  ;;  %10912 = vmatpush1.bf16.msra.mxu0 %v17398_v61  ;;  %10955 = vmatpush1.bf16.msra.mxu1 %v17526_v41  ;;  %v1623_v53 = vld [vmem:[#allocation5 + $0x2cd0] sm:$0xff]  ;;  %v17510_v38 = vcombine.low %v1631_v10, %v1635_v47  ;;  %v17375_v61 = vcombine.high %v1495_v57, %v1499_v14 }
 0x4af   :  { %10913 = vmatprep.subr.bf16.mxu0 %v17391_v17  ;;  %10956 = vmatprep.subr.bf16.mxu1 %v17519_v51  ;;  %v1627_v35 = vld [vmem:[#allocation5 + $0x2cf0] sm:$0xff]  ;;  %v17374_v17 = vcombine.low %v1495_v57, %v1499_v14 }
 0x4b0   :  { %v18910_v22 = vadd.f32 %v10646_v5, %v10604_v56  ;;  %v17503_v52 = vcombine.high %v1623_v53, %v1627_v35  ;;  %v1491_v41 = vld [vmem:[#allocation5 + $0x28b0] sm:$0xff]  ;;  %v17502_v51 = vcombine.low %v1623_v53, %v1627_v35 }
 0x4b1   :  { %v1619_v39 = vld [vmem:[#allocation5 + $0x2cb0] sm:$0xff]  ;;  %v17367_v32 = vcombine.high %v1487_v46, %v1491_v41  ;;  %v17366_v10 = vcombine.low %v1487_v46, %v1491_v41 }
 0x4b2   :  { %10914 = vmatpush1.bf16.msra.mxu0 %v17390_v50  ;;  %10957 = vmatpush1.bf16.msra.mxu1 %v17518_v28  ;;  %v17495_v56 = vcombine.high %v1615_v3, %v1619_v39  ;;  %v1479_v50 = vld [vmem:[#allocation5 + $0x2850] sm:$0xff]  ;;  %v17494_v47 = vcombine.low %v1615_v3, %v1619_v39 }
 0x4b3   :  { %10915 = vmatprep.subr.bf16.mxu0 %v17383_v12  ;;  %10958 = vmatprep.subr.bf16.mxu1 %v17511_v26  ;;  %v1483_v9 = vld [vmem:[#allocation5 + $0x2870] sm:$0xff] }
 0x4b4   :  { %v1607_v1 = vld [vmem:[#allocation5 + $0x2c50] sm:$0xff]  ;;  %v17359_v28 = vcombine.high %v1479_v50, %v1483_v9  ;;  %v17358_v35 = vcombine.low %v1479_v50, %v1483_v9 }
 0x4b5   :  { %v1611_v5 = vld [vmem:[#allocation5 + $0x2c70] sm:$0xff] }
 0x4b6   :  { %10916 = vmatpush1.bf16.msra.mxu0 %v17382_v43  ;;  %10959 = vmatpush1.bf16.msra.mxu1 %v17510_v38  ;;  %v17487_v12 = vcombine.high %v1607_v1, %v1611_v5  ;;  %v1471_v43 = vld [vmem:[#allocation5 + $0x2810] sm:$0xff]  ;;  %v17486_v53 = vcombine.low %v1607_v1, %v1611_v5 }
 0x4b7   :  { %10917 = vmatprep.subr.bf16.mxu0 %v17375_v61  ;;  %10960 = vmatprep.subr.bf16.mxu1 %v17503_v52  ;;  %v1475_v26 = vld [vmem:[#allocation5 + $0x2830] sm:$0xff] }
 0x4b8   :  { %v1599_v57 = vld [vmem:[#allocation5 + $0x2c10] sm:$0xff]  ;;  %v17351_v38 = vcombine.high %v1471_v43, %v1475_v26  ;;  %v17350_v3 = vcombine.low %v1471_v43, %v1475_v26 }
 0x4b9   :  { %v1603_v14 = vld [vmem:[#allocation5 + $0x2c30] sm:$0xff] }
 0x4ba   :  { %10918 = vmatpush1.bf16.msra.mxu0 %v17374_v17  ;;  %10961 = vmatpush1.bf16.msra.mxu1 %v17502_v51  ;;  %v17479_v61 = vcombine.high %v1599_v57, %v1603_v14  ;;  %v1591_v52 = vld [vmem:[#allocation5 + $0x2bd0] sm:$0xff]  ;;  %v17478_v39 = vcombine.low %v1599_v57, %v1603_v14 }
 0x4bb   :  { %10919 = vmatprep.subr.bf16.mxu0 %v17367_v32  ;;  %10962 = vmatprep.subr.bf16.mxu1 %v17495_v56  ;;  %v1595_v46 = vld [vmem:[#allocation5 + $0x2bf0] sm:$0xff] }
 0x4bc   :  { %v1719_v41 = vld [vmem:[#allocation5 + $0x2fd0] sm:$0xff]  ;;  %v17471_v51 = vcombine.high %v1591_v52, %v1595_v46  ;;  %v17470_v1 = vcombine.low %v1591_v52, %v1595_v46 }
 0x4bd   :  { %v1723_v17 = vld [vmem:[#allocation5 + $0x2ff0] sm:$0xff] }
 0x4be   :  { %10920 = vmatpush1.bf16.msra.mxu0 %v17366_v10  ;;  %10963 = vmatpush1.bf16.msra.mxu1 %v17494_v47  ;;  %v17599_v32 = vcombine.high %v1719_v41, %v1723_v17  ;;  %v1583_v56 = vld [vmem:[#allocation5 + $0x2b90] sm:$0xff]  ;;  %v17598_v5 = vcombine.low %v1719_v41, %v1723_v17 }
 0x4bf   :  { %10921 = vmatprep.subr.bf16.mxu0 %v17359_v28  ;;  %10964 = vmatprep.subr.bf16.mxu1 %v17487_v12  ;;  %v1587_v50 = vld [vmem:[#allocation5 + $0x2bb0] sm:$0xff] }
 0x4c0   :  { %v1711_v9 = vld [vmem:[#allocation5 + $0x2f90] sm:$0xff]  ;;  %v17463_v47 = vcombine.high %v1583_v56, %v1587_v50  ;;  %v17462_v57 = vcombine.low %v1583_v56, %v1587_v50 }
 0x4c1   :  { %v1715_v10 = vld [vmem:[#allocation5 + $0x2fb0] sm:$0xff] }
 0x4c2   :  { %10922 = vmatpush1.bf16.msra.mxu0 %v17358_v35  ;;  %10965 = vmatpush1.bf16.msra.mxu1 %v17486_v53  ;;  %v17591_v28 = vcombine.high %v1711_v9, %v1715_v10  ;;  %v1575_v12 = vld [vmem:[#allocation5 + $0x2b50] sm:$0xff]  ;;  %v17590_v14 = vcombine.low %v1711_v9, %v1715_v10 }
 0x4c3   :  { %10923 = vmatprep.subr.bf16.mxu0 %v17351_v38  ;;  %10966 = vmatprep.subr.bf16.mxu1 %v17479_v61  ;;  %v1579_v43 = vld [vmem:[#allocation5 + $0x2b70] sm:$0xff] }
 0x4c4   :  { %v1703_v26 = vld [vmem:[#allocation5 + $0x2f50] sm:$0xff]  ;;  %v17455_v53 = vcombine.high %v1575_v12, %v1579_v43  ;;  %v17454_v41 = vcombine.low %v1575_v12, %v1579_v43 }
 0x4c5   :  { %v1707_v35 = vld [vmem:[#allocation5 + $0x2f70] sm:$0xff] }
 0x4c6   :  { %10924 = vmatpush1.bf16.msra.mxu0 %v17350_v3  ;;  %10967 = vmatpush1.bf16.msra.mxu1 %v17478_v39  ;;  %v17583_v38 = vcombine.high %v1703_v26, %v1707_v35  ;;  %v1567_v61 = vld [vmem:[#allocation5 + $0x2b10] sm:$0xff]  ;;  %v17582_v17 = vcombine.low %v1703_v26, %v1707_v35 }
 0x4c7   :  { %10925 = vmatprep.subr.bf16.mxu0 %v17471_v51  ;;  %10968 = vmatprep.subr.bf16.mxu1 %v17599_v32  ;;  %v1571_v52 = vld [vmem:[#allocation5 + $0x2b30] sm:$0xff] }
 0x4c8   :  { %v1695_v46 = vld [vmem:[#allocation5 + $0x2f10] sm:$0xff]  ;;  %v17447_v39 = vcombine.high %v1567_v61, %v1571_v52  ;;  %v17446_v9 = vcombine.low %v1567_v61, %v1571_v52 }
 0x4c9   :  { %v1699_v3 = vld [vmem:[#allocation5 + $0x2f30] sm:$0xff] }
 0x4ca   :  { %10926 = vmatpush2.bf16.msra.mxu0 %v17470_v1  ;;  %10969 = vmatpush2.bf16.msra.mxu1 %v17598_v5  ;;  %v17575_v51 = vcombine.high %v1695_v46, %v1699_v3  ;;  %v1559_v32 = vld [vmem:[#allocation5 + $0x2ad0] sm:$0xff]  ;;  %v17574_v10 = vcombine.low %v1695_v46, %v1699_v3 }
 0x4cb   :  { %10927 = vmatprep.subr.bf16.mxu0 %v17463_v47  ;;  %10970 = vmatprep.subr.bf16.mxu1 %v17591_v28  ;;  %v1563_v56 = vld [vmem:[#allocation5 + $0x2af0] sm:$0xff] }
 0x4cc   :  { %v1687_v50 = vld [vmem:[#allocation5 + $0x2ed0] sm:$0xff]  ;;  %v17439_v5 = vcombine.high %v1559_v32, %v1563_v56  ;;  %v17438_v26 = vcombine.low %v1559_v32, %v1563_v56 }
 0x4cd   :  { %v1691_v1 = vld [vmem:[#allocation5 + $0x2ef0] sm:$0xff] }
 0x4ce   :  { %10928 = vmatpush2.bf16.msra.mxu0 %v17462_v57  ;;  %10971 = vmatpush2.bf16.msra.mxu1 %v17590_v14  ;;  %v17567_v47 = vcombine.high %v1687_v50, %v1691_v1  ;;  %v1551_v28 = vld [vmem:[#allocation5 + $0x2a90] sm:$0xff]  ;;  %v17566_v35 = vcombine.low %v1687_v50, %v1691_v1 }
 0x4cf   :  { %10929 = vmatprep.subr.bf16.mxu0 %v17455_v53  ;;  %10972 = vmatprep.subr.bf16.mxu1 %v17583_v38  ;;  %v1555_v12 = vld [vmem:[#allocation5 + $0x2ab0] sm:$0xff] }
 0x4d0   :  { %v1679_v43 = vld [vmem:[#allocation5 + $0x2e90] sm:$0xff]  ;;  %v17431_v14 = vcombine.high %v1551_v28, %v1555_v12  ;;  %v17430_v46 = vcombine.low %v1551_v28, %v1555_v12  ;;  %v252_v28 = vld [vmem:[#allocation5 + $0x1f8] sm:$0xff] }
 0x4d1   :  { %v1683_v57 = vld [vmem:[#allocation5 + $0x2eb0] sm:$0xff]  ;;  %v376_v12 = vld [vmem:[#allocation5 + $0x5d8] sm:$0xff] }
 0x4d2   :  { %10930 = vmatpush2.bf16.msra.mxu0 %v17454_v41  ;;  %10973 = vmatpush2.bf16.msra.mxu1 %v17582_v17  ;;  %v17559_v53 = vcombine.high %v1679_v43, %v1683_v57  ;;  %v1543_v38 = vld [vmem:[#allocation5 + $0x2a50] sm:$0xff]  ;;  %v17558_v3 = vcombine.low %v1679_v43, %v1683_v57 }
 0x4d3   :  { %10931 = vmatprep.subr.bf16.mxu0 %v17447_v39  ;;  %10974 = vmatprep.subr.bf16.mxu1 %v17575_v51  ;;  %v1547_v61 = vld [vmem:[#allocation5 + $0x2a70] sm:$0xff] }
 0x4d4   :  { %v1671_v52 = vld [vmem:[#allocation5 + $0x2e50] sm:$0xff]  ;;  %v17423_v17 = vcombine.high %v1543_v38, %v1547_v61  ;;  %v17422_v50 = vcombine.low %v1543_v38, %v1547_v61  ;;  %v244_v38 = vld [vmem:[#allocation5 + $0x1b8] sm:$0xff] }
 0x4d5   :  { %v1675_v41 = vld [vmem:[#allocation5 + $0x2e70] sm:$0xff]  ;;  %v368_v61 = vld [vmem:[#allocation5 + $0x598] sm:$0xff] }
 0x4d6   :  { %10932 = vmatpush2.bf16.msra.mxu0 %v17446_v9  ;;  %10975 = vmatpush2.bf16.msra.mxu1 %v17574_v10  ;;  %v17551_v39 = vcombine.high %v1671_v52, %v1675_v41  ;;  %v1535_v51 = vld [vmem:[#allocation5 + $0x2a10] sm:$0xff]  ;;  %v17550_v1 = vcombine.low %v1671_v52, %v1675_v41  ;;  %v18912_v41 = vpop.f32.mrf.mxu0 }
 0x4d7   :  { %10933 = vmatprep.subr.bf16.mxu0 %v17439_v5  ;;  %10976 = vmatprep.subr.bf16.mxu1 %v17567_v47  ;;  %v1539_v32 = vld [vmem:[#allocation5 + $0x2a30] sm:$0xff]  ;;  %v248_v47 = vld [vmem:[#allocation5 + $0x1d8] sm:$0xff] }
 0x4d8   :  { %v1663_v56 = vld [vmem:[#allocation5 + $0x2e10] sm:$0xff]  ;;  %v17415_v10 = vcombine.high %v1535_v51, %v1539_v32  ;;  %v17414_v43 = vcombine.low %v1535_v51, %v1539_v32  ;;  %v16128_v52 = vcombine.low %v248_v47, %v252_v28  ;;  %v232_v32 = vld [vmem:[#allocation5 + $0x158] sm:$0xff] }
 0x4d9   :  { %v1667_v9 = vld [vmem:[#allocation5 + $0x2e30] sm:$0xff] }
 0x4da   :  { %10934 = vmatpush2.bf16.msra.mxu0 %v17438_v26  ;;  %10977 = vmatpush2.bf16.msra.mxu1 %v17566_v35  ;;  %v17543_v5 = vcombine.high %v1663_v56, %v1667_v9  ;;  %v380_v26 = vld [vmem:[#allocation5 + $0x5f8] sm:$0xff]  ;;  %v17542_v57 = vcombine.low %v1663_v56, %v1667_v9  ;;  %v16129_v35 = vcombine.high %v248_v47, %v252_v28 }
 0x4db   :  { %10935 = vmatprep.subr.bf16.mxu0 %v17431_v14  ;;  %10978 = vmatprep.subr.bf16.mxu1 %v17559_v53  ;;  %v16257_v14 = vcombine.high %v376_v12, %v380_v26  ;;  %v240_v53 = vld [vmem:[#allocation5 + $0x198] sm:$0xff] }
 0x4dc   :  { %v236_v56 = vld [vmem:[#allocation5 + $0x178] sm:$0xff]  ;;  %v16120_v47 = vcombine.low %v240_v53, %v244_v38 }
 0x4de   :  { %10936 = vmatpush2.bf16.msra.mxu0 %v17430_v46  ;;  %10979 = vmatpush2.bf16.msra.mxu1 %v17558_v3  ;;  %v372_v46 = vld [vmem:[#allocation5 + $0x5b8] sm:$0xff]  ;;  %v16256_v3 = vcombine.low %v376_v12, %v380_v26  ;;  %v16113_v26 = vcombine.high %v232_v32, %v236_v56 }
 0x4df   :  { %10937 = vmatprep.subr.bf16.mxu0 %v17423_v17  ;;  %10980 = vmatprep.subr.bf16.mxu1 %v17551_v39  ;;  %v16121_v17 = vcombine.high %v240_v53, %v244_v38  ;;  %v18914_v39 = vpop.f32.mrf.mxu1  ;;  %v16249_v51 = vcombine.high %v368_v61, %v372_v46  ;;  %v16248_v12 = vcombine.low %v368_v61, %v372_v46 }
 0x4e0   :  { %19340 = vst [vmem:[#allocation62_spill] sm:$0xff] %v18914_v39  ;;  %v228_v39 = vld [vmem:[#allocation5 + $0x138] sm:$0xff]  ;;  %v16112_v38 = vcombine.low %v232_v32, %v236_v56 }
 0x4e1   :  { %v208_v56 = vld [vmem:[#allocation5 + $0x98] sm:$0xff] }
 0x4e2   :  { %10938 = vmatpush2.bf16.msra.mxu0 %v17422_v50  ;;  %10981 = vmatpush2.bf16.msra.mxu1 %v17550_v1  ;;  %v360_v50 = vld [vmem:[#allocation5 + $0x558] sm:$0xff] }
 0x4e3   :  { %10939 = vmatprep.subr.bf16.mxu0 %v17415_v10  ;;  %10982 = vmatprep.subr.bf16.mxu1 %v17543_v5  ;;  %v364_v1 = vld [vmem:[#allocation5 + $0x578] sm:$0xff] }
 0x4e4   :  { %v16240_v46 = vcombine.low %v360_v50, %v364_v1 }
 0x4e6   :  { %10940 = vmatpush2.bf16.msra.mxu0 %v17414_v43  ;;  %10983 = vmatpush2.bf16.msra.mxu1 %v17542_v57 }
 0x4e7   :  { %10995 = vmatprep.subr.bf16.mxu0 %v16129_v35  ;;  %11038 = vmatprep.subr.bf16.mxu1 %v16257_v14  ;;  %v16241_v35 = vcombine.high %v360_v50, %v364_v1  ;;  %v224_v14 = vld [vmem:[#allocation5 + $0x118] sm:$0xff] }
 0x4e8   :  { %v336_v50 = vld [vmem:[#allocation5 + $0x498] sm:$0xff] }
 0x4e9   :  { %v10685_v9 = vpop.f32.mrf.mxu0  ;;  %10942 = vmatmul.mubr.bf16.vlgmr.msra.gmra.mxu0 %v18694_v16  ;;  %v10728_v5 = vpop.f32.mrf.mxu1  ;;  %10985 = vmatmul.mubr.bf16.vlgmr.msra.gmra.mxu1 %v18696_v23  ;;  %v340_v1 = vld [vmem:[#allocation5 + $0x4b8] sm:$0xff] }
 0x4ea   :  { %v10686_v10 = vadd.f32 %v10685_v9, %v18903_v36  ;;  %10996 = vmatpush1.bf16.msra.mxu0 %v16128_v52  ;;  %11039 = vmatpush1.bf16.msra.mxu1 %v16256_v3  ;;  %v352_v9 = vld [vmem:[#allocation5 + $0x518] sm:$0xff]  ;;  %v16105_v3 = vcombine.high %v224_v14, %v228_v39 }
 0x4eb   :  { %v18919_v28 = vpop.f32.mrf.mxu0  ;;  %10997 = vmatprep.subr.bf16.mxu0 %v16121_v17  ;;  %v18923_v57 = vpop.f32.mrf.mxu1  ;;  %11040 = vmatprep.subr.bf16.mxu1 %v16249_v51  ;;  %v356_v52 = vld [vmem:[#allocation5 + $0x538] sm:$0xff] }
 0x4ec   :  { %19341 = vst [vmem:[#allocation63_spill] sm:$0xff] %v18919_v28  ;;  %v18921_v43 = vadd.f32 %v10728_v5, %v10686_v10  ;;  %19342 = vst [vmem:[#allocation64_spill] sm:$0xff] %v18923_v57  ;;  %11027 = vmatprep.mubr.bf16.mxu0 %v18598_v58  ;;  %11070 = vmatprep.mubr.bf16.mxu1 %v18600_v63  ;;  %v16233_v51 = vcombine.high %v352_v9, %v356_v52  ;;  %v216_v10 = vld [vmem:[#allocation5 + $0xd8] sm:$0xff] }
 0x4ed   :  { %v10689_v36 = vpop.f32.mrf.mxu0  ;;  %v10732_v61 = vpop.f32.mrf.mxu1  ;;  %v220_v58 = vld [vmem:[#allocation5 + $0xf8] sm:$0xff]  ;;  %v16104_v28 = vcombine.low %v224_v14, %v228_v39  ;;  %v16232_v63 = vcombine.low %v352_v9, %v356_v52  ;;  %v16216_v52 = vcombine.low %v336_v50, %v340_v1 }
 0x4ee   :  { %v10690_v53 = vadd.f32 %v10689_v36, %v18910_v22  ;;  %10998 = vmatpush1.bf16.msra.mxu0 %v16120_v47  ;;  %11041 = vmatpush1.bf16.msra.mxu1 %v16248_v12  ;;  %v344_v5 = vld [vmem:[#allocation5 + $0x4d8] sm:$0xff]  ;;  %v16097_v22 = vcombine.high %v216_v10, %v220_v58  ;;  %v16096_v12 = vcombine.low %v216_v10, %v220_v58 }
 0x4ef   :  { %10999 = vmatprep.subr.bf16.mxu0 %v16113_v26  ;;  %11042 = vmatprep.subr.bf16.mxu1 %v16241_v35  ;;  %v348_v57 = vld [vmem:[#allocation5 + $0x4f8] sm:$0xff]  ;;  %v16217_v36 = vcombine.high %v336_v50, %v340_v1 }
 0x4f0   :  { %v18928_v17 = vadd.f32 %v10732_v61, %v10690_v53  ;;  %v16225_v32 = vcombine.high %v344_v5, %v348_v57  ;;  %v212_v47 = vld [vmem:[#allocation5 + $0xb8] sm:$0xff]  ;;  %v16224_v26 = vcombine.low %v344_v5, %v348_v57 }
 0x4f1   :  { %v16089_v35 = vcombine.high %v208_v56, %v212_v47  ;;  %v200_v53 = vld [vmem:[#allocation5 + $0x58] sm:$0xff]  ;;  %v16088_v9 = vcombine.low %v208_v56, %v212_v47 }
 0x4f2   :  { %11000 = vmatpush1.bf16.msra.mxu0 %v16112_v38  ;;  %11043 = vmatpush1.bf16.msra.mxu1 %v16240_v46  ;;  %v204_v39 = vld [vmem:[#allocation5 + $0x78] sm:$0xff] }
 0x4f3   :  { %11001 = vmatprep.subr.bf16.mxu0 %v16105_v3  ;;  %11044 = vmatprep.subr.bf16.mxu1 %v16233_v51  ;;  %v328_v14 = vld [vmem:[#allocation5 + $0x458] sm:$0xff]  ;;  %v16081_v61 = vcombine.high %v200_v53, %v204_v39  ;;  %v16080_v57 = vcombine.low %v200_v53, %v204_v39 }
 0x4f4   :  { %v332_v38 = vld [vmem:[#allocation5 + $0x478] sm:$0xff] }
 0x4f5   :  { %v16209_v46 = vcombine.high %v328_v14, %v332_v38  ;;  %v196_v3 = vld [vmem:[#allocation5 + $0x38] sm:$0xff]  ;;  %v16208_v58 = vcombine.low %v328_v14, %v332_v38 }
 0x4f6   :  { %11002 = vmatpush1.bf16.msra.mxu0 %v16104_v28  ;;  %11045 = vmatpush1.bf16.msra.mxu1 %v16232_v63  ;;  %v192_v28 = vld [vmem:[#allocation5 + $0x18] sm:$0xff] }
 0x4f7   :  { %11003 = vmatprep.subr.bf16.mxu0 %v16097_v22  ;;  %11046 = vmatprep.subr.bf16.mxu1 %v16225_v32  ;;  %v320_v51 = vld [vmem:[#allocation5 + $0x418] sm:$0xff]  ;;  %v16073_v5 = vcombine.high %v192_v28, %v196_v3  ;;  %v16072_v50 = vcombine.low %v192_v28, %v196_v3 }
 0x4f8   :  { %v324_v10 = vld [vmem:[#allocation5 + $0x438] sm:$0xff] }
 0x4f9   :  { %v16201_v63 = vcombine.high %v320_v51, %v324_v10  ;;  %v312_v22 = vld [vmem:[#allocation5 + $0x3d8] sm:$0xff]  ;;  %v16200_v1 = vcombine.low %v320_v51, %v324_v10 }
 0x4fa   :  { %11004 = vmatpush1.bf16.msra.mxu0 %v16096_v12  ;;  %11047 = vmatpush1.bf16.msra.mxu1 %v16224_v26  ;;  %v316_v32 = vld [vmem:[#allocation5 + $0x3f8] sm:$0xff] }
 0x4fb   :  { %11005 = vmatprep.subr.bf16.mxu0 %v16089_v35  ;;  %11048 = vmatprep.subr.bf16.mxu1 %v16217_v36  ;;  %v440_v56 = vld [vmem:[#allocation5 + $0x7d8] sm:$0xff]  ;;  %v16193_v12 = vcombine.high %v312_v22, %v316_v32  ;;  %v16192_v14 = vcombine.low %v312_v22, %v316_v32 }
 0x4fc   :  { %v444_v47 = vld [vmem:[#allocation5 + $0x7f8] sm:$0xff] }
 0x4fd   :  { %v16321_v26 = vcombine.high %v440_v56, %v444_v47  ;;  %v304_v35 = vld [vmem:[#allocation5 + $0x398] sm:$0xff]  ;;  %v16320_v38 = vcombine.low %v440_v56, %v444_v47 }
 0x4fe   :  { %11006 = vmatpush1.bf16.msra.mxu0 %v16088_v9  ;;  %11049 = vmatpush1.bf16.msra.mxu1 %v16216_v52  ;;  %v308_v36 = vld [vmem:[#allocation5 + $0x3b8] sm:$0xff] }
 0x4ff   :  { %11007 = vmatprep.subr.bf16.mxu0 %v16081_v61  ;;  %11050 = vmatprep.subr.bf16.mxu1 %v16209_v46  ;;  %v432_v53 = vld [vmem:[#allocation5 + $0x798] sm:$0xff]  ;;  %v16185_v9 = vcombine.high %v304_v35, %v308_v36  ;;  %v16184_v51 = vcombine.low %v304_v35, %v308_v36 }
 0x500   :  { %v436_v39 = vld [vmem:[#allocation5 + $0x7b8] sm:$0xff] }
 0x501   :  { %v16313_v52 = vcombine.high %v432_v53, %v436_v39  ;;  %v296_v61 = vld [vmem:[#allocation5 + $0x358] sm:$0xff]  ;;  %v16312_v10 = vcombine.low %v432_v53, %v436_v39 }
 0x502   :  { %11008 = vmatpush1.bf16.msra.mxu0 %v16080_v57  ;;  %11051 = vmatpush1.bf16.msra.mxu1 %v16208_v58  ;;  %v300_v46 = vld [vmem:[#allocation5 + $0x378] sm:$0xff] }
 0x503   :  { %11009 = vmatprep.subr.bf16.mxu0 %v16073_v5  ;;  %11052 = vmatprep.subr.bf16.mxu1 %v16201_v63  ;;  %v424_v28 = vld [vmem:[#allocation5 + $0x758] sm:$0xff]  ;;  %v16177_v57 = vcombine.high %v296_v61, %v300_v46  ;;  %v16176_v56 = vcombine.low %v296_v61, %v300_v46 }
 0x504   :  { %v428_v3 = vld [vmem:[#allocation5 + $0x778] sm:$0xff] }
 0x505   :  { %v16305_v58 = vcombine.high %v424_v28, %v428_v3  ;;  %v288_v5 = vld [vmem:[#allocation5 + $0x318] sm:$0xff]  ;;  %v16304_v47 = vcombine.low %v424_v28, %v428_v3 }
 0x506   :  { %11010 = vmatpush1.bf16.msra.mxu0 %v16072_v50  ;;  %11053 = vmatpush1.bf16.msra.mxu1 %v16200_v1  ;;  %v292_v63 = vld [vmem:[#allocation5 + $0x338] sm:$0xff] }
 0x507   :  { %11011 = vmatprep.subr.bf16.mxu0 %v16193_v12  ;;  %11054 = vmatprep.subr.bf16.mxu1 %v16321_v26  ;;  %v416_v22 = vld [vmem:[#allocation5 + $0x718] sm:$0xff]  ;;  %v16169_v50 = vcombine.high %v288_v5, %v292_v63  ;;  %v16168_v53 = vcombine.low %v288_v5, %v292_v63 }
 0x508   :  { %v420_v32 = vld [vmem:[#allocation5 + $0x738] sm:$0xff] }
 0x509   :  { %v16297_v1 = vcombine.high %v416_v22, %v420_v32  ;;  %v280_v12 = vld [vmem:[#allocation5 + $0x2d8] sm:$0xff]  ;;  %v16296_v39 = vcombine.low %v416_v22, %v420_v32 }
 0x50a   :  { %11012 = vmatpush2.bf16.msra.mxu0 %v16192_v14  ;;  %11055 = vmatpush2.bf16.msra.mxu1 %v16320_v38  ;;  %v284_v26 = vld [vmem:[#allocation5 + $0x2f8] sm:$0xff] }
 0x50b   :  { %11013 = vmatprep.subr.bf16.mxu0 %v16185_v9  ;;  %11056 = vmatprep.subr.bf16.mxu1 %v16313_v52  ;;  %v408_v35 = vld [vmem:[#allocation5 + $0x6d8] sm:$0xff]  ;;  %v16161_v14 = vcombine.high %v280_v12, %v284_v26  ;;  %v16160_v28 = vcombine.low %v280_v12, %v284_v26 }
 0x50c   :  { %v412_v36 = vld [vmem:[#allocation5 + $0x6f8] sm:$0xff] }
 0x50d   :  { %v16289_v38 = vcombine.high %v408_v35, %v412_v36  ;;  %v272_v9 = vld [vmem:[#allocation5 + $0x298] sm:$0xff]  ;;  %v16288_v3 = vcombine.low %v408_v35, %v412_v36 }
 0x50e   :  { %11014 = vmatpush2.bf16.msra.mxu0 %v16184_v51  ;;  %11057 = vmatpush2.bf16.msra.mxu1 %v16312_v10  ;;  %v276_v52 = vld [vmem:[#allocation5 + $0x2b8] sm:$0xff] }
 0x50f   :  { %11015 = vmatprep.subr.bf16.mxu0 %v16177_v57  ;;  %11058 = vmatprep.subr.bf16.mxu1 %v16305_v58  ;;  %v400_v61 = vld [vmem:[#allocation5 + $0x698] sm:$0xff]  ;;  %v16153_v51 = vcombine.high %v272_v9, %v276_v52  ;;  %v16152_v22 = vcombine.low %v272_v9, %v276_v52 }
 0x510   :  { %v404_v46 = vld [vmem:[#allocation5 + $0x6b8] sm:$0xff] }
 0x511   :  { %v16281_v10 = vcombine.high %v400_v61, %v404_v46  ;;  %v264_v57 = vld [vmem:[#allocation5 + $0x258] sm:$0xff]  ;;  %v16280_v32 = vcombine.low %v400_v61, %v404_v46 }
 0x512   :  { %11016 = vmatpush2.bf16.msra.mxu0 %v16176_v56  ;;  %11059 = vmatpush2.bf16.msra.mxu1 %v16304_v47  ;;  %v268_v58 = vld [vmem:[#allocation5 + $0x278] sm:$0xff] }
 0x513   :  { %11017 = vmatprep.subr.bf16.mxu0 %v16169_v50  ;;  %11060 = vmatprep.subr.bf16.mxu1 %v16297_v1  ;;  %v392_v5 = vld [vmem:[#allocation5 + $0x658] sm:$0xff]  ;;  %v16145_v56 = vcombine.high %v264_v57, %v268_v58  ;;  %v16144_v35 = vcombine.low %v264_v57, %v268_v58 }
 0x514   :  { %v396_v63 = vld [vmem:[#allocation5 + $0x678] sm:$0xff] }
 0x515   :  { %v16273_v47 = vcombine.high %v392_v5, %v396_v63  ;;  %v256_v50 = vld [vmem:[#allocation5 + $0x218] sm:$0xff]  ;;  %v16272_v36 = vcombine.low %v392_v5, %v396_v63  ;;  %v18930_v63 = vpop.f32.mrf.mxu0 }
 0x516   :  { %11018 = vmatpush2.bf16.msra.mxu0 %v16168_v53  ;;  %11061 = vmatpush2.bf16.msra.mxu1 %v16296_v39  ;;  %v260_v1 = vld [vmem:[#allocation5 + $0x238] sm:$0xff] }
 0x517   :  { %11019 = vmatprep.subr.bf16.mxu0 %v16161_v14  ;;  %11062 = vmatprep.subr.bf16.mxu1 %v16289_v38  ;;  %v384_v12 = vld [vmem:[#allocation5 + $0x618] sm:$0xff]  ;;  %v16137_v53 = vcombine.high %v256_v50, %v260_v1  ;;  %v16136_v61 = vcombine.low %v256_v50, %v260_v1 }
 0x518   :  { %v388_v26 = vld [vmem:[#allocation5 + $0x638] sm:$0xff] }
 0x519   :  { %v16265_v39 = vcombine.high %v384_v12, %v388_v26  ;;  %v504_v14 = vld [vmem:[#allocation5 + $0x9d8] sm:$0xff]  ;;  %v16264_v46 = vcombine.low %v384_v12, %v388_v26 }
 0x51a   :  { %11020 = vmatpush2.bf16.msra.mxu0 %v16160_v28  ;;  %11063 = vmatpush2.bf16.msra.mxu1 %v16288_v3  ;;  %v508_v38 = vld [vmem:[#allocation5 + $0x9f8] sm:$0xff] }
 0x51b   :  { %11021 = vmatprep.subr.bf16.mxu0 %v16153_v51  ;;  %11064 = vmatprep.subr.bf16.mxu1 %v16281_v10  ;;  %v632_v9 = vld [vmem:[#allocation5 + $0xdd8] sm:$0xff]  ;;  %v16385_v28 = vcombine.high %v504_v14, %v508_v38  ;;  %v16384_v5 = vcombine.low %v504_v14, %v508_v38 }
 0x51c   :  { %v636_v52 = vld [vmem:[#allocation5 + $0xdf8] sm:$0xff] }
 0x51d   :  { %v16513_v3 = vcombine.high %v632_v9, %v636_v52  ;;  %v496_v51 = vld [vmem:[#allocation5 + $0x998] sm:$0xff] }
 0x51e   :  { %11022 = vmatpush2.bf16.msra.mxu0 %v16152_v22  ;;  %11065 = vmatpush2.bf16.msra.mxu1 %v16280_v32  ;;  %v500_v10 = vld [vmem:[#allocation5 + $0x9b8] sm:$0xff]  ;;  %v16512_v22 = vcombine.low %v632_v9, %v636_v52 }
 0x51f   :  { %11023 = vmatprep.subr.bf16.mxu0 %v16145_v56  ;;  %11066 = vmatprep.subr.bf16.mxu1 %v16273_v47  ;;  %v624_v57 = vld [vmem:[#allocation5 + $0xd98] sm:$0xff]  ;;  %v16377_v32 = vcombine.high %v496_v51, %v500_v10  ;;  %v18932_v56 = vpop.f32.mrf.mxu1 }
 0x520   :  { %v628_v58 = vld [vmem:[#allocation5 + $0xdb8] sm:$0xff] }
 0x521   :  { %v16505_v47 = vcombine.high %v624_v57, %v628_v58  ;;  %v488_v50 = vld [vmem:[#allocation5 + $0x958] sm:$0xff]  ;;  %v16504_v38 = vcombine.low %v624_v57, %v628_v58 }
 0x522   :  { %11024 = vmatpush2.bf16.msra.mxu0 %v16144_v35  ;;  %11067 = vmatpush2.bf16.msra.mxu1 %v16272_v36  ;;  %v492_v1 = vld [vmem:[#allocation5 + $0x978] sm:$0xff] }
 0x523   :  { %11025 = vmatprep.subr.bf16.mxu0 %v16137_v53  ;;  %11068 = vmatprep.subr.bf16.mxu1 %v16265_v39  ;;  %v616_v26 = vld [vmem:[#allocation5 + $0xd58] sm:$0xff]  ;;  %v16376_v39 = vcombine.low %v496_v51, %v500_v10  ;;  %v16369_v9 = vcombine.high %v488_v50, %v492_v1  ;;  %v16368_v10 = vcombine.low %v488_v50, %v492_v1 }
 0x524   :  { %v620_v35 = vld [vmem:[#allocation5 + $0xd78] sm:$0xff] }
 0x525   :  { %v16496_v58 = vcombine.low %v616_v26, %v620_v35  ;;  %v464_v1 = vld [vmem:[#allocation5 + $0x898] sm:$0xff] }
 0x526   :  { %11026 = vmatpush2.bf16.msra.mxu0 %v16136_v61  ;;  %11069 = vmatpush2.bf16.msra.mxu1 %v16264_v46  ;;  %v480_v46 = vld [vmem:[#allocation5 + $0x918] sm:$0xff] }
 0x527   :  { %11081 = vmatprep.subr.bf16.mxu0 %v16385_v28  ;;  %11124 = vmatprep.subr.bf16.mxu1 %v16513_v3  ;;  %v484_v28 = vld [vmem:[#allocation5 + $0x938] sm:$0xff] }
 0x528   :  { %v612_v3 = vld [vmem:[#allocation5 + $0xd38] sm:$0xff] }
 0x529   :  { %v10771_v12 = vpop.f32.mrf.mxu0  ;;  %11028 = vmatmul.mubr.bf16.vlgmr.msra.gmra.mxu0 %v18604_v21  ;;  %v10814_v53 = vpop.f32.mrf.mxu1  ;;  %11071 = vmatmul.mubr.bf16.vlgmr.msra.gmra.mxu1 %v18606_v25  ;;  %v16497_v21 = vcombine.high %v616_v26, %v620_v35  ;;  %v608_v25 = vld [vmem:[#allocation5 + $0xd18] sm:$0xff] }
 0x52a   :  { %v10772_v36 = vadd.f32 %v10771_v12, %v18921_v43  ;;  %11082 = vmatpush1.bf16.msra.mxu0 %v16384_v5  ;;  %11125 = vmatpush1.bf16.msra.mxu1 %v16512_v22  ;;  %v16361_v5 = vcombine.high %v480_v46, %v484_v28  ;;  %v600_v12 = vld [vmem:[#allocation5 + $0xcd8] sm:$0xff] }
 0x52b   :  { %v18937_v14 = vpop.f32.mrf.mxu0  ;;  %11083 = vmatprep.subr.bf16.mxu0 %v16377_v32  ;;  %v18941_v61 = vpop.f32.mrf.mxu1  ;;  %11126 = vmatprep.subr.bf16.mxu1 %v16505_v47  ;;  %v16489_v32 = vcombine.high %v608_v25, %v612_v3  ;;  %v472_v47 = vld [vmem:[#allocation5 + $0x8d8] sm:$0xff] }
 0x52c   :  { %v18939_v52 = vadd.f32 %v10814_v53, %v10772_v36  ;;  %11113 = vmatprep.mubr.bf16.mxu0 %v18608_v34  ;;  %11156 = vmatprep.mubr.bf16.mxu1 %v18611_v37  ;;  %v476_v34 = vld [vmem:[#allocation5 + $0x8f8] sm:$0xff]  ;;  %v16360_v53 = vcombine.low %v480_v46, %v484_v28  ;;  %v16488_v37 = vcombine.low %v608_v25, %v612_v3 }
 0x52d   :  { %v10775_v43 = vpop.f32.mrf.mxu0  ;;  %v10818_v57 = vpop.f32.mrf.mxu1  ;;  %v604_v36 = vld [vmem:[#allocation5 + $0xcf8] sm:$0xff] }
 0x52e   :  { %v10776_v51 = vadd.f32 %v10775_v43, %v18928_v17  ;;  %11084 = vmatpush1.bf16.msra.mxu0 %v16376_v39  ;;  %11127 = vmatpush1.bf16.msra.mxu1 %v16504_v38  ;;  %v16353_v17 = vcombine.high %v472_v47, %v476_v34  ;;  %v16481_v50 = vcombine.high %v600_v12, %v604_v36  ;;  %v468_v39 = vld [vmem:[#allocation5 + $0x8b8] sm:$0xff] }
 0x52f   :  { %11085 = vmatprep.subr.bf16.mxu0 %v16369_v9  ;;  %11128 = vmatprep.subr.bf16.mxu1 %v16497_v21  ;;  %v592_v26 = vld [vmem:[#allocation5 + $0xc98] sm:$0xff]  ;;  %v16352_v38 = vcombine.low %v472_v47, %v476_v34  ;;  %v16480_v9 = vcombine.low %v600_v12, %v604_v36  ;;  %v16345_v21 = vcombine.high %v464_v1, %v468_v39 }
 0x530   :  { %v18946_v22 = vadd.f32 %v10818_v57, %v10776_v51  ;;  %v596_v35 = vld [vmem:[#allocation5 + $0xcb8] sm:$0xff]  ;;  %v16344_v25 = vcombine.low %v464_v1, %v468_v39 }
 0x531   :  { %v16473_v43 = vcombine.high %v592_v26, %v596_v35  ;;  %v456_v51 = vld [vmem:[#allocation5 + $0x858] sm:$0xff]  ;;  %v16472_v3 = vcombine.low %v592_v26, %v596_v35 }
 0x532   :  { %11086 = vmatpush1.bf16.msra.mxu0 %v16368_v10  ;;  %11129 = vmatpush1.bf16.msra.mxu1 %v16496_v58  ;;  %v460_v46 = vld [vmem:[#allocation5 + $0x878] sm:$0xff] }
 0x533   :  { %11087 = vmatprep.subr.bf16.mxu0 %v16361_v5  ;;  %11130 = vmatprep.subr.bf16.mxu1 %v16489_v32  ;;  %v584_v28 = vld [vmem:[#allocation5 + $0xc58] sm:$0xff]  ;;  %v16337_v57 = vcombine.high %v456_v51, %v460_v46  ;;  %v16336_v12 = vcombine.low %v456_v51, %v460_v46 }
 0x534   :  { %v588_v10 = vld [vmem:[#allocation5 + $0xc78] sm:$0xff] }
 0x535   :  { %v16465_v58 = vcombine.high %v584_v28, %v588_v10  ;;  %v448_v5 = vld [vmem:[#allocation5 + $0x818] sm:$0xff]  ;;  %v16464_v36 = vcombine.low %v584_v28, %v588_v10 }
 0x536   :  { %11088 = vmatpush1.bf16.msra.mxu0 %v16360_v53  ;;  %11131 = vmatpush1.bf16.msra.mxu1 %v16488_v37  ;;  %v452_v32 = vld [vmem:[#allocation5 + $0x838] sm:$0xff] }
 0x537   :  { %11089 = vmatprep.subr.bf16.mxu0 %v16353_v17  ;;  %11132 = vmatprep.subr.bf16.mxu1 %v16481_v50  ;;  %v576_v47 = vld [vmem:[#allocation5 + $0xc18] sm:$0xff]  ;;  %v16329_v53 = vcombine.high %v448_v5, %v452_v32  ;;  %v16328_v26 = vcombine.low %v448_v5, %v452_v32 }
 0x538   :  { %v580_v34 = vld [vmem:[#allocation5 + $0xc38] sm:$0xff] }
 0x539   :  { %v16457_v37 = vcombine.high %v576_v47, %v580_v34  ;;  %v568_v17 = vld [vmem:[#allocation5 + $0xbd8] sm:$0xff]  ;;  %v16456_v35 = vcombine.low %v576_v47, %v580_v34 }
 0x53a   :  { %11090 = vmatpush1.bf16.msra.mxu0 %v16352_v38  ;;  %11133 = vmatpush1.bf16.msra.mxu1 %v16480_v9  ;;  %v572_v50 = vld [vmem:[#allocation5 + $0xbf8] sm:$0xff] }
 0x53b   :  { %11091 = vmatprep.subr.bf16.mxu0 %v16345_v21  ;;  %11134 = vmatprep.subr.bf16.mxu1 %v16473_v43  ;;  %v696_v1 = vld [vmem:[#allocation5 + $0xfd8] sm:$0xff]  ;;  %v16449_v38 = vcombine.high %v568_v17, %v572_v50  ;;  %v16448_v28 = vcombine.low %v568_v17, %v572_v50 }
 0x53c   :  { %v700_v39 = vld [vmem:[#allocation5 + $0xff8] sm:$0xff] }
 0x53d   :  { %v16577_v9 = vcombine.high %v696_v1, %v700_v39  ;;  %v560_v21 = vld [vmem:[#allocation5 + $0xb98] sm:$0xff]  ;;  %v16576_v10 = vcombine.low %v696_v1, %v700_v39 }
 0x53e   :  { %11092 = vmatpush1.bf16.msra.mxu0 %v16344_v25  ;;  %11135 = vmatpush1.bf16.msra.mxu1 %v16472_v3  ;;  %v564_v43 = vld [vmem:[#allocation5 + $0xbb8] sm:$0xff] }
 0x53f   :  { %11093 = vmatprep.subr.bf16.mxu0 %v16337_v57  ;;  %11136 = vmatprep.subr.bf16.mxu1 %v16465_v58  ;;  %v688_v51 = vld [vmem:[#allocation5 + $0xf98] sm:$0xff]  ;;  %v16441_v25 = vcombine.high %v560_v21, %v564_v43  ;;  %v16440_v47 = vcombine.low %v560_v21, %v564_v43 }
 0x540   :  { %v692_v46 = vld [vmem:[#allocation5 + $0xfb8] sm:$0xff] }
 0x541   :  { %v16569_v3 = vcombine.high %v688_v51, %v692_v46  ;;  %v552_v57 = vld [vmem:[#allocation5 + $0xb58] sm:$0xff]  ;;  %v16568_v34 = vcombine.low %v688_v51, %v692_v46 }
 0x542   :  { %11094 = vmatpush1.bf16.msra.mxu0 %v16336_v12  ;;  %11137 = vmatpush1.bf16.msra.mxu1 %v16464_v36  ;;  %v556_v58 = vld [vmem:[#allocation5 + $0xb78] sm:$0xff] }
 0x543   :  { %11095 = vmatprep.subr.bf16.mxu0 %v16329_v53  ;;  %11138 = vmatprep.subr.bf16.mxu1 %v16457_v37  ;;  %v680_v5 = vld [vmem:[#allocation5 + $0xf58] sm:$0xff]  ;;  %v16433_v12 = vcombine.high %v552_v57, %v556_v58  ;;  %v16432_v1 = vcombine.low %v552_v57, %v556_v58 }
 0x544   :  { %v684_v32 = vld [vmem:[#allocation5 + $0xf78] sm:$0xff] }
 0x545   :  { %v16561_v36 = vcombine.high %v680_v5, %v684_v32  ;;  %v544_v53 = vld [vmem:[#allocation5 + $0xb18] sm:$0xff]  ;;  %v16560_v39 = vcombine.low %v680_v5, %v684_v32 }
 0x546   :  { %11096 = vmatpush1.bf16.msra.mxu0 %v16328_v26  ;;  %11139 = vmatpush1.bf16.msra.mxu1 %v16456_v35  ;;  %v548_v37 = vld [vmem:[#allocation5 + $0xb38] sm:$0xff] }
 0x547   :  { %11097 = vmatprep.subr.bf16.mxu0 %v16449_v38  ;;  %11140 = vmatprep.subr.bf16.mxu1 %v16577_v9  ;;  %v672_v17 = vld [vmem:[#allocation5 + $0xf18] sm:$0xff]  ;;  %v16425_v26 = vcombine.high %v544_v53, %v548_v37  ;;  %v16424_v51 = vcombine.low %v544_v53, %v548_v37 }
 0x548   :  { %v676_v50 = vld [vmem:[#allocation5 + $0xf38] sm:$0xff] }
 0x549   :  { %v16553_v35 = vcombine.high %v672_v17, %v676_v50  ;;  %v536_v38 = vld [vmem:[#allocation5 + $0xad8] sm:$0xff]  ;;  %v16552_v46 = vcombine.low %v672_v17, %v676_v50 }
 0x54a   :  { %11098 = vmatpush2.bf16.msra.mxu0 %v16448_v28  ;;  %11141 = vmatpush2.bf16.msra.mxu1 %v16576_v10  ;;  %v540_v9 = vld [vmem:[#allocation5 + $0xaf8] sm:$0xff] }
 0x54b   :  { %11099 = vmatprep.subr.bf16.mxu0 %v16441_v25  ;;  %11142 = vmatprep.subr.bf16.mxu1 %v16569_v3  ;;  %v664_v21 = vld [vmem:[#allocation5 + $0xed8] sm:$0xff]  ;;  %v16417_v28 = vcombine.high %v536_v38, %v540_v9  ;;  %v16416_v5 = vcombine.low %v536_v38, %v540_v9 }
 0x54c   :  { %v668_v43 = vld [vmem:[#allocation5 + $0xef8] sm:$0xff] }
 0x54d   :  { %v16545_v10 = vcombine.high %v664_v21, %v668_v43  ;;  %v528_v25 = vld [vmem:[#allocation5 + $0xa98] sm:$0xff]  ;;  %v16544_v32 = vcombine.low %v664_v21, %v668_v43 }
 0x54e   :  { %11100 = vmatpush2.bf16.msra.mxu0 %v16440_v47  ;;  %11143 = vmatpush2.bf16.msra.mxu1 %v16568_v34  ;;  %v532_v3 = vld [vmem:[#allocation5 + $0xab8] sm:$0xff] }
 0x54f   :  { %11101 = vmatprep.subr.bf16.mxu0 %v16433_v12  ;;  %11144 = vmatprep.subr.bf16.mxu1 %v16561_v36  ;;  %v656_v57 = vld [vmem:[#allocation5 + $0xe98] sm:$0xff]  ;;  %v16409_v47 = vcombine.high %v528_v25, %v532_v3  ;;  %v16408_v17 = vcombine.low %v528_v25, %v532_v3 }
 0x550   :  { %v660_v58 = vld [vmem:[#allocation5 + $0xeb8] sm:$0xff] }
 0x551   :  { %v16537_v34 = vcombine.high %v656_v57, %v660_v58  ;;  %v520_v12 = vld [vmem:[#allocation5 + $0xa58] sm:$0xff]  ;;  %v16536_v50 = vcombine.low %v656_v57, %v660_v58 }
 0x552   :  { %11102 = vmatpush2.bf16.msra.mxu0 %v16432_v1  ;;  %11145 = vmatpush2.bf16.msra.mxu1 %v16560_v39  ;;  %v524_v36 = vld [vmem:[#allocation5 + $0xa78] sm:$0xff] }
 0x553   :  { %11103 = vmatprep.subr.bf16.mxu0 %v16425_v26  ;;  %11146 = vmatprep.subr.bf16.mxu1 %v16553_v35  ;;  %v648_v53 = vld [vmem:[#allocation5 + $0xe58] sm:$0xff]  ;;  %v16401_v1 = vcombine.high %v520_v12, %v524_v36  ;;  %v16400_v21 = vcombine.low %v520_v12, %v524_v36 }
 0x554   :  { %v652_v37 = vld [vmem:[#allocation5 + $0xe78] sm:$0xff] }
 0x555   :  { %v16529_v39 = vcombine.high %v648_v53, %v652_v37  ;;  %v512_v26 = vld [vmem:[#allocation5 + $0xa18] sm:$0xff]  ;;  %v16528_v43 = vcombine.low %v648_v53, %v652_v37  ;;  %v18948_v37 = vpop.f32.mrf.mxu0 }
 0x556   :  { %11104 = vmatpush2.bf16.msra.mxu0 %v16424_v51  ;;  %11147 = vmatpush2.bf16.msra.mxu1 %v16552_v46  ;;  %v516_v35 = vld [vmem:[#allocation5 + $0xa38] sm:$0xff] }
 0x557   :  { %11105 = vmatprep.subr.bf16.mxu0 %v16417_v28  ;;  %11148 = vmatprep.subr.bf16.mxu1 %v16545_v10  ;;  %v640_v38 = vld [vmem:[#allocation5 + $0xe18] sm:$0xff]  ;;  %v16393_v51 = vcombine.high %v512_v26, %v516_v35  ;;  %v16392_v57 = vcombine.low %v512_v26, %v516_v35 }
 0x558   :  { %v644_v9 = vld [vmem:[#allocation5 + $0xe38] sm:$0xff] }
 0x559   :  { %v16521_v46 = vcombine.high %v640_v38, %v644_v9  ;;  %v760_v28 = vld [vmem:[#allocation5 + $0x11d8] sm:$0xff]  ;;  %v16520_v58 = vcombine.low %v640_v38, %v644_v9 }
 0x55a   :  { %11106 = vmatpush2.bf16.msra.mxu0 %v16416_v5  ;;  %11149 = vmatpush2.bf16.msra.mxu1 %v16544_v32  ;;  %v764_v10 = vld [vmem:[#allocation5 + $0x11f8] sm:$0xff] }
 0x55b   :  { %11107 = vmatprep.subr.bf16.mxu0 %v16409_v47  ;;  %11150 = vmatprep.subr.bf16.mxu1 %v16537_v34  ;;  %v888_v25 = vld [vmem:[#allocation5 + $0x15d8] sm:$0xff]  ;;  %v16641_v5 = vcombine.high %v760_v28, %v764_v10  ;;  %v16640_v53 = vcombine.low %v760_v28, %v764_v10 }
 0x55c   :  { %v892_v3 = vld [vmem:[#allocation5 + $0x15f8] sm:$0xff] }
 0x55d   :  { %v16769_v32 = vcombine.high %v888_v25, %v892_v3  ;;  %v752_v47 = vld [vmem:[#allocation5 + $0x1198] sm:$0xff] }
 0x55e   :  { %11108 = vmatpush2.bf16.msra.mxu0 %v16408_v17  ;;  %11151 = vmatpush2.bf16.msra.mxu1 %v16536_v50  ;;  %v756_v34 = vld [vmem:[#allocation5 + $0x11b8] sm:$0xff]  ;;  %v16768_v17 = vcombine.low %v888_v25, %v892_v3 }
 0x55f   :  { %11109 = vmatprep.subr.bf16.mxu0 %v16401_v1  ;;  %11152 = vmatprep.subr.bf16.mxu1 %v16529_v39  ;;  %v880_v12 = vld [vmem:[#allocation5 + $0x1598] sm:$0xff]  ;;  %v16633_v50 = vcombine.high %v752_v47, %v756_v34  ;;  %v18950_v1 = vpop.f32.mrf.mxu1 }
 0x560   :  { %v884_v36 = vld [vmem:[#allocation5 + $0x15b8] sm:$0xff] }
 0x561   :  { %v16761_v39 = vcombine.high %v880_v12, %v884_v36  ;;  %v744_v26 = vld [vmem:[#allocation5 + $0x1158] sm:$0xff]  ;;  %v16760_v10 = vcombine.low %v880_v12, %v884_v36 }
 0x562   :  { %11110 = vmatpush2.bf16.msra.mxu0 %v16400_v21  ;;  %11153 = vmatpush2.bf16.msra.mxu1 %v16528_v43  ;;  %v748_v35 = vld [vmem:[#allocation5 + $0x1178] sm:$0xff] }
 0x563   :  { %11111 = vmatprep.subr.bf16.mxu0 %v16393_v51  ;;  %11154 = vmatprep.subr.bf16.mxu1 %v16521_v46  ;;  %v872_v9 = vld [vmem:[#allocation5 + $0x1558] sm:$0xff]  ;;  %v16632_v46 = vcombine.low %v752_v47, %v756_v34  ;;  %v16625_v25 = vcombine.high %v744_v26, %v748_v35  ;;  %v16624_v34 = vcombine.low %v744_v26, %v748_v35 }
 0x564   :  { %v876_v21 = vld [vmem:[#allocation5 + $0x1578] sm:$0xff] }
 0x565   :  { %v16752_v36 = vcombine.low %v872_v9, %v876_v21  ;;  %v720_v35 = vld [vmem:[#allocation5 + $0x1098] sm:$0xff] }
 0x566   :  { %11112 = vmatpush2.bf16.msra.mxu0 %v16392_v57  ;;  %11155 = vmatpush2.bf16.msra.mxu1 %v16520_v58  ;;  %v736_v58 = vld [vmem:[#allocation5 + $0x1118] sm:$0xff] }
 0x567   :  { %11167 = vmatprep.subr.bf16.mxu0 %v16641_v5  ;;  %11210 = vmatprep.subr.bf16.mxu1 %v16769_v32  ;;  %v740_v5 = vld [vmem:[#allocation5 + $0x1138] sm:$0xff] }
 0x568   :  { %v868_v32 = vld [vmem:[#allocation5 + $0x1538] sm:$0xff] }
 0x569   :  { %v10857_v38 = vpop.f32.mrf.mxu0  ;;  %11114 = vmatmul.mubr.bf16.vlgmr.msra.gmra.mxu0 %v18616_v48  ;;  %v10900_v51 = vpop.f32.mrf.mxu1  ;;  %11157 = vmatmul.mubr.bf16.vlgmr.msra.gmra.mxu1 %v18618_v49  ;;  %v16753_v48 = vcombine.high %v872_v9, %v876_v21  ;;  %v864_v49 = vld [vmem:[#allocation5 + $0x1518] sm:$0xff] }
 0x56a   :  { %v10858_v43 = vadd.f32 %v10857_v38, %v18939_v52  ;;  %11168 = vmatpush1.bf16.msra.mxu0 %v16640_v53  ;;  %11211 = vmatpush1.bf16.msra.mxu1 %v16768_v17  ;;  %v16617_v53 = vcombine.high %v736_v58, %v740_v5  ;;  %v856_v38 = vld [vmem:[#allocation5 + $0x14d8] sm:$0xff] }
 0x56b   :  { %v18955_v28 = vpop.f32.mrf.mxu0  ;;  %11169 = vmatprep.subr.bf16.mxu0 %v16633_v50  ;;  %v18959_v57 = vpop.f32.mrf.mxu1  ;;  %11212 = vmatprep.subr.bf16.mxu1 %v16761_v39  ;;  %v16745_v50 = vcombine.high %v864_v49, %v868_v32  ;;  %v728_v39 = vld [vmem:[#allocation5 + $0x10d8] sm:$0xff] }
 0x56c   :  { %v18957_v3 = vadd.f32 %v10900_v51, %v10858_v43  ;;  %11199 = vmatprep.mubr.bf16.mxu0 %v18620_v59  ;;  %11242 = vmatprep.mubr.bf16.mxu1 %v18623_v62  ;;  %v732_v59 = vld [vmem:[#allocation5 + $0x10f8] sm:$0xff]  ;;  %v16616_v51 = vcombine.low %v736_v58, %v740_v5  ;;  %v16744_v62 = vcombine.low %v864_v49, %v868_v32 }
 0x56d   :  { %v10861_v52 = vpop.f32.mrf.mxu0  ;;  %v10904_v12 = vpop.f32.mrf.mxu1  ;;  %v860_v43 = vld [vmem:[#allocation5 + $0x14f8] sm:$0xff] }
 0x56e   :  { %v10862_v47 = vadd.f32 %v10861_v52, %v18946_v22  ;;  %11170 = vmatpush1.bf16.msra.mxu0 %v16632_v46  ;;  %11213 = vmatpush1.bf16.msra.mxu1 %v16760_v10  ;;  %v16609_v22 = vcombine.high %v728_v39, %v732_v59  ;;  %v16737_v26 = vcombine.high %v856_v38, %v860_v43  ;;  %v724_v46 = vld [vmem:[#allocation5 + $0x10b8] sm:$0xff] }
 0x56f   :  { %11171 = vmatprep.subr.bf16.mxu0 %v16625_v25  ;;  %11214 = vmatprep.subr.bf16.mxu1 %v16753_v48  ;;  %v848_v9 = vld [vmem:[#allocation5 + $0x1498] sm:$0xff]  ;;  %v16608_v10 = vcombine.low %v728_v39, %v732_v59  ;;  %v16736_v25 = vcombine.low %v856_v38, %v860_v43  ;;  %v16601_v48 = vcombine.high %v720_v35, %v724_v46 }
 0x570   :  { %v18964_v17 = vadd.f32 %v10904_v12, %v10862_v47  ;;  %v852_v21 = vld [vmem:[#allocation5 + $0x14b8] sm:$0xff]  ;;  %v16600_v49 = vcombine.low %v720_v35, %v724_v46 }
 0x571   :  { %v16729_v52 = vcombine.high %v848_v9, %v852_v21  ;;  %v712_v47 = vld [vmem:[#allocation5 + $0x1058] sm:$0xff]  ;;  %v16728_v32 = vcombine.low %v848_v9, %v852_v21 }
 0x572   :  { %11172 = vmatpush1.bf16.msra.mxu0 %v16624_v34  ;;  %11215 = vmatpush1.bf16.msra.mxu1 %v16752_v36  ;;  %v716_v58 = vld [vmem:[#allocation5 + $0x1078] sm:$0xff] }
 0x573   :  { %11173 = vmatprep.subr.bf16.mxu0 %v16617_v53  ;;  %11216 = vmatprep.subr.bf16.mxu1 %v16745_v50  ;;  %v840_v5 = vld [vmem:[#allocation5 + $0x1458] sm:$0xff]  ;;  %v16593_v12 = vcombine.high %v712_v47, %v716_v58  ;;  %v16592_v38 = vcombine.low %v712_v47, %v716_v58 }
 0x574   :  { %v844_v34 = vld [vmem:[#allocation5 + $0x1478] sm:$0xff] }
 0x575   :  { %v16721_v36 = vcombine.high %v840_v5, %v844_v34  ;;  %v704_v53 = vld [vmem:[#allocation5 + $0x1018] sm:$0xff]  ;;  %v16720_v43 = vcombine.low %v840_v5, %v844_v34 }
 0x576   :  { %11174 = vmatpush1.bf16.msra.mxu0 %v16616_v51  ;;  %11217 = vmatpush1.bf16.msra.mxu1 %v16744_v62  ;;  %v708_v50 = vld [vmem:[#allocation5 + $0x1038] sm:$0xff] }
 0x577   :  { %11175 = vmatprep.subr.bf16.mxu0 %v16609_v22  ;;  %11218 = vmatprep.subr.bf16.mxu1 %v16737_v26  ;;  %v832_v39 = vld [vmem:[#allocation5 + $0x1418] sm:$0xff]  ;;  %v16585_v51 = vcombine.high %v704_v53, %v708_v50  ;;  %v16584_v9 = vcombine.low %v704_v53, %v708_v50 }
 0x578   :  { %v836_v59 = vld [vmem:[#allocation5 + $0x1438] sm:$0xff] }
 0x579   :  { %v16713_v62 = vcombine.high %v832_v39, %v836_v59  ;;  %v824_v22 = vld [vmem:[#allocation5 + $0x13d8] sm:$0xff]  ;;  %v16712_v21 = vcombine.low %v832_v39, %v836_v59 }
 0x57a   :  { %11176 = vmatpush1.bf16.msra.mxu0 %v16608_v10  ;;  %11219 = vmatpush1.bf16.msra.mxu1 %v16736_v25  ;;  %v828_v26 = vld [vmem:[#allocation5 + $0x13f8] sm:$0xff] }
 0x57b   :  { %11177 = vmatprep.subr.bf16.mxu0 %v16601_v48  ;;  %11220 = vmatprep.subr.bf16.mxu1 %v16729_v52  ;;  %v952_v35 = vld [vmem:[#allocation5 + $0x17d8] sm:$0xff]  ;;  %v16705_v10 = vcombine.high %v824_v22, %v828_v26  ;;  %v16704_v5 = vcombine.low %v824_v22, %v828_v26 }
 0x57c   :  { %v956_v46 = vld [vmem:[#allocation5 + $0x17f8] sm:$0xff] }
 0x57d   :  { %v16833_v25 = vcombine.high %v952_v35, %v956_v46  ;;  %v816_v48 = vld [vmem:[#allocation5 + $0x1398] sm:$0xff]  ;;  %v16832_v34 = vcombine.low %v952_v35, %v956_v46 }
 0x57e   :  { %11178 = vmatpush1.bf16.msra.mxu0 %v16600_v49  ;;  %11221 = vmatpush1.bf16.msra.mxu1 %v16728_v32  ;;  %v820_v52 = vld [vmem:[#allocation5 + $0x13b8] sm:$0xff] }
 0x57f   :  { %11179 = vmatprep.subr.bf16.mxu0 %v16593_v12  ;;  %11222 = vmatprep.subr.bf16.mxu1 %v16721_v36  ;;  %v944_v47 = vld [vmem:[#allocation5 + $0x1798] sm:$0xff]  ;;  %v16697_v49 = vcombine.high %v816_v48, %v820_v52  ;;  %v16696_v39 = vcombine.low %v816_v48, %v820_v52 }
 0x580   :  { %v948_v58 = vld [vmem:[#allocation5 + $0x17b8] sm:$0xff] }
 0x581   :  { %v16825_v32 = vcombine.high %v944_v47, %v948_v58  ;;  %v808_v12 = vld [vmem:[#allocation5 + $0x1358] sm:$0xff]  ;;  %v16824_v59 = vcombine.low %v944_v47, %v948_v58 }
 0x582   :  { %11180 = vmatpush1.bf16.msra.mxu0 %v16592_v38  ;;  %11223 = vmatpush1.bf16.msra.mxu1 %v16720_v43  ;;  %v812_v36 = vld [vmem:[#allocation5 + $0x1378] sm:$0xff] }
 0x583   :  { %11181 = vmatprep.subr.bf16.mxu0 %v16585_v51  ;;  %11224 = vmatprep.subr.bf16.mxu1 %v16713_v62  ;;  %v936_v53 = vld [vmem:[#allocation5 + $0x1758] sm:$0xff]  ;;  %v16689_v38 = vcombine.high %v808_v12, %v812_v36  ;;  %v16688_v35 = vcombine.low %v808_v12, %v812_v36 }
 0x584   :  { %v940_v50 = vld [vmem:[#allocation5 + $0x1778] sm:$0xff] }
 0x585   :  { %v16817_v43 = vcombine.high %v936_v53, %v940_v50  ;;  %v800_v51 = vld [vmem:[#allocation5 + $0x1318] sm:$0xff]  ;;  %v16816_v46 = vcombine.low %v936_v53, %v940_v50 }
 0x586   :  { %11182 = vmatpush1.bf16.msra.mxu0 %v16584_v9  ;;  %11225 = vmatpush1.bf16.msra.mxu1 %v16712_v21  ;;  %v804_v62 = vld [vmem:[#allocation5 + $0x1338] sm:$0xff] }
 0x587   :  { %11183 = vmatprep.subr.bf16.mxu0 %v16705_v10  ;;  %11226 = vmatprep.subr.bf16.mxu1 %v16833_v25  ;;  %v928_v22 = vld [vmem:[#allocation5 + $0x1718] sm:$0xff]  ;;  %v16681_v9 = vcombine.high %v800_v51, %v804_v62  ;;  %v16680_v47 = vcombine.low %v800_v51, %v804_v62 }
 0x588   :  { %v932_v26 = vld [vmem:[#allocation5 + $0x1738] sm:$0xff] }
 0x589   :  { %v16809_v21 = vcombine.high %v928_v22, %v932_v26  ;;  %v792_v10 = vld [vmem:[#allocation5 + $0x12d8] sm:$0xff]  ;;  %v16808_v58 = vcombine.low %v928_v22, %v932_v26 }
 0x58a   :  { %11184 = vmatpush2.bf16.msra.mxu0 %v16704_v5  ;;  %11227 = vmatpush2.bf16.msra.mxu1 %v16832_v34  ;;  %v796_v25 = vld [vmem:[#allocation5 + $0x12f8] sm:$0xff] }
 0x58b   :  { %11185 = vmatprep.subr.bf16.mxu0 %v16697_v49  ;;  %11228 = vmatprep.subr.bf16.mxu1 %v16825_v32  ;;  %v920_v48 = vld [vmem:[#allocation5 + $0x16d8] sm:$0xff]  ;;  %v16673_v5 = vcombine.high %v792_v10, %v796_v25  ;;  %v16672_v53 = vcombine.low %v792_v10, %v796_v25 }
 0x58c   :  { %v924_v52 = vld [vmem:[#allocation5 + $0x16f8] sm:$0xff] }
 0x58d   :  { %v16801_v34 = vcombine.high %v920_v48, %v924_v52  ;;  %v784_v49 = vld [vmem:[#allocation5 + $0x1298] sm:$0xff]  ;;  %v16800_v50 = vcombine.low %v920_v48, %v924_v52 }
 0x58e   :  { %11186 = vmatpush2.bf16.msra.mxu0 %v16696_v39  ;;  %11229 = vmatpush2.bf16.msra.mxu1 %v16824_v59  ;;  %v788_v32 = vld [vmem:[#allocation5 + $0x12b8] sm:$0xff] }
 0x58f   :  { %11187 = vmatprep.subr.bf16.mxu0 %v16689_v38  ;;  %11230 = vmatprep.subr.bf16.mxu1 %v16817_v43  ;;  %v912_v12 = vld [vmem:[#allocation5 + $0x1698] sm:$0xff]  ;;  %v16665_v39 = vcombine.high %v784_v49, %v788_v32  ;;  %v16664_v22 = vcombine.low %v784_v49, %v788_v32 }
 0x590   :  { %v916_v36 = vld [vmem:[#allocation5 + $0x16b8] sm:$0xff] }
 0x591   :  { %v16793_v59 = vcombine.high %v912_v12, %v916_v36  ;;  %v776_v38 = vld [vmem:[#allocation5 + $0x1258] sm:$0xff]  ;;  %v16792_v26 = vcombine.low %v912_v12, %v916_v36 }
 0x592   :  { %11188 = vmatpush2.bf16.msra.mxu0 %v16688_v35  ;;  %11231 = vmatpush2.bf16.msra.mxu1 %v16816_v46  ;;  %v780_v43 = vld [vmem:[#allocation5 + $0x1278] sm:$0xff] }
 0x593   :  { %11189 = vmatprep.subr.bf16.mxu0 %v16681_v9  ;;  %11232 = vmatprep.subr.bf16.mxu1 %v16809_v21  ;;  %v904_v51 = vld [vmem:[#allocation5 + $0x1658] sm:$0xff]  ;;  %v16657_v35 = vcombine.high %v776_v38, %v780_v43  ;;  %v16656_v48 = vcombine.low %v776_v38, %v780_v43 }
 0x594   :  { %v908_v62 = vld [vmem:[#allocation5 + $0x1678] sm:$0xff] }
 0x595   :  { %v16785_v46 = vcombine.high %v904_v51, %v908_v62  ;;  %v768_v9 = vld [vmem:[#allocation5 + $0x1218] sm:$0xff]  ;;  %v16784_v52 = vcombine.low %v904_v51, %v908_v62  ;;  %v18966_v62 = vpop.f32.mrf.mxu0 }
 0x596   :  { %11190 = vmatpush2.bf16.msra.mxu0 %v16680_v47  ;;  %11233 = vmatpush2.bf16.msra.mxu1 %v16808_v58  ;;  %v772_v21 = vld [vmem:[#allocation5 + $0x1238] sm:$0xff] }
 0x597   :  { %11191 = vmatprep.subr.bf16.mxu0 %v16673_v5  ;;  %11234 = vmatprep.subr.bf16.mxu1 %v16801_v34  ;;  %v896_v10 = vld [vmem:[#allocation5 + $0x1618] sm:$0xff]  ;;  %v16649_v47 = vcombine.high %v768_v9, %v772_v21  ;;  %v16648_v12 = vcombine.low %v768_v9, %v772_v21 }
 0x598   :  { %v900_v25 = vld [vmem:[#allocation5 + $0x1638] sm:$0xff] }
 0x599   :  { %v16777_v58 = vcombine.high %v896_v10, %v900_v25  ;;  %v1016_v5 = vld [vmem:[#allocation5 + $0x19d8] sm:$0xff]  ;;  %v16776_v36 = vcombine.low %v896_v10, %v900_v25 }
 0x59a   :  { %11192 = vmatpush2.bf16.msra.mxu0 %v16672_v53  ;;  %11235 = vmatpush2.bf16.msra.mxu1 %v16800_v50  ;;  %v1020_v34 = vld [vmem:[#allocation5 + $0x19f8] sm:$0xff] }
 0x59b   :  { %11193 = vmatprep.subr.bf16.mxu0 %v16665_v39  ;;  %11236 = vmatprep.subr.bf16.mxu1 %v16793_v59  ;;  %v1144_v49 = vld [vmem:[#allocation5 + $0x1dd8] sm:$0xff]  ;;  %v16897_v53 = vcombine.high %v1016_v5, %v1020_v34  ;;  %v16896_v51 = vcombine.low %v1016_v5, %v1020_v34 }
 0x59c   :  { %v1148_v32 = vld [vmem:[#allocation5 + $0x1df8] sm:$0xff] }
 0x59d   :  { %v17025_v50 = vcombine.high %v1144_v49, %v1148_v32  ;;  %v1008_v39 = vld [vmem:[#allocation5 + $0x1998] sm:$0xff] }
 0x59e   :  { %11194 = vmatpush2.bf16.msra.mxu0 %v16664_v22  ;;  %11237 = vmatpush2.bf16.msra.mxu1 %v16792_v26  ;;  %v1012_v59 = vld [vmem:[#allocation5 + $0x19b8] sm:$0xff]  ;;  %v17024_v22 = vcombine.low %v1144_v49, %v1148_v32 }
 0x59f   :  { %11195 = vmatprep.subr.bf16.mxu0 %v16657_v35  ;;  %11238 = vmatprep.subr.bf16.mxu1 %v16785_v46  ;;  %v1136_v38 = vld [vmem:[#allocation5 + $0x1d98] sm:$0xff]  ;;  %v16889_v26 = vcombine.high %v1008_v39, %v1012_v59  ;;  %v18968_v35 = vpop.f32.mrf.mxu1 }
 0x5a0   :  { %v1140_v43 = vld [vmem:[#allocation5 + $0x1db8] sm:$0xff] }
 0x5a1   :  { %v17017_v46 = vcombine.high %v1136_v38, %v1140_v43  ;;  %v1000_v9 = vld [vmem:[#allocation5 + $0x1958] sm:$0xff]  ;;  %v17016_v34 = vcombine.low %v1136_v38, %v1140_v43 }
 0x5a2   :  { %11196 = vmatpush2.bf16.msra.mxu0 %v16656_v48  ;;  %11239 = vmatpush2.bf16.msra.mxu1 %v16784_v52  ;;  %v1004_v21 = vld [vmem:[#allocation5 + $0x1978] sm:$0xff] }
 0x5a3   :  { %11197 = vmatprep.subr.bf16.mxu0 %v16649_v47  ;;  %11240 = vmatprep.subr.bf16.mxu1 %v16777_v58  ;;  %v1128_v25 = vld [vmem:[#allocation5 + $0x1d58] sm:$0xff]  ;;  %v16888_v58 = vcombine.low %v1008_v39, %v1012_v59  ;;  %v16881_v49 = vcombine.high %v1000_v9, %v1004_v21  ;;  %v16880_v59 = vcombine.low %v1000_v9, %v1004_v21 }
 0x5a4   :  { %v1132_v48 = vld [vmem:[#allocation5 + $0x1d78] sm:$0xff] }
 0x5a5   :  { %v17008_v43 = vcombine.low %v1128_v25, %v1132_v48 }
 0x5a6   :  { %11198 = vmatpush2.bf16.msra.mxu0 %v16648_v12  ;;  %11241 = vmatpush2.bf16.msra.mxu1 %v16776_v36  ;;  %v992_v36 = vld [vmem:[#allocation5 + $0x1918] sm:$0xff] }
 0x5a7   :  { %11253 = vmatprep.subr.bf16.mxu0 %v16897_v53  ;;  %11296 = vmatprep.subr.bf16.mxu1 %v17025_v50  ;;  %v996_v53 = vld [vmem:[#allocation5 + $0x1938] sm:$0xff] }
 0x5a8   :  { %v1120_v50 = vld [vmem:[#allocation5 + $0x1d18] sm:$0xff] }
 0x5a9   :  { %v10943_v10 = vpop.f32.mrf.mxu0  ;;  %11200 = vmatmul.mubr.bf16.vlgmr.msra.gmra.mxu0 %v18628_v15  ;;  %v10986_v47 = vpop.f32.mrf.mxu1  ;;  %11243 = vmatmul.mubr.bf16.vlgmr.msra.gmra.mxu1 %v18630_v19  ;;  %v17009_v15 = vcombine.high %v1128_v25, %v1132_v48  ;;  %v1124_v19 = vld [vmem:[#allocation5 + $0x1d38] sm:$0xff] }
 0x5aa   :  { %v10944_v52 = vadd.f32 %v10943_v10, %v18957_v3  ;;  %11254 = vmatpush1.bf16.msra.mxu0 %v16896_v51  ;;  %11297 = vmatpush1.bf16.msra.mxu1 %v17024_v22  ;;  %v16873_v51 = vcombine.high %v992_v36, %v996_v53  ;;  %v988_v10 = vld [vmem:[#allocation5 + $0x18f8] sm:$0xff] }
 0x5ab   :  { %v18973_v5 = vpop.f32.mrf.mxu0  ;;  %11255 = vmatprep.subr.bf16.mxu0 %v16889_v26  ;;  %v18975_v12 = vpop.f32.mrf.mxu1  ;;  %11298 = vmatprep.subr.bf16.mxu1 %v17017_v46  ;;  %v17001_v26 = vcombine.high %v1120_v50, %v1124_v19  ;;  %v984_v46 = vld [vmem:[#allocation5 + $0x18d8] sm:$0xff] }
 0x5ac   :  { %v10987_v32 = vadd.f32 %v10986_v47, %v10944_v52  ;;  %19343 = vst [vmem:[#allocation65_spill] sm:$0xff] %v18975_v12  ;;  %11285 = vmatprep.mubr.bf16.mxu0 %v18632_v30  ;;  %11328 = vmatprep.mubr.bf16.mxu1 %v18635_v33  ;;  %v1112_v30 = vld [vmem:[#allocation5 + $0x1cd8] sm:$0xff]  ;;  %v16872_v33 = vcombine.low %v992_v36, %v996_v53 }
 0x5ad   :  { %v10947_v3 = vpop.f32.mrf.mxu0  ;;  %v10990_v38 = vpop.f32.mrf.mxu1  ;;  %v1116_v52 = vld [vmem:[#allocation5 + $0x1cf8] sm:$0xff]  ;;  %v16865_v9 = vcombine.high %v984_v46, %v988_v10 }
 0x5ae   :  { %v10948_v39 = vadd.f32 %v10947_v3, %v18964_v17  ;;  %11256 = vmatpush1.bf16.msra.mxu0 %v16888_v58  ;;  %11299 = vmatpush1.bf16.msra.mxu1 %v17016_v34  ;;  %v11515_v47 = vmax.f32 %v10987_v32, 0.0  ;;  %v17000_v17 = vcombine.low %v1120_v50, %v1124_v19  ;;  %v16993_v25 = vcombine.high %v1112_v30, %v1116_v52  ;;  %v976_v48 = vld [vmem:[#allocation5 + $0x1898] sm:$0xff] }
 0x5af   :  { %11257 = vmatprep.subr.bf16.mxu0 %v16881_v49  ;;  %11300 = vmatprep.subr.bf16.mxu1 %v17009_v15  ;;  %v980_v58 = vld [vmem:[#allocation5 + $0x18b8] sm:$0xff]  ;;  %v16864_v15 = vcombine.low %v984_v46, %v988_v10  ;;  %v16992_v32 = vcombine.low %v1112_v30, %v1116_v52 }
 0x5b0   :  { %v10991_v22 = vadd.f32 %v10990_v38, %v10948_v39  ;;  %v1104_v34 = vld [vmem:[#allocation5 + $0x1c98] sm:$0xff]  ;;  %v16857_v3 = vcombine.high %v976_v48, %v980_v58 }
 0x5b1   :  { %v1108_v49 = vld [vmem:[#allocation5 + $0x1cb8] sm:$0xff] }
 0x5b2   :  { %v11523_v12 = vmax.f32 %v10991_v22, 0.0  ;;  %11258 = vmatpush1.bf16.msra.mxu0 %v16880_v59  ;;  %11301 = vmatpush1.bf16.msra.mxu1 %v17008_v43  ;;  %v16985_v36 = vcombine.high %v1104_v34, %v1108_v49  ;;  %v968_v53 = vld [vmem:[#allocation5 + $0x1858] sm:$0xff]  ;;  %v16984_v59 = vcombine.low %v1104_v34, %v1108_v49 }
 0x5b3   :  { %11259 = vmatprep.subr.bf16.mxu0 %v16873_v51  ;;  %11302 = vmatprep.subr.bf16.mxu1 %v17001_v26  ;;  %v972_v39 = vld [vmem:[#allocation5 + $0x1878] sm:$0xff] }
 0x5b4   :  { %v18980_v21 = vpack.c.bf16 %v11523_v12, %v11515_v47  ;;  %v1096_v50 = vld [vmem:[#allocation5 + $0x1c58] sm:$0xff]  ;;  %v16856_v12 = vcombine.low %v976_v48, %v980_v58  ;;  %v16849_v38 = vcombine.high %v968_v53, %v972_v39  ;;  %v16848_v10 = vcombine.low %v968_v53, %v972_v39 }
 0x5b5   :  { %v1100_v19 = vld [vmem:[#allocation5 + $0x1c78] sm:$0xff] }
 0x5b6   :  { %11260 = vmatpush1.bf16.msra.mxu0 %v16872_v33  ;;  %11303 = vmatpush1.bf16.msra.mxu1 %v17000_v17  ;;  %v16977_v43 = vcombine.high %v1096_v50, %v1100_v19  ;;  %v960_v51 = vld [vmem:[#allocation5 + $0x1818] sm:$0xff]  ;;  %v16976_v30 = vcombine.low %v1096_v50, %v1100_v19 }
 0x5b7   :  { %11261 = vmatprep.subr.bf16.mxu0 %v16865_v9  ;;  %11304 = vmatprep.subr.bf16.mxu1 %v16993_v25  ;;  %v964_v22 = vld [vmem:[#allocation5 + $0x1838] sm:$0xff] }
 0x5b8   :  { %v1088_v26 = vld [vmem:[#allocation5 + $0x1c18] sm:$0xff]  ;;  %v16841_v52 = vcombine.high %v960_v51, %v964_v22  ;;  %v16840_v48 = vcombine.low %v960_v51, %v964_v22 }
 0x5b9   :  { %v1092_v46 = vld [vmem:[#allocation5 + $0x1c38] sm:$0xff] }
 0x5ba   :  { %11262 = vmatpush1.bf16.msra.mxu0 %v16864_v15  ;;  %11305 = vmatpush1.bf16.msra.mxu1 %v16992_v32  ;;  %v16969_v47 = vcombine.high %v1088_v26, %v1092_v46  ;;  %v1080_v33 = vld [vmem:[#allocation5 + $0x1bd8] sm:$0xff]  ;;  %v16968_v58 = vcombine.low %v1088_v26, %v1092_v46 }
 0x5bb   :  { %11263 = vmatprep.subr.bf16.mxu0 %v16857_v3  ;;  %11306 = vmatprep.subr.bf16.mxu1 %v16985_v36  ;;  %v1084_v17 = vld [vmem:[#allocation5 + $0x1bf8] sm:$0xff] }
 0x5bc   :  { %v1208_v9 = vld [vmem:[#allocation5 + $0x1fd8] sm:$0xff]  ;;  %v16961_v34 = vcombine.high %v1080_v33, %v1084_v17  ;;  %v16960_v53 = vcombine.low %v1080_v33, %v1084_v17 }
 0x5bd   :  { %v1212_v25 = vld [vmem:[#allocation5 + $0x1ff8] sm:$0xff] }
 0x5be   :  { %11264 = vmatpush1.bf16.msra.mxu0 %v16856_v12  ;;  %11307 = vmatpush1.bf16.msra.mxu1 %v16984_v59  ;;  %v17089_v49 = vcombine.high %v1208_v9, %v1212_v25  ;;  %v1072_v15 = vld [vmem:[#allocation5 + $0x1b98] sm:$0xff]  ;;  %v17088_v39 = vcombine.low %v1208_v9, %v1212_v25 }
 0x5bf   :  { %11265 = vmatprep.subr.bf16.mxu0 %v16849_v38  ;;  %11308 = vmatprep.subr.bf16.mxu1 %v16977_v43  ;;  %v1076_v32 = vld [vmem:[#allocation5 + $0x1bb8] sm:$0xff] }
 0x5c0   :  { %v1200_v3 = vld [vmem:[#allocation5 + $0x1f98] sm:$0xff]  ;;  %v16953_v50 = vcombine.high %v1072_v15, %v1076_v32  ;;  %v16952_v51 = vcombine.low %v1072_v15, %v1076_v32 }
 0x5c1   :  { %v1204_v36 = vld [vmem:[#allocation5 + $0x1fb8] sm:$0xff] }
 0x5c2   :  { %11266 = vmatpush1.bf16.msra.mxu0 %v16848_v10  ;;  %11309 = vmatpush1.bf16.msra.mxu1 %v16976_v30  ;;  %v17081_v19 = vcombine.high %v1200_v3, %v1204_v36  ;;  %v1064_v12 = vld [vmem:[#allocation5 + $0x1b58] sm:$0xff]  ;;  %v17080_v22 = vcombine.low %v1200_v3, %v1204_v36 }
 0x5c3   :  { %11267 = vmatprep.subr.bf16.mxu0 %v16841_v52  ;;  %11310 = vmatprep.subr.bf16.mxu1 %v16969_v47  ;;  %v1068_v59 = vld [vmem:[#allocation5 + $0x1b78] sm:$0xff] }
 0x5c4   :  { %v1192_v38 = vld [vmem:[#allocation5 + $0x1f58] sm:$0xff]  ;;  %v16945_v26 = vcombine.high %v1064_v12, %v1068_v59  ;;  %v16944_v33 = vcombine.low %v1064_v12, %v1068_v59 }
 0x5c5   :  { %v1196_v43 = vld [vmem:[#allocation5 + $0x1f78] sm:$0xff] }
 0x5c6   :  { %11268 = vmatpush1.bf16.msra.mxu0 %v16840_v48  ;;  %11311 = vmatpush1.bf16.msra.mxu1 %v16968_v58  ;;  %v17073_v46 = vcombine.high %v1192_v38, %v1196_v43  ;;  %v1056_v10 = vld [vmem:[#allocation5 + $0x1b18] sm:$0xff]  ;;  %v17072_v17 = vcombine.low %v1192_v38, %v1196_v43 }
 0x5c7   :  { %11269 = vmatprep.subr.bf16.mxu0 %v16961_v34  ;;  %11312 = vmatprep.subr.bf16.mxu1 %v17089_v49  ;;  %v1060_v30 = vld [vmem:[#allocation5 + $0x1b38] sm:$0xff] }
 0x5c8   :  { %v1184_v52 = vld [vmem:[#allocation5 + $0x1f18] sm:$0xff]  ;;  %v16937_v9 = vcombine.high %v1056_v10, %v1060_v30  ;;  %v16936_v15 = vcombine.low %v1056_v10, %v1060_v30 }
 0x5c9   :  { %v1188_v47 = vld [vmem:[#allocation5 + $0x1f38] sm:$0xff] }
 0x5ca   :  { %11270 = vmatpush2.bf16.msra.mxu0 %v16960_v53  ;;  %11313 = vmatpush2.bf16.msra.mxu1 %v17088_v39  ;;  %v17065_v25 = vcombine.high %v1184_v52, %v1188_v47  ;;  %v1048_v48 = vld [vmem:[#allocation5 + $0x1ad8] sm:$0xff]  ;;  %v17064_v32 = vcombine.low %v1184_v52, %v1188_v47 }
 0x5cb   :  { %11271 = vmatprep.subr.bf16.mxu0 %v16953_v50  ;;  %11314 = vmatprep.subr.bf16.mxu1 %v17081_v19  ;;  %v1052_v58 = vld [vmem:[#allocation5 + $0x1af8] sm:$0xff] }
 0x5cc   :  { %v1176_v34 = vld [vmem:[#allocation5 + $0x1ed8] sm:$0xff]  ;;  %v16929_v3 = vcombine.high %v1048_v48, %v1052_v58  ;;  %v16928_v12 = vcombine.low %v1048_v48, %v1052_v58 }
 0x5cd   :  { %v1180_v49 = vld [vmem:[#allocation5 + $0x1ef8] sm:$0xff] }
 0x5ce   :  { %11272 = vmatpush2.bf16.msra.mxu0 %v16952_v51  ;;  %11315 = vmatpush2.bf16.msra.mxu1 %v17080_v22  ;;  %v17057_v36 = vcombine.high %v1176_v34, %v1180_v49  ;;  %v1040_v53 = vld [vmem:[#allocation5 + $0x1a98] sm:$0xff]  ;;  %v17056_v59 = vcombine.low %v1176_v34, %v1180_v49 }
 0x5cf   :  { %11273 = vmatprep.subr.bf16.mxu0 %v16945_v26  ;;  %11316 = vmatprep.subr.bf16.mxu1 %v17073_v46  ;;  %v1044_v39 = vld [vmem:[#allocation5 + $0x1ab8] sm:$0xff] }
 0x5d0   :  { %v1168_v50 = vld [vmem:[#allocation5 + $0x1e98] sm:$0xff]  ;;  %v16921_v38 = vcombine.high %v1040_v53, %v1044_v39  ;;  %v16920_v10 = vcombine.low %v1040_v53, %v1044_v39 }
 0x5d1   :  { %v1172_v19 = vld [vmem:[#allocation5 + $0x1eb8] sm:$0xff] }
 0x5d2   :  { %11274 = vmatpush2.bf16.msra.mxu0 %v16944_v33  ;;  %11317 = vmatpush2.bf16.msra.mxu1 %v17072_v17  ;;  %v17049_v43 = vcombine.high %v1168_v50, %v1172_v19  ;;  %v1032_v51 = vld [vmem:[#allocation5 + $0x1a58] sm:$0xff]  ;;  %v17048_v30 = vcombine.low %v1168_v50, %v1172_v19 }
 0x5d3   :  { %11275 = vmatprep.subr.bf16.mxu0 %v16937_v9  ;;  %11318 = vmatprep.subr.bf16.mxu1 %v17065_v25  ;;  %v1036_v22 = vld [vmem:[#allocation5 + $0x1a78] sm:$0xff] }
 0x5d4   :  { %v1160_v26 = vld [vmem:[#allocation5 + $0x1e58] sm:$0xff]  ;;  %v16913_v52 = vcombine.high %v1032_v51, %v1036_v22  ;;  %v16912_v48 = vcombine.low %v1032_v51, %v1036_v22 }
 0x5d5   :  { %v1164_v46 = vld [vmem:[#allocation5 + $0x1e78] sm:$0xff] }
 0x5d6   :  { %11276 = vmatpush2.bf16.msra.mxu0 %v16936_v15  ;;  %11319 = vmatpush2.bf16.msra.mxu1 %v17064_v32  ;;  %v17041_v47 = vcombine.high %v1160_v26, %v1164_v46  ;;  %v1024_v33 = vld [vmem:[#allocation5 + $0x1a18] sm:$0xff]  ;;  %v17040_v58 = vcombine.low %v1160_v26, %v1164_v46 }
 0x5d7   :  { %11277 = vmatprep.subr.bf16.mxu0 %v16929_v3  ;;  %11320 = vmatprep.subr.bf16.mxu1 %v17057_v36  ;;  %v1028_v17 = vld [vmem:[#allocation5 + $0x1a38] sm:$0xff] }
 0x5d8   :  { %v1152_v9 = vld [vmem:[#allocation5 + $0x1e18] sm:$0xff]  ;;  %v16905_v34 = vcombine.high %v1024_v33, %v1028_v17  ;;  %v16904_v53 = vcombine.low %v1024_v33, %v1028_v17 }
 0x5d9   :  { %v1156_v25 = vld [vmem:[#allocation5 + $0x1e38] sm:$0xff] }
 0x5da   :  { %11278 = vmatpush2.bf16.msra.mxu0 %v16928_v12  ;;  %11321 = vmatpush2.bf16.msra.mxu1 %v17056_v59  ;;  %v17033_v49 = vcombine.high %v1152_v9, %v1156_v25  ;;  %v1272_v15 = vld [vmem:[#allocation5 + $0x21d8] sm:$0xff]  ;;  %v17032_v39 = vcombine.low %v1152_v9, %v1156_v25 }
 0x5db   :  { %11279 = vmatprep.subr.bf16.mxu0 %v16921_v38  ;;  %11322 = vmatprep.subr.bf16.mxu1 %v17049_v43  ;;  %v1276_v32 = vld [vmem:[#allocation5 + $0x21f8] sm:$0xff] }
 0x5dc   :  { %v1400_v3 = vld [vmem:[#allocation5 + $0x25d8] sm:$0xff]  ;;  %v17153_v50 = vcombine.high %v1272_v15, %v1276_v32  ;;  %v17152_v51 = vcombine.low %v1272_v15, %v1276_v32 }
 0x5dd   :  { %v1404_v36 = vld [vmem:[#allocation5 + $0x25f8] sm:$0xff] }
 0x5de   :  { %11280 = vmatpush2.bf16.msra.mxu0 %v16920_v10  ;;  %11323 = vmatpush2.bf16.msra.mxu1 %v17048_v30  ;;  %v17281_v19 = vcombine.high %v1400_v3, %v1404_v36  ;;  %v1264_v12 = vld [vmem:[#allocation5 + $0x2198] sm:$0xff]  ;;  %v17280_v22 = vcombine.low %v1400_v3, %v1404_v36 }
 0x5df   :  { %11281 = vmatprep.subr.bf16.mxu0 %v16913_v52  ;;  %11324 = vmatprep.subr.bf16.mxu1 %v17041_v47  ;;  %v1268_v59 = vld [vmem:[#allocation5 + $0x21b8] sm:$0xff] }
 0x5e0   :  { %v1392_v38 = vld [vmem:[#allocation5 + $0x2598] sm:$0xff]  ;;  %v17145_v26 = vcombine.high %v1264_v12, %v1268_v59  ;;  %v17144_v33 = vcombine.low %v1264_v12, %v1268_v59 }
 0x5e1   :  { %v1396_v43 = vld [vmem:[#allocation5 + $0x25b8] sm:$0xff] }
 0x5e2   :  { %11282 = vmatpush2.bf16.msra.mxu0 %v16912_v48  ;;  %11325 = vmatpush2.bf16.msra.mxu1 %v17040_v58  ;;  %v17273_v46 = vcombine.high %v1392_v38, %v1396_v43  ;;  %v1256_v10 = vld [vmem:[#allocation5 + $0x2158] sm:$0xff]  ;;  %v17272_v17 = vcombine.low %v1392_v38, %v1396_v43 }
 0x5e3   :  { %11283 = vmatprep.subr.bf16.mxu0 %v16905_v34  ;;  %11326 = vmatprep.subr.bf16.mxu1 %v17033_v49  ;;  %v1260_v30 = vld [vmem:[#allocation5 + $0x2178] sm:$0xff] }
 0x5e4   :  { %v1384_v52 = vld [vmem:[#allocation5 + $0x2558] sm:$0xff]  ;;  %v17137_v9 = vcombine.high %v1256_v10, %v1260_v30 }
 0x5e5   :  { %v1388_v47 = vld [vmem:[#allocation5 + $0x2578] sm:$0xff] }
 0x5e6   :  { %11284 = vmatpush2.bf16.msra.mxu0 %v16904_v53  ;;  %11327 = vmatpush2.bf16.msra.mxu1 %v17032_v39  ;;  %v17265_v25 = vcombine.high %v1384_v52, %v1388_v47  ;;  %v1248_v48 = vld [vmem:[#allocation5 + $0x2118] sm:$0xff] }
 0x5e7   :  { %11339 = vmatprep.subr.bf16.mxu0 %v17153_v50  ;;  %11382 = vmatprep.subr.bf16.mxu1 %v17281_v19  ;;  %v1252_v58 = vld [vmem:[#allocation5 + $0x2138] sm:$0xff] }
 0x5e8   :  { %v1376_v34 = vld [vmem:[#allocation5 + $0x2518] sm:$0xff]  ;;  %v17129_v15 = vcombine.high %v1248_v48, %v1252_v58  ;;  %v17128_v50 = vcombine.low %v1248_v48, %v1252_v58 }
 0x5e9   :  { %11286 = vmatmul.mubr.bf16.vlgmr.msra.gmra.mxu0 %v18644_v6  ;;  %11329 = vmatmul.mubr.bf16.vlgmr.msra.gmra.mxu1 %v18648_v11  ;;  %v1380_v49 = vld [vmem:[#allocation5 + $0x2538] sm:$0xff]  ;;  %v17136_v6 = vcombine.low %v1256_v10, %v1260_v30  ;;  %v17264_v11 = vcombine.low %v1384_v52, %v1388_v47 }
 0x5ea   :  { %11340 = vmatpush1.bf16.msra.mxu0 %v17152_v51  ;;  %11383 = vmatpush1.bf16.msra.mxu1 %v17280_v22  ;;  %v17257_v32 = vcombine.high %v1376_v34, %v1380_v49  ;;  %v1240_v3 = vld [vmem:[#allocation5 + $0x20d8] sm:$0xff] }
 0x5eb   :  { %11341 = vmatprep.subr.bf16.mxu0 %v17145_v26  ;;  %11384 = vmatprep.subr.bf16.mxu1 %v17273_v46  ;;  %v1244_v36 = vld [vmem:[#allocation5 + $0x20f8] sm:$0xff] }
 0x5ec   :  { %11371 = vmatprep.mubr.bf16.mxu0 %v18654_v24  ;;  %11414 = vmatprep.mubr.bf16.mxu1 %v18657_v29  ;;  %v1368_v53 = vld [vmem:[#allocation5 + $0x24d8] sm:$0xff]  ;;  %v17256_v24 = vcombine.low %v1376_v34, %v1380_v49  ;;  %v17121_v19 = vcombine.high %v1240_v3, %v1244_v36  ;;  %v17120_v51 = vcombine.low %v1240_v3, %v1244_v36 }
 0x5ed   :  { %v1372_v39 = vld [vmem:[#allocation5 + $0x24f8] sm:$0xff] }
 0x5ee   :  { %11342 = vmatpush1.bf16.msra.mxu0 %v17144_v33  ;;  %11385 = vmatpush1.bf16.msra.mxu1 %v17272_v17  ;;  %v17249_v29 = vcombine.high %v1368_v53, %v1372_v39  ;;  %v1232_v12 = vld [vmem:[#allocation5 + $0x2098] sm:$0xff]  ;;  %v17248_v22 = vcombine.low %v1368_v53, %v1372_v39 }
 0x5ef   :  { %11343 = vmatprep.subr.bf16.mxu0 %v17137_v9  ;;  %11386 = vmatprep.subr.bf16.mxu1 %v17265_v25  ;;  %v1236_v59 = vld [vmem:[#allocation5 + $0x20b8] sm:$0xff] }
 0x5f0   :  { %v1360_v38 = vld [vmem:[#allocation5 + $0x2498] sm:$0xff]  ;;  %v17113_v26 = vcombine.high %v1232_v12, %v1236_v59  ;;  %v17112_v33 = vcombine.low %v1232_v12, %v1236_v59 }
 0x5f1   :  { %v1364_v43 = vld [vmem:[#allocation5 + $0x24b8] sm:$0xff] }
 0x5f2   :  { %11344 = vmatpush1.bf16.msra.mxu0 %v17136_v6  ;;  %11387 = vmatpush1.bf16.msra.mxu1 %v17264_v11  ;;  %v17241_v46 = vcombine.high %v1360_v38, %v1364_v43  ;;  %v1224_v10 = vld [vmem:[#allocation5 + $0x2058] sm:$0xff]  ;;  %v17240_v17 = vcombine.low %v1360_v38, %v1364_v43 }
 0x5f3   :  { %11345 = vmatprep.subr.bf16.mxu0 %v17129_v15  ;;  %11388 = vmatprep.subr.bf16.mxu1 %v17257_v32  ;;  %v1228_v30 = vld [vmem:[#allocation5 + $0x2078] sm:$0xff] }
 0x5f4   :  { %v1352_v52 = vld [vmem:[#allocation5 + $0x2458] sm:$0xff]  ;;  %v17105_v9 = vcombine.high %v1224_v10, %v1228_v30  ;;  %v17104_v6 = vcombine.low %v1224_v10, %v1228_v30 }
 0x5f5   :  { %v1356_v47 = vld [vmem:[#allocation5 + $0x2478] sm:$0xff] }
 0x5f6   :  { %11346 = vmatpush1.bf16.msra.mxu0 %v17128_v50  ;;  %11389 = vmatpush1.bf16.msra.mxu1 %v17256_v24  ;;  %v17233_v25 = vcombine.high %v1352_v52, %v1356_v47  ;;  %v1216_v48 = vld [vmem:[#allocation5 + $0x2018] sm:$0xff]  ;;  %v17232_v11 = vcombine.low %v1352_v52, %v1356_v47 }
 0x5f7   :  { %11347 = vmatprep.subr.bf16.mxu0 %v17121_v19  ;;  %11390 = vmatprep.subr.bf16.mxu1 %v17249_v29  ;;  %v1220_v58 = vld [vmem:[#allocation5 + $0x2038] sm:$0xff] }
 0x5f8   :  { %v1344_v34 = vld [vmem:[#allocation5 + $0x2418] sm:$0xff]  ;;  %v17097_v15 = vcombine.high %v1216_v48, %v1220_v58  ;;  %v17096_v50 = vcombine.low %v1216_v48, %v1220_v58 }
 0x5f9   :  { %v1348_v49 = vld [vmem:[#allocation5 + $0x2438] sm:$0xff] }
 0x5fa   :  { %11348 = vmatpush1.bf16.msra.mxu0 %v17120_v51  ;;  %11391 = vmatpush1.bf16.msra.mxu1 %v17248_v22  ;;  %v17225_v32 = vcombine.high %v1344_v34, %v1348_v49  ;;  %v1336_v3 = vld [vmem:[#allocation5 + $0x23d8] sm:$0xff]  ;;  %v17224_v24 = vcombine.low %v1344_v34, %v1348_v49 }
 0x5fb   :  { %11349 = vmatprep.subr.bf16.mxu0 %v17113_v26  ;;  %11392 = vmatprep.subr.bf16.mxu1 %v17241_v46  ;;  %v1340_v36 = vld [vmem:[#allocation5 + $0x23f8] sm:$0xff] }
 0x5fc   :  { %v1464_v53 = vld [vmem:[#allocation5 + $0x27d8] sm:$0xff]  ;;  %v17217_v19 = vcombine.high %v1336_v3, %v1340_v36  ;;  %v17216_v51 = vcombine.low %v1336_v3, %v1340_v36 }
 0x5fd   :  { %v1468_v39 = vld [vmem:[#allocation5 + $0x27f8] sm:$0xff] }
 0x5fe   :  { %11350 = vmatpush1.bf16.msra.mxu0 %v17112_v33  ;;  %11393 = vmatpush1.bf16.msra.mxu1 %v17240_v17  ;;  %v17345_v29 = vcombine.high %v1464_v53, %v1468_v39  ;;  %v1328_v12 = vld [vmem:[#allocation5 + $0x2398] sm:$0xff]  ;;  %v17344_v22 = vcombine.low %v1464_v53, %v1468_v39 }
 0x5ff   :  { %11351 = vmatprep.subr.bf16.mxu0 %v17105_v9  ;;  %11394 = vmatprep.subr.bf16.mxu1 %v17233_v25  ;;  %v1332_v59 = vld [vmem:[#allocation5 + $0x23b8] sm:$0xff] }
 0x600   :  { %v1456_v38 = vld [vmem:[#allocation5 + $0x2798] sm:$0xff]  ;;  %v17209_v26 = vcombine.high %v1328_v12, %v1332_v59  ;;  %v17208_v33 = vcombine.low %v1328_v12, %v1332_v59 }
 0x601   :  { %v1460_v43 = vld [vmem:[#allocation5 + $0x27b8] sm:$0xff] }
 0x602   :  { %11352 = vmatpush1.bf16.msra.mxu0 %v17104_v6  ;;  %11395 = vmatpush1.bf16.msra.mxu1 %v17232_v11  ;;  %v17337_v46 = vcombine.high %v1456_v38, %v1460_v43  ;;  %v1320_v10 = vld [vmem:[#allocation5 + $0x2358] sm:$0xff]  ;;  %v17336_v17 = vcombine.low %v1456_v38, %v1460_v43 }
 0x603   :  { %11353 = vmatprep.subr.bf16.mxu0 %v17097_v15  ;;  %11396 = vmatprep.subr.bf16.mxu1 %v17225_v32  ;;  %v1324_v30 = vld [vmem:[#allocation5 + $0x2378] sm:$0xff] }
 0x604   :  { %v1448_v52 = vld [vmem:[#allocation5 + $0x2758] sm:$0xff]  ;;  %v17201_v9 = vcombine.high %v1320_v10, %v1324_v30  ;;  %v17200_v6 = vcombine.low %v1320_v10, %v1324_v30 }
 0x605   :  { %v1452_v47 = vld [vmem:[#allocation5 + $0x2778] sm:$0xff] }
 0x606   :  { %11354 = vmatpush1.bf16.msra.mxu0 %v17096_v50  ;;  %11397 = vmatpush1.bf16.msra.mxu1 %v17224_v24  ;;  %v17329_v25 = vcombine.high %v1448_v52, %v1452_v47  ;;  %v1312_v48 = vld [vmem:[#allocation5 + $0x2318] sm:$0xff]  ;;  %v17328_v11 = vcombine.low %v1448_v52, %v1452_v47 }
 0x607   :  { %11355 = vmatprep.subr.bf16.mxu0 %v17217_v19  ;;  %11398 = vmatprep.subr.bf16.mxu1 %v17345_v29  ;;  %v1316_v58 = vld [vmem:[#allocation5 + $0x2338] sm:$0xff] }
 0x608   :  { %v1440_v34 = vld [vmem:[#allocation5 + $0x2718] sm:$0xff]  ;;  %v17193_v15 = vcombine.high %v1312_v48, %v1316_v58  ;;  %v17192_v50 = vcombine.low %v1312_v48, %v1316_v58 }
 0x609   :  { %v1444_v49 = vld [vmem:[#allocation5 + $0x2738] sm:$0xff] }
 0x60a   :  { %11356 = vmatpush2.bf16.msra.mxu0 %v17216_v51  ;;  %11399 = vmatpush2.bf16.msra.mxu1 %v17344_v22  ;;  %v17321_v32 = vcombine.high %v1440_v34, %v1444_v49  ;;  %v1304_v3 = vld [vmem:[#allocation5 + $0x22d8] sm:$0xff]  ;;  %v17320_v24 = vcombine.low %v1440_v34, %v1444_v49 }
 0x60b   :  { %11357 = vmatprep.subr.bf16.mxu0 %v17209_v26  ;;  %11400 = vmatprep.subr.bf16.mxu1 %v17337_v46  ;;  %v1308_v36 = vld [vmem:[#allocation5 + $0x22f8] sm:$0xff] }
 0x60c   :  { %v1432_v53 = vld [vmem:[#allocation5 + $0x26d8] sm:$0xff]  ;;  %v17185_v19 = vcombine.high %v1304_v3, %v1308_v36  ;;  %v17184_v51 = vcombine.low %v1304_v3, %v1308_v36 }
 0x60d   :  { %v1436_v39 = vld [vmem:[#allocation5 + $0x26f8] sm:$0xff] }
 0x60e   :  { %11358 = vmatpush2.bf16.msra.mxu0 %v17208_v33  ;;  %11401 = vmatpush2.bf16.msra.mxu1 %v17336_v17  ;;  %v17313_v29 = vcombine.high %v1432_v53, %v1436_v39  ;;  %v1296_v12 = vld [vmem:[#allocation5 + $0x2298] sm:$0xff]  ;;  %v17312_v22 = vcombine.low %v1432_v53, %v1436_v39 }
 0x60f   :  { %11359 = vmatprep.subr.bf16.mxu0 %v17201_v9  ;;  %11402 = vmatprep.subr.bf16.mxu1 %v17329_v25  ;;  %v1300_v59 = vld [vmem:[#allocation5 + $0x22b8] sm:$0xff] }
 0x610   :  { %v1424_v38 = vld [vmem:[#allocation5 + $0x2698] sm:$0xff]  ;;  %v17177_v26 = vcombine.high %v1296_v12, %v1300_v59  ;;  %v17176_v33 = vcombine.low %v1296_v12, %v1300_v59 }
 0x611   :  { %v1428_v43 = vld [vmem:[#allocation5 + $0x26b8] sm:$0xff] }
 0x612   :  { %11360 = vmatpush2.bf16.msra.mxu0 %v17200_v6  ;;  %11403 = vmatpush2.bf16.msra.mxu1 %v17328_v11  ;;  %v17305_v46 = vcombine.high %v1424_v38, %v1428_v43  ;;  %v1288_v10 = vld [vmem:[#allocation5 + $0x2258] sm:$0xff]  ;;  %v17304_v17 = vcombine.low %v1424_v38, %v1428_v43 }
 0x613   :  { %11361 = vmatprep.subr.bf16.mxu0 %v17193_v15  ;;  %11404 = vmatprep.subr.bf16.mxu1 %v17321_v32  ;;  %v1292_v30 = vld [vmem:[#allocation5 + $0x2278] sm:$0xff] }
 0x614   :  { %v1416_v52 = vld [vmem:[#allocation5 + $0x2658] sm:$0xff]  ;;  %v17169_v9 = vcombine.high %v1288_v10, %v1292_v30  ;;  %v17168_v6 = vcombine.low %v1288_v10, %v1292_v30 }
 0x615   :  { %v1420_v47 = vld [vmem:[#allocation5 + $0x2678] sm:$0xff] }
 0x616   :  { %11362 = vmatpush2.bf16.msra.mxu0 %v17192_v50  ;;  %11405 = vmatpush2.bf16.msra.mxu1 %v17320_v24  ;;  %v17297_v25 = vcombine.high %v1416_v52, %v1420_v47  ;;  %v1280_v48 = vld [vmem:[#allocation5 + $0x2218] sm:$0xff]  ;;  %v17296_v11 = vcombine.low %v1416_v52, %v1420_v47 }
 0x617   :  { %11363 = vmatprep.subr.bf16.mxu0 %v17185_v19  ;;  %11406 = vmatprep.subr.bf16.mxu1 %v17313_v29  ;;  %v1284_v58 = vld [vmem:[#allocation5 + $0x2238] sm:$0xff] }
 0x618   :  { %v1408_v34 = vld [vmem:[#allocation5 + $0x2618] sm:$0xff]  ;;  %v17161_v15 = vcombine.high %v1280_v48, %v1284_v58  ;;  %v17160_v50 = vcombine.low %v1280_v48, %v1284_v58 }
 0x619   :  { %v1412_v49 = vld [vmem:[#allocation5 + $0x2638] sm:$0xff] }
 0x61a   :  { %11364 = vmatpush2.bf16.msra.mxu0 %v17184_v51  ;;  %11407 = vmatpush2.bf16.msra.mxu1 %v17312_v22  ;;  %v17289_v32 = vcombine.high %v1408_v34, %v1412_v49  ;;  %v1528_v3 = vld [vmem:[#allocation5 + $0x29d8] sm:$0xff]  ;;  %v17288_v24 = vcombine.low %v1408_v34, %v1412_v49 }
 0x61b   :  { %11365 = vmatprep.subr.bf16.mxu0 %v17177_v26  ;;  %11408 = vmatprep.subr.bf16.mxu1 %v17305_v46  ;;  %v1532_v36 = vld [vmem:[#allocation5 + $0x29f8] sm:$0xff] }
 0x61c   :  { %v1656_v53 = vld [vmem:[#allocation5 + $0x2dd8] sm:$0xff]  ;;  %v17409_v19 = vcombine.high %v1528_v3, %v1532_v36  ;;  %v17408_v51 = vcombine.low %v1528_v3, %v1532_v36 }
 0x61d   :  { %v1660_v39 = vld [vmem:[#allocation5 + $0x2df8] sm:$0xff] }
 0x61e   :  { %11366 = vmatpush2.bf16.msra.mxu0 %v17176_v33  ;;  %11409 = vmatpush2.bf16.msra.mxu1 %v17304_v17  ;;  %v17537_v29 = vcombine.high %v1656_v53, %v1660_v39  ;;  %v1520_v12 = vld [vmem:[#allocation5 + $0x2998] sm:$0xff]  ;;  %v17536_v22 = vcombine.low %v1656_v53, %v1660_v39 }
 0x61f   :  { %11367 = vmatprep.subr.bf16.mxu0 %v17169_v9  ;;  %11410 = vmatprep.subr.bf16.mxu1 %v17297_v25  ;;  %v1524_v59 = vld [vmem:[#allocation5 + $0x29b8] sm:$0xff] }
 0x620   :  { %v1648_v38 = vld [vmem:[#allocation5 + $0x2d98] sm:$0xff]  ;;  %v17401_v26 = vcombine.high %v1520_v12, %v1524_v59  ;;  %v17400_v33 = vcombine.low %v1520_v12, %v1524_v59 }
 0x621   :  { %v1652_v43 = vld [vmem:[#allocation5 + $0x2db8] sm:$0xff] }
 0x622   :  { %11368 = vmatpush2.bf16.msra.mxu0 %v17168_v6  ;;  %11411 = vmatpush2.bf16.msra.mxu1 %v17296_v11  ;;  %v17529_v46 = vcombine.high %v1648_v38, %v1652_v43  ;;  %v1512_v10 = vld [vmem:[#allocation5 + $0x2958] sm:$0xff]  ;;  %v17528_v17 = vcombine.low %v1648_v38, %v1652_v43 }
 0x623   :  { %11369 = vmatprep.subr.bf16.mxu0 %v17161_v15  ;;  %11412 = vmatprep.subr.bf16.mxu1 %v17289_v32  ;;  %v1516_v30 = vld [vmem:[#allocation5 + $0x2978] sm:$0xff] }
 0x624   :  { %v1640_v52 = vld [vmem:[#allocation5 + $0x2d58] sm:$0xff]  ;;  %v17393_v9 = vcombine.high %v1512_v10, %v1516_v30 }
 0x625   :  { %v1644_v47 = vld [vmem:[#allocation5 + $0x2d78] sm:$0xff] }
 0x626   :  { %11370 = vmatpush2.bf16.msra.mxu0 %v17160_v50  ;;  %11413 = vmatpush2.bf16.msra.mxu1 %v17288_v24  ;;  %v17521_v25 = vcombine.high %v1640_v52, %v1644_v47  ;;  %v1504_v48 = vld [vmem:[#allocation5 + $0x2918] sm:$0xff] }
 0x627   :  { %11425 = vmatprep.subr.bf16.mxu0 %v17409_v19  ;;  %11468 = vmatprep.subr.bf16.mxu1 %v17537_v29  ;;  %v1508_v58 = vld [vmem:[#allocation5 + $0x2938] sm:$0xff] }
 0x628   :  { %v1632_v34 = vld [vmem:[#allocation5 + $0x2d18] sm:$0xff]  ;;  %v17385_v6 = vcombine.high %v1504_v48, %v1508_v58  ;;  %v17384_v53 = vcombine.low %v1504_v48, %v1508_v58  ;;  %v18991_v58 = vld [vmem:[#allocation7] sm:$0xff] }
 0x629   :  { %11372 = vmatmul.mubr.bf16.vlgmr.msra.gmra.mxu0 %v18669_v54  ;;  %11415 = vmatmul.mubr.bf16.vlgmr.msra.gmra.mxu1 %v18671_v60  ;;  %v1636_v49 = vld [vmem:[#allocation5 + $0x2d38] sm:$0xff]  ;;  %v17392_v54 = vcombine.low %v1512_v10, %v1516_v30  ;;  %v17520_v60 = vcombine.low %v1640_v52, %v1644_v47  ;;  %v1741_v10 = vsub.s32 3, %v18640_v42 }
 0x62a   :  { %11426 = vmatpush1.bf16.msra.mxu0 %v17408_v51  ;;  %11469 = vmatpush1.bf16.msra.mxu1 %v17536_v22  ;;  %v17513_v11 = vcombine.high %v1632_v34, %v1636_v49  ;;  %v1496_v15 = vld [vmem:[#allocation5 + $0x28d8] sm:$0xff] }
 0x62b   :  { %11427 = vmatprep.subr.bf16.mxu0 %v17401_v26  ;;  %11470 = vmatprep.subr.bf16.mxu1 %v17529_v46  ;;  %v1500_v32 = vld [vmem:[#allocation5 + $0x28f8] sm:$0xff] }
 0x62c   :  { %11457 = vmatprep.mubr.bf16.mxu0 %v18677_v13  ;;  %11500 = vmatprep.mubr.bf16.mxu1 %v18680_v20  ;;  %v1624_v3 = vld [vmem:[#allocation5 + $0x2cd8] sm:$0xff]  ;;  %v17512_v13 = vcombine.low %v1632_v34, %v1636_v49  ;;  %v17377_v39 = vcombine.high %v1496_v15, %v1500_v32  ;;  %v17376_v12 = vcombine.low %v1496_v15, %v1500_v32 }
 0x62d   :  { %v1628_v36 = vld [vmem:[#allocation5 + $0x2cf8] sm:$0xff]  ;;  %v1742_v34 = vrot.slane %v18991_v58, %v1741_v10 }
 0x62e   :  { %11428 = vmatpush1.bf16.msra.mxu0 %v17400_v33  ;;  %11471 = vmatpush1.bf16.msra.mxu1 %v17528_v17  ;;  %v17505_v20 = vcombine.high %v1624_v3, %v1628_v36  ;;  %v1488_v50 = vld [vmem:[#allocation5 + $0x2898] sm:$0xff]  ;;  %v17504_v59 = vcombine.low %v1624_v3, %v1628_v36 }
 0x62f   :  { %11429 = vmatprep.subr.bf16.mxu0 %v17393_v9  ;;  %11472 = vmatprep.subr.bf16.mxu1 %v17521_v25  ;;  %v1492_v24 = vld [vmem:[#allocation5 + $0x28b8] sm:$0xff] }
 0x630   :  { %v1616_v19 = vld [vmem:[#allocation5 + $0x2c98] sm:$0xff]  ;;  %v17369_v38 = vcombine.high %v1488_v50, %v1492_v24  ;;  %v17368_v30 = vcombine.low %v1488_v50, %v1492_v24 }
 0x631   :  { %v1620_v29 = vld [vmem:[#allocation5 + $0x2cb8] sm:$0xff] }
 0x632   :  { %11430 = vmatpush1.bf16.msra.mxu0 %v17392_v54  ;;  %11473 = vmatpush1.bf16.msra.mxu1 %v17520_v60  ;;  %v17497_v43 = vcombine.high %v1616_v19, %v1620_v29  ;;  %v1480_v51 = vld [vmem:[#allocation5 + $0x2858] sm:$0xff]  ;;  %v17496_v52 = vcombine.low %v1616_v19, %v1620_v29  ;;  %v9488_v54 = vadd.f32 %v18673_v4, %v18652_v18 }
 0x633   :  { %11431 = vmatprep.subr.bf16.mxu0 %v17385_v6  ;;  %11474 = vmatprep.subr.bf16.mxu1 %v17513_v11  ;;  %v1484_v22 = vld [vmem:[#allocation5 + $0x2878] sm:$0xff]  ;;  %v10004_v11 = vadd.f32 %v18787_v2, %v1742_v34 }
 0x634   :  { %v1608_v26 = vld [vmem:[#allocation5 + $0x2c58] sm:$0xff]  ;;  %v17361_v47 = vcombine.high %v1480_v51, %v1484_v22  ;;  %v17360_v49 = vcombine.low %v1480_v51, %v1484_v22 }
 0x635   :  { %v1612_v46 = vld [vmem:[#allocation5 + $0x2c78] sm:$0xff]  ;;  %v10047_v50 = vadd.f32 %v18789_v44, %v10004_v11 }
 0x636   :  { %11432 = vmatpush1.bf16.msra.mxu0 %v17384_v53  ;;  %11475 = vmatpush1.bf16.msra.mxu1 %v17512_v13  ;;  %v17489_v33 = vcombine.high %v1608_v26, %v1612_v46  ;;  %v1472_v17 = vld [vmem:[#allocation5 + $0x2818] sm:$0xff]  ;;  %v17488_v60 = vcombine.low %v1608_v26, %v1612_v46  ;;  %v10000_v13 = vadd.f32 %v18777_v40, %v1742_v34  ;;  %v19347_v34 = vld [vmem:[#allocation20_spill] sm:$0xff] }
 0x637   :  { %11433 = vmatprep.subr.bf16.mxu0 %v17377_v39  ;;  %11476 = vmatprep.subr.bf16.mxu1 %v17505_v20  ;;  %v1476_v9 = vld [vmem:[#allocation5 + $0x2838] sm:$0xff]  ;;  %v9531_v20 = vadd.f32 %v18675_v8, %v9488_v54 }
 0x638   :  { %v1600_v25 = vld [vmem:[#allocation5 + $0x2c18] sm:$0xff]  ;;  %v17353_v6 = vcombine.high %v1472_v17, %v1476_v9  ;;  %v17352_v39 = vcombine.low %v1472_v17, %v1476_v9  ;;  %v10043_v40 = vadd.f32 %v18781_v31, %v10000_v13  ;;  %v19346_v17 = vld [vmem:[#allocation24_spill] sm:$0xff]  ;;  %v19351_v13 = vld [vmem:[#allocation41_spill] sm:$0xff] }
 0x639   :  { %v1604_v48 = vld [vmem:[#allocation5 + $0x2c38] sm:$0xff]  ;;  %v9574_v29 = vadd.f32 %v18698_v27, %v9531_v20 }
 0x63a   :  { %11434 = vmatpush1.bf16.msra.mxu0 %v17376_v12  ;;  %11477 = vmatpush1.bf16.msra.mxu1 %v17504_v59  ;;  %v17481_v15 = vcombine.high %v1600_v25, %v1604_v48  ;;  %v1592_v32 = vld [vmem:[#allocation5 + $0x2bd8] sm:$0xff]  ;;  %v17480_v18 = vcombine.low %v1600_v25, %v1604_v48  ;;  %v10086_v44 = vadd.f32 %v18794_v0, %v10043_v40 }
 0x63b   :  { %11435 = vmatprep.subr.bf16.mxu0 %v17369_v38  ;;  %11478 = vmatprep.subr.bf16.mxu1 %v17497_v43  ;;  %v1596_v3 = vld [vmem:[#allocation5 + $0x2bf8] sm:$0xff]  ;;  %v10090_v38 = vadd.f32 %v18805_v55, %v10047_v50 }
 0x63c   :  { %v1720_v36 = vld [vmem:[#allocation5 + $0x2fd8] sm:$0xff]  ;;  %v17473_v4 = vcombine.high %v1592_v32, %v1596_v3  ;;  %v17472_v8 = vcombine.low %v1592_v32, %v1596_v3 }
 0x63d   :  { %v1724_v53 = vld [vmem:[#allocation5 + $0x2ff8] sm:$0xff] }
 0x63e   :  { %11436 = vmatpush1.bf16.msra.mxu0 %v17368_v30  ;;  %11479 = vmatpush1.bf16.msra.mxu1 %v17496_v52  ;;  %v17601_v2 = vcombine.high %v1720_v36, %v1724_v53  ;;  %v1584_v24 = vld [vmem:[#allocation5 + $0x2b98] sm:$0xff]  ;;  %v17600_v43 = vcombine.low %v1720_v36, %v1724_v53  ;;  %v19344_v30 = vld [vmem:[#allocation21_spill] sm:$0xff] }
 0x63f   :  { %11437 = vmatprep.subr.bf16.mxu0 %v17361_v47  ;;  %11480 = vmatprep.subr.bf16.mxu1 %v17489_v33  ;;  %v1588_v19 = vld [vmem:[#allocation5 + $0x2bb8] sm:$0xff]  ;;  %v9617_v27 = vadd.f32 %v19344_v30, %v9574_v29  ;;  %v19345_v33 = vld [vmem:[#allocation40_spill] sm:$0xff] }
 0x640   :  { %v1712_v12 = vld [vmem:[#allocation5 + $0x2f98] sm:$0xff]  ;;  %v17465_v51 = vcombine.high %v1584_v24, %v1588_v19  ;;  %v10133_v31 = vadd.f32 %v19345_v33, %v10090_v38  ;;  %v17464_v55 = vcombine.low %v1584_v24, %v1588_v19  ;;  %v19354_v29 = vld [vmem:[#allocation44_spill] sm:$0xff] }
 0x641   :  { %v1716_v59 = vld [vmem:[#allocation5 + $0x2fb8] sm:$0xff]  ;;  %v9660_v9 = vadd.f32 %v19346_v17, %v9617_v27 }
 0x642   :  { %11438 = vmatpush1.bf16.msra.mxu0 %v17360_v49  ;;  %11481 = vmatpush1.bf16.msra.mxu1 %v17488_v60  ;;  %v17593_v22 = vcombine.high %v1712_v12, %v1716_v59  ;;  %v1576_v26 = vld [vmem:[#allocation5 + $0x2b58] sm:$0xff]  ;;  %v17592_v25 = vcombine.low %v1712_v12, %v1716_v59 }
 0x643   :  { %11439 = vmatprep.subr.bf16.mxu0 %v17353_v6  ;;  %11482 = vmatprep.subr.bf16.mxu1 %v17481_v15  ;;  %v1580_v46 = vld [vmem:[#allocation5 + $0x2b78] sm:$0xff] }
 0x644   :  { %v1704_v52 = vld [vmem:[#allocation5 + $0x2f58] sm:$0xff]  ;;  %v17457_v48 = vcombine.high %v1576_v26, %v1580_v46  ;;  %v17456_v20 = vcombine.low %v1576_v26, %v1580_v46 }
 0x645   :  { %v1708_v47 = vld [vmem:[#allocation5 + $0x2f78] sm:$0xff] }
 0x646   :  { %11440 = vmatpush1.bf16.msra.mxu0 %v17352_v39  ;;  %11483 = vmatpush1.bf16.msra.mxu1 %v17480_v18  ;;  %v19348_v0 = vld [vmem:[#allocation22_spill] sm:$0xff]  ;;  %v19349_v54 = vld [vmem:[#allocation39_spill] sm:$0xff]  ;;  %v17585_v15 = vcombine.high %v1704_v52, %v1708_v47  ;;  %v19352_v18 = vld [vmem:[#allocation25_spill] sm:$0xff]  ;;  %v17584_v50 = vcombine.low %v1704_v52, %v1708_v47 }
 0x647   :  { %11441 = vmatprep.subr.bf16.mxu0 %v17473_v4  ;;  %11484 = vmatprep.subr.bf16.mxu1 %v17601_v2  ;;  %v9656_v49 = vadd.f32 %v19348_v0, %v19347_v34  ;;  %v10129_v60 = vadd.f32 %v19349_v54, %v10086_v44  ;;  %v19350_v6 = vld [vmem:[#allocation43_spill] sm:$0xff]  ;;  %v9703_v4 = vadd.f32 %v19352_v18, %v9660_v9  ;;  %v19357_v46 = vld [vmem:[#allocation42_spill] sm:$0xff]  ;;  %v19360_v34 = vld [vmem:[#allocation29_spill] sm:$0xff] }
 0x648   :  { %v10176_v11 = vadd.f32 %v19350_v6, %v10133_v31  ;;  %v1568_v32 = vld [vmem:[#allocation5 + $0x2b18] sm:$0xff] }
 0x649   :  { %v1572_v3 = vld [vmem:[#allocation5 + $0x2b38] sm:$0xff]  ;;  %v10172_v39 = vadd.f32 %v19351_v13, %v10129_v60 }
 0x64a   :  { %11442 = vmatpush2.bf16.msra.mxu0 %v17472_v8  ;;  %11485 = vmatpush2.bf16.msra.mxu1 %v17600_v43  ;;  %v1696_v36 = vld [vmem:[#allocation5 + $0x2f18] sm:$0xff]  ;;  %v17449_v2 = vcombine.high %v1568_v32, %v1572_v3  ;;  %v10219_v12 = vadd.f32 %v19354_v29, %v10176_v11  ;;  %v19355_v8 = vld [vmem:[#allocation28_spill] sm:$0xff]  ;;  %v17448_v52 = vcombine.low %v1568_v32, %v1572_v3 }
 0x64b   :  { %11443 = vmatprep.subr.bf16.mxu0 %v17465_v51  ;;  %11486 = vmatprep.subr.bf16.mxu1 %v17593_v22  ;;  %v1700_v53 = vld [vmem:[#allocation5 + $0x2f38] sm:$0xff]  ;;  %v9746_v43 = vadd.f32 %v19355_v8, %v9703_v4  ;;  %v10215_v30 = vadd.f32 %v19357_v46, %v10172_v39  ;;  %v19362_v11 = vld [vmem:[#allocation48_spill] sm:$0xff]  ;;  %v19367_v8 = vld [vmem:[#allocation49_spill] sm:$0xff] }
 0x64c   :  { %v19353_v24 = vld [vmem:[#allocation23_spill] sm:$0xff]  ;;  %v17577_v59 = vcombine.high %v1696_v36, %v1700_v53  ;;  %v19356_v22 = vld [vmem:[#allocation26_spill] sm:$0xff]  ;;  %v17576_v47 = vcombine.low %v1696_v36, %v1700_v53  ;;  %v19363_v3 = vld [vmem:[#allocation32_spill] sm:$0xff] }
 0x64d   :  { %v9699_v19 = vadd.f32 %v19353_v24, %v9656_v49  ;;  %v1560_v40 = vld [vmem:[#allocation5 + $0x2ad8] sm:$0xff]  ;;  %v9789_v0 = vadd.f32 %v19360_v34, %v9746_v43  ;;  %v19368_v43 = vld [vmem:[#allocation33_spill] sm:$0xff] }
 0x64e   :  { %11444 = vmatpush2.bf16.msra.mxu0 %v17464_v55  ;;  %11487 = vmatpush2.bf16.msra.mxu1 %v17592_v25  ;;  %v1564_v38 = vld [vmem:[#allocation5 + $0x2af8] sm:$0xff]  ;;  %v19359_v55 = vld [vmem:[#allocation45_spill] sm:$0xff] }
 0x64f   :  { %11445 = vmatprep.subr.bf16.mxu0 %v17457_v48  ;;  %11488 = vmatprep.subr.bf16.mxu1 %v17585_v15  ;;  %v1688_v51 = vld [vmem:[#allocation5 + $0x2ed8] sm:$0xff]  ;;  %v9742_v26 = vadd.f32 %v19356_v22, %v9699_v19  ;;  %v17441_v31 = vcombine.high %v1560_v40, %v1564_v38  ;;  %v10258_v17 = vadd.f32 %v19359_v55, %v10215_v30 }
 0x650   :  { %v1692_v44 = vld [vmem:[#allocation5 + $0x2ef8] sm:$0xff]  ;;  %v17440_v32 = vcombine.low %v1560_v40, %v1564_v38  ;;  %v9832_v13 = vadd.f32 %v19363_v3, %v9789_v0  ;;  %v11591_v3 = vld [vmem:[#allocation8 + $0x1c0] sm:$0xff] }
 0x651   :  { %v19358_v27 = vld [vmem:[#allocation47_spill] sm:$0xff]  ;;  %v17569_v9 = vcombine.high %v1688_v51, %v1692_v44  ;;  %v17568_v36 = vcombine.low %v1688_v51, %v1692_v44  ;;  %v19364_v39 = vld [vmem:[#allocation46_spill] sm:$0xff] }
 0x652   :  { %v10262_v33 = vadd.f32 %v19358_v27, %v10219_v12  ;;  %11446 = vmatpush2.bf16.msra.mxu0 %v17456_v20  ;;  %11489 = vmatpush2.bf16.msra.mxu1 %v17584_v50  ;;  %v1552_v25 = vld [vmem:[#allocation5 + $0x2a98] sm:$0xff]  ;;  %v10301_v20 = vadd.f32 %v19364_v39, %v10258_v17  ;;  %v9875_v22 = vadd.f32 %v19368_v43, %v9832_v13  ;;  %v11595_v13 = vld [vmem:[#allocation8 + $0x1e0] sm:$0xff] }
 0x653   :  { %11447 = vmatprep.subr.bf16.mxu0 %v17449_v2  ;;  %11490 = vmatprep.subr.bf16.mxu1 %v17577_v59  ;;  %v1556_v48 = vld [vmem:[#allocation5 + $0x2ab8] sm:$0xff]  ;;  %v11719_v39 = vld [vmem:[#allocation8 + $0x5c0] sm:$0xff]  ;;  %v17658_v43 = vcombine.low %v11591_v3, %v11595_v13 }
 0x654   :  { %v1680_v49 = vld [vmem:[#allocation5 + $0x2e98] sm:$0xff]  ;;  %v10305_v15 = vadd.f32 %v19362_v11, %v10262_v33  ;;  %v17433_v53 = vcombine.high %v1552_v25, %v1556_v48  ;;  %v10344_v40 = vadd.f32 %v19367_v8, %v10301_v20  ;;  %v17432_v38 = vcombine.low %v1552_v25, %v1556_v48  ;;  %v19374_v11 = vld [vmem:[#allocation53_spill] sm:$0xff] }
 0x655   :  { %v1684_v54 = vld [vmem:[#allocation5 + $0x2eb8] sm:$0xff]  ;;  %v11723_v20 = vld [vmem:[#allocation8 + $0x5e0] sm:$0xff] }
 0x656   :  { %v19361_v60 = vld [vmem:[#allocation27_spill] sm:$0xff]  ;;  %11448 = vmatpush2.bf16.msra.mxu0 %v17448_v52  ;;  %11491 = vmatpush2.bf16.msra.mxu1 %v17576_v47  ;;  %v17561_v50 = vcombine.high %v1680_v49, %v1684_v54  ;;  %v19366_v19 = vld [vmem:[#allocation30_spill] sm:$0xff]  ;;  %v17560_v51 = vcombine.low %v1680_v49, %v1684_v54  ;;  %v11583_v8 = vld [vmem:[#allocation8 + $0x180] sm:$0xff] }
 0x657   :  { %v9785_v6 = vadd.f32 %v19361_v60, %v9742_v26  ;;  %11449 = vmatprep.subr.bf16.mxu0 %v17441_v31  ;;  %v19365_v18 = vld [vmem:[#allocation51_spill] sm:$0xff]  ;;  %11492 = vmatprep.subr.bf16.mxu1 %v17569_v9  ;;  %v19369_v26 = vld [vmem:[#allocation52_spill] sm:$0xff]  ;;  %v19371_v31 = vld [vmem:[#allocation37_spill] sm:$0xff] }
 0x658   :  { %v10348_v4 = vadd.f32 %v19365_v18, %v10305_v15  ;;  %v1544_v2 = vld [vmem:[#allocation5 + $0x2a58] sm:$0xff]  ;;  %v9918_v55 = vadd.f32 %v19371_v31, %v9875_v22  ;;  %v11711_v22 = vld [vmem:[#allocation8 + $0x580] sm:$0xff] }
 0x659   :  { %v1548_v24 = vld [vmem:[#allocation5 + $0x2a78] sm:$0xff]  ;;  %v9828_v29 = vadd.f32 %v19366_v19, %v9785_v6  ;;  %v11707_v31 = vld [vmem:[#allocation8 + $0x560] sm:$0xff] }
 0x65a   :  { %v1672_v12 = vld [vmem:[#allocation5 + $0x2e58] sm:$0xff]  ;;  %11450 = vmatpush2.bf16.msra.mxu0 %v17440_v32  ;;  %11493 = vmatpush2.bf16.msra.mxu1 %v17568_v36  ;;  %v17425_v44 = vcombine.high %v1544_v2, %v1548_v24  ;;  %v10391_v46 = vadd.f32 %v19369_v26, %v10348_v4  ;;  %v17424_v0 = vcombine.low %v1544_v2, %v1548_v24 }
 0x65b   :  { %v1676_v59 = vld [vmem:[#allocation5 + $0x2e78] sm:$0xff]  ;;  %11451 = vmatprep.subr.bf16.mxu0 %v17433_v53  ;;  %11494 = vmatprep.subr.bf16.mxu1 %v17561_v50  ;;  %v17659_v24 = vcombine.high %v11591_v3, %v11595_v13  ;;  %v11691_v3 = vld [vmem:[#allocation8 + $0x4e0] sm:$0xff] }
 0x65c   :  { %v17553_v30 = vcombine.high %v1672_v12, %v1676_v59  ;;  %v1536_v27 = vld [vmem:[#allocation5 + $0x2a18] sm:$0xff]  ;;  %v10434_v48 = vadd.f32 %v18878_v45, %v10391_v46  ;;  %v17552_v60 = vcombine.low %v1672_v12, %v1676_v59  ;;  %v17787_v12 = vcombine.high %v11719_v39, %v11723_v20 }
 0x65d   :  { %v1540_v33 = vld [vmem:[#allocation5 + $0x2a38] sm:$0xff] }
 0x65e   :  { %v19370_v52 = vld [vmem:[#allocation31_spill] sm:$0xff]  ;;  %v19372_v34 = vld [vmem:[#allocation50_spill] sm:$0xff]  ;;  %11452 = vmatpush2.bf16.msra.mxu0 %v17432_v38  ;;  %11495 = vmatpush2.bf16.msra.mxu1 %v17560_v51  ;;  %v17417_v6 = vcombine.high %v1536_v27, %v1540_v33  ;;  %v10477_v45 = vadd.f32 %v18880_v7, %v10434_v48  ;;  %v17416_v18 = vcombine.low %v1536_v27, %v1540_v33  ;;  %v11715_v7 = vld [vmem:[#allocation8 + $0x5a0] sm:$0xff] }
 0x65f   :  { %v9871_v47 = vadd.f32 %v19370_v52, %v9828_v29  ;;  %v1664_v17 = vld [vmem:[#allocation5 + $0x2e18] sm:$0xff]  ;;  %v10387_v25 = vadd.f32 %v19372_v34, %v10344_v40  ;;  %11453 = vmatprep.subr.bf16.mxu0 %v17425_v44  ;;  %11496 = vmatprep.subr.bf16.mxu1 %v17553_v30  ;;  %v11587_v40 = vld [vmem:[#allocation8 + $0x1a0] sm:$0xff]  ;;  %v17786_v44 = vcombine.low %v11719_v39, %v11723_v20 }
 0x660   :  { %v1668_v9 = vld [vmem:[#allocation5 + $0x2e38] sm:$0xff]  ;;  %v11522_v38 = vmax.f32 %v10477_v45, 0.0  ;;  %v17651_v46 = vcombine.high %v11583_v8, %v11587_v40  ;;  %v11575_v30 = vld [vmem:[#allocation8 + $0x140] sm:$0xff]  ;;  %v17779_v52 = vcombine.high %v11711_v22, %v11715_v7 }
 0x661   :  { %v19373_v49 = vld [vmem:[#allocation34_spill] sm:$0xff]  ;;  %v10430_v15 = vadd.f32 %v19374_v11, %v10387_v25  ;;  %v17545_v32 = vcombine.high %v1664_v17, %v1668_v9  ;;  %v19376_v4 = vld [vmem:[#allocation35_spill] sm:$0xff]  ;;  %v17544_v2 = vcombine.low %v1664_v17, %v1668_v9  ;;  %v11579_v27 = vld [vmem:[#allocation8 + $0x160] sm:$0xff]  ;;  %v17650_v17 = vcombine.low %v11583_v8, %v11587_v40 }
 0x662   :  { %v9914_v54 = vadd.f32 %v19373_v49, %v9871_v47  ;;  %v19375_v36 = vld [vmem:[#allocation38_spill] sm:$0xff]  ;;  %11454 = vmatpush2.bf16.msra.mxu0 %v17424_v0  ;;  %11497 = vmatpush2.bf16.msra.mxu1 %v17552_v60  ;;  %v11703_v47 = vld [vmem:[#allocation8 + $0x540] sm:$0xff]  ;;  %v17778_v9 = vcombine.low %v11711_v22, %v11715_v7  ;;  %v17643_v34 = vcombine.high %v11575_v30, %v11579_v27 }
 0x663   :  { %v9961_v53 = vadd.f32 %v19375_v36, %v9918_v55  ;;  %11455 = vmatprep.subr.bf16.mxu0 %v17417_v6  ;;  %v19377_v19 = vld [vmem:[#allocation54_spill] sm:$0xff]  ;;  %11498 = vmatprep.subr.bf16.mxu1 %v17545_v32  ;;  %v17771_v25 = vcombine.high %v11703_v47, %v11707_v31  ;;  %v11567_v48 = vld [vmem:[#allocation8 + $0x100] sm:$0xff] }
 0x664   :  { %v9957_v50 = vadd.f32 %v19376_v4, %v9914_v54  ;;  %v10473_v29 = vadd.f32 %v19377_v19, %v10430_v15  ;;  %v11695_v0 = vld [vmem:[#allocation8 + $0x500] sm:$0xff]  ;;  %v17642_v54 = vcombine.low %v11575_v30, %v11579_v27  ;;  %v1749_v19 = vsub.s32 5, %v18640_v42 }
 0x665   :  { %v11520_v59 = vmax.f32 %v9961_v53, 0.0  ;;  %v11699_v49 = vld [vmem:[#allocation8 + $0x520] sm:$0xff] }
 0x666   :  { %11456 = vmatpush2.bf16.msra.mxu0 %v17416_v18  ;;  %v11512_v51 = vmax.f32 %v9957_v50, 0.0  ;;  %11499 = vmatpush2.bf16.msra.mxu1 %v17544_v2  ;;  %v11514_v26 = vmax.f32 %v10473_v29, 0.0  ;;  %v17763_v6 = vcombine.high %v11695_v0, %v11699_v49  ;;  %v11559_v11 = vld [vmem:[#allocation8 + $0xc0] sm:$0xff]  ;;  %v17762_v36 = vcombine.low %v11695_v0, %v11699_v49 }
 0x667   :  { %14649 = vmatprep.subr.bf16.mxu0 %v17659_v24  ;;  %14692 = vmatprep.subr.bf16.mxu1 %v17787_v12  ;;  %v11563_v15 = vld [vmem:[#allocation8 + $0xe0] sm:$0xff]  ;;  %v1750_v7 = vrot.slane %v18991_v58, %v1749_v19 }
 0x668   :  { %v19042_v33 = vpack.c.bf16 %v11520_v59, %v11512_v51  ;;  %v19045_v55 = vpack.c.bf16 %v11522_v38, %v11514_v26  ;;  %v11687_v32 = vld [vmem:[#allocation8 + $0x4c0] sm:$0xff]  ;;  %v17627_v53 = vcombine.high %v11559_v11, %v11563_v15  ;;  %v17626_v50 = vcombine.low %v11559_v11, %v11563_v15 }
 0x669   :  { %11458 = vmatmul.mubr.bf16.vlgmr.msra.gmra.mxu0 %v18694_v16  ;;  %11501 = vmatmul.mubr.bf16.vlgmr.msra.gmra.mxu1 %v18696_v23  ;;  %v11571_v16 = vld [vmem:[#allocation8 + $0x120] sm:$0xff]  ;;  %v17770_v23 = vcombine.low %v11703_v47, %v11707_v31  ;;  %v17755_v39 = vcombine.high %v11687_v32, %v11691_v3  ;;  %v17754_v2 = vcombine.low %v11687_v32, %v11691_v3 }
 0x66a   :  { %14650 = vmatpush1.bf16.msra.mxu0 %v17658_v43  ;;  %14681 = vmatprep.mubr.bf16.mxu0 %v19042_v33  ;;  %v17635_v60 = vcombine.high %v11567_v48, %v11571_v16  ;;  %v17634_v13 = vcombine.low %v11567_v48, %v11571_v16  ;;  %v11551_v20 = vld [vmem:[#allocation8 + $0x80] sm:$0xff] }
 0x66b   :  { %14693 = vmatpush1.bf16.msra.mxu1 %v17786_v44  ;;  %14724 = vmatprep.mubr.bf16.mxu1 %v19045_v55  ;;  %v11555_v45 = vld [vmem:[#allocation8 + $0xa0] sm:$0xff] }
 0x66c   :  { %14651 = vmatprep.subr.bf16.mxu0 %v17651_v46  ;;  %14694 = vmatprep.subr.bf16.mxu1 %v17779_v52  ;;  %v11679_v18 = vld [vmem:[#allocation8 + $0x480] sm:$0xff]  ;;  %v17619_v24 = vcombine.high %v11551_v20, %v11555_v45  ;;  %v17618_v38 = vcombine.low %v11551_v20, %v11555_v45  ;;  %v19378_v52 = vld [vmem:[#allocation58_spill] sm:$0xff] }
 0x66d   :  { %v11683_v4 = vld [vmem:[#allocation8 + $0x4a0] sm:$0xff]  ;;  %v10520_v47 = vadd.f32 %v19378_v52, %v1750_v7 }
 0x66e   :  { %14652 = vmatpush1.bf16.msra.mxu0 %v17650_v17  ;;  %v17747_v29 = vcombine.high %v11679_v18, %v11683_v4  ;;  %v11543_v12 = vld [vmem:[#allocation8 + $0x40] sm:$0xff]  ;;  %v17746_v43 = vcombine.low %v11679_v18, %v11683_v4 }
 0x66f   :  { %14695 = vmatpush1.bf16.msra.mxu1 %v17778_v9  ;;  %14653 = vmatprep.subr.bf16.mxu0 %v17643_v34  ;;  %v11547_v59 = vld [vmem:[#allocation8 + $0x60] sm:$0xff] }
 0x670   :  { %14696 = vmatprep.subr.bf16.mxu1 %v17771_v25  ;;  %v11671_v8 = vld [vmem:[#allocation8 + $0x440] sm:$0xff]  ;;  %v17611_v22 = vcombine.high %v11543_v12, %v11547_v59  ;;  %v17610_v27 = vcombine.low %v11543_v12, %v11547_v59  ;;  %v19383_v12 = vld [vmem:[#allocation62_spill] sm:$0xff] }
 0x671   :  { %v11675_v40 = vld [vmem:[#allocation8 + $0x460] sm:$0xff] }
 0x672   :  { %14654 = vmatpush1.bf16.msra.mxu0 %v17642_v54  ;;  %v17739_v51 = vcombine.high %v11671_v8, %v11675_v40  ;;  %v11535_v44 = vld [vmem:[#allocation8] sm:$0xff]  ;;  %v17738_v31 = vcombine.low %v11671_v8, %v11675_v40  ;;  %v19380_v54 = vld [vmem:[#allocation59_spill] sm:$0xff] }
 0x673   :  { %14697 = vmatpush1.bf16.msra.mxu1 %v17770_v23  ;;  %14655 = vmatprep.subr.bf16.mxu0 %v17635_v60  ;;  %v11539_v26 = vld [vmem:[#allocation8 + $0x20] sm:$0xff]  ;;  %v10563_v23 = vadd.f32 %v19380_v54, %v10520_v47 }
 0x674   :  { %14698 = vmatprep.subr.bf16.mxu1 %v17763_v6  ;;  %v11663_v46 = vld [vmem:[#allocation8 + $0x400] sm:$0xff]  ;;  %v17603_v17 = vcombine.high %v11535_v44, %v11539_v26  ;;  %v17602_v49 = vcombine.low %v11535_v44, %v11539_v26  ;;  %v19385_v44 = vld [vmem:[#allocation63_spill] sm:$0xff] }
 0x675   :  { %v11667_v30 = vld [vmem:[#allocation8 + $0x420] sm:$0xff] }
 0x676   :  { %14656 = vmatpush1.bf16.msra.mxu0 %v17634_v13  ;;  %v19379_v9 = vld [vmem:[#allocation56_spill] sm:$0xff]  ;;  %v17731_v25 = vcombine.high %v11663_v46, %v11667_v30  ;;  %v17730_v60 = vcombine.low %v11663_v46, %v11667_v30  ;;  %v19381_v11 = vld [vmem:[#allocation57_spill] sm:$0xff] }
 0x677   :  { %14699 = vmatpush1.bf16.msra.mxu1 %v17762_v36  ;;  %14657 = vmatprep.subr.bf16.mxu0 %v17627_v53  ;;  %v10516_v34 = vadd.f32 %v19379_v9, %v1750_v7  ;;  %v11655_v48 = vld [vmem:[#allocation8 + $0x3c0] sm:$0xff]  ;;  %v10606_v36 = vadd.f32 %v18912_v41, %v10563_v23 }
 0x678   :  { %14700 = vmatprep.subr.bf16.mxu1 %v17755_v39  ;;  %v11659_v58 = vld [vmem:[#allocation8 + $0x3e0] sm:$0xff] }
 0x679   :  { %v11783_v16 = vld [vmem:[#allocation8 + $0x7c0] sm:$0xff]  ;;  %v17723_v6 = vcombine.high %v11655_v48, %v11659_v58  ;;  %v10559_v15 = vadd.f32 %v19381_v11, %v10516_v34  ;;  %v17722_v18 = vcombine.low %v11655_v48, %v11659_v58  ;;  %v10649_v59 = vadd.f32 %v19383_v12, %v10606_v36 }
 0x67a   :  { %14658 = vmatpush1.bf16.msra.mxu0 %v17626_v50  ;;  %v11787_v0 = vld [vmem:[#allocation8 + $0x7e0] sm:$0xff] }
 0x67b   :  { %14701 = vmatpush1.bf16.msra.mxu1 %v17754_v2  ;;  %14659 = vmatprep.subr.bf16.mxu0 %v17619_v24  ;;  %v17851_v32 = vcombine.high %v11783_v16, %v11787_v0  ;;  %v11647_v3 = vld [vmem:[#allocation8 + $0x380] sm:$0xff]  ;;  %v17850_v4 = vcombine.low %v11783_v16, %v11787_v0 }
 0x67c   :  { %14702 = vmatprep.subr.bf16.mxu1 %v17747_v29  ;;  %v11651_v13 = vld [vmem:[#allocation8 + $0x3a0] sm:$0xff] }
 0x67d   :  { %v11775_v53 = vld [vmem:[#allocation8 + $0x780] sm:$0xff]  ;;  %v17715_v50 = vcombine.high %v11647_v3, %v11651_v13 }
 0x67e   :  { %14660 = vmatpush1.bf16.msra.mxu0 %v17618_v38  ;;  %v11779_v39 = vld [vmem:[#allocation8 + $0x7a0] sm:$0xff] }
 0x67f   :  { %14703 = vmatpush1.bf16.msra.mxu1 %v17746_v43  ;;  %14661 = vmatprep.subr.bf16.mxu0 %v17611_v22  ;;  %v19382_v20 = vld [vmem:[#allocation60_spill] sm:$0xff]  ;;  %v17843_v2 = vcombine.high %v11775_v53, %v11779_v39  ;;  %v19384_v38 = vld [vmem:[#allocation61_spill] sm:$0xff]  ;;  %v17714_v43 = vcombine.low %v11647_v3, %v11651_v13  ;;  %v10692_v22 = vadd.f32 %v18930_v63, %v10649_v59 }
 0x680   :  { %14704 = vmatprep.subr.bf16.mxu1 %v17739_v51  ;;  %v10602_v45 = vadd.f32 %v19382_v20, %v10559_v15  ;;  %v11639_v24 = vld [vmem:[#allocation8 + $0x340] sm:$0xff]  ;;  %v17842_v7 = vcombine.low %v11775_v53, %v11779_v39 }
 0x681   :  { %v11643_v29 = vld [vmem:[#allocation8 + $0x360] sm:$0xff] }
 0x682   :  { %14662 = vmatpush1.bf16.msra.mxu0 %v17610_v27  ;;  %v11767_v8 = vld [vmem:[#allocation8 + $0x740] sm:$0xff]  ;;  %v10645_v41 = vadd.f32 %v19384_v38, %v10602_v45  ;;  %v17707_v51 = vcombine.high %v11639_v24, %v11643_v29 }
 0x683   :  { %14705 = vmatpush1.bf16.msra.mxu1 %v17738_v31  ;;  %14663 = vmatprep.subr.bf16.mxu0 %v17603_v17  ;;  %v11771_v40 = vld [vmem:[#allocation8 + $0x760] sm:$0xff]  ;;  %v17706_v31 = vcombine.low %v11639_v24, %v11643_v29  ;;  %v10735_v17 = vadd.f32 %v18932_v56, %v10692_v22  ;;  %v10949_v24 = vpop.f32.mrf.mxu0 }
 0x684   :  { %14706 = vmatprep.subr.bf16.mxu1 %v17731_v25  ;;  %v10688_v26 = vadd.f32 %v19385_v44, %v10645_v41  ;;  %v17835_v46 = vcombine.high %v11767_v8, %v11771_v40  ;;  %v11631_v30 = vld [vmem:[#allocation8 + $0x300] sm:$0xff]  ;;  %v17834_v9 = vcombine.low %v11767_v8, %v11771_v40  ;;  %v10992_v44 = vpop.f32.mrf.mxu1 }
 0x685   :  { %v11635_v27 = vld [vmem:[#allocation8 + $0x320] sm:$0xff]  ;;  %v10778_v0 = vadd.f32 %v18948_v37, %v10735_v17 }
 0x686   :  { %14664 = vmatpush1.bf16.msra.mxu0 %v17602_v49  ;;  %v11759_v52 = vld [vmem:[#allocation8 + $0x700] sm:$0xff]  ;;  %v17699_v63 = vcombine.high %v11631_v30, %v11635_v27 }
 0x687   :  { %14707 = vmatpush1.bf16.msra.mxu1 %v17730_v60  ;;  %14665 = vmatprep.subr.bf16.mxu0 %v17723_v6  ;;  %v11763_v47 = vld [vmem:[#allocation8 + $0x720] sm:$0xff]  ;;  %v17698_v60 = vcombine.low %v11631_v30, %v11635_v27  ;;  %v10821_v3 = vadd.f32 %v18950_v1, %v10778_v0 }
 0x688   :  { %14708 = vmatprep.subr.bf16.mxu1 %v17851_v32  ;;  %v19386_v34 = vld [vmem:[#allocation64_spill] sm:$0xff]  ;;  %v17827_v48 = vcombine.high %v11759_v52, %v11763_v47  ;;  %v17826_v56 = vcombine.low %v11759_v52, %v11763_v47 }
 0x689   :  { %v10731_v25 = vadd.f32 %v19386_v34, %v10688_v26  ;;  %v11623_v58 = vld [vmem:[#allocation8 + $0x2c0] sm:$0xff] }
 0x68a   :  { %14666 = vmatpush2.bf16.msra.mxu0 %v17722_v18  ;;  %v11627_v16 = vld [vmem:[#allocation8 + $0x2e0] sm:$0xff] }
 0x68b   :  { %14709 = vmatpush2.bf16.msra.mxu1 %v17850_v4  ;;  %14667 = vmatprep.subr.bf16.mxu0 %v17715_v50  ;;  %v11751_v49 = vld [vmem:[#allocation8 + $0x6c0] sm:$0xff]  ;;  %v10774_v23 = vadd.f32 %v18937_v14, %v10731_v25  ;;  %v17691_v6 = vcombine.high %v11623_v58, %v11627_v16  ;;  %v17690_v53 = vcombine.low %v11623_v58, %v11627_v16 }
 0x68c   :  { %14710 = vmatprep.subr.bf16.mxu1 %v17843_v2  ;;  %v11755_v54 = vld [vmem:[#allocation8 + $0x6e0] sm:$0xff]  ;;  %v10864_v14 = vadd.f32 %v18966_v62, %v10821_v3 }
 0x68d   :  { %v17819_v11 = vcombine.high %v11751_v49, %v11755_v54  ;;  %v11615_v15 = vld [vmem:[#allocation8 + $0x280] sm:$0xff]  ;;  %v10817_v37 = vadd.f32 %v18941_v61, %v10774_v23  ;;  %v17818_v39 = vcombine.low %v11751_v49, %v11755_v54 }
 0x68e   :  { %14668 = vmatpush2.bf16.msra.mxu0 %v17714_v43  ;;  %v11619_v32 = vld [vmem:[#allocation8 + $0x2a0] sm:$0xff]  ;;  %v10907_v61 = vadd.f32 %v18968_v35, %v10864_v14 }
 0x68f   :  { %14711 = vmatpush2.bf16.msra.mxu1 %v17842_v7  ;;  %14669 = vmatprep.subr.bf16.mxu0 %v17707_v51  ;;  %v11743_v13 = vld [vmem:[#allocation8 + $0x680] sm:$0xff]  ;;  %v17683_v20 = vcombine.high %v11615_v15, %v11619_v32  ;;  %v10860_v50 = vadd.f32 %v18955_v28, %v10817_v37  ;;  %v17682_v29 = vcombine.low %v11615_v15, %v11619_v32  ;;  %v19389_v32 = vld [vmem:[#allocation55_spill] sm:$0xff] }
 0x690   :  { %14712 = vmatprep.subr.bf16.mxu1 %v17835_v46  ;;  %v11747_v36 = vld [vmem:[#allocation8 + $0x6a0] sm:$0xff]  ;;  %v10950_v41 = vadd.f32 %v10949_v24, %v10907_v61 }
 0x691   :  { %v17811_v45 = vcombine.high %v11743_v13, %v11747_v36  ;;  %v11607_v18 = vld [vmem:[#allocation8 + $0x240] sm:$0xff]  ;;  %v17810_v62 = vcombine.low %v11743_v13, %v11747_v36  ;;  %v10903_v38 = vadd.f32 %v18959_v57, %v10860_v50 }
 0x692   :  { %14670 = vmatpush2.bf16.msra.mxu0 %v17706_v31  ;;  %v11611_v4 = vld [vmem:[#allocation8 + $0x260] sm:$0xff]  ;;  %v10993_v27 = vadd.f32 %v10992_v44, %v10950_v41 }
 0x693   :  { %14713 = vmatpush2.bf16.msra.mxu1 %v17834_v9  ;;  %14671 = vmatprep.subr.bf16.mxu0 %v17699_v63  ;;  %v11735_v2 = vld [vmem:[#allocation8 + $0x640] sm:$0xff]  ;;  %v17675_v12 = vcombine.high %v11607_v18, %v11611_v4  ;;  %v17674_v22 = vcombine.low %v11607_v18, %v11611_v4  ;;  %v10946_v7 = vadd.f32 %v18973_v5, %v10903_v38 }
 0x694   :  { %14714 = vmatprep.subr.bf16.mxu1 %v17827_v48  ;;  %v11739_v1 = vld [vmem:[#allocation8 + $0x660] sm:$0xff]  ;;  %v11524_v48 = vmax.f32 %v10993_v27, 0.0 }
 0x695   :  { %v17803_v59 = vcombine.high %v11735_v2, %v11739_v1  ;;  %v11599_v8 = vld [vmem:[#allocation8 + $0x200] sm:$0xff]  ;;  %v17802_v35 = vcombine.low %v11735_v2, %v11739_v1 }
 0x696   :  { %14672 = vmatpush2.bf16.msra.mxu0 %v17698_v60  ;;  %v11603_v40 = vld [vmem:[#allocation8 + $0x220] sm:$0xff] }
 0x697   :  { %14715 = vmatpush2.bf16.msra.mxu1 %v17826_v56  ;;  %14673 = vmatprep.subr.bf16.mxu0 %v17691_v6  ;;  %v11727_v43 = vld [vmem:[#allocation8 + $0x600] sm:$0xff]  ;;  %v17667_v51 = vcombine.high %v11599_v8, %v11603_v40  ;;  %v17666_v57 = vcombine.low %v11599_v8, %v11603_v40 }
 0x698   :  { %14716 = vmatprep.subr.bf16.mxu1 %v17819_v11  ;;  %v11731_v28 = vld [vmem:[#allocation8 + $0x620] sm:$0xff] }
 0x699   :  { %v17795_v26 = vcombine.high %v11727_v43, %v11731_v28  ;;  %v11847_v46 = vld [vmem:[#allocation8 + $0x9c0] sm:$0xff]  ;;  %v17794_v9 = vcombine.low %v11727_v43, %v11731_v28 }
 0x69a   :  { %14674 = vmatpush2.bf16.msra.mxu0 %v17690_v53  ;;  %v11851_v30 = vld [vmem:[#allocation8 + $0x9e0] sm:$0xff] }
 0x69b   :  { %14717 = vmatpush2.bf16.msra.mxu1 %v17818_v39  ;;  %14675 = vmatprep.subr.bf16.mxu0 %v17683_v20  ;;  %v11975_v52 = vld [vmem:[#allocation8 + $0xdc0] sm:$0xff]  ;;  %v17915_v5 = vcombine.high %v11847_v46, %v11851_v30  ;;  %v17914_v58 = vcombine.low %v11847_v46, %v11851_v30 }
 0x69c   :  { %14718 = vmatprep.subr.bf16.mxu1 %v17811_v45  ;;  %v11979_v47 = vld [vmem:[#allocation8 + $0xde0] sm:$0xff] }
 0x69d   :  { %v19387_v31 = vld [vmem:[#allocation65_spill] sm:$0xff]  ;;  %v18043_v25 = vcombine.high %v11975_v52, %v11979_v47  ;;  %v18042_v56 = vcombine.low %v11975_v52, %v11979_v47  ;;  %v19388_v11 = vld [vmem:[#allocation36_spill] sm:$0xff] }
 0x69e   :  { %14676 = vmatpush2.bf16.msra.mxu0 %v17682_v29  ;;  %v10989_v17 = vadd.f32 %v19387_v31, %v10946_v7  ;;  %v11839_v63 = vld [vmem:[#allocation8 + $0x980] sm:$0xff] }
 0x69f   :  { %14719 = vmatpush2.bf16.msra.mxu1 %v17810_v62  ;;  %14677 = vmatprep.subr.bf16.mxu0 %v17675_v12  ;;  %v11843_v34 = vld [vmem:[#allocation8 + $0x9a0] sm:$0xff] }
 0x6a0   :  { %14720 = vmatprep.subr.bf16.mxu1 %v17803_v59  ;;  %v11967_v16 = vld [vmem:[#allocation8 + $0xd80] sm:$0xff]  ;;  %v11516_v49 = vmax.f32 %v10989_v17, 0.0  ;;  %v17907_v54 = vcombine.high %v11839_v63, %v11843_v34  ;;  %v17906_v3 = vcombine.low %v11839_v63, %v11843_v34 }
 0x6a1   :  { %v11971_v0 = vld [vmem:[#allocation8 + $0xda0] sm:$0xff] }
 0x6a2   :  { %14678 = vmatpush2.bf16.msra.mxu0 %v17674_v22  ;;  %v11831_v23 = vld [vmem:[#allocation8 + $0x940] sm:$0xff]  ;;  %v19076_v6 = vpack.c.bf16 %v11524_v48, %v11516_v49  ;;  %v18035_v15 = vcombine.high %v11967_v16, %v11971_v0  ;;  %v18034_v39 = vcombine.low %v11967_v16, %v11971_v0 }
 0x6a3   :  { %14721 = vmatpush2.bf16.msra.mxu1 %v17802_v35  ;;  %14679 = vmatprep.subr.bf16.mxu0 %v17667_v51  ;;  %v11835_v60 = vld [vmem:[#allocation8 + $0x960] sm:$0xff]  ;;  %v19081_v35 = vld [vmem:[#allocation8 + $0x5c8] sm:$0xff] }
 0x6a4   :  { %14722 = vmatprep.subr.bf16.mxu1 %v17795_v26  ;;  %v11959_v13 = vld [vmem:[#allocation8 + $0xd40] sm:$0xff]  ;;  %v17899_v37 = vcombine.high %v11831_v23, %v11835_v60  ;;  %v17898_v45 = vcombine.low %v11831_v23, %v11835_v60  ;;  %v19083_v51 = vld [vmem:[#allocation8 + $0x5e8] sm:$0xff] }
 0x6a5   :  { %v11963_v36 = vld [vmem:[#allocation8 + $0xd60] sm:$0xff]  ;;  %v17788_v30 = vcombine.low %v19081_v35, %v19083_v51 }
 0x6a6   :  { %14680 = vmatpush2.bf16.msra.mxu0 %v17666_v57  ;;  %v11823_v53 = vld [vmem:[#allocation8 + $0x900] sm:$0xff]  ;;  %v18027_v20 = vcombine.high %v11959_v13, %v11963_v36  ;;  %v18026_v24 = vcombine.low %v11959_v13, %v11963_v36 }
 0x6a7   :  { %14723 = vmatpush2.bf16.msra.mxu1 %v17794_v9  ;;  %14735 = vmatprep.subr.bf16.mxu0 %v17915_v5  ;;  %v11827_v14 = vld [vmem:[#allocation8 + $0x920] sm:$0xff] }
 0x6a8   :  { %14778 = vmatprep.subr.bf16.mxu1 %v18043_v25  ;;  %v11951_v18 = vld [vmem:[#allocation8 + $0xd00] sm:$0xff]  ;;  %v17891_v50 = vcombine.high %v11823_v53, %v11827_v14  ;;  %v17890_v61 = vcombine.low %v11823_v53, %v11827_v14 }
 0x6a9   :  { %14682 = vmatmul.mubr.bf16.vlgmr.msra.gmra.mxu0 %v19388_v11  ;;  %v11955_v4 = vld [vmem:[#allocation8 + $0xd20] sm:$0xff] }
 0x6aa   :  { %14725 = vmatmul.mubr.bf16.vlgmr.msra.gmra.mxu1 %v19389_v32  ;;  %14736 = vmatpush1.bf16.msra.mxu0 %v17914_v58  ;;  %v11815_v2 = vld [vmem:[#allocation8 + $0x8c0] sm:$0xff]  ;;  %v18019_v29 = vcombine.high %v11951_v18, %v11955_v4  ;;  %v18018_v38 = vcombine.low %v11951_v18, %v11955_v4 }
 0x6ab   :  { %14767 = vmatprep.mubr.bf16.mxu0 %v19076_v6  ;;  %14737 = vmatprep.subr.bf16.mxu0 %v17907_v54  ;;  %v11819_v1 = vld [vmem:[#allocation8 + $0x8e0] sm:$0xff] }
 0x6ac   :  { %14779 = vmatpush1.bf16.msra.mxu1 %v18042_v56  ;;  %v11943_v62 = vld [vmem:[#allocation8 + $0xcc0] sm:$0xff]  ;;  %v17883_v59 = vcombine.high %v11815_v2, %v11819_v1  ;;  %v17882_v43 = vcombine.low %v11815_v2, %v11819_v1 }
 0x6ad   :  { %14780 = vmatprep.subr.bf16.mxu1 %v18035_v15  ;;  %v11947_v12 = vld [vmem:[#allocation8 + $0xce0] sm:$0xff] }
 0x6ae   :  { %14738 = vmatpush1.bf16.msra.mxu0 %v17906_v3  ;;  %v11807_v8 = vld [vmem:[#allocation8 + $0x880] sm:$0xff]  ;;  %v18011_v41 = vcombine.high %v11943_v62, %v11947_v12  ;;  %v18010_v46 = vcombine.low %v11943_v62, %v11947_v12 }
 0x6af   :  { %14739 = vmatprep.subr.bf16.mxu0 %v17899_v37  ;;  %v11811_v40 = vld [vmem:[#allocation8 + $0x8a0] sm:$0xff] }
 0x6b0   :  { %14781 = vmatpush1.bf16.msra.mxu1 %v18034_v39  ;;  %v11935_v28 = vld [vmem:[#allocation8 + $0xc80] sm:$0xff]  ;;  %v17875_v7 = vcombine.high %v11807_v8, %v11811_v40  ;;  %v17874_v52 = vcombine.low %v11807_v8, %v11811_v40 }
 0x6b1   :  { %14782 = vmatprep.subr.bf16.mxu1 %v18027_v20  ;;  %v11939_v22 = vld [vmem:[#allocation8 + $0xca0] sm:$0xff] }
 0x6b2   :  { %14740 = vmatpush1.bf16.msra.mxu0 %v17898_v45  ;;  %v11799_v44 = vld [vmem:[#allocation8 + $0x840] sm:$0xff]  ;;  %v18003_v27 = vcombine.high %v11935_v28, %v11939_v22  ;;  %v18002_v5 = vcombine.low %v11935_v28, %v11939_v22 }
 0x6b3   :  { %14741 = vmatprep.subr.bf16.mxu0 %v17891_v50  ;;  %v11803_v26 = vld [vmem:[#allocation8 + $0x860] sm:$0xff] }
 0x6b4   :  { %14783 = vmatpush1.bf16.msra.mxu1 %v18026_v24  ;;  %v11927_v47 = vld [vmem:[#allocation8 + $0xc40] sm:$0xff]  ;;  %v17867_v31 = vcombine.high %v11799_v44, %v11803_v26  ;;  %v17866_v34 = vcombine.low %v11799_v44, %v11803_v26 }
 0x6b5   :  { %14784 = vmatprep.subr.bf16.mxu1 %v18019_v29  ;;  %v11931_v57 = vld [vmem:[#allocation8 + $0xc60] sm:$0xff] }
 0x6b6   :  { %14742 = vmatpush1.bf16.msra.mxu0 %v17890_v61  ;;  %v11791_v17 = vld [vmem:[#allocation8 + $0x800] sm:$0xff]  ;;  %v17995_v63 = vcombine.high %v11927_v47, %v11931_v57  ;;  %v17994_v49 = vcombine.low %v11927_v47, %v11931_v57 }
 0x6b7   :  { %14743 = vmatprep.subr.bf16.mxu0 %v17883_v59  ;;  %v11795_v9 = vld [vmem:[#allocation8 + $0x820] sm:$0xff] }
 0x6b8   :  { %14785 = vmatpush1.bf16.msra.mxu1 %v18018_v38  ;;  %v11919_v25 = vld [vmem:[#allocation8 + $0xc00] sm:$0xff]  ;;  %v17859_v58 = vcombine.high %v11791_v17, %v11795_v9  ;;  %v17858_v23 = vcombine.low %v11791_v17, %v11795_v9 }
 0x6b9   :  { %14786 = vmatprep.subr.bf16.mxu1 %v18011_v41  ;;  %v11923_v48 = vld [vmem:[#allocation8 + $0xc20] sm:$0xff] }
 0x6ba   :  { %14744 = vmatpush1.bf16.msra.mxu0 %v17882_v43  ;;  %v11911_v16 = vld [vmem:[#allocation8 + $0xbc0] sm:$0xff]  ;;  %v17987_v54 = vcombine.high %v11919_v25, %v11923_v48  ;;  %v17986_v36 = vcombine.low %v11919_v25, %v11923_v48 }
 0x6bb   :  { %14745 = vmatprep.subr.bf16.mxu0 %v17875_v7  ;;  %v11915_v0 = vld [vmem:[#allocation8 + $0xbe0] sm:$0xff] }
 0x6bc   :  { %14787 = vmatpush1.bf16.msra.mxu1 %v18010_v46  ;;  %v12039_v60 = vld [vmem:[#allocation8 + $0xfc0] sm:$0xff]  ;;  %v17979_v15 = vcombine.high %v11911_v16, %v11915_v0  ;;  %v17978_v53 = vcombine.low %v11911_v16, %v11915_v0 }
 0x6bd   :  { %14788 = vmatprep.subr.bf16.mxu1 %v18003_v27  ;;  %v12043_v56 = vld [vmem:[#allocation8 + $0xfe0] sm:$0xff] }
 0x6be   :  { %14746 = vmatpush1.bf16.msra.mxu0 %v17874_v52  ;;  %v11903_v3 = vld [vmem:[#allocation8 + $0xb80] sm:$0xff]  ;;  %v18107_v37 = vcombine.high %v12039_v60, %v12043_v56  ;;  %v18106_v4 = vcombine.low %v12039_v60, %v12043_v56 }
 0x6bf   :  { %14747 = vmatprep.subr.bf16.mxu0 %v17867_v31  ;;  %v11907_v13 = vld [vmem:[#allocation8 + $0xba0] sm:$0xff] }
 0x6c0   :  { %14789 = vmatpush1.bf16.msra.mxu1 %v18002_v5  ;;  %v12031_v14 = vld [vmem:[#allocation8 + $0xf80] sm:$0xff]  ;;  %v17971_v20 = vcombine.high %v11903_v3, %v11907_v13  ;;  %v17970_v2 = vcombine.low %v11903_v3, %v11907_v13 }
 0x6c1   :  { %14790 = vmatprep.subr.bf16.mxu1 %v17995_v63  ;;  %v12035_v39 = vld [vmem:[#allocation8 + $0xfa0] sm:$0xff] }
 0x6c2   :  { %14748 = vmatpush1.bf16.msra.mxu0 %v17866_v34  ;;  %v11895_v45 = vld [vmem:[#allocation8 + $0xb40] sm:$0xff]  ;;  %v18099_v50 = vcombine.high %v12031_v14, %v12035_v39  ;;  %v18098_v12 = vcombine.low %v12031_v14, %v12035_v39  ;;  %v11596_v14 = vld [vmem:[#allocation8 + $0x1e8] sm:$0xff] }
 0x6c3   :  { %14749 = vmatprep.subr.bf16.mxu0 %v17859_v58  ;;  %v11899_v18 = vld [vmem:[#allocation8 + $0xb60] sm:$0xff] }
 0x6c4   :  { %14791 = vmatpush1.bf16.msra.mxu1 %v17994_v49  ;;  %v12023_v1 = vld [vmem:[#allocation8 + $0xf40] sm:$0xff]  ;;  %v17963_v29 = vcombine.high %v11895_v45, %v11899_v18  ;;  %v17962_v8 = vcombine.low %v11895_v45, %v11899_v18  ;;  %v19087_v18 = vpop.f32.mrf.mxu0 }
 0x6c5   :  { %14792 = vmatprep.subr.bf16.mxu1 %v17987_v54  ;;  %v12027_v24 = vld [vmem:[#allocation8 + $0xf60] sm:$0xff] }
 0x6c6   :  { %14750 = vmatpush1.bf16.msra.mxu0 %v17858_v23  ;;  %v11887_v61 = vld [vmem:[#allocation8 + $0xb00] sm:$0xff]  ;;  %v18091_v59 = vcombine.high %v12023_v1, %v12027_v24  ;;  %v18090_v22 = vcombine.low %v12023_v1, %v12027_v24  ;;  %v11588_v1 = vld [vmem:[#allocation8 + $0x1a8] sm:$0xff] }
 0x6c7   :  { %14751 = vmatprep.subr.bf16.mxu0 %v17979_v15  ;;  %v11891_v62 = vld [vmem:[#allocation8 + $0xb20] sm:$0xff] }
 0x6c8   :  { %14793 = vmatpush1.bf16.msra.mxu1 %v17986_v36  ;;  %v12015_v40 = vld [vmem:[#allocation8 + $0xf00] sm:$0xff]  ;;  %v17955_v41 = vcombine.high %v11887_v61, %v11891_v62  ;;  %v17954_v44 = vcombine.low %v11887_v61, %v11891_v62  ;;  %v19093_v62 = vpop.f32.mrf.mxu0 }
 0x6c9   :  { %14794 = vmatprep.subr.bf16.mxu1 %v18107_v37  ;;  %v12019_v38 = vld [vmem:[#allocation8 + $0xf20] sm:$0xff] }
 0x6ca   :  { %14752 = vmatpush2.bf16.msra.mxu0 %v17978_v53  ;;  %v11879_v43 = vld [vmem:[#allocation8 + $0xac0] sm:$0xff]  ;;  %v18083_v7 = vcombine.high %v12015_v40, %v12019_v38  ;;  %v18082_v57 = vcombine.low %v12015_v40, %v12019_v38  ;;  %v11592_v53 = vld [vmem:[#allocation8 + $0x1c8] sm:$0xff] }
 0x6cb   :  { %14753 = vmatprep.subr.bf16.mxu0 %v17971_v20  ;;  %v11883_v28 = vld [vmem:[#allocation8 + $0xae0] sm:$0xff]  ;;  %v17660_v61 = vcombine.low %v11592_v53, %v11596_v14  ;;  %v11580_v40 = vld [vmem:[#allocation8 + $0x168] sm:$0xff] }
 0x6cc   :  { %14795 = vmatpush2.bf16.msra.mxu1 %v18106_v4  ;;  %v12007_v26 = vld [vmem:[#allocation8 + $0xec0] sm:$0xff]  ;;  %v17947_v27 = vcombine.high %v11879_v43, %v11883_v28  ;;  %v17946_v17 = vcombine.low %v11879_v43, %v11883_v28  ;;  %v17661_v4 = vcombine.high %v11592_v53, %v11596_v14 }
 0x6cd   :  { %14796 = vmatprep.subr.bf16.mxu1 %v18099_v50  ;;  %v12011_v46 = vld [vmem:[#allocation8 + $0xee0] sm:$0xff]  ;;  %v19089_v50 = vpop.f32.mrf.mxu1 }
 0x6ce   :  { %14754 = vmatpush2.bf16.msra.mxu0 %v17970_v2  ;;  %v11871_v52 = vld [vmem:[#allocation8 + $0xa80] sm:$0xff]  ;;  %v18075_v31 = vcombine.high %v12007_v26, %v12011_v46  ;;  %v18074_v48 = vcombine.low %v12007_v26, %v12011_v46  ;;  %v11584_v2 = vld [vmem:[#allocation8 + $0x188] sm:$0xff] }
 0x6cf   :  { %14755 = vmatprep.subr.bf16.mxu0 %v17963_v29  ;;  %v11875_v47 = vld [vmem:[#allocation8 + $0xaa0] sm:$0xff]  ;;  %v17789_v29 = vcombine.high %v19081_v35, %v19083_v51  ;;  %v17652_v38 = vcombine.low %v11584_v2, %v11588_v1 }
 0x6d0   :  { %14797 = vmatpush2.bf16.msra.mxu1 %v18098_v12  ;;  %v11999_v9 = vld [vmem:[#allocation8 + $0xe80] sm:$0xff]  ;;  %v17939_v63 = vcombine.high %v11871_v52, %v11875_v47  ;;  %v17938_v16 = vcombine.low %v11871_v52, %v11875_v47  ;;  %v17653_v12 = vcombine.high %v11584_v2, %v11588_v1  ;;  %v11560_v52 = vld [vmem:[#allocation8 + $0xc8] sm:$0xff] }
 0x6d1   :  { %14798 = vmatprep.subr.bf16.mxu1 %v18091_v59  ;;  %v12003_v5 = vld [vmem:[#allocation8 + $0xea0] sm:$0xff]  ;;  %v19095_v59 = vpop.f32.mrf.mxu1  ;;  %v11564_v47 = vld [vmem:[#allocation8 + $0xe8] sm:$0xff] }
 0x6d2   :  { %14756 = vmatpush2.bf16.msra.mxu0 %v17962_v8  ;;  %v11863_v34 = vld [vmem:[#allocation8 + $0xa40] sm:$0xff]  ;;  %v18067_v58 = vcombine.high %v11999_v9, %v12003_v5  ;;  %v18066_v56 = vcombine.low %v11999_v9, %v12003_v5  ;;  %v11576_v8 = vld [vmem:[#allocation8 + $0x148] sm:$0xff]  ;;  %v17629_v9 = vcombine.high %v11560_v52, %v11564_v47 }
 0x6d3   :  { %14757 = vmatprep.subr.bf16.mxu0 %v17955_v41  ;;  %v11867_v25 = vld [vmem:[#allocation8 + $0xa60] sm:$0xff]  ;;  %v19099_v41 = vpop.f32.mrf.mxu0  ;;  %v17645_v43 = vcombine.high %v11576_v8, %v11580_v40  ;;  %v19101_v28 = vpop.f32.mrf.mxu1  ;;  %v11552_v5 = vld [vmem:[#allocation8 + $0x88] sm:$0xff] }
 0x6d4   :  { %14799 = vmatpush2.bf16.msra.mxu1 %v18090_v22  ;;  %v11991_v0 = vld [vmem:[#allocation8 + $0xe40] sm:$0xff]  ;;  %v17931_v54 = vcombine.high %v11863_v34, %v11867_v25  ;;  %v17930_v3 = vcombine.low %v11863_v34, %v11867_v25  ;;  %v11568_v22 = vld [vmem:[#allocation8 + $0x108] sm:$0xff] }
 0x6d5   :  { %14800 = vmatprep.subr.bf16.mxu1 %v18083_v7  ;;  %v11995_v49 = vld [vmem:[#allocation8 + $0xe60] sm:$0xff]  ;;  %v11572_v7 = vld [vmem:[#allocation8 + $0x128] sm:$0xff]  ;;  %v19103_v26 = vpop.f32.mrf.mxu0 }
 0x6d6   :  { %14758 = vmatpush2.bf16.msra.mxu0 %v17954_v44  ;;  %v11855_v23 = vld [vmem:[#allocation8 + $0xa00] sm:$0xff]  ;;  %v18059_v15 = vcombine.high %v11991_v0, %v11995_v49  ;;  %v18058_v39 = vcombine.low %v11991_v0, %v11995_v49  ;;  %v17644_v44 = vcombine.low %v11576_v8, %v11580_v40  ;;  %v17637_v46 = vcombine.high %v11568_v22, %v11572_v7  ;;  %v11548_v0 = vld [vmem:[#allocation8 + $0x68] sm:$0xff] }
 0x6d7   :  { %14759 = vmatprep.subr.bf16.mxu0 %v17947_v27  ;;  %v11859_v60 = vld [vmem:[#allocation8 + $0xa20] sm:$0xff]  ;;  %v19105_v27 = vpop.f32.mrf.mxu1  ;;  %v1753_v8 = vsub.s32 6, %v18640_v42 }
 0x6d8   :  { %14801 = vmatpush2.bf16.msra.mxu1 %v18082_v57  ;;  %v11983_v13 = vld [vmem:[#allocation8 + $0xe00] sm:$0xff]  ;;  %v17923_v37 = vcombine.high %v11855_v23, %v11859_v60  ;;  %v17922_v45 = vcombine.low %v11855_v23, %v11859_v60  ;;  %v19107_v57 = vpop.f32.mrf.mxu0 }
 0x6d9   :  { %14802 = vmatprep.subr.bf16.mxu1 %v18075_v31  ;;  %v11987_v36 = vld [vmem:[#allocation8 + $0xe20] sm:$0xff]  ;;  %v19109_v31 = vpop.f32.mrf.mxu1 }
 0x6da   :  { %14760 = vmatpush2.bf16.msra.mxu0 %v17946_v17  ;;  %v18051_v20 = vcombine.high %v11983_v13, %v11987_v36  ;;  %v18050_v24 = vcombine.low %v11983_v13, %v11987_v36  ;;  %v17636_v17 = vcombine.low %v11568_v22, %v11572_v7  ;;  %v19111_v34 = vpop.f32.mrf.mxu0  ;;  %v11640_v22 = vld [vmem:[#allocation8 + $0x348] sm:$0xff] }
 0x6db   :  { %14761 = vmatprep.subr.bf16.mxu0 %v17939_v63  ;;  %v11556_v63 = vld [vmem:[#allocation8 + $0xa8] sm:$0xff]  ;;  %v19113_v25 = vpop.f32.mrf.mxu1 }
 0x6dc   :  { %14803 = vmatpush2.bf16.msra.mxu1 %v18074_v48  ;;  %v17628_v48 = vcombine.low %v11560_v52, %v11564_v47  ;;  %v19115_v49 = vpop.f32.mrf.mxu0  ;;  %v17620_v23 = vcombine.low %v11552_v5, %v11556_v63  ;;  %v11644_v7 = vld [vmem:[#allocation8 + $0x368] sm:$0xff] }
 0x6dd   :  { %14804 = vmatprep.subr.bf16.mxu1 %v18067_v58  ;;  %v17621_v58 = vcombine.high %v11552_v5, %v11556_v63  ;;  %v11632_v63 = vld [vmem:[#allocation8 + $0x308] sm:$0xff] }
 0x6de   :  { %14762 = vmatpush2.bf16.msra.mxu0 %v17938_v16  ;;  %v11544_v16 = vld [vmem:[#allocation8 + $0x48] sm:$0xff] }
 0x6df   :  { %14763 = vmatprep.subr.bf16.mxu0 %v17931_v54  ;;  %v19117_v54 = vpop.f32.mrf.mxu1  ;;  %v17613_v60 = vcombine.high %v11544_v16, %v11548_v0  ;;  %v17612_v36 = vcombine.low %v11544_v16, %v11548_v0 }
 0x6e0   :  { %14805 = vmatpush2.bf16.msra.mxu1 %v18066_v56  ;;  %v11536_v56 = vld [vmem:[#allocation8 + $0x8] sm:$0xff] }
 0x6e1   :  { %14806 = vmatprep.subr.bf16.mxu1 %v18059_v15  ;;  %v11540_v15 = vld [vmem:[#allocation8 + $0x28] sm:$0xff]  ;;  %v19121_v13 = vpop.f32.mrf.mxu1 }
 0x6e2   :  { %14764 = vmatpush2.bf16.msra.mxu0 %v17930_v3  ;;  %v19119_v3 = vpop.f32.mrf.mxu0  ;;  %v17605_v53 = vcombine.high %v11536_v56, %v11540_v15 }
 0x6e3   :  { %14765 = vmatprep.subr.bf16.mxu0 %v17923_v37  ;;  %v19125_v14 = vpop.f32.mrf.mxu1 }
 0x6e4   :  { %14807 = vmatpush2.bf16.msra.mxu1 %v18058_v39  ;;  %v19123_v37 = vpop.f32.mrf.mxu0  ;;  %v11656_v39 = vld [vmem:[#allocation8 + $0x3c8] sm:$0xff] }
 0x6e5   :  { %14808 = vmatprep.subr.bf16.mxu1 %v18051_v20  ;;  %v11660_v20 = vld [vmem:[#allocation8 + $0x3e8] sm:$0xff]  ;;  %v19129_v1 = vpop.f32.mrf.mxu1 }
 0x6e6   :  { %14766 = vmatpush2.bf16.msra.mxu0 %v17922_v45  ;;  %v17604_v45 = vcombine.low %v11536_v56, %v11540_v15  ;;  %v17725_v2 = vcombine.high %v11656_v39, %v11660_v20 }
 0x6e7   :  { %14821 = vmatprep.subr.bf16.mxu0 %v17661_v4  ;;  %v19127_v4 = vpop.f32.mrf.mxu0 }
 0x6e8   :  { %14809 = vmatpush2.bf16.msra.mxu1 %v18050_v24  ;;  %v11648_v24 = vld [vmem:[#allocation8 + $0x388] sm:$0xff] }
 0x6e9   :  { %14768 = vmatmul.mubr.bf16.vlgmr.msra.gmra.mxu0 %v18980_v21  ;;  %14864 = vmatprep.subr.bf16.mxu1 %v17789_v29  ;;  %v11652_v29 = vld [vmem:[#allocation8 + $0x3a8] sm:$0xff]  ;;  %v19133_v40 = vpop.f32.mrf.mxu0 }
 0x6ea   :  { %14822 = vmatpush1.bf16.msra.mxu0 %v17660_v61  ;;  %14853 = vmatprep.mubr.bf16.mxu0 %v19042_v33  ;;  %v1757_v61 = vsub.s32 7, %v18640_v42  ;;  %v17716_v52 = vcombine.low %v11648_v24, %v11652_v29 }
 0x6eb   :  { %14823 = vmatprep.subr.bf16.mxu0 %v17653_v12  ;;  %v17724_v12 = vcombine.low %v11656_v39, %v11660_v20 }
 0x6ee   :  { %14824 = vmatpush1.bf16.msra.mxu0 %v17652_v38  ;;  %v17717_v38 = vcombine.high %v11648_v24, %v11652_v29 }
 0x6ef   :  { %14825 = vmatprep.subr.bf16.mxu0 %v17645_v43  ;;  %v19135_v43 = vpop.f32.mrf.mxu1 }
 0x6f1   :  { %v19141_v5 = vpop.f32.mrf.mxu1 }
 0x6f2   :  { %14826 = vmatpush1.bf16.msra.mxu0 %v17644_v44  ;;  %v18350_v44 = vld [vmem:[#allocation7] sm:$0xff] }
 0x6f3   :  { %14827 = vmatprep.subr.bf16.mxu0 %v17637_v46  ;;  %v1758_v46 = vrot.slane %v18350_v44, %v1757_v61  ;;  %v1754_v47 = vrot.slane %v18350_v44, %v1753_v8  ;;  %v19146_v0 = vpop.f32.mrf.mxu1 }
 0x6f5   :  { %v11032_v16 = vadd.f32 %v19093_v62, %v1758_v46  ;;  %v11034_v15 = vadd.f32 %v19099_v41, %v1754_v47  ;;  %v11620_v41 = vld [vmem:[#allocation8 + $0x2a8] sm:$0xff] }
 0x6f6   :  { %14828 = vmatpush1.bf16.msra.mxu0 %v17636_v17  ;;  %v11207_v17 = vpop.f32.mrf.mxu0 }
 0x6f7   :  { %14829 = vmatprep.subr.bf16.mxu0 %v17629_v9  ;;  %v17709_v9 = vcombine.high %v11640_v22, %v11644_v7  ;;  %v11075_v20 = vadd.f32 %v19095_v59, %v11032_v16 }
 0x6fa   :  { %14830 = vmatpush1.bf16.msra.mxu0 %v17628_v48  ;;  %v11636_v48 = vld [vmem:[#allocation8 + $0x328] sm:$0xff] }
 0x6fb   :  { %14831 = vmatprep.subr.bf16.mxu0 %v17621_v58  ;;  %v19143_v58 = vpop.f32.mrf.mxu0  ;;  %v17701_v56 = vcombine.high %v11632_v63, %v11636_v48  ;;  %v17700_v62 = vcombine.low %v11632_v63, %v11636_v48 }
 0x6fd   :  { %v11289_v39 = vpop.f32.mrf.mxu0 }
 0x6fe   :  { %14832 = vmatpush1.bf16.msra.mxu0 %v17620_v23  ;;  %v17708_v23 = vcombine.low %v11640_v22, %v11644_v7 }
 0x6ff   :  { %14833 = vmatprep.subr.bf16.mxu0 %v17613_v60  ;;  %v11030_v60 = vadd.f32 %v19087_v18, %v1754_v47  ;;  %v11077_v18 = vadd.f32 %v19101_v28, %v11034_v15  ;;  %v11291_v7 = vpop.f32.mrf.mxu0  ;;  %v11608_v47 = vld [vmem:[#allocation8 + $0x248] sm:$0xff] }
 0x700   :  { %v11600_v15 = vld [vmem:[#allocation8 + $0x208] sm:$0xff] }
 0x701   :  { %v11073_v24 = vadd.f32 %v19089_v50, %v11030_v60  ;;  %v11293_v63 = vpop.f32.mrf.mxu0 }
 0x702   :  { %14834 = vmatpush1.bf16.msra.mxu0 %v17612_v36  ;;  %v11624_v36 = vld [vmem:[#allocation8 + $0x2c8] sm:$0xff] }
 0x703   :  { %14835 = vmatprep.subr.bf16.mxu0 %v17605_v53  ;;  %v11628_v53 = vld [vmem:[#allocation8 + $0x2e8] sm:$0xff]  ;;  %v11116_v22 = vadd.f32 %v19107_v57, %v11073_v24 }
 0x704   :  { %v17693_v29 = vcombine.high %v11624_v36, %v11628_v53 }
 0x706   :  { %14836 = vmatpush1.bf16.msra.mxu0 %v17604_v45  ;;  %v11036_v45 = vadd.f32 %v19103_v26, %v1758_v46  ;;  %v11120_v26 = vadd.f32 %v19115_v49, %v11077_v18  ;;  %v17692_v46 = vcombine.low %v11624_v36, %v11628_v53 }
 0x707   :  { %14837 = vmatprep.subr.bf16.mxu0 %v17725_v2  ;;  %v11332_v2 = vpop.f32.mrf.mxu1 }
 0x708   :  { %v11079_v59 = vadd.f32 %v19105_v27, %v11036_v45  ;;  %v11163_v57 = vadd.f32 %v19117_v54, %v11120_v26  ;;  %v11844_v26 = vld [vmem:[#allocation8 + $0x9a8] sm:$0xff] }
 0x709   :  { %v11334_v44 = vpop.f32.mrf.mxu1 }
 0x70a   :  { %14838 = vmatpush2.bf16.msra.mxu0 %v17724_v12  ;;  %v11118_v12 = vadd.f32 %v19111_v34, %v11075_v20  ;;  %v11122_v28 = vadd.f32 %v19119_v3, %v11079_v59  ;;  %v11612_v34 = vld [vmem:[#allocation8 + $0x268] sm:$0xff]  ;;  %v11206_v3 = vadd.f32 %v19133_v40, %v11163_v57 }
 0x70b   :  { %14839 = vmatprep.subr.bf16.mxu0 %v17717_v38  ;;  %v11616_v38 = vld [vmem:[#allocation8 + $0x288] sm:$0xff]  ;;  %v11336_v48 = vpop.f32.mrf.mxu1  ;;  %v17677_v60 = vcombine.high %v11608_v47, %v11612_v34 }
 0x70c   :  { %v17685_v50 = vcombine.high %v11616_v38, %v11620_v41  ;;  %v17684_v49 = vcombine.low %v11616_v38, %v11620_v41  ;;  %v11249_v45 = vadd.f32 %v19135_v43, %v11206_v3  ;;  %v11840_v59 = vld [vmem:[#allocation8 + $0x988] sm:$0xff] }
 0x70d   :  { %v11828_v3 = vld [vmem:[#allocation8 + $0x928] sm:$0xff] }
 0x70e   :  { %14840 = vmatpush2.bf16.msra.mxu0 %v17716_v52  ;;  %v11161_v52 = vadd.f32 %v19113_v25, %v11118_v12  ;;  %v11165_v25 = vadd.f32 %v19121_v13, %v11122_v28  ;;  %v11848_v13 = vld [vmem:[#allocation8 + $0x9c8] sm:$0xff]  ;;  %v11292_v12 = vadd.f32 %v11291_v7, %v11249_v45 }
 0x70f   :  { %14841 = vmatprep.subr.bf16.mxu0 %v17709_v9  ;;  %v11159_v9 = vadd.f32 %v19109_v31, %v11116_v22  ;;  %v11604_v31 = vld [vmem:[#allocation8 + $0x228] sm:$0xff] }
 0x710   :  { %v11204_v27 = vadd.f32 %v19127_v4, %v11161_v52  ;;  %v11208_v54 = vadd.f32 %v11207_v17, %v11165_v25  ;;  %v17676_v4 = vcombine.low %v11608_v47, %v11612_v34  ;;  %v11832_v34 = vld [vmem:[#allocation8 + $0x948] sm:$0xff] }
 0x711   :  { %v11202_v16 = vadd.f32 %v19123_v37, %v11159_v9  ;;  %v17669_v37 = vcombine.high %v11600_v15, %v11604_v31  ;;  %v11836_v9 = vld [vmem:[#allocation8 + $0x968] sm:$0xff] }
 0x712   :  { %14842 = vmatpush2.bf16.msra.mxu0 %v17708_v23  ;;  %v11373_v23 = vpop.f32.mrf.mxu0  ;;  %v11247_v36 = vadd.f32 %v19129_v1, %v11204_v27  ;;  %v11251_v18 = vadd.f32 %v19141_v5, %v11208_v54  ;;  %v17668_v1 = vcombine.low %v11600_v15, %v11604_v31  ;;  %v17909_v5 = vcombine.high %v11840_v59, %v11844_v26  ;;  %v11824_v25 = vld [vmem:[#allocation8 + $0x908] sm:$0xff] }
 0x713   :  { %14843 = vmatprep.subr.bf16.mxu0 %v17701_v56  ;;  %v11416_v56 = vpop.f32.mrf.mxu1  ;;  %v11245_v53 = vadd.f32 %v19125_v14, %v11202_v16  ;;  %v17901_v16 = vcombine.high %v11832_v34, %v11836_v9 }
 0x714   :  { %v11375_v20 = vpop.f32.mrf.mxu0  ;;  %v11294_v41 = vadd.f32 %v11293_v63, %v11251_v18 }
 0x715   :  { %v11418_v24 = vpop.f32.mrf.mxu1  ;;  %v11288_v40 = vadd.f32 %v19143_v58, %v11245_v53  ;;  %v17900_v53 = vcombine.low %v11832_v34, %v11836_v9 }
 0x716   :  { %14844 = vmatpush2.bf16.msra.mxu0 %v17700_v62  ;;  %v11290_v62 = vadd.f32 %v11289_v39, %v11247_v36  ;;  %v11377_v17 = vpop.f32.mrf.mxu0  ;;  %v11335_v39 = vadd.f32 %v11334_v44, %v11292_v12  ;;  %v11337_v7 = vadd.f32 %v11336_v48, %v11294_v41  ;;  %v17892_v12 = vcombine.low %v11824_v25, %v11828_v3  ;;  %v11712_v41 = vld [vmem:[#allocation8 + $0x588] sm:$0xff] }
 0x717   :  { %14845 = vmatprep.subr.bf16.mxu0 %v17693_v29  ;;  %v11852_v29 = vld [vmem:[#allocation8 + $0x9e8] sm:$0xff]  ;;  %v11420_v22 = vpop.f32.mrf.mxu1  ;;  %v11331_v43 = vadd.f32 %v19146_v0, %v11288_v40  ;;  %v17908_v0 = vcombine.low %v11840_v59, %v11844_v26 }
 0x718   :  { %v17917_v38 = vcombine.high %v11848_v13, %v11852_v29  ;;  %v11333_v14 = vadd.f32 %v11332_v2, %v11290_v62  ;;  %v11379_v52 = vpop.f32.mrf.mxu0  ;;  %v11378_v28 = vadd.f32 %v11377_v17, %v11335_v39  ;;  %v11808_v26 = vld [vmem:[#allocation8 + $0x888] sm:$0xff] }
 0x719   :  { %v11374_v58 = vadd.f32 %v11373_v23, %v11331_v43  ;;  %v11422_v47 = vpop.f32.mrf.mxu1  ;;  %v11380_v57 = vadd.f32 %v11379_v52, %v11337_v7  ;;  %v11812_v43 = vld [vmem:[#allocation8 + $0x8a8] sm:$0xff] }
 0x71a   :  { %14846 = vmatpush2.bf16.msra.mxu0 %v17692_v46  ;;  %v11376_v46 = vadd.f32 %v11375_v20, %v11333_v14  ;;  %v11421_v23 = vadd.f32 %v11420_v22, %v11378_v28  ;;  %v11716_v22 = vld [vmem:[#allocation8 + $0x5a8] sm:$0xff]  ;;  %v17877_v52 = vcombine.high %v11808_v26, %v11812_v43  ;;  %v17876_v9 = vcombine.low %v11808_v26, %v11812_v43 }
 0x71b   :  { %14847 = vmatprep.subr.bf16.mxu0 %v17685_v50  ;;  %v17916_v50 = vcombine.low %v11848_v13, %v11852_v29  ;;  %v11417_v44 = vadd.f32 %v11416_v56, %v11374_v58  ;;  %v11423_v36 = vadd.f32 %v11422_v47, %v11380_v57  ;;  %v11820_v13 = vld [vmem:[#allocation8 + $0x8e8] sm:$0xff]  ;;  %v17781_v58 = vcombine.high %v11712_v41, %v11716_v22 }
 0x71c   :  { %v11419_v63 = vadd.f32 %v11418_v24, %v11376_v46  ;;  %v11816_v24 = vld [vmem:[#allocation8 + $0x8c8] sm:$0xff]  ;;  %v17780_v34 = vcombine.low %v11712_v41, %v11716_v22 }
 0x71d   :  { %v17885_v17 = vcombine.high %v11816_v24, %v11820_v13  ;;  %v11708_v7 = vld [vmem:[#allocation8 + $0x568] sm:$0xff] }
 0x71e   :  { %14848 = vmatpush2.bf16.msra.mxu0 %v17684_v49  ;;  %v11800_v28 = vld [vmem:[#allocation8 + $0x848] sm:$0xff] }
 0x71f   :  { %14849 = vmatprep.subr.bf16.mxu0 %v17677_v60  ;;  %v11804_v47 = vld [vmem:[#allocation8 + $0x868] sm:$0xff] }
 0x720   :  { %v11696_v57 = vld [vmem:[#allocation8 + $0x508] sm:$0xff] }
 0x721   :  { %v11892_v41 = vld [vmem:[#allocation8 + $0xb28] sm:$0xff] }
 0x722   :  { %14850 = vmatpush2.bf16.msra.mxu0 %v17676_v4 }
 0x723   :  { %14851 = vmatprep.subr.bf16.mxu0 %v17669_v37  ;;  %v17893_v37 = vcombine.high %v11824_v25, %v11828_v3 }
 0x726   :  { %14852 = vmatpush2.bf16.msra.mxu0 %v17668_v1 }
 0x727   :  { %14907 = vmatprep.subr.bf16.mxu0 %v17917_v38 }
 0x729   :  { %v11459_v2 = vpop.f32.mrf.mxu0  ;;  %14854 = vmatmul.mubr.bf16.vlgmr.msra.gmra.mxu0 %v19388_v11  ;;  %v11502_v27 = vpop.f32.mrf.mxu1 }
 0x72a   :  { %14908 = vmatpush1.bf16.msra.mxu0 %v17916_v50  ;;  %14939 = vmatprep.mubr.bf16.mxu0 %v19076_v6  ;;  %v11460_v15 = vadd.f32 %v11459_v2, %v11417_v44  ;;  %v17884_v50 = vcombine.low %v11816_v24, %v11820_v13  ;;  %v11796_v44 = vld [vmem:[#allocation8 + $0x828] sm:$0xff] }
 0x72b   :  { %v11461_v49 = vpop.f32.mrf.mxu0  ;;  %14909 = vmatprep.subr.bf16.mxu0 %v17909_v5  ;;  %v11504_v60 = vpop.f32.mrf.mxu1  ;;  %v11704_v5 = vld [vmem:[#allocation8 + $0x548] sm:$0xff] }
 0x72c   :  { %v11462_v48 = vadd.f32 %v11461_v49, %v11419_v63  ;;  %v11503_v29 = vadd.f32 %v11502_v27, %v11460_v15  ;;  %v17773_v2 = vcombine.high %v11704_v5, %v11708_v7  ;;  %v17869_v63 = vcombine.high %v11800_v28, %v11804_v47  ;;  %v11700_v27 = vld [vmem:[#allocation8 + $0x528] sm:$0xff] }
 0x72d   :  { %v11463_v31 = vpop.f32.mrf.mxu0  ;;  %v11506_v4 = vpop.f32.mrf.mxu1  ;;  %v17772_v49 = vcombine.low %v11704_v5, %v11708_v7  ;;  %v17765_v35 = vcombine.high %v11696_v57, %v11700_v27  ;;  %v17764_v25 = vcombine.low %v11696_v57, %v11700_v27  ;;  %v11676_v24 = vld [vmem:[#allocation8 + $0x468] sm:$0xff] }
 0x72e   :  { %v11464_v54 = vadd.f32 %v11463_v31, %v11421_v23  ;;  %14910 = vmatpush1.bf16.msra.mxu0 %v17908_v0  ;;  %v11505_v45 = vadd.f32 %v11504_v60, %v11462_v48  ;;  %v11517_v59 = vmax.f32 %v11503_v29, 0.0  ;;  %v11792_v0 = vld [vmem:[#allocation8 + $0x808] sm:$0xff] }
 0x72f   :  { %v11465_v20 = vpop.f32.mrf.mxu0  ;;  %14911 = vmatprep.subr.bf16.mxu0 %v17901_v16  ;;  %v11508_v40 = vpop.f32.mrf.mxu1  ;;  %v17868_v16 = vcombine.low %v11800_v28, %v11804_v47  ;;  %v17861_v51 = vcombine.high %v11792_v0, %v11796_v44  ;;  %v11692_v23 = vld [vmem:[#allocation8 + $0x4e8] sm:$0xff]  ;;  %v17860_v3 = vcombine.low %v11792_v0, %v11796_v44 }
 0x730   :  { %v11507_v56 = vadd.f32 %v11506_v4, %v11464_v54  ;;  %v11466_v62 = vadd.f32 %v11465_v20, %v11423_v36  ;;  %v11518_v38 = vmax.f32 %v11505_v45, 0.0  ;;  %v11912_v48 = vld [vmem:[#allocation8 + $0xbc8] sm:$0xff] }
 0x731   :  { %v11916_v60 = vld [vmem:[#allocation8 + $0xbe8] sm:$0xff] }
 0x732   :  { %v11509_v18 = vadd.f32 %v11508_v40, %v11466_v62  ;;  %14912 = vmatpush1.bf16.msra.mxu0 %v17900_v53  ;;  %v11525_v1 = vmax.f32 %v11507_v56, 0.0  ;;  %v17981_v31 = vcombine.high %v11912_v48, %v11916_v60  ;;  %v11680_v36 = vld [vmem:[#allocation8 + $0x488] sm:$0xff] }
 0x733   :  { %14913 = vmatprep.subr.bf16.mxu0 %v17893_v37  ;;  %v11684_v54 = vld [vmem:[#allocation8 + $0x4a8] sm:$0xff]  ;;  %v17980_v37 = vcombine.low %v11912_v48, %v11916_v60 }
 0x734   :  { %v11526_v14 = vmax.f32 %v11509_v18, 0.0  ;;  %v19176_v46 = vpack.c.bf16 %v11525_v1, %v11517_v59  ;;  %v11904_v4 = vld [vmem:[#allocation8 + $0xb88] sm:$0xff]  ;;  %v17749_v45 = vcombine.high %v11680_v36, %v11684_v54  ;;  %v17748_v40 = vcombine.low %v11680_v36, %v11684_v54 }
 0x735   :  { %v11908_v53 = vld [vmem:[#allocation8 + $0xba8] sm:$0xff] }
 0x736   :  { %v19174_v39 = vpack.c.bf16 %v11526_v14, %v11518_v38  ;;  %14914 = vmatpush1.bf16.msra.mxu0 %v17892_v12  ;;  %v17973_v56 = vcombine.high %v11904_v4, %v11908_v53  ;;  %v11672_v62 = vld [vmem:[#allocation8 + $0x448] sm:$0xff]  ;;  %v17972_v18 = vcombine.low %v11904_v4, %v11908_v53 }
 0x737   :  { %14915 = vmatprep.subr.bf16.mxu0 %v17885_v17  ;;  %v11896_v13 = vld [vmem:[#allocation8 + $0xb48] sm:$0xff]  ;;  %v17741_v12 = vcombine.high %v11672_v62, %v11676_v24  ;;  %v17740_v22 = vcombine.low %v11672_v62, %v11676_v24  ;;  %v11597_v62 = vld [vmem:[#allocation8 + $0x1f0] sm:$0xff] }
 0x738   :  { %14810 = vmatprep.mubr.bf16.mxu1 %v19174_v39  ;;  %v11900_v29 = vld [vmem:[#allocation8 + $0xb68] sm:$0xff] }
 0x739   :  { %14811 = vmatmul.mubr.bf16.vlgmr.msra.gmra.mxu1 %v19176_v46  ;;  %v17965_v1 = vcombine.high %v11896_v13, %v11900_v29  ;;  %v11664_v17 = vld [vmem:[#allocation8 + $0x408] sm:$0xff]  ;;  %v17964_v59 = vcombine.low %v11896_v13, %v11900_v29 }
 0x73a   :  { %14865 = vmatpush1.bf16.msra.mxu1 %v17788_v30  ;;  %14896 = vmatprep.mubr.bf16.mxu1 %v19045_v55  ;;  %v11688_v30 = vld [vmem:[#allocation8 + $0x4c8] sm:$0xff] }
 0x73b   :  { %14916 = vmatpush1.bf16.msra.mxu0 %v17884_v50  ;;  %14866 = vmatprep.subr.bf16.mxu1 %v17781_v58  ;;  %v17757_v15 = vcombine.high %v11688_v30, %v11692_v23  ;;  %v17756_v20 = vcombine.low %v11688_v30, %v11692_v23  ;;  %v11668_v38 = vld [vmem:[#allocation8 + $0x428] sm:$0xff] }
 0x73c   :  { %14917 = vmatprep.subr.bf16.mxu0 %v17877_v52  ;;  %v11888_v14 = vld [vmem:[#allocation8 + $0xb08] sm:$0xff]  ;;  %v17733_v26 = vcombine.high %v11664_v17, %v11668_v38  ;;  %v17732_v7 = vcombine.low %v11664_v17, %v11668_v38  ;;  %v11589_v17 = vld [vmem:[#allocation8 + $0x1b0] sm:$0xff] }
 0x73d   :  { %v17957_v43 = vcombine.high %v11888_v14, %v11892_v41  ;;  %v11784_v50 = vld [vmem:[#allocation8 + $0x7c8] sm:$0xff]  ;;  %v17956_v28 = vcombine.low %v11888_v14, %v11892_v41 }
 0x73e   :  { %14867 = vmatpush1.bf16.msra.mxu1 %v17780_v34  ;;  %v11788_v58 = vld [vmem:[#allocation8 + $0x7e8] sm:$0xff] }
 0x73f   :  { %14918 = vmatpush1.bf16.msra.mxu0 %v17876_v9  ;;  %14868 = vmatprep.subr.bf16.mxu1 %v17773_v2  ;;  %v11880_v52 = vld [vmem:[#allocation8 + $0xac8] sm:$0xff]  ;;  %v17853_v47 = vcombine.high %v11784_v50, %v11788_v58  ;;  %v17852_v27 = vcombine.low %v11784_v50, %v11788_v58  ;;  %v11581_v50 = vld [vmem:[#allocation8 + $0x170] sm:$0xff] }
 0x740   :  { %14919 = vmatprep.subr.bf16.mxu0 %v17869_v63  ;;  %v11884_v5 = vld [vmem:[#allocation8 + $0xae8] sm:$0xff] }
 0x741   :  { %v17949_v34 = vcombine.high %v11880_v52, %v11884_v5  ;;  %v11776_v9 = vld [vmem:[#allocation8 + $0x788] sm:$0xff]  ;;  %v17948_v0 = vcombine.low %v11880_v52, %v11884_v5 }
 0x742   :  { %14869 = vmatpush1.bf16.msra.mxu1 %v17772_v49  ;;  %v11780_v2 = vld [vmem:[#allocation8 + $0x7a8] sm:$0xff] }
 0x743   :  { %14920 = vmatpush1.bf16.msra.mxu0 %v17868_v16  ;;  %14870 = vmatprep.subr.bf16.mxu1 %v17765_v35  ;;  %v11872_v63 = vld [vmem:[#allocation8 + $0xa88] sm:$0xff]  ;;  %v17845_v44 = vcombine.high %v11776_v9, %v11780_v2  ;;  %v17844_v23 = vcombine.low %v11776_v9, %v11780_v2  ;;  %v11573_v9 = vld [vmem:[#allocation8 + $0x130] sm:$0xff] }
 0x744   :  { %14921 = vmatprep.subr.bf16.mxu0 %v17861_v51  ;;  %v11876_v57 = vld [vmem:[#allocation8 + $0xaa8] sm:$0xff] }
 0x745   :  { %v17941_v49 = vcombine.high %v11872_v63, %v11876_v57  ;;  %v11768_v16 = vld [vmem:[#allocation8 + $0x748] sm:$0xff]  ;;  %v17940_v48 = vcombine.low %v11872_v63, %v11876_v57 }
 0x746   :  { %14871 = vmatpush1.bf16.msra.mxu1 %v17764_v25  ;;  %v11772_v35 = vld [vmem:[#allocation8 + $0x768] sm:$0xff] }
 0x747   :  { %14922 = vmatpush1.bf16.msra.mxu0 %v17860_v3  ;;  %14872 = vmatprep.subr.bf16.mxu1 %v17757_v15  ;;  %v11864_v51 = vld [vmem:[#allocation8 + $0xa48] sm:$0xff]  ;;  %v17837_v60 = vcombine.high %v11768_v16, %v11772_v35  ;;  %v17836_v54 = vcombine.low %v11768_v16, %v11772_v35  ;;  %v11565_v16 = vld [vmem:[#allocation8 + $0xf0] sm:$0xff] }
 0x748   :  { %14923 = vmatprep.subr.bf16.mxu0 %v17981_v31  ;;  %v11868_v30 = vld [vmem:[#allocation8 + $0xa68] sm:$0xff] }
 0x749   :  { %v17933_v25 = vcombine.high %v11864_v51, %v11868_v30  ;;  %v11760_v3 = vld [vmem:[#allocation8 + $0x708] sm:$0xff]  ;;  %v17932_v4 = vcombine.low %v11864_v51, %v11868_v30 }
 0x74a   :  { %14873 = vmatpush1.bf16.msra.mxu1 %v17756_v20  ;;  %v11764_v15 = vld [vmem:[#allocation8 + $0x728] sm:$0xff] }
 0x74b   :  { %14924 = vmatpush2.bf16.msra.mxu0 %v17980_v37  ;;  %14874 = vmatprep.subr.bf16.mxu1 %v17749_v45  ;;  %v11856_v31 = vld [vmem:[#allocation8 + $0xa08] sm:$0xff]  ;;  %v17829_v53 = vcombine.high %v11760_v3, %v11764_v15  ;;  %v17828_v24 = vcombine.low %v11760_v3, %v11764_v15  ;;  %v11557_v3 = vld [vmem:[#allocation8 + $0xb0] sm:$0xff] }
 0x74c   :  { %14925 = vmatprep.subr.bf16.mxu0 %v17973_v56  ;;  %v11860_v36 = vld [vmem:[#allocation8 + $0xa28] sm:$0xff]  ;;  %v11593_v56 = vld [vmem:[#allocation8 + $0x1d0] sm:$0xff] }
 0x74d   :  { %v17925_v20 = vcombine.high %v11856_v31, %v11860_v36  ;;  %v11752_v37 = vld [vmem:[#allocation8 + $0x6c8] sm:$0xff]  ;;  %v17924_v13 = vcombine.low %v11856_v31, %v11860_v36  ;;  %v17662_v14 = vcombine.low %v11593_v56, %v11597_v62 }
 0x74e   :  { %14875 = vmatpush1.bf16.msra.mxu1 %v17748_v40  ;;  %v11756_v45 = vld [vmem:[#allocation8 + $0x6e8] sm:$0xff]  ;;  %v17663_v40 = vcombine.high %v11593_v56, %v11597_v62 }
 0x74f   :  { %14926 = vmatpush2.bf16.msra.mxu0 %v17972_v18  ;;  %14876 = vmatprep.subr.bf16.mxu1 %v17741_v12  ;;  %v17821_v29 = vcombine.high %v11752_v37, %v11756_v45  ;;  %v11744_v18 = vld [vmem:[#allocation8 + $0x688] sm:$0xff]  ;;  %v17820_v38 = vcombine.low %v11752_v37, %v11756_v45  ;;  %v11549_v37 = vld [vmem:[#allocation8 + $0x70] sm:$0xff] }
 0x750   :  { %14927 = vmatprep.subr.bf16.mxu0 %v17965_v1  ;;  %v11748_v12 = vld [vmem:[#allocation8 + $0x6a8] sm:$0xff]  ;;  %v11585_v1 = vld [vmem:[#allocation8 + $0x190] sm:$0xff] }
 0x751   :  { %v17813_v41 = vcombine.high %v11744_v18, %v11748_v12  ;;  %v17812_v58 = vcombine.low %v11744_v18, %v11748_v12  ;;  %v17654_v52 = vcombine.low %v11585_v1, %v11589_v17  ;;  %v11541_v18 = vld [vmem:[#allocation8 + $0x30] sm:$0xff] }
 0x752   :  { %14877 = vmatpush1.bf16.msra.mxu1 %v17740_v22  ;;  %v17655_v22 = vcombine.high %v11585_v1, %v11589_v17 }
 0x753   :  { %14928 = vmatpush2.bf16.msra.mxu0 %v17964_v59  ;;  %14878 = vmatprep.subr.bf16.mxu1 %v17733_v26  ;;  %v11736_v59 = vld [vmem:[#allocation8 + $0x648] sm:$0xff] }
 0x754   :  { %14929 = vmatprep.subr.bf16.mxu0 %v17957_v43  ;;  %v11740_v26 = vld [vmem:[#allocation8 + $0x668] sm:$0xff]  ;;  %v11577_v43 = vld [vmem:[#allocation8 + $0x150] sm:$0xff] }
 0x755   :  { %v17805_v5 = vcombine.high %v11736_v59, %v11740_v26  ;;  %v17804_v2 = vcombine.low %v11736_v59, %v11740_v26  ;;  %v17646_v63 = vcombine.low %v11577_v43, %v11581_v50  ;;  %v11661_v59 = vld [vmem:[#allocation8 + $0x3f0] sm:$0xff] }
 0x756   :  { %14879 = vmatpush1.bf16.msra.mxu1 %v17732_v7  ;;  %v17647_v7 = vcombine.high %v11577_v43, %v11581_v50 }
 0x757   :  { %14930 = vmatpush2.bf16.msra.mxu0 %v17956_v28  ;;  %14880 = vmatprep.subr.bf16.mxu1 %v17853_v47  ;;  %v11728_v28 = vld [vmem:[#allocation8 + $0x608] sm:$0xff] }
 0x758   :  { %14931 = vmatprep.subr.bf16.mxu0 %v17949_v34  ;;  %v11732_v47 = vld [vmem:[#allocation8 + $0x628] sm:$0xff]  ;;  %v11569_v34 = vld [vmem:[#allocation8 + $0x110] sm:$0xff] }
 0x759   :  { %v17797_v57 = vcombine.high %v11728_v28, %v11732_v47  ;;  %v17796_v35 = vcombine.low %v11728_v28, %v11732_v47  ;;  %v17638_v51 = vcombine.low %v11569_v34, %v11573_v9  ;;  %v11653_v28 = vld [vmem:[#allocation8 + $0x3b0] sm:$0xff] }
 0x75a   :  { %14881 = vmatpush2.bf16.msra.mxu1 %v17852_v27  ;;  %v17639_v27 = vcombine.high %v11569_v34, %v11573_v9 }
 0x75b   :  { %14932 = vmatpush2.bf16.msra.mxu0 %v17948_v0  ;;  %14882 = vmatprep.subr.bf16.mxu1 %v17845_v44  ;;  %v11976_v0 = vld [vmem:[#allocation8 + $0xdc8] sm:$0xff] }
 0x75c   :  { %14933 = vmatprep.subr.bf16.mxu0 %v17941_v49  ;;  %v11980_v44 = vld [vmem:[#allocation8 + $0xde8] sm:$0xff]  ;;  %v11561_v49 = vld [vmem:[#allocation8 + $0xd0] sm:$0xff] }
 0x75d   :  { %v18045_v30 = vcombine.high %v11976_v0, %v11980_v44  ;;  %v18044_v15 = vcombine.low %v11976_v0, %v11980_v44  ;;  %v17630_v31 = vcombine.low %v11561_v49, %v11565_v16  ;;  %v11645_v0 = vld [vmem:[#allocation8 + $0x370] sm:$0xff] }
 0x75e   :  { %14883 = vmatpush2.bf16.msra.mxu1 %v17844_v23  ;;  %v17631_v23 = vcombine.high %v11561_v49, %v11565_v16 }
 0x75f   :  { %14934 = vmatpush2.bf16.msra.mxu0 %v17940_v48  ;;  %14884 = vmatprep.subr.bf16.mxu1 %v17837_v60  ;;  %v11968_v48 = vld [vmem:[#allocation8 + $0xd88] sm:$0xff] }
 0x760   :  { %14935 = vmatprep.subr.bf16.mxu0 %v17933_v25  ;;  %v11972_v60 = vld [vmem:[#allocation8 + $0xda8] sm:$0xff]  ;;  %v11553_v25 = vld [vmem:[#allocation8 + $0x90] sm:$0xff] }
 0x761   :  { %v18037_v36 = vcombine.high %v11968_v48, %v11972_v60  ;;  %v18036_v45 = vcombine.low %v11968_v48, %v11972_v60  ;;  %v17622_v56 = vcombine.low %v11553_v25, %v11557_v3  ;;  %v11637_v48 = vld [vmem:[#allocation8 + $0x330] sm:$0xff] }
 0x762   :  { %14885 = vmatpush2.bf16.msra.mxu1 %v17836_v54  ;;  %v17623_v54 = vcombine.high %v11553_v25, %v11557_v3 }
 0x763   :  { %14936 = vmatpush2.bf16.msra.mxu0 %v17932_v4  ;;  %14886 = vmatprep.subr.bf16.mxu1 %v17829_v53  ;;  %v11960_v4 = vld [vmem:[#allocation8 + $0xd48] sm:$0xff] }
 0x764   :  { %14937 = vmatprep.subr.bf16.mxu0 %v17925_v20  ;;  %v11964_v53 = vld [vmem:[#allocation8 + $0xd68] sm:$0xff]  ;;  %v11545_v20 = vld [vmem:[#allocation8 + $0x50] sm:$0xff] }
 0x765   :  { %v18029_v62 = vcombine.high %v11960_v4, %v11964_v53  ;;  %v18028_v12 = vcombine.low %v11960_v4, %v11964_v53  ;;  %v17614_v1 = vcombine.low %v11545_v20, %v11549_v37  ;;  %v11629_v4 = vld [vmem:[#allocation8 + $0x2f0] sm:$0xff] }
 0x766   :  { %14887 = vmatpush2.bf16.msra.mxu1 %v17828_v24  ;;  %v17615_v24 = vcombine.high %v11545_v20, %v11549_v37 }
 0x767   :  { %14938 = vmatpush2.bf16.msra.mxu0 %v17924_v13  ;;  %14888 = vmatprep.subr.bf16.mxu1 %v17821_v29  ;;  %v11952_v13 = vld [vmem:[#allocation8 + $0xd08] sm:$0xff] }
 0x768   :  { %14993 = vmatprep.subr.bf16.mxu0 %v17663_v40  ;;  %v11956_v29 = vld [vmem:[#allocation8 + $0xd28] sm:$0xff]  ;;  %v11537_v40 = vld [vmem:[#allocation8 + $0x10] sm:$0xff] }
 0x769   :  { %v18021_v17 = vcombine.high %v11952_v13, %v11956_v29  ;;  %v18020_v26 = vcombine.low %v11952_v13, %v11956_v29  ;;  %v17606_v43 = vcombine.low %v11537_v40, %v11541_v18  ;;  %v11621_v13 = vld [vmem:[#allocation8 + $0x2b0] sm:$0xff] }
 0x76a   :  { %14889 = vmatpush2.bf16.msra.mxu1 %v17820_v38  ;;  %14940 = vmatmul.mubr.bf16.vlgmr.msra.gmra.mxu0 %v18980_v21  ;;  %v17607_v38 = vcombine.high %v11537_v40, %v11541_v18 }
 0x76b   :  { %14994 = vmatpush1.bf16.msra.mxu0 %v17662_v14  ;;  %15025 = vmatprep.mubr.bf16.mxu0 %v19042_v33  ;;  %v11944_v14 = vld [vmem:[#allocation8 + $0xcc8] sm:$0xff] }
 0x76c   :  { %14890 = vmatprep.subr.bf16.mxu1 %v17813_v41  ;;  %14995 = vmatprep.subr.bf16.mxu0 %v17655_v22  ;;  %v11948_v41 = vld [vmem:[#allocation8 + $0xce8] sm:$0xff]  ;;  %v11657_v22 = vld [vmem:[#allocation8 + $0x3d0] sm:$0xff] }
 0x76d   :  { %v18013_v50 = vcombine.high %v11944_v14, %v11948_v41  ;;  %v18012_v47 = vcombine.low %v11944_v14, %v11948_v41  ;;  %v17726_v34 = vcombine.low %v11657_v22, %v11661_v59  ;;  %v11613_v14 = vld [vmem:[#allocation8 + $0x270] sm:$0xff] }
 0x76e   :  { %14891 = vmatpush2.bf16.msra.mxu1 %v17812_v58  ;;  %v17727_v58 = vcombine.high %v11657_v22, %v11661_v59 }
 0x76f   :  { %14996 = vmatpush1.bf16.msra.mxu0 %v17654_v52  ;;  %14892 = vmatprep.subr.bf16.mxu1 %v17805_v5  ;;  %v11936_v52 = vld [vmem:[#allocation8 + $0xc88] sm:$0xff] }
 0x770   :  { %14997 = vmatprep.subr.bf16.mxu0 %v17647_v7  ;;  %v11940_v5 = vld [vmem:[#allocation8 + $0xca8] sm:$0xff]  ;;  %v11649_v7 = vld [vmem:[#allocation8 + $0x390] sm:$0xff] }
 0x771   :  { %v18005_v9 = vcombine.high %v11936_v52, %v11940_v5  ;;  %v18004_v44 = vcombine.low %v11936_v52, %v11940_v5  ;;  %v17718_v49 = vcombine.low %v11649_v7, %v11653_v28  ;;  %v11605_v52 = vld [vmem:[#allocation8 + $0x230] sm:$0xff] }
 0x772   :  { %14893 = vmatpush2.bf16.msra.mxu1 %v17804_v2  ;;  %v17719_v2 = vcombine.high %v11649_v7, %v11653_v28 }
 0x773   :  { %14998 = vmatpush1.bf16.msra.mxu0 %v17646_v63  ;;  %14894 = vmatprep.subr.bf16.mxu1 %v17797_v57  ;;  %v11928_v63 = vld [vmem:[#allocation8 + $0xc48] sm:$0xff] }
 0x774   :  { %14999 = vmatprep.subr.bf16.mxu0 %v17639_v27  ;;  %v11932_v57 = vld [vmem:[#allocation8 + $0xc68] sm:$0xff]  ;;  %v11641_v27 = vld [vmem:[#allocation8 + $0x350] sm:$0xff] }
 0x775   :  { %v17997_v16 = vcombine.high %v11928_v63, %v11932_v57  ;;  %v17996_v60 = vcombine.low %v11928_v63, %v11932_v57  ;;  %v17710_v25 = vcombine.low %v11641_v27, %v11645_v0  ;;  %v11853_v63 = vld [vmem:[#allocation8 + $0x9f0] sm:$0xff] }
 0x776   :  { %14895 = vmatpush2.bf16.msra.mxu1 %v17796_v35  ;;  %v17711_v35 = vcombine.high %v11641_v27, %v11645_v0 }
 0x777   :  { %15000 = vmatpush1.bf16.msra.mxu0 %v17638_v51  ;;  %14950 = vmatprep.subr.bf16.mxu1 %v18045_v30  ;;  %v11920_v51 = vld [vmem:[#allocation8 + $0xc08] sm:$0xff] }
 0x778   :  { %15001 = vmatprep.subr.bf16.mxu0 %v17631_v23  ;;  %v11924_v30 = vld [vmem:[#allocation8 + $0xc28] sm:$0xff]  ;;  %v11633_v23 = vld [vmem:[#allocation8 + $0x310] sm:$0xff] }
 0x779   :  { %14897 = vmatmul.mubr.bf16.vlgmr.msra.gmra.mxu1 %v19389_v32  ;;  %v17989_v3 = vcombine.high %v11920_v51, %v11924_v30  ;;  %v17988_v53 = vcombine.low %v11920_v51, %v11924_v30  ;;  %v17702_v20 = vcombine.low %v11633_v23, %v11637_v48  ;;  %v11845_v51 = vld [vmem:[#allocation8 + $0x9b0] sm:$0xff] }
 0x77a   :  { %14951 = vmatpush1.bf16.msra.mxu1 %v18044_v15  ;;  %14982 = vmatprep.mubr.bf16.mxu1 %v19174_v39  ;;  %v17703_v15 = vcombine.high %v11633_v23, %v11637_v48 }
 0x77b   :  { %15002 = vmatpush1.bf16.msra.mxu0 %v17630_v31  ;;  %14952 = vmatprep.subr.bf16.mxu1 %v18037_v36  ;;  %v12040_v31 = vld [vmem:[#allocation8 + $0xfc8] sm:$0xff] }
 0x77c   :  { %15003 = vmatprep.subr.bf16.mxu0 %v17623_v54  ;;  %v12044_v36 = vld [vmem:[#allocation8 + $0xfe8] sm:$0xff]  ;;  %v11625_v54 = vld [vmem:[#allocation8 + $0x2d0] sm:$0xff] }
 0x77d   :  { %v18109_v37 = vcombine.high %v12040_v31, %v12044_v36  ;;  %v18108_v29 = vcombine.low %v12040_v31, %v12044_v36  ;;  %v17694_v40 = vcombine.low %v11625_v54, %v11629_v4  ;;  %v11837_v31 = vld [vmem:[#allocation8 + $0x970] sm:$0xff] }
 0x77e   :  { %14953 = vmatpush1.bf16.msra.mxu1 %v18036_v45  ;;  %v17695_v45 = vcombine.high %v11625_v54, %v11629_v4 }
 0x77f   :  { %15004 = vmatpush1.bf16.msra.mxu0 %v17622_v56  ;;  %14954 = vmatprep.subr.bf16.mxu1 %v18029_v62  ;;  %v12032_v56 = vld [vmem:[#allocation8 + $0xf88] sm:$0xff] }
 0x780   :  { %15005 = vmatprep.subr.bf16.mxu0 %v17615_v24  ;;  %v12036_v62 = vld [vmem:[#allocation8 + $0xfa8] sm:$0xff]  ;;  %v11617_v24 = vld [vmem:[#allocation8 + $0x290] sm:$0xff] }
 0x781   :  { %v18101_v18 = vcombine.high %v12032_v56, %v12036_v62  ;;  %v18100_v41 = vcombine.low %v12032_v56, %v12036_v62  ;;  %v17686_v22 = vcombine.low %v11617_v24, %v11621_v13  ;;  %v11829_v56 = vld [vmem:[#allocation8 + $0x930] sm:$0xff] }
 0x782   :  { %14955 = vmatpush1.bf16.msra.mxu1 %v18028_v12  ;;  %v17687_v12 = vcombine.high %v11617_v24, %v11621_v13 }
 0x783   :  { %15006 = vmatpush1.bf16.msra.mxu0 %v17614_v1  ;;  %14956 = vmatprep.subr.bf16.mxu1 %v18021_v17  ;;  %v12024_v1 = vld [vmem:[#allocation8 + $0xf48] sm:$0xff] }
 0x784   :  { %15007 = vmatprep.subr.bf16.mxu0 %v17607_v38  ;;  %v12028_v17 = vld [vmem:[#allocation8 + $0xf68] sm:$0xff]  ;;  %v11609_v38 = vld [vmem:[#allocation8 + $0x250] sm:$0xff] }
 0x785   :  { %v18093_v59 = vcombine.high %v12024_v1, %v12028_v17  ;;  %v18092_v5 = vcombine.low %v12024_v1, %v12028_v17  ;;  %v17678_v7 = vcombine.low %v11609_v38, %v11613_v14  ;;  %v11821_v1 = vld [vmem:[#allocation8 + $0x8f0] sm:$0xff] }
 0x786   :  { %14957 = vmatpush1.bf16.msra.mxu1 %v18020_v26  ;;  %v17679_v26 = vcombine.high %v11609_v38, %v11613_v14 }
 0x787   :  { %15008 = vmatpush1.bf16.msra.mxu0 %v17606_v43  ;;  %14958 = vmatprep.subr.bf16.mxu1 %v18013_v50  ;;  %v12016_v43 = vld [vmem:[#allocation8 + $0xf08] sm:$0xff] }
 0x788   :  { %15009 = vmatprep.subr.bf16.mxu0 %v17727_v58  ;;  %v12020_v50 = vld [vmem:[#allocation8 + $0xf28] sm:$0xff]  ;;  %v11601_v58 = vld [vmem:[#allocation8 + $0x210] sm:$0xff] }
 0x789   :  { %v18085_v28 = vcombine.high %v12016_v43, %v12020_v50  ;;  %v18084_v57 = vcombine.low %v12016_v43, %v12020_v50  ;;  %v17670_v27 = vcombine.low %v11601_v58, %v11605_v52  ;;  %v11813_v43 = vld [vmem:[#allocation8 + $0x8b0] sm:$0xff] }
 0x78a   :  { %14959 = vmatpush1.bf16.msra.mxu1 %v18012_v47  ;;  %v17671_v47 = vcombine.high %v11601_v58, %v11605_v52 }
 0x78b   :  { %15010 = vmatpush2.bf16.msra.mxu0 %v17726_v34  ;;  %14960 = vmatprep.subr.bf16.mxu1 %v18005_v9  ;;  %v12008_v34 = vld [vmem:[#allocation8 + $0xec8] sm:$0xff] }
 0x78c   :  { %15011 = vmatprep.subr.bf16.mxu0 %v17719_v2  ;;  %v12012_v9 = vld [vmem:[#allocation8 + $0xee8] sm:$0xff]  ;;  %v11849_v2 = vld [vmem:[#allocation8 + $0x9d0] sm:$0xff] }
 0x78d   :  { %v18077_v0 = vcombine.high %v12008_v34, %v12012_v9  ;;  %v18076_v30 = vcombine.low %v12008_v34, %v12012_v9  ;;  %v17918_v23 = vcombine.low %v11849_v2, %v11853_v63  ;;  %v11805_v34 = vld [vmem:[#allocation8 + $0x870] sm:$0xff] }
 0x78e   :  { %14961 = vmatpush1.bf16.msra.mxu1 %v18004_v44  ;;  %v17919_v44 = vcombine.high %v11849_v2, %v11853_v63 }
 0x78f   :  { %15012 = vmatpush2.bf16.msra.mxu0 %v17718_v49  ;;  %14962 = vmatprep.subr.bf16.mxu1 %v17997_v16  ;;  %v12000_v49 = vld [vmem:[#allocation8 + $0xe88] sm:$0xff] }
 0x790   :  { %15013 = vmatprep.subr.bf16.mxu0 %v17711_v35  ;;  %v12004_v16 = vld [vmem:[#allocation8 + $0xea8] sm:$0xff]  ;;  %v11841_v35 = vld [vmem:[#allocation8 + $0x990] sm:$0xff] }
 0x791   :  { %v18069_v48 = vcombine.high %v12000_v49, %v12004_v16  ;;  %v18068_v36 = vcombine.low %v12000_v49, %v12004_v16  ;;  %v17910_v54 = vcombine.low %v11841_v35, %v11845_v51  ;;  %v11797_v49 = vld [vmem:[#allocation8 + $0x830] sm:$0xff] }
 0x792   :  { %14963 = vmatpush1.bf16.msra.mxu1 %v17996_v60  ;;  %v17911_v60 = vcombine.high %v11841_v35, %v11845_v51 }
 0x793   :  { %15014 = vmatpush2.bf16.msra.mxu0 %v17710_v25  ;;  %14964 = vmatprep.subr.bf16.mxu1 %v17989_v3  ;;  %v11992_v25 = vld [vmem:[#allocation8 + $0xe48] sm:$0xff] }
 0x794   :  { %15015 = vmatprep.subr.bf16.mxu0 %v17703_v15  ;;  %v11996_v3 = vld [vmem:[#allocation8 + $0xe68] sm:$0xff]  ;;  %v11833_v15 = vld [vmem:[#allocation8 + $0x950] sm:$0xff] }
 0x795   :  { %v18061_v4 = vcombine.high %v11992_v25, %v11996_v3  ;;  %v18060_v62 = vcombine.low %v11992_v25, %v11996_v3  ;;  %v17902_v24 = vcombine.low %v11833_v15, %v11837_v31  ;;  %v11917_v25 = vld [vmem:[#allocation8 + $0xbf0] sm:$0xff] }
 0x796   :  { %14965 = vmatpush1.bf16.msra.mxu1 %v17988_v53  ;;  %v17903_v53 = vcombine.high %v11833_v15, %v11837_v31 }
 0x797   :  { %15016 = vmatpush2.bf16.msra.mxu0 %v17702_v20  ;;  %14966 = vmatprep.subr.bf16.mxu1 %v18109_v37  ;;  %v11984_v20 = vld [vmem:[#allocation8 + $0xe08] sm:$0xff] }
 0x798   :  { %15017 = vmatprep.subr.bf16.mxu0 %v17695_v45  ;;  %v11988_v37 = vld [vmem:[#allocation8 + $0xe28] sm:$0xff]  ;;  %v11825_v45 = vld [vmem:[#allocation8 + $0x910] sm:$0xff] }
 0x799   :  { %v18053_v13 = vcombine.high %v11984_v20, %v11988_v37  ;;  %v18052_v17 = vcombine.low %v11984_v20, %v11988_v37  ;;  %v17894_v38 = vcombine.low %v11825_v45, %v11829_v56  ;;  %v11909_v20 = vld [vmem:[#allocation8 + $0xbb0] sm:$0xff] }
 0x79a   :  { %14967 = vmatpush2.bf16.msra.mxu1 %v18108_v29  ;;  %v17895_v29 = vcombine.high %v11825_v45, %v11829_v56 }
 0x79b   :  { %15018 = vmatpush2.bf16.msra.mxu0 %v17694_v40  ;;  %14968 = vmatprep.subr.bf16.mxu1 %v18101_v18  ;;  %v11721_v40 = vld [vmem:[#allocation8 + $0x5d0] sm:$0xff] }
 0x79c   :  { %15019 = vmatprep.subr.bf16.mxu0 %v17687_v12  ;;  %v11725_v18 = vld [vmem:[#allocation8 + $0x5f0] sm:$0xff] }
 0x79d   :  { %v11817_v12 = vld [vmem:[#allocation8 + $0x8d0] sm:$0xff]  ;;  %v17791_v14 = vcombine.high %v11721_v40, %v11725_v18  ;;  %v17790_v50 = vcombine.low %v11721_v40, %v11725_v18 }
 0x79e   :  { %14969 = vmatpush2.bf16.msra.mxu1 %v18100_v41  ;;  %v17887_v41 = vcombine.high %v11817_v12, %v11821_v1  ;;  %v17886_v58 = vcombine.low %v11817_v12, %v11821_v1  ;;  %v11901_v40 = vld [vmem:[#allocation8 + $0xb70] sm:$0xff] }
 0x79f   :  { %15020 = vmatpush2.bf16.msra.mxu0 %v17686_v22  ;;  %14970 = vmatprep.subr.bf16.mxu1 %v18093_v59  ;;  %v11713_v22 = vld [vmem:[#allocation8 + $0x590] sm:$0xff] }
 0x7a0   :  { %15021 = vmatprep.subr.bf16.mxu0 %v17679_v26  ;;  %v11717_v59 = vld [vmem:[#allocation8 + $0x5b0] sm:$0xff] }
 0x7a1   :  { %v11809_v26 = vld [vmem:[#allocation8 + $0x890] sm:$0xff]  ;;  %v17783_v52 = vcombine.high %v11713_v22, %v11717_v59  ;;  %v17782_v9 = vcombine.low %v11713_v22, %v11717_v59 }
 0x7a2   :  { %14971 = vmatpush2.bf16.msra.mxu1 %v18092_v5  ;;  %v17879_v5 = vcombine.high %v11809_v26, %v11813_v43  ;;  %v17878_v2 = vcombine.low %v11809_v26, %v11813_v43  ;;  %v11893_v22 = vld [vmem:[#allocation8 + $0xb30] sm:$0xff] }
 0x7a3   :  { %15022 = vmatpush2.bf16.msra.mxu0 %v17678_v7  ;;  %14972 = vmatprep.subr.bf16.mxu1 %v18085_v28  ;;  %v11705_v7 = vld [vmem:[#allocation8 + $0x550] sm:$0xff] }
 0x7a4   :  { %15023 = vmatprep.subr.bf16.mxu0 %v17671_v47  ;;  %v11709_v28 = vld [vmem:[#allocation8 + $0x570] sm:$0xff] }
 0x7a5   :  { %v11801_v47 = vld [vmem:[#allocation8 + $0x850] sm:$0xff]  ;;  %v17775_v63 = vcombine.high %v11705_v7, %v11709_v28  ;;  %v17774_v16 = vcombine.low %v11705_v7, %v11709_v28 }
 0x7a6   :  { %14973 = vmatpush2.bf16.msra.mxu1 %v18084_v57  ;;  %v17871_v57 = vcombine.high %v11801_v47, %v11805_v34  ;;  %v17870_v35 = vcombine.low %v11801_v47, %v11805_v34  ;;  %v11885_v7 = vld [vmem:[#allocation8 + $0xaf0] sm:$0xff] }
 0x7a7   :  { %15024 = vmatpush2.bf16.msra.mxu0 %v17670_v27  ;;  %14974 = vmatprep.subr.bf16.mxu1 %v18077_v0  ;;  %v11697_v27 = vld [vmem:[#allocation8 + $0x510] sm:$0xff] }
 0x7a8   :  { %15079 = vmatprep.subr.bf16.mxu0 %v17919_v44  ;;  %v11701_v0 = vld [vmem:[#allocation8 + $0x530] sm:$0xff] }
 0x7a9   :  { %v11793_v44 = vld [vmem:[#allocation8 + $0x810] sm:$0xff]  ;;  %v17767_v51 = vcombine.high %v11697_v27, %v11701_v0  ;;  %v17766_v3 = vcombine.low %v11697_v27, %v11701_v0 }
 0x7aa   :  { %14975 = vmatpush2.bf16.msra.mxu1 %v18076_v30  ;;  %15026 = vmatmul.mubr.bf16.vlgmr.msra.gmra.mxu0 %v19388_v11  ;;  %v17863_v30 = vcombine.high %v11793_v44, %v11797_v49  ;;  %v17862_v15 = vcombine.low %v11793_v44, %v11797_v49  ;;  %v11877_v27 = vld [vmem:[#allocation8 + $0xab0] sm:$0xff] }
 0x7ab   :  { %15080 = vmatpush1.bf16.msra.mxu0 %v17918_v23  ;;  %15111 = vmatprep.mubr.bf16.mxu0 %v19076_v6  ;;  %v11689_v23 = vld [vmem:[#allocation8 + $0x4d0] sm:$0xff] }
 0x7ac   :  { %14976 = vmatprep.subr.bf16.mxu1 %v18069_v48  ;;  %15081 = vmatprep.subr.bf16.mxu0 %v17911_v60  ;;  %v11693_v48 = vld [vmem:[#allocation8 + $0x4f0] sm:$0xff] }
 0x7ad   :  { %v11913_v60 = vld [vmem:[#allocation8 + $0xbd0] sm:$0xff]  ;;  %v17759_v31 = vcombine.high %v11689_v23, %v11693_v48  ;;  %v17758_v37 = vcombine.low %v11689_v23, %v11693_v48 }
 0x7ae   :  { %14977 = vmatpush2.bf16.msra.mxu1 %v18068_v36  ;;  %v17983_v36 = vcombine.high %v11913_v60, %v11917_v25  ;;  %v17982_v45 = vcombine.low %v11913_v60, %v11917_v25  ;;  %v11869_v23 = vld [vmem:[#allocation8 + $0xa70] sm:$0xff] }
 0x7af   :  { %15082 = vmatpush1.bf16.msra.mxu0 %v17910_v54  ;;  %14978 = vmatprep.subr.bf16.mxu1 %v18061_v4  ;;  %v11681_v54 = vld [vmem:[#allocation8 + $0x490] sm:$0xff] }
 0x7b0   :  { %15083 = vmatprep.subr.bf16.mxu0 %v17903_v53  ;;  %v11685_v4 = vld [vmem:[#allocation8 + $0x4b0] sm:$0xff] }
 0x7b1   :  { %v11905_v53 = vld [vmem:[#allocation8 + $0xb90] sm:$0xff]  ;;  %v17751_v56 = vcombine.high %v11681_v54, %v11685_v4  ;;  %v17750_v18 = vcombine.low %v11681_v54, %v11685_v4 }
 0x7b2   :  { %14979 = vmatpush2.bf16.msra.mxu1 %v18060_v62  ;;  %v17975_v62 = vcombine.high %v11905_v53, %v11909_v20  ;;  %v17974_v12 = vcombine.low %v11905_v53, %v11909_v20  ;;  %v11861_v54 = vld [vmem:[#allocation8 + $0xa30] sm:$0xff] }
 0x7b3   :  { %15084 = vmatpush1.bf16.msra.mxu0 %v17902_v24  ;;  %14980 = vmatprep.subr.bf16.mxu1 %v18053_v13  ;;  %v11673_v24 = vld [vmem:[#allocation8 + $0x450] sm:$0xff] }
 0x7b4   :  { %15085 = vmatprep.subr.bf16.mxu0 %v17895_v29  ;;  %v11677_v13 = vld [vmem:[#allocation8 + $0x470] sm:$0xff] }
 0x7b5   :  { %v11897_v29 = vld [vmem:[#allocation8 + $0xb50] sm:$0xff]  ;;  %v17743_v1 = vcombine.high %v11673_v24, %v11677_v13  ;;  %v17742_v59 = vcombine.low %v11673_v24, %v11677_v13  ;;  %v11598_v24 = vld [vmem:[#allocation8 + $0x1f8] sm:$0xff] }
 0x7b6   :  { %14981 = vmatpush2.bf16.msra.mxu1 %v18052_v17  ;;  %v17967_v17 = vcombine.high %v11897_v29, %v11901_v40  ;;  %v17966_v26 = vcombine.low %v11897_v29, %v11901_v40 }
 0x7b7   :  { %15086 = vmatpush1.bf16.msra.mxu0 %v17894_v38  ;;  %15036 = vmatprep.subr.bf16.mxu1 %v17791_v14  ;;  %v11665_v38 = vld [vmem:[#allocation8 + $0x410] sm:$0xff] }
 0x7b8   :  { %15087 = vmatprep.subr.bf16.mxu0 %v17887_v41  ;;  %v11669_v14 = vld [vmem:[#allocation8 + $0x430] sm:$0xff] }
 0x7b9   :  { %14983 = vmatmul.mubr.bf16.vlgmr.msra.gmra.mxu1 %v19176_v46  ;;  %v11889_v41 = vld [vmem:[#allocation8 + $0xb10] sm:$0xff]  ;;  %v17735_v43 = vcombine.high %v11665_v38, %v11669_v14  ;;  %v17734_v28 = vcombine.low %v11665_v38, %v11669_v14  ;;  %v11590_v38 = vld [vmem:[#allocation8 + $0x1b8] sm:$0xff] }
 0x7ba   :  { %15037 = vmatpush1.bf16.msra.mxu1 %v17790_v50  ;;  %15068 = vmatprep.mubr.bf16.mxu1 %v19045_v55  ;;  %v17959_v50 = vcombine.high %v11889_v41, %v11893_v22  ;;  %v17958_v47 = vcombine.low %v11889_v41, %v11893_v22 }
 0x7bb   :  { %15088 = vmatpush1.bf16.msra.mxu0 %v17886_v58  ;;  %15038 = vmatprep.subr.bf16.mxu1 %v17783_v52  ;;  %v11785_v58 = vld [vmem:[#allocation8 + $0x7d0] sm:$0xff] }
 0x7bc   :  { %15089 = vmatprep.subr.bf16.mxu0 %v17879_v5  ;;  %v11789_v52 = vld [vmem:[#allocation8 + $0x7f0] sm:$0xff] }
 0x7bd   :  { %v11881_v5 = vld [vmem:[#allocation8 + $0xad0] sm:$0xff]  ;;  %v17855_v34 = vcombine.high %v11785_v58, %v11789_v52  ;;  %v17854_v0 = vcombine.low %v11785_v58, %v11789_v52  ;;  %v11582_v58 = vld [vmem:[#allocation8 + $0x178] sm:$0xff] }
 0x7be   :  { %15039 = vmatpush1.bf16.msra.mxu1 %v17782_v9  ;;  %v17951_v9 = vcombine.high %v11881_v5, %v11885_v7  ;;  %v17950_v44 = vcombine.low %v11881_v5, %v11885_v7 }
 0x7bf   :  { %15090 = vmatpush1.bf16.msra.mxu0 %v17878_v2  ;;  %15040 = vmatprep.subr.bf16.mxu1 %v17775_v63  ;;  %v11777_v2 = vld [vmem:[#allocation8 + $0x790] sm:$0xff] }
 0x7c0   :  { %15091 = vmatprep.subr.bf16.mxu0 %v17871_v57  ;;  %v11781_v63 = vld [vmem:[#allocation8 + $0x7b0] sm:$0xff] }
 0x7c1   :  { %v11873_v57 = vld [vmem:[#allocation8 + $0xa90] sm:$0xff]  ;;  %v17847_v49 = vcombine.high %v11777_v2, %v11781_v63  ;;  %v17846_v48 = vcombine.low %v11777_v2, %v11781_v63  ;;  %v11574_v2 = vld [vmem:[#allocation8 + $0x138] sm:$0xff] }
 0x7c2   :  { %15041 = vmatpush1.bf16.msra.mxu1 %v17774_v16  ;;  %v17943_v16 = vcombine.high %v11873_v57, %v11877_v27  ;;  %v17942_v60 = vcombine.low %v11873_v57, %v11877_v27 }
 0x7c3   :  { %15092 = vmatpush1.bf16.msra.mxu0 %v17870_v35  ;;  %15042 = vmatprep.subr.bf16.mxu1 %v17767_v51  ;;  %v11769_v35 = vld [vmem:[#allocation8 + $0x750] sm:$0xff] }
 0x7c4   :  { %15093 = vmatprep.subr.bf16.mxu0 %v17863_v30  ;;  %v11773_v51 = vld [vmem:[#allocation8 + $0x770] sm:$0xff] }
 0x7c5   :  { %v11865_v30 = vld [vmem:[#allocation8 + $0xa50] sm:$0xff]  ;;  %v17839_v25 = vcombine.high %v11769_v35, %v11773_v51  ;;  %v17838_v4 = vcombine.low %v11769_v35, %v11773_v51 }
 0x7c6   :  { %15043 = vmatpush1.bf16.msra.mxu1 %v17766_v3  ;;  %v17935_v3 = vcombine.high %v11865_v30, %v11869_v23  ;;  %v17934_v53 = vcombine.low %v11865_v30, %v11869_v23 }
 0x7c7   :  { %15094 = vmatpush1.bf16.msra.mxu0 %v17862_v15  ;;  %15044 = vmatprep.subr.bf16.mxu1 %v17759_v31  ;;  %v11761_v15 = vld [vmem:[#allocation8 + $0x710] sm:$0xff] }
 0x7c8   :  { %15095 = vmatprep.subr.bf16.mxu0 %v17983_v36  ;;  %v11765_v31 = vld [vmem:[#allocation8 + $0x730] sm:$0xff] }
 0x7c9   :  { %v11857_v36 = vld [vmem:[#allocation8 + $0xa10] sm:$0xff]  ;;  %v17831_v20 = vcombine.high %v11761_v15, %v11765_v31  ;;  %v17830_v13 = vcombine.low %v11761_v15, %v11765_v31 }
 0x7ca   :  { %15045 = vmatpush1.bf16.msra.mxu1 %v17758_v37  ;;  %v17927_v37 = vcombine.high %v11857_v36, %v11861_v54  ;;  %v17926_v29 = vcombine.low %v11857_v36, %v11861_v54 }
 0x7cb   :  { %15096 = vmatpush2.bf16.msra.mxu0 %v17982_v45  ;;  %15046 = vmatprep.subr.bf16.mxu1 %v17751_v56  ;;  %v11753_v45 = vld [vmem:[#allocation8 + $0x6d0] sm:$0xff] }
 0x7cc   :  { %15097 = vmatprep.subr.bf16.mxu0 %v17975_v62  ;;  %v11757_v56 = vld [vmem:[#allocation8 + $0x6f0] sm:$0xff]  ;;  %v11594_v62 = vld [vmem:[#allocation8 + $0x1d8] sm:$0xff] }
 0x7cd   :  { %v17823_v40 = vcombine.high %v11753_v45, %v11757_v56  ;;  %v17822_v14 = vcombine.low %v11753_v45, %v11757_v56  ;;  %v17664_v41 = vcombine.low %v11594_v62, %v11598_v24 }
 0x7ce   :  { %15047 = vmatpush1.bf16.msra.mxu1 %v17750_v18  ;;  %v17665_v18 = vcombine.high %v11594_v62, %v11598_v24 }
 0x7cf   :  { %15098 = vmatpush2.bf16.msra.mxu0 %v17974_v12  ;;  %15048 = vmatprep.subr.bf16.mxu1 %v17743_v1  ;;  %v11745_v12 = vld [vmem:[#allocation8 + $0x690] sm:$0xff] }
 0x7d0   :  { %15099 = vmatprep.subr.bf16.mxu0 %v17967_v17  ;;  %v11749_v1 = vld [vmem:[#allocation8 + $0x6b0] sm:$0xff]  ;;  %v11586_v17 = vld [vmem:[#allocation8 + $0x198] sm:$0xff] }
 0x7d1   :  { %v17815_v22 = vcombine.high %v11745_v12, %v11749_v1  ;;  %v17814_v52 = vcombine.low %v11745_v12, %v11749_v1  ;;  %v17656_v5 = vcombine.low %v11586_v17, %v11590_v38 }
 0x7d2   :  { %15049 = vmatpush1.bf16.msra.mxu1 %v17742_v59  ;;  %v17657_v59 = vcombine.high %v11586_v17, %v11590_v38 }
 0x7d3   :  { %15100 = vmatpush2.bf16.msra.mxu0 %v17966_v26  ;;  %15050 = vmatprep.subr.bf16.mxu1 %v17735_v43  ;;  %v11737_v26 = vld [vmem:[#allocation8 + $0x650] sm:$0xff] }
 0x7d4   :  { %15101 = vmatprep.subr.bf16.mxu0 %v17959_v50  ;;  %v11741_v43 = vld [vmem:[#allocation8 + $0x670] sm:$0xff]  ;;  %v11578_v50 = vld [vmem:[#allocation8 + $0x158] sm:$0xff] }
 0x7d5   :  { %v17807_v7 = vcombine.high %v11737_v26, %v11741_v43  ;;  %v17806_v63 = vcombine.low %v11737_v26, %v11741_v43  ;;  %v17648_v57 = vcombine.low %v11578_v50, %v11582_v58 }
 0x7d6   :  { %15051 = vmatpush1.bf16.msra.mxu1 %v17734_v28  ;;  %v17649_v28 = vcombine.high %v11578_v50, %v11582_v58 }
 0x7d7   :  { %15102 = vmatpush2.bf16.msra.mxu0 %v17958_v47  ;;  %15052 = vmatprep.subr.bf16.mxu1 %v17855_v34  ;;  %v11729_v47 = vld [vmem:[#allocation8 + $0x610] sm:$0xff] }
 0x7d8   :  { %15103 = vmatprep.subr.bf16.mxu0 %v17951_v9  ;;  %v11733_v34 = vld [vmem:[#allocation8 + $0x630] sm:$0xff]  ;;  %v11570_v9 = vld [vmem:[#allocation8 + $0x118] sm:$0xff] }
 0x7d9   :  { %v17799_v27 = vcombine.high %v11729_v47, %v11733_v34  ;;  %v17798_v35 = vcombine.low %v11729_v47, %v11733_v34  ;;  %v17640_v51 = vcombine.low %v11570_v9, %v11574_v2 }
 0x7da   :  { %15053 = vmatpush2.bf16.msra.mxu1 %v17854_v0  ;;  %v17641_v0 = vcombine.high %v11570_v9, %v11574_v2 }
 0x7db   :  { %15104 = vmatpush2.bf16.msra.mxu0 %v17950_v44  ;;  %15054 = vmatprep.subr.bf16.mxu1 %v17847_v49  ;;  %v11977_v44 = vld [vmem:[#allocation8 + $0xdd0] sm:$0xff] }
 0x7dc   :  { %15105 = vmatprep.subr.bf16.mxu0 %v17943_v16  ;;  %v11981_v49 = vld [vmem:[#allocation8 + $0xdf0] sm:$0xff]  ;;  %v11566_v16 = vld [vmem:[#allocation8 + $0xf8] sm:$0xff] }
 0x7dd   :  { %v18047_v30 = vcombine.high %v11977_v44, %v11981_v49  ;;  %v18046_v15 = vcombine.low %v11977_v44, %v11981_v49 }
 0x7de   :  { %15055 = vmatpush2.bf16.msra.mxu1 %v17846_v48  ;;  %v11969_v48 = vld [vmem:[#allocation8 + $0xd90] sm:$0xff] }
 0x7df   :  { %15106 = vmatpush2.bf16.msra.mxu0 %v17942_v60  ;;  %15056 = vmatprep.subr.bf16.mxu1 %v17839_v25  ;;  %v11973_v60 = vld [vmem:[#allocation8 + $0xdb0] sm:$0xff]  ;;  %v11554_v25 = vld [vmem:[#allocation8 + $0x98] sm:$0xff] }
 0x7e0   :  { %15107 = vmatprep.subr.bf16.mxu0 %v17935_v3  ;;  %v11558_v3 = vld [vmem:[#allocation8 + $0xb8] sm:$0xff]  ;;  %v18039_v36 = vcombine.high %v11969_v48, %v11973_v60  ;;  %v18038_v45 = vcombine.low %v11969_v48, %v11973_v60 }
 0x7e1   :  { %v17625_v54 = vcombine.high %v11554_v25, %v11558_v3  ;;  %v17624_v56 = vcombine.low %v11554_v25, %v11558_v3 }
 0x7e2   :  { %15057 = vmatpush2.bf16.msra.mxu1 %v17838_v4  ;;  %v11961_v4 = vld [vmem:[#allocation8 + $0xd50] sm:$0xff] }
 0x7e3   :  { %15108 = vmatpush2.bf16.msra.mxu0 %v17934_v53  ;;  %15058 = vmatprep.subr.bf16.mxu1 %v17831_v20  ;;  %v11965_v53 = vld [vmem:[#allocation8 + $0xd70] sm:$0xff]  ;;  %v11546_v20 = vld [vmem:[#allocation8 + $0x58] sm:$0xff] }
 0x7e4   :  { %15109 = vmatprep.subr.bf16.mxu0 %v17927_v37  ;;  %v11550_v37 = vld [vmem:[#allocation8 + $0x78] sm:$0xff]  ;;  %v18031_v62 = vcombine.high %v11961_v4, %v11965_v53  ;;  %v18030_v12 = vcombine.low %v11961_v4, %v11965_v53 }
 0x7e5   :  { %v17617_v24 = vcombine.high %v11546_v20, %v11550_v37  ;;  %v17616_v1 = vcombine.low %v11546_v20, %v11550_v37 }
 0x7e6   :  { %15059 = vmatpush2.bf16.msra.mxu1 %v17830_v13  ;;  %v11953_v13 = vld [vmem:[#allocation8 + $0xd10] sm:$0xff] }
 0x7e7   :  { %15110 = vmatpush2.bf16.msra.mxu0 %v17926_v29  ;;  %15060 = vmatprep.subr.bf16.mxu1 %v17823_v40  ;;  %v11957_v29 = vld [vmem:[#allocation8 + $0xd30] sm:$0xff]  ;;  %v11538_v40 = vld [vmem:[#allocation8 + $0x18] sm:$0xff] }
 0x7e8   :  { %15165 = vmatprep.subr.bf16.mxu0 %v17665_v18  ;;  %v11542_v18 = vld [vmem:[#allocation8 + $0x38] sm:$0xff]  ;;  %v18023_v17 = vcombine.high %v11953_v13, %v11957_v29  ;;  %v18022_v26 = vcombine.low %v11953_v13, %v11957_v29 }
 0x7e9   :  { %v17609_v38 = vcombine.high %v11538_v40, %v11542_v18  ;;  %v17608_v43 = vcombine.low %v11538_v40, %v11542_v18 }
 0x7ea   :  { %15061 = vmatpush2.bf16.msra.mxu1 %v17822_v14  ;;  %15112 = vmatmul.mubr.bf16.vlgmr.msra.gmra.mxu0 %v18980_v21  ;;  %v11945_v14 = vld [vmem:[#allocation8 + $0xcd0] sm:$0xff] }
 0x7eb   :  { %15166 = vmatpush1.bf16.msra.mxu0 %v17664_v41  ;;  %15197 = vmatprep.mubr.bf16.mxu0 %v19042_v33  ;;  %v11562_v33 = vld [vmem:[#allocation8 + $0xd8] sm:$0xff]  ;;  %v11949_v41 = vld [vmem:[#allocation8 + $0xcf0] sm:$0xff] }
 0x7ec   :  { %15062 = vmatprep.subr.bf16.mxu1 %v17815_v22  ;;  %15167 = vmatprep.subr.bf16.mxu0 %v17657_v59  ;;  %v17633_v23 = vcombine.high %v11562_v33, %v11566_v16  ;;  %v17632_v31 = vcombine.low %v11562_v33, %v11566_v16  ;;  %v11658_v22 = vld [vmem:[#allocation8 + $0x3d8] sm:$0xff]  ;;  %v18015_v50 = vcombine.high %v11945_v14, %v11949_v41 }
 0x7ed   :  { %v11662_v59 = vld [vmem:[#allocation8 + $0x3f8] sm:$0xff]  ;;  %v18014_v47 = vcombine.low %v11945_v14, %v11949_v41 }
 0x7ee   :  { %15063 = vmatpush2.bf16.msra.mxu1 %v17814_v52  ;;  %v17729_v58 = vcombine.high %v11658_v22, %v11662_v59  ;;  %v11937_v52 = vld [vmem:[#allocation8 + $0xc90] sm:$0xff]  ;;  %v17728_v34 = vcombine.low %v11658_v22, %v11662_v59 }
 0x7ef   :  { %15168 = vmatpush1.bf16.msra.mxu0 %v17656_v5  ;;  %15064 = vmatprep.subr.bf16.mxu1 %v17807_v7  ;;  %v11941_v5 = vld [vmem:[#allocation8 + $0xcb0] sm:$0xff]  ;;  %v11650_v7 = vld [vmem:[#allocation8 + $0x398] sm:$0xff] }
 0x7f0   :  { %15169 = vmatprep.subr.bf16.mxu0 %v17649_v28  ;;  %v11654_v28 = vld [vmem:[#allocation8 + $0x3b8] sm:$0xff]  ;;  %v18007_v9 = vcombine.high %v11937_v52, %v11941_v5  ;;  %v18006_v44 = vcombine.low %v11937_v52, %v11941_v5 }
 0x7f1   :  { %v17721_v2 = vcombine.high %v11650_v7, %v11654_v28  ;;  %v17720_v49 = vcombine.low %v11650_v7, %v11654_v28 }
 0x7f2   :  { %15065 = vmatpush2.bf16.msra.mxu1 %v17806_v63  ;;  %v11929_v63 = vld [vmem:[#allocation8 + $0xc50] sm:$0xff] }
 0x7f3   :  { %15170 = vmatpush1.bf16.msra.mxu0 %v17648_v57  ;;  %15066 = vmatprep.subr.bf16.mxu1 %v17799_v27  ;;  %v11933_v57 = vld [vmem:[#allocation8 + $0xc70] sm:$0xff]  ;;  %v11642_v27 = vld [vmem:[#allocation8 + $0x358] sm:$0xff] }
 0x7f4   :  { %15171 = vmatprep.subr.bf16.mxu0 %v17641_v0  ;;  %v11646_v0 = vld [vmem:[#allocation8 + $0x378] sm:$0xff]  ;;  %v17999_v33 = vcombine.high %v11929_v63, %v11933_v57  ;;  %v17998_v48 = vcombine.low %v11929_v63, %v11933_v57 }
 0x7f5   :  { %v17713_v16 = vcombine.high %v11642_v27, %v11646_v0  ;;  %v17712_v60 = vcombine.low %v11642_v27, %v11646_v0 }
 0x7f6   :  { %15067 = vmatpush2.bf16.msra.mxu1 %v17798_v35  ;;  %v11921_v35 = vld [vmem:[#allocation8 + $0xc10] sm:$0xff] }
 0x7f7   :  { %15172 = vmatpush1.bf16.msra.mxu0 %v17640_v51  ;;  %15122 = vmatprep.subr.bf16.mxu1 %v18047_v30  ;;  %v11925_v51 = vld [vmem:[#allocation8 + $0xc30] sm:$0xff]  ;;  %v11634_v30 = vld [vmem:[#allocation8 + $0x318] sm:$0xff] }
 0x7f8   :  { %15173 = vmatprep.subr.bf16.mxu0 %v17633_v23  ;;  %v11638_v23 = vld [vmem:[#allocation8 + $0x338] sm:$0xff]  ;;  %v17991_v25 = vcombine.high %v11921_v35, %v11925_v51  ;;  %v17990_v4 = vcombine.low %v11921_v35, %v11925_v51 }
 0x7f9   :  { %15069 = vmatmul.mubr.bf16.vlgmr.msra.gmra.mxu1 %v19389_v32  ;;  %v17705_v3 = vcombine.high %v11634_v30, %v11638_v23  ;;  %v17704_v53 = vcombine.low %v11634_v30, %v11638_v23 }
 0x7fa   :  { %15123 = vmatpush1.bf16.msra.mxu1 %v18046_v15  ;;  %15154 = vmatprep.mubr.bf16.mxu1 %v19174_v39  ;;  %v12041_v15 = vld [vmem:[#allocation8 + $0xfd0] sm:$0xff] }
 0x7fb   :  { %15174 = vmatpush1.bf16.msra.mxu0 %v17632_v31  ;;  %15124 = vmatprep.subr.bf16.mxu1 %v18039_v36  ;;  %v12045_v31 = vld [vmem:[#allocation8 + $0xff0] sm:$0xff]  ;;  %v11626_v36 = vld [vmem:[#allocation8 + $0x2d8] sm:$0xff] }
 0x7fc   :  { %15175 = vmatprep.subr.bf16.mxu0 %v17625_v54  ;;  %v11630_v54 = vld [vmem:[#allocation8 + $0x2f8] sm:$0xff]  ;;  %v18111_v20 = vcombine.high %v12041_v15, %v12045_v31  ;;  %v18110_v13 = vcombine.low %v12041_v15, %v12045_v31 }
 0x7fd   :  { %v17697_v37 = vcombine.high %v11626_v36, %v11630_v54  ;;  %v17696_v29 = vcombine.low %v11626_v36, %v11630_v54 }
 0x7fe   :  { %15125 = vmatpush1.bf16.msra.mxu1 %v18038_v45  ;;  %v12033_v45 = vld [vmem:[#allocation8 + $0xf90] sm:$0xff] }
 0x7ff   :  { %15176 = vmatpush1.bf16.msra.mxu0 %v17624_v56  ;;  %15126 = vmatprep.subr.bf16.mxu1 %v18031_v62  ;;  %v12037_v56 = vld [vmem:[#allocation8 + $0xfb0] sm:$0xff]  ;;  %v11618_v62 = vld [vmem:[#allocation8 + $0x298] sm:$0xff] }
 0x800   :  { %15177 = vmatprep.subr.bf16.mxu0 %v17617_v24  ;;  %v11622_v24 = vld [vmem:[#allocation8 + $0x2b8] sm:$0xff]  ;;  %v18103_v40 = vcombine.high %v12033_v45, %v12037_v56  ;;  %v18102_v14 = vcombine.low %v12033_v45, %v12037_v56 }
 0x801   :  { %v17689_v18 = vcombine.high %v11618_v62, %v11622_v24  ;;  %v17688_v41 = vcombine.low %v11618_v62, %v11622_v24  ;;  %v11722_v24 = vld [vmem:[#allocation8 + $0x5d8] sm:$0xff] }
 0x802   :  { %15127 = vmatpush1.bf16.msra.mxu1 %v18030_v12  ;;  %v12025_v12 = vld [vmem:[#allocation8 + $0xf50] sm:$0xff] }
 0x803   :  { %15178 = vmatpush1.bf16.msra.mxu0 %v17616_v1  ;;  %15128 = vmatprep.subr.bf16.mxu1 %v18023_v17  ;;  %v12029_v1 = vld [vmem:[#allocation8 + $0xf70] sm:$0xff]  ;;  %v11610_v17 = vld [vmem:[#allocation8 + $0x258] sm:$0xff] }
 0x804   :  { %15179 = vmatprep.subr.bf16.mxu0 %v17609_v38  ;;  %v11614_v38 = vld [vmem:[#allocation8 + $0x278] sm:$0xff]  ;;  %v18095_v22 = vcombine.high %v12025_v12, %v12029_v1  ;;  %v18094_v52 = vcombine.low %v12025_v12, %v12029_v1 }
 0x805   :  { %v17681_v59 = vcombine.high %v11610_v17, %v11614_v38  ;;  %v17680_v5 = vcombine.low %v11610_v17, %v11614_v38  ;;  %v11714_v17 = vld [vmem:[#allocation8 + $0x598] sm:$0xff] }
 0x806   :  { %15129 = vmatpush1.bf16.msra.mxu1 %v18022_v26  ;;  %v12017_v26 = vld [vmem:[#allocation8 + $0xf10] sm:$0xff]  ;;  %v11718_v38 = vld [vmem:[#allocation8 + $0x5b8] sm:$0xff] }
 0x807   :  { %15180 = vmatpush1.bf16.msra.mxu0 %v17608_v43  ;;  %15130 = vmatprep.subr.bf16.mxu1 %v18015_v50  ;;  %v12021_v43 = vld [vmem:[#allocation8 + $0xf30] sm:$0xff]  ;;  %v11602_v50 = vld [vmem:[#allocation8 + $0x218] sm:$0xff] }
 0x808   :  { %15181 = vmatprep.subr.bf16.mxu0 %v17729_v58  ;;  %v11606_v58 = vld [vmem:[#allocation8 + $0x238] sm:$0xff]  ;;  %v18087_v7 = vcombine.high %v12017_v26, %v12021_v43  ;;  %v18086_v63 = vcombine.low %v12017_v26, %v12021_v43  ;;  %v17785_v26 = vcombine.high %v11714_v17, %v11718_v38 }
 0x809   :  { %v17673_v28 = vcombine.high %v11602_v50, %v11606_v58  ;;  %v17672_v57 = vcombine.low %v11602_v50, %v11606_v58  ;;  %v11706_v50 = vld [vmem:[#allocation8 + $0x558] sm:$0xff] }
 0x80a   :  { %15131 = vmatpush1.bf16.msra.mxu1 %v18014_v47  ;;  %v12009_v47 = vld [vmem:[#allocation8 + $0xed0] sm:$0xff]  ;;  %v11710_v58 = vld [vmem:[#allocation8 + $0x578] sm:$0xff] }
 0x80b   :  { %15182 = vmatpush2.bf16.msra.mxu0 %v17728_v34  ;;  %15132 = vmatprep.subr.bf16.mxu1 %v18007_v9  ;;  %v12013_v34 = vld [vmem:[#allocation8 + $0xef0] sm:$0xff]  ;;  %v11850_v9 = vld [vmem:[#allocation8 + $0x9d8] sm:$0xff] }
 0x80c   :  { %15183 = vmatprep.subr.bf16.mxu0 %v17721_v2  ;;  %v11854_v2 = vld [vmem:[#allocation8 + $0x9f8] sm:$0xff]  ;;  %v18079_v27 = vcombine.high %v12009_v47, %v12013_v34  ;;  %v18078_v35 = vcombine.low %v12009_v47, %v12013_v34  ;;  %v17777_v47 = vcombine.high %v11706_v50, %v11710_v58 }
 0x80d   :  { %v17921_v0 = vcombine.high %v11850_v9, %v11854_v2  ;;  %v17920_v51 = vcombine.low %v11850_v9, %v11854_v2  ;;  %v11698_v9 = vld [vmem:[#allocation8 + $0x518] sm:$0xff] }
 0x80e   :  { %15133 = vmatpush1.bf16.msra.mxu1 %v18006_v44  ;;  %v12001_v44 = vld [vmem:[#allocation8 + $0xe90] sm:$0xff]  ;;  %v11702_v2 = vld [vmem:[#allocation8 + $0x538] sm:$0xff] }
 0x80f   :  { %15184 = vmatpush2.bf16.msra.mxu0 %v17720_v49  ;;  %15134 = vmatprep.subr.bf16.mxu1 %v17999_v33  ;;  %v12005_v49 = vld [vmem:[#allocation8 + $0xeb0] sm:$0xff]  ;;  %v11842_v33 = vld [vmem:[#allocation8 + $0x998] sm:$0xff] }
 0x810   :  { %15185 = vmatprep.subr.bf16.mxu0 %v17713_v16  ;;  %v11846_v16 = vld [vmem:[#allocation8 + $0x9b8] sm:$0xff]  ;;  %v18071_v30 = vcombine.high %v12001_v44, %v12005_v49  ;;  %v18070_v15 = vcombine.low %v12001_v44, %v12005_v49  ;;  %v17769_v44 = vcombine.high %v11698_v9, %v11702_v2 }
 0x811   :  { %v17913_v23 = vcombine.high %v11842_v33, %v11846_v16  ;;  %v17912_v31 = vcombine.low %v11842_v33, %v11846_v16  ;;  %v11694_v33 = vld [vmem:[#allocation8 + $0x4f8] sm:$0xff] }
 0x812   :  { %15135 = vmatpush1.bf16.msra.mxu1 %v17998_v48  ;;  %v11993_v48 = vld [vmem:[#allocation8 + $0xe50] sm:$0xff]  ;;  %v11914_v16 = vld [vmem:[#allocation8 + $0xbd8] sm:$0xff] }
 0x813   :  { %15186 = vmatpush2.bf16.msra.mxu0 %v17712_v60  ;;  %15136 = vmatprep.subr.bf16.mxu1 %v17991_v25  ;;  %v11997_v60 = vld [vmem:[#allocation8 + $0xe70] sm:$0xff]  ;;  %v11834_v25 = vld [vmem:[#allocation8 + $0x958] sm:$0xff] }
 0x814   :  { %15187 = vmatprep.subr.bf16.mxu0 %v17705_v3  ;;  %v11838_v3 = vld [vmem:[#allocation8 + $0x978] sm:$0xff]  ;;  %v18063_v36 = vcombine.high %v11993_v48, %v11997_v60  ;;  %v18062_v45 = vcombine.low %v11993_v48, %v11997_v60  ;;  %v19202_v60 = vpop.f32.mrf.mxu1 }
 0x815   :  { %v17905_v54 = vcombine.high %v11834_v25, %v11838_v3  ;;  %v17904_v56 = vcombine.low %v11834_v25, %v11838_v3  ;;  %v11682_v3 = vld [vmem:[#allocation8 + $0x498] sm:$0xff] }
 0x816   :  { %15137 = vmatpush1.bf16.msra.mxu1 %v17990_v4  ;;  %v11985_v4 = vld [vmem:[#allocation8 + $0xe10] sm:$0xff] }
 0x817   :  { %15188 = vmatpush2.bf16.msra.mxu0 %v17704_v53  ;;  %15138 = vmatprep.subr.bf16.mxu1 %v18111_v20  ;;  %v11989_v53 = vld [vmem:[#allocation8 + $0xe30] sm:$0xff]  ;;  %v11826_v20 = vld [vmem:[#allocation8 + $0x918] sm:$0xff] }
 0x818   :  { %15189 = vmatprep.subr.bf16.mxu0 %v17697_v37  ;;  %v11830_v37 = vld [vmem:[#allocation8 + $0x938] sm:$0xff]  ;;  %v18055_v62 = vcombine.high %v11985_v4, %v11989_v53 }
 0x81a   :  { %15139 = vmatpush2.bf16.msra.mxu1 %v18110_v13  ;;  %v11726_v13 = vld [vmem:[#allocation8 + $0x5f8] sm:$0xff] }
 0x81b   :  { %15190 = vmatpush2.bf16.msra.mxu0 %v17696_v29  ;;  %15140 = vmatprep.subr.bf16.mxu1 %v18103_v40  ;;  %v11822_v29 = vld [vmem:[#allocation8 + $0x8f8] sm:$0xff]  ;;  %v18054_v40 = vcombine.low %v11985_v4, %v11989_v53  ;;  %v17793_v12 = vcombine.high %v11722_v24, %v11726_v13 }
 0x81c   :  { %15191 = vmatprep.subr.bf16.mxu0 %v17689_v18  ;;  %v17896_v18 = vcombine.low %v11826_v20, %v11830_v37 }
 0x81e   :  { %15141 = vmatpush2.bf16.msra.mxu1 %v18102_v14  ;;  %v11810_v14 = vld [vmem:[#allocation8 + $0x898] sm:$0xff] }
 0x81f   :  { %15192 = vmatpush2.bf16.msra.mxu0 %v17688_v41  ;;  %15142 = vmatprep.subr.bf16.mxu1 %v18095_v22  ;;  %v11814_v41 = vld [vmem:[#allocation8 + $0x8b8] sm:$0xff]  ;;  %v17792_v22 = vcombine.low %v11722_v24, %v11726_v13 }
 0x820   :  { %15193 = vmatprep.subr.bf16.mxu0 %v17681_v59  ;;  %v17881_v43 = vcombine.high %v11810_v14, %v11814_v41  ;;  %v11902_v24 = vld [vmem:[#allocation8 + $0xb78] sm:$0xff] }
 0x822   :  { %15143 = vmatpush2.bf16.msra.mxu1 %v18094_v52  ;;  %v11802_v52 = vld [vmem:[#allocation8 + $0x858] sm:$0xff] }
 0x823   :  { %15194 = vmatpush2.bf16.msra.mxu0 %v17680_v5  ;;  %15144 = vmatprep.subr.bf16.mxu1 %v18087_v7  ;;  %v11806_v5 = vld [vmem:[#allocation8 + $0x878] sm:$0xff]  ;;  %v17784_v7 = vcombine.low %v11714_v17, %v11718_v38 }
 0x824   :  { %15195 = vmatprep.subr.bf16.mxu0 %v17673_v28  ;;  %v17880_v28 = vcombine.low %v11810_v14, %v11814_v41  ;;  %v17873_v34 = vcombine.high %v11802_v52, %v11806_v5  ;;  %v11670_v17 = vld [vmem:[#allocation8 + $0x438] sm:$0xff] }
 0x825   :  { %v11890_v38 = vld [vmem:[#allocation8 + $0xb18] sm:$0xff] }
 0x826   :  { %15145 = vmatpush2.bf16.msra.mxu1 %v18086_v63  ;;  %v11794_v63 = vld [vmem:[#allocation8 + $0x818] sm:$0xff] }
 0x827   :  { %15196 = vmatpush2.bf16.msra.mxu0 %v17672_v57  ;;  %15146 = vmatprep.subr.bf16.mxu1 %v18079_v27  ;;  %v11798_v57 = vld [vmem:[#allocation8 + $0x838] sm:$0xff]  ;;  %v17776_v27 = vcombine.low %v11706_v50, %v11710_v58 }
 0x828   :  { %15251 = vmatprep.subr.bf16.mxu0 %v17921_v0  ;;  %v17872_v0 = vcombine.low %v11802_v52, %v11806_v5  ;;  %v17865_v49 = vcombine.high %v11794_v63, %v11798_v57  ;;  %v11894_v14 = vld [vmem:[#allocation8 + $0xb38] sm:$0xff] }
 0x829   :  { %v17961_v58 = vcombine.high %v11890_v38, %v11894_v14  ;;  %v11786_v52 = vld [vmem:[#allocation8 + $0x7d8] sm:$0xff] }
 0x82a   :  { %15147 = vmatpush2.bf16.msra.mxu1 %v18078_v35  ;;  %15198 = vmatmul.mubr.bf16.vlgmr.msra.gmra.mxu0 %v19388_v11  ;;  %v17897_v11 = vcombine.high %v11826_v20, %v11830_v37  ;;  %v11918_v35 = vld [vmem:[#allocation8 + $0xbf8] sm:$0xff]  ;;  %v19206_v37 = vpop.f32.mrf.mxu1 }
 0x82b   :  { %15252 = vmatpush1.bf16.msra.mxu0 %v17920_v51  ;;  %15283 = vmatprep.mubr.bf16.mxu0 %v19076_v6  ;;  %v11818_v6 = vld [vmem:[#allocation8 + $0x8d8] sm:$0xff]  ;;  %v19200_v51 = vpop.f32.mrf.mxu0  ;;  %v17985_v25 = vcombine.high %v11914_v16, %v11918_v35  ;;  %v17984_v53 = vcombine.low %v11914_v16, %v11918_v35 }
 0x82c   :  { %15148 = vmatprep.subr.bf16.mxu1 %v18071_v30  ;;  %15253 = vmatprep.subr.bf16.mxu0 %v17913_v23  ;;  %v17889_v1 = vcombine.high %v11818_v6, %v11822_v29  ;;  %v17888_v59 = vcombine.low %v11818_v6, %v11822_v29  ;;  %v17768_v30 = vcombine.low %v11698_v9, %v11702_v2  ;;  %v11790_v5 = vld [vmem:[#allocation8 + $0x7f8] sm:$0xff] }
 0x82d   :  { %v17864_v23 = vcombine.low %v11794_v63, %v11798_v57  ;;  %v17960_v9 = vcombine.low %v11890_v38, %v11894_v14  ;;  %v17857_v2 = vcombine.high %v11786_v52, %v11790_v5 }
 0x82e   :  { %15149 = vmatpush2.bf16.msra.mxu1 %v18070_v15  ;;  %v11686_v15 = vld [vmem:[#allocation8 + $0x4b8] sm:$0xff] }
 0x82f   :  { %15254 = vmatpush1.bf16.msra.mxu0 %v17912_v31  ;;  %15150 = vmatprep.subr.bf16.mxu1 %v18063_v36  ;;  %v11906_v31 = vld [vmem:[#allocation8 + $0xb98] sm:$0xff]  ;;  %v17753_v20 = vcombine.high %v11682_v3, %v11686_v15  ;;  %v17752_v6 = vcombine.low %v11682_v3, %v11686_v15 }
 0x830   :  { %15255 = vmatprep.subr.bf16.mxu0 %v17905_v54  ;;  %v11910_v36 = vld [vmem:[#allocation8 + $0xbb8] sm:$0xff]  ;;  %v19204_v54 = vpop.f32.mrf.mxu0 }
 0x831   :  { %v17976_v29 = vcombine.low %v11906_v31, %v11910_v36  ;;  %v11770_v15 = vld [vmem:[#allocation8 + $0x758] sm:$0xff] }
 0x832   :  { %15151 = vmatpush2.bf16.msra.mxu1 %v18062_v45  ;;  %v17977_v45 = vcombine.high %v11906_v31, %v11910_v36  ;;  %v19208_v13 = vpop.f32.mrf.mxu0  ;;  %v11774_v31 = vld [vmem:[#allocation8 + $0x778] sm:$0xff] }
 0x833   :  { %15256 = vmatpush1.bf16.msra.mxu0 %v17904_v56  ;;  %15152 = vmatprep.subr.bf16.mxu1 %v18055_v62  ;;  %v11674_v56 = vld [vmem:[#allocation8 + $0x458] sm:$0xff] }
 0x834   :  { %15257 = vmatprep.subr.bf16.mxu0 %v17897_v11  ;;  %v11678_v62 = vld [vmem:[#allocation8 + $0x478] sm:$0xff]  ;;  %v14689_v41 = vpop.f32.mrf.mxu0 }
 0x835   :  { %v11898_v11 = vld [vmem:[#allocation8 + $0xb58] sm:$0xff] }
 0x836   :  { %15153 = vmatpush2.bf16.msra.mxu1 %v18054_v40  ;;  %v17745_v40 = vcombine.high %v11674_v56, %v11678_v62  ;;  %v19212_v50 = vpop.f32.mrf.mxu0 }
 0x837   :  { %15258 = vmatpush1.bf16.msra.mxu0 %v17896_v18  ;;  %15208 = vmatprep.subr.bf16.mxu1 %v17793_v12  ;;  %v19210_v18 = vpop.f32.mrf.mxu1  ;;  %v17969_v12 = vcombine.high %v11898_v11, %v11902_v24 }
 0x838   :  { %15259 = vmatprep.subr.bf16.mxu0 %v17889_v1  ;;  %v11666_v1 = vld [vmem:[#allocation8 + $0x418] sm:$0xff]  ;;  %v14771_v63 = vpop.f32.mrf.mxu0 }
 0x839   :  { %15155 = vmatmul.mubr.bf16.vlgmr.msra.gmra.mxu1 %v19176_v46 }
 0x83a   :  { %15209 = vmatpush1.bf16.msra.mxu1 %v17792_v22  ;;  %15240 = vmatprep.mubr.bf16.mxu1 %v19045_v55  ;;  %v11690_v55 = vld [vmem:[#allocation8 + $0x4d8] sm:$0xff]  ;;  %v17744_v22 = vcombine.low %v11674_v56, %v11678_v62 }
 0x83b   :  { %15260 = vmatpush1.bf16.msra.mxu0 %v17888_v59  ;;  %15210 = vmatprep.subr.bf16.mxu1 %v17785_v26  ;;  %v17761_v48 = vcombine.high %v11690_v55, %v11694_v33  ;;  %v17760_v4 = vcombine.low %v11690_v55, %v11694_v33  ;;  %v17968_v59 = vcombine.low %v11898_v11, %v11902_v24  ;;  %v11878_v55 = vld [vmem:[#allocation8 + $0xab8] sm:$0xff]  ;;  %v19390_v33 = vsub.s32 1, %v18640_v42 }
 0x83c   :  { %15261 = vmatprep.subr.bf16.mxu0 %v17881_v43  ;;  %v17737_v26 = vcombine.high %v11666_v1, %v11670_v17  ;;  %v14732_v43 = vpop.f32.mrf.mxu1  ;;  %v17841_v11 = vcombine.high %v11770_v15, %v11774_v31 }
 0x83e   :  { %15211 = vmatpush1.bf16.msra.mxu1 %v17784_v7  ;;  %v11882_v7 = vld [vmem:[#allocation8 + $0xad8] sm:$0xff] }
 0x83f   :  { %15262 = vmatpush1.bf16.msra.mxu0 %v17880_v28  ;;  %15212 = vmatprep.subr.bf16.mxu1 %v17777_v47  ;;  %v11886_v28 = vld [vmem:[#allocation8 + $0xaf8] sm:$0xff]  ;;  %v19214_v47 = vpop.f32.mrf.mxu1 }
 0x840   :  { %15263 = vmatprep.subr.bf16.mxu0 %v17873_v34  ;;  %v17736_v34 = vcombine.low %v11666_v1, %v11670_v17  ;;  %v17953_v57 = vcombine.high %v11882_v7, %v11886_v28  ;;  %v11858_v1 = vld [vmem:[#allocation8 + $0xa18] sm:$0xff] }
 0x841   :  { %v14814_v35 = vpop.f32.mrf.mxu1  ;;  %v11862_v17 = vld [vmem:[#allocation8 + $0xa38] sm:$0xff] }
 0x842   :  { %15213 = vmatpush1.bf16.msra.mxu1 %v17776_v27  ;;  %v11778_v27 = vld [vmem:[#allocation8 + $0x798] sm:$0xff] }
 0x843   :  { %15264 = vmatpush1.bf16.msra.mxu0 %v17872_v0  ;;  %15214 = vmatprep.subr.bf16.mxu1 %v17769_v44  ;;  %v11782_v0 = vld [vmem:[#allocation8 + $0x7b8] sm:$0xff]  ;;  %v19216_v44 = vld [vmem:[#allocation10] sm:$0xff] }
 0x844   :  { %15265 = vmatprep.subr.bf16.mxu0 %v17865_v49  ;;  %v11874_v49 = vld [vmem:[#allocation8 + $0xa98] sm:$0xff]  ;;  %v12056_v16 = vrot.slane %v19216_v44, %v19390_v33  ;;  %v17848_v56 = vcombine.low %v11778_v27, %v11782_v0 }
 0x845   :  { %v17945_v3 = vcombine.high %v11874_v49, %v11878_v55  ;;  %v17944_v62 = vcombine.low %v11874_v49, %v11878_v55  ;;  %v18284_v55 = vld [vmem:[#allocation11 + $0x38] sm:$0xff]   ;;  %v18285_v33 = vld [vmem:[#allocation11 + $0x70] sm:$0xff]  }
 0x846   :  { %15215 = vmatpush1.bf16.msra.mxu1 %v17768_v30  ;;  %v17856_v30 = vcombine.low %v11786_v52, %v11790_v5  ;;  %v14690_v36 = vadd.f32 %v14689_v41, %v12056_v16  ;;  %v11758_v52 = vld [vmem:[#allocation8 + $0x6f8] sm:$0xff] }
 0x847   :  { %15266 = vmatpush1.bf16.msra.mxu0 %v17864_v23  ;;  %15216 = vmatprep.subr.bf16.mxu1 %v17761_v48  ;;  %v17952_v23 = vcombine.low %v11882_v7, %v11886_v28  ;;  %v17849_v48 = vcombine.high %v11778_v27, %v11782_v0  ;;  %v11750_v27 = vld [vmem:[#allocation8 + $0x6b8] sm:$0xff] }
 0x848   :  { %15267 = vmatprep.subr.bf16.mxu0 %v17985_v25  ;;  %v19221_v25 = vpop.f32.mrf.mxu0 }
 0x84a   :  { %15217 = vmatpush1.bf16.msra.mxu1 %v17760_v4  ;;  %v11866_v4 = vld [vmem:[#allocation8 + $0xa58] sm:$0xff]  ;;  %v14775_v24 = vpop.f32.mrf.mxu0 }
 0x84b   :  { %15268 = vmatpush2.bf16.msra.mxu0 %v17984_v53  ;;  %15218 = vmatprep.subr.bf16.mxu1 %v17753_v20  ;;  %v11870_v53 = vld [vmem:[#allocation8 + $0xa78] sm:$0xff]  ;;  %v14686_v20 = vadd.f32 %v19204_v54, %v12056_v16  ;;  %v17840_v54 = vcombine.low %v11770_v15, %v11774_v31  ;;  %v18287_v15 = vld [vmem:[#allocation11 + $0x68] sm:$0xff]  }
 0x84c   :  { %15269 = vmatprep.subr.bf16.mxu0 %v17977_v45  ;;  %v19224_v45 = vpop.f32.mrf.mxu1  ;;  %v11738_v16 = vld [vmem:[#allocation8 + $0x658] sm:$0xff] }
 0x84d   :  { %v14729_v38 = vadd.f32 %v19206_v37, %v14686_v20  ;;  %v17928_v37 = vcombine.low %v11858_v1, %v11862_v17  ;;  %v11730_v31 = vld [vmem:[#allocation8 + $0x618] sm:$0xff] }
 0x84e   :  { %15219 = vmatpush1.bf16.msra.mxu1 %v17752_v6  ;;  %v17937_v6 = vcombine.high %v11866_v4, %v11870_v53  ;;  %v14818_v14 = vpop.f32.mrf.mxu1 }
 0x84f   :  { %15270 = vmatpush2.bf16.msra.mxu0 %v17976_v29  ;;  %15220 = vmatprep.subr.bf16.mxu1 %v17745_v40  ;;  %v11762_v29 = vld [vmem:[#allocation8 + $0x718] sm:$0xff]  ;;  %v14772_v5 = vadd.f32 %v14771_v63, %v14729_v38 }
 0x850   :  { %15271 = vmatprep.subr.bf16.mxu0 %v17969_v12  ;;  %v11766_v40 = vld [vmem:[#allocation8 + $0x738] sm:$0xff]  ;;  %v14733_v12 = vadd.f32 %v14732_v43, %v14690_v36 }
 0x851   :  { %v17832_v43 = vcombine.low %v11762_v29, %v11766_v40  ;;  %v14815_v28 = vadd.f32 %v14814_v35, %v14772_v5  ;;  %v11742_v35 = vld [vmem:[#allocation8 + $0x678] sm:$0xff] }
 0x852   :  { %15221 = vmatpush1.bf16.msra.mxu1 %v17744_v22  ;;  %v14776_v41 = vadd.f32 %v14775_v24, %v14733_v12  ;;  %v17936_v22 = vcombine.low %v11866_v4, %v11870_v53  ;;  %v11734_v36 = vld [vmem:[#allocation8 + $0x638] sm:$0xff]  ;;  %v17808_v4 = vcombine.low %v11738_v16, %v11742_v35  ;;  %v18288_v53 = vld [vmem:[#allocation11 + $0x28] sm:$0xff]   ;;  %v18290_v24 = vld [vmem:[#allocation11 + $0x20] sm:$0xff]  }
 0x853   :  { %15272 = vmatpush2.bf16.msra.mxu0 %v17968_v59  ;;  %15222 = vmatprep.subr.bf16.mxu1 %v17737_v26  ;;  %v17833_v59 = vcombine.high %v11762_v29, %v11766_v40  ;;  %v17929_v26 = vcombine.high %v11858_v1, %v11862_v17  ;;  %v15338_v49 = vmax.f32 %v14815_v28, 0.0  ;;  %v17801_v20 = vcombine.high %v11730_v31, %v11734_v36  ;;  %v18291_v29 = vld [vmem:[#allocation11 + $0x58] sm:$0xff]   ;;  %v11970_v40 = vld [vmem:[#allocation8 + $0xd98] sm:$0xff] }
 0x854   :  { %15273 = vmatprep.subr.bf16.mxu0 %v17961_v58  ;;  %v11754_v58 = vld [vmem:[#allocation8 + $0x6d8] sm:$0xff]  ;;  %v14819_v7 = vadd.f32 %v14818_v14, %v14776_v41  ;;  %v19391_v1 = vsub.s32 0, %v18640_v42  ;;  %v18292_v14 = vld [vmem:[#allocation11 + $0x18] sm:$0xff]  }
 0x855   :  { %v17824_v0 = vcombine.low %v11754_v58, %v11758_v52  ;;  %v11974_v12 = vld [vmem:[#allocation8 + $0xdb8] sm:$0xff] }
 0x856   :  { %15223 = vmatpush1.bf16.msra.mxu1 %v17736_v34  ;;  %v17825_v34 = vcombine.high %v11754_v58, %v11758_v52  ;;  %v12052_v17 = vrot.slane %v19216_v44, %v19391_v1  ;;  %v18040_v52 = vcombine.low %v11970_v40, %v11974_v12  ;;  %v18294_v5 = vld [vmem:[#allocation11 + $0x10] sm:$0xff]   ;;  %v19243_v1 = vpop.f32.mrf.mxu1 }
 0x857   :  { %15274 = vmatpush2.bf16.msra.mxu0 %v17960_v9  ;;  %15224 = vmatprep.subr.bf16.mxu1 %v17857_v2  ;;  %v18283_v9 = vld [vmem:[#allocation11 + $0x78] sm:$0xff]   ;;  %v15346_v2 = vmax.f32 %v14819_v7, 0.0  ;;  %v11954_v28 = vld [vmem:[#allocation8 + $0xd18] sm:$0xff] }
 0x858   :  { %15275 = vmatprep.subr.bf16.mxu0 %v17953_v57  ;;  %v11746_v57 = vld [vmem:[#allocation8 + $0x698] sm:$0xff]  ;;  %v14688_v41 = vadd.f32 %v19208_v13, %v12052_v17  ;;  %v14684_v58 = vadd.f32 %v19200_v51, %v12052_v17  ;;  %v18295_v13 = vld [vmem:[#allocation11 + $0x48] sm:$0xff]  }
 0x859   :  { %v17817_v63 = vcombine.high %v11746_v57, %v11750_v27 }
 0x85a   :  { %15225 = vmatpush2.bf16.msra.mxu1 %v17856_v30  ;;  %v15354_v30 = vpack.c.bf16 %v15346_v2, %v15338_v49 }
 0x85b   :  { %15276 = vmatpush2.bf16.msra.mxu0 %v17952_v23  ;;  %15226 = vmatprep.subr.bf16.mxu1 %v17849_v48  ;;  %v17816_v23 = vcombine.low %v11746_v57, %v11750_v27  ;;  %v18286_v48 = vld [vmem:[#allocation11 + $0x30] sm:$0xff]  }
 0x85c   :  { %15277 = vmatprep.subr.bf16.mxu0 %v17945_v3  ;;  %v17809_v3 = vcombine.high %v11738_v16, %v11742_v35  ;;  %v11946_v27 = vld [vmem:[#allocation8 + $0xcd8] sm:$0xff]  ;;  %v18315_v35 = vld [vmem:[#allocation11 + $0x178] sm:$0xff]  }
 0x85d   :  { %v11942_v16 = vld [vmem:[#allocation8 + $0xcb8] sm:$0xff] }
 0x85e   :  { %15227 = vmatpush2.bf16.msra.mxu1 %v17848_v56  ;;  %v18289_v56 = vld [vmem:[#allocation11 + $0x60] sm:$0xff]  }
 0x85f   :  { %15278 = vmatpush2.bf16.msra.mxu0 %v17944_v62  ;;  %15228 = vmatprep.subr.bf16.mxu1 %v17841_v11  ;;  %v11978_v62 = vld [vmem:[#allocation8 + $0xdd8] sm:$0xff]  ;;  %v17800_v11 = vcombine.low %v11730_v31, %v11734_v36 }
 0x860   :  { %15279 = vmatprep.subr.bf16.mxu0 %v17937_v6 }
 0x862   :  { %15229 = vmatpush2.bf16.msra.mxu1 %v17840_v54  ;;  %v18041_v54 = vcombine.high %v11970_v40, %v11974_v12  ;;  %v19241_v12 = vpop.f32.mrf.mxu0 }
 0x863   :  { %15280 = vmatpush2.bf16.msra.mxu0 %v17936_v22  ;;  %15230 = vmatprep.subr.bf16.mxu1 %v17833_v59  ;;  %v18293_v22 = vld [vmem:[#allocation11 + $0x50] sm:$0xff]  }
 0x864   :  { %15281 = vmatprep.subr.bf16.mxu0 %v17929_v26  ;;  %v11962_v59 = vld [vmem:[#allocation8 + $0xd58] sm:$0xff] }
 0x865   :  { %v11966_v26 = vld [vmem:[#allocation8 + $0xd78] sm:$0xff] }
 0x866   :  { %15231 = vmatpush2.bf16.msra.mxu1 %v17832_v43  ;;  %v18033_v7 = vcombine.high %v11962_v59, %v11966_v26  ;;  %v14731_v43 = vadd.f32 %v19210_v18, %v14688_v41  ;;  %v18032_v51 = vcombine.low %v11962_v59, %v11966_v26  ;;  %v18297_v18 = vld [vmem:[#allocation11 + $0x40] sm:$0xff]   ;;  %v18323_v41 = vld [vmem:[#allocation11 + $0x158] sm:$0xff]   ;;  %v14857_v59 = vpop.f32.mrf.mxu0  ;;  %v19245_v26 = vpop.f32.mrf.mxu1 }
 0x867   :  { %15282 = vmatpush2.bf16.msra.mxu0 %v17928_v37  ;;  %15232 = vmatprep.subr.bf16.mxu1 %v17825_v34  ;;  %v11958_v37 = vld [vmem:[#allocation8 + $0xd38] sm:$0xff]  ;;  %v14727_v34 = vadd.f32 %v19202_v60, %v14684_v58 }
 0x868   :  { %18179 = vmatprep.subr.bf16.mxu0 %v18283_v9  ;;  %v18025_v9 = vcombine.high %v11954_v28, %v11958_v37  ;;  %v18024_v60 = vcombine.low %v11954_v28, %v11958_v37  ;;  %v19247_v28 = vpop.f32.mrf.mxu0  ;;  %v19249_v37 = vpop.f32.mrf.mxu1 }
 0x869   :  { %v14770_v2 = vadd.f32 %v19212_v50, %v14727_v34 }
 0x86a   :  { %15233 = vmatpush2.bf16.msra.mxu1 %v17824_v0  ;;  %15284 = vmatmul.mubr.bf16.vlgmr.msra.gmra.mxu0 %v18980_v21  ;;  %v11982_v21 = vld [vmem:[#allocation8 + $0xdf8] sm:$0xff] }
 0x86b   :  { %18180 = vmatpush3.bf16.msra.mxu0 %v18284_v55  ;;  %15912 = vmatprep.mubr.bf16.mxu0 %v15354_v30  ;;  %v18049_v6 = vcombine.high %v11978_v62, %v11982_v21  ;;  %v18048_v38 = vcombine.low %v11978_v62, %v11982_v21  ;;  %v11950_v0 = vld [vmem:[#allocation8 + $0xcf8] sm:$0xff]  ;;  %v14813_v49 = vadd.f32 %v19214_v47, %v14770_v2 }
 0x86c   :  { %15234 = vmatprep.subr.bf16.mxu1 %v17817_v63  ;;  %18181 = vmatprep.subr.bf16.mxu0 %v18285_v33  ;;  %v18017_v55 = vcombine.high %v11946_v27, %v11950_v0  ;;  %v11938_v33 = vld [vmem:[#allocation8 + $0xc98] sm:$0xff] }
 0x86d   :  { %v15337_v50 = vmax.f32 %v14813_v49, 0.0  ;;  %v18009_v30 = vcombine.high %v11938_v33, %v11942_v16  ;;  %v11930_v47 = vld [vmem:[#allocation8 + $0xc58] sm:$0xff]  ;;  %v18008_v31 = vcombine.low %v11938_v33, %v11942_v16 }
 0x86e   :  { %15235 = vmatpush2.bf16.msra.mxu1 %v17816_v23  ;;  %v18316_v23 = vld [vmem:[#allocation11 + $0x138] sm:$0xff]   ;;  %v12010_v49 = vld [vmem:[#allocation8 + $0xed8] sm:$0xff] }
 0x86f   :  { %18182 = vmatpush3.bf16.msra.mxu0 %v18286_v48  ;;  %15236 = vmatprep.subr.bf16.mxu1 %v17809_v3  ;;  %v11934_v3 = vld [vmem:[#allocation8 + $0xc78] sm:$0xff] }
 0x870   :  { %18183 = vmatprep.subr.bf16.mxu0 %v18287_v15  ;;  %v18317_v15 = vld [vmem:[#allocation11 + $0x170] sm:$0xff]   ;;  %v18001_v36 = vcombine.high %v11930_v47, %v11934_v3  ;;  %v18000_v62 = vcombine.low %v11930_v47, %v11934_v3 }
 0x872   :  { %15237 = vmatpush2.bf16.msra.mxu1 %v17808_v4  ;;  %v18318_v4 = vld [vmem:[#allocation11 + $0x130] sm:$0xff]  }
 0x873   :  { %18184 = vmatpush3.bf16.msra.mxu0 %v18288_v53  ;;  %15238 = vmatprep.subr.bf16.mxu1 %v17801_v20  ;;  %v11922_v53 = vld [vmem:[#allocation8 + $0xc18] sm:$0xff] }
 0x874   :  { %18185 = vmatprep.subr.bf16.mxu0 %v18289_v56  ;;  %v11926_v20 = vld [vmem:[#allocation8 + $0xc38] sm:$0xff]  ;;  %v18319_v56 = vld [vmem:[#allocation11 + $0x168] sm:$0xff]  }
 0x875   :  { %v17993_v21 = vcombine.high %v11922_v53, %v11926_v20  ;;  %v17992_v40 = vcombine.low %v11922_v53, %v11926_v20 }
 0x876   :  { %15239 = vmatpush2.bf16.msra.mxu1 %v17800_v11  ;;  %v18320_v11 = vld [vmem:[#allocation11 + $0x128] sm:$0xff]  }
 0x877   :  { %18186 = vmatpush3.bf16.msra.mxu0 %v18290_v24  ;;  %15294 = vmatprep.subr.bf16.mxu1 %v18049_v6  ;;  %v12042_v24 = vld [vmem:[#allocation8 + $0xfd8] sm:$0xff] }
 0x878   :  { %18187 = vmatprep.subr.bf16.mxu0 %v18291_v29  ;;  %v12046_v6 = vld [vmem:[#allocation8 + $0xff8] sm:$0xff]  ;;  %v18321_v29 = vld [vmem:[#allocation11 + $0x160] sm:$0xff]  }
 0x879   :  { %15241 = vmatmul.mubr.bf16.vlgmr.msra.gmra.mxu1 %v19389_v32  ;;  %v14774_v32 = vadd.f32 %v19221_v25, %v14731_v43  ;;  %v18298_v25 = vld [vmem:[#allocation11] sm:$0xff]   ;;  %v18113_v17 = vcombine.high %v12042_v24, %v12046_v6  ;;  %v18325_v43 = vld [vmem:[#allocation11 + $0x150] sm:$0xff]  }
 0x87a   :  { %15295 = vmatpush1.bf16.msra.mxu1 %v18048_v38  ;;  %15326 = vmatprep.mubr.bf16.mxu1 %v19174_v39  ;;  %v18296_v39 = vld [vmem:[#allocation11 + $0x8] sm:$0xff]   ;;  %v18322_v38 = vld [vmem:[#allocation11 + $0x120] sm:$0xff]  }
 0x87b   :  { %18188 = vmatpush3.bf16.msra.mxu0 %v18292_v14  ;;  %15296 = vmatprep.subr.bf16.mxu1 %v18041_v54  ;;  %v14817_v57 = vadd.f32 %v19224_v45, %v14774_v32  ;;  %v18016_v45 = vcombine.low %v11946_v27, %v11950_v0  ;;  %v12034_v14 = vld [vmem:[#allocation8 + $0xf98] sm:$0xff]  ;;  %v18328_v0 = vld [vmem:[#allocation11 + $0x108] sm:$0xff]  }
 0x87c   :  { %18189 = vmatprep.subr.bf16.mxu0 %v18293_v22  ;;  %v12038_v54 = vld [vmem:[#allocation8 + $0xfb8] sm:$0xff]  ;;  %v18112_v22 = vcombine.low %v12042_v24, %v12046_v6 }
 0x87d   :  { %v15345_v63 = vmax.f32 %v14817_v57, 0.0  ;;  %v18105_v58 = vcombine.high %v12034_v14, %v12038_v54  ;;  %v18326_v32 = vld [vmem:[#allocation11 + $0x110] sm:$0xff]   ;;  %v14861_v57 = vpop.f32.mrf.mxu0 }
 0x87e   :  { %15297 = vmatpush1.bf16.msra.mxu1 %v18040_v52  ;;  %v18324_v52 = vld [vmem:[#allocation11 + $0x118] sm:$0xff]   ;;  %v11986_v24 = vld [vmem:[#allocation8 + $0xe18] sm:$0xff] }
 0x87f   :  { %18190 = vmatpush3.bf16.msra.mxu0 %v18294_v5  ;;  %15298 = vmatprep.subr.bf16.mxu1 %v18033_v7  ;;  %v15353_v48 = vpack.c.bf16 %v15345_v63, %v15337_v50  ;;  %v12026_v5 = vld [vmem:[#allocation8 + $0xf58] sm:$0xff] }
 0x880   :  { %18191 = vmatprep.subr.bf16.mxu0 %v18295_v13  ;;  %v12030_v7 = vld [vmem:[#allocation8 + $0xf78] sm:$0xff]  ;;  %v18104_v13 = vcombine.low %v12034_v14, %v12038_v54 }
 0x881   :  { %v18097_v34 = vcombine.high %v12026_v5, %v12030_v7  ;;  %v18096_v2 = vcombine.low %v12026_v5, %v12030_v7  ;;  %v12002_v50 = vld [vmem:[#allocation8 + $0xe98] sm:$0xff] }
 0x882   :  { %15299 = vmatpush1.bf16.msra.mxu1 %v18032_v51  ;;  %v12018_v51 = vld [vmem:[#allocation8 + $0xf18] sm:$0xff] }
 0x883   :  { %18192 = vmatpush3.bf16.msra.mxu0 %v18296_v39  ;;  %15300 = vmatprep.subr.bf16.mxu1 %v18025_v9  ;;  %v12022_v39 = vld [vmem:[#allocation8 + $0xf38] sm:$0xff]  ;;  %v18327_v9 = vld [vmem:[#allocation11 + $0x148] sm:$0xff]  }
 0x884   :  { %18193 = vmatprep.subr.bf16.mxu0 %v18297_v18  ;;  %v14904_v18 = vpop.f32.mrf.mxu1  ;;  %v18089_v27 = vcombine.high %v12018_v51, %v12022_v39  ;;  %v18088_v33 = vcombine.low %v12018_v51, %v12022_v39  ;;  %v18301_v5 = vld [vmem:[#allocation11 + $0xf0] sm:$0xff]   ;;  %v18306_v51 = vld [vmem:[#allocation11 + $0xa0] sm:$0xff]   ;;  %v18307_v39 = vld [vmem:[#allocation11 + $0xd8] sm:$0xff]  }
 0x886   :  { %15301 = vmatpush1.bf16.msra.mxu1 %v18024_v60  ;;  %v12014_v60 = vld [vmem:[#allocation8 + $0xef8] sm:$0xff]  ;;  %v19253_v63 = vpop.f32.mrf.mxu1 }
 0x887   :  { %18194 = vmatpush3.bf16.msra.mxu0 %v18298_v25  ;;  %15302 = vmatprep.subr.bf16.mxu1 %v18017_v55  ;;  %v18329_v25 = vld [vmem:[#allocation11 + $0x140] sm:$0xff]   ;;  %v19251_v55 = vpop.f32.mrf.mxu0  ;;  %v18081_v16 = vcombine.high %v12010_v49, %v12014_v60  ;;  %v18080_v47 = vcombine.low %v12010_v49, %v12014_v60  ;;  %v18310_v49 = vld [vmem:[#allocation11 + $0x90] sm:$0xff]  }
 0x888   :  { %18223 = vmatprep.subr.bf16.mxu0 %v18315_v35  ;;  %v18330_v35 = vld [vmem:[#allocation11 + $0x100] sm:$0xff]  }
 0x88a   :  { %15303 = vmatpush1.bf16.msra.mxu1 %v18016_v45  ;;  %15913 = vmatmul.mubr.bf16.vlgmr.msra.gmra.mxu0 %v15353_v48  ;;  %v12006_v45 = vld [vmem:[#allocation8 + $0xeb8] sm:$0xff]  ;;  %v12064_v48 = vrot.slane %v19216_v44, %v1741_v10 }
 0x88b   :  { %15304 = vmatprep.subr.bf16.mxu1 %v18009_v30  ;;  %18224 = vmatpush3.bf16.msra.mxu0 %v18316_v23  ;;  %v14943_v30 = vpop.f32.mrf.mxu0  ;;  %v14986_v23 = vpop.f32.mrf.mxu1  ;;  %v18073_v3 = vcombine.high %v12002_v50, %v12006_v45  ;;  %v11990_v10 = vld [vmem:[#allocation8 + $0xe38] sm:$0xff] }
 0x88c   :  { %18225 = vmatprep.subr.bf16.mxu0 %v18317_v15  ;;  %v14862_v15 = vadd.f32 %v14861_v57, %v12064_v48  ;;  %v14858_v20 = vadd.f32 %v14857_v59, %v12064_v48  ;;  %v18299_v59 = vld [vmem:[#allocation11 + $0xf8] sm:$0xff]  }
 0x88d   :  { %v14988_v53 = vpop.f32.mrf.mxu1  ;;  %v18308_v57 = vld [vmem:[#allocation11 + $0x98] sm:$0xff]  }
 0x88e   :  { %15305 = vmatpush1.bf16.msra.mxu1 %v18008_v31  ;;  %v11994_v31 = vld [vmem:[#allocation8 + $0xe58] sm:$0xff] }
 0x88f   :  { %15306 = vmatprep.subr.bf16.mxu1 %v18001_v36  ;;  %18226 = vmatpush3.bf16.msra.mxu0 %v18318_v4  ;;  %v11998_v36 = vld [vmem:[#allocation8 + $0xe78] sm:$0xff]  ;;  %v14945_v4 = vpop.f32.mrf.mxu0 }
 0x890   :  { %18227 = vmatprep.subr.bf16.mxu0 %v18319_v56  ;;  %v14905_v56 = vadd.f32 %v14904_v18, %v14862_v15  ;;  %v18309_v18 = vld [vmem:[#allocation11 + $0xd0] sm:$0xff]   ;;  %v18336_v15 = vld [vmem:[#allocation11 + $0x1a8] sm:$0xff]  }
 0x891   :  { %v14947_v6 = vpop.f32.mrf.mxu0 }
 0x892   :  { %15307 = vmatpush1.bf16.msra.mxu1 %v18000_v62  ;;  %v18072_v62 = vcombine.low %v12002_v50, %v12006_v45 }
 0x893   :  { %15308 = vmatprep.subr.bf16.mxu1 %v17993_v21  ;;  %18228 = vmatpush3.bf16.msra.mxu0 %v18320_v11  ;;  %v18065_v21 = vcombine.high %v11994_v31, %v11998_v36  ;;  %v14901_v11 = vadd.f32 %v19245_v26, %v14858_v20  ;;  %v18300_v26 = vld [vmem:[#allocation11 + $0xb8] sm:$0xff]  }
 0x894   :  { %18229 = vmatprep.subr.bf16.mxu0 %v18321_v29  ;;  %v14990_v29 = vpop.f32.mrf.mxu1 }
 0x895   :  { %v14944_v14 = vadd.f32 %v14943_v30, %v14901_v11 }
 0x896   :  { %15309 = vmatpush1.bf16.msra.mxu1 %v17992_v40  ;;  %v14948_v40 = vadd.f32 %v14947_v6, %v14905_v56  ;;  %v19393_v6 = vsub.s32 4, %v18640_v42 }
 0x897   :  { %15310 = vmatprep.subr.bf16.mxu1 %v18113_v17  ;;  %18230 = vmatpush3.bf16.msra.mxu0 %v18322_v38  ;;  %v18064_v17 = vcombine.low %v11994_v31, %v11998_v36  ;;  %v18057_v38 = vcombine.high %v11986_v24, %v11990_v10  ;;  %v18338_v31 = vld [vmem:[#allocation11 + $0x1a0] sm:$0xff]   ;;  %v15027_v36 = vpop.f32.mrf.mxu0 }
 0x898   :  { %18231 = vmatprep.subr.bf16.mxu0 %v18323_v41  ;;  %v14991_v54 = vadd.f32 %v14990_v29, %v14948_v40  ;;  %v14987_v41 = vadd.f32 %v14986_v23, %v14944_v14  ;;  %v12068_v29 = vrot.slane %v19216_v44, %v19393_v6 }
 0x899   :  { %v15029_v20 = vpop.f32.mrf.mxu0 }
 0x89a   :  { %15311 = vmatpush2.bf16.msra.mxu1 %v18112_v22  ;;  %v18056_v22 = vcombine.low %v11986_v24, %v11990_v10  ;;  %v12072_v10 = vrot.slane %v19216_v44, %v1749_v19  ;;  %v18342_v19 = vld [vmem:[#allocation11 + $0x190] sm:$0xff]  }
 0x89b   :  { %15312 = vmatprep.subr.bf16.mxu1 %v18105_v58  ;;  %18232 = vmatpush3.bf16.msra.mxu0 %v18324_v52  ;;  %v15348_v58 = vmax.f32 %v14991_v54, 0.0  ;;  %v15340_v52 = vmax.f32 %v14987_v41, 0.0  ;;  %v15031_v56 = vpop.f32.mrf.mxu0  ;;  %v15028_v54 = vadd.f32 %v15027_v36, %v12068_v29 }
 0x89c   :  { %18233 = vmatprep.subr.bf16.mxu0 %v18325_v43  ;;  %v18302_v43 = vld [vmem:[#allocation11 + $0xb0] sm:$0xff]   ;;  %v15032_v14 = vadd.f32 %v15031_v56, %v12068_v29 }
 0x89d   :  { %v15356_v7 = vpack.c.bf16 %v15348_v58, %v15340_v52 }
 0x89e   :  { %15313 = vmatpush2.bf16.msra.mxu1 %v18104_v13  ;;  %v18303_v13 = vld [vmem:[#allocation11 + $0xe8] sm:$0xff]  }
 0x89f   :  { %15314 = vmatprep.subr.bf16.mxu1 %v18097_v34  ;;  %18234 = vmatpush3.bf16.msra.mxu0 %v18326_v32  ;;  %v18304_v34 = vld [vmem:[#allocation11 + $0xa8] sm:$0xff]   ;;  %v18305_v32 = vld [vmem:[#allocation11 + $0xe0] sm:$0xff]  }
 0x8a0   :  { %18235 = vmatprep.subr.bf16.mxu0 %v18327_v9  ;;  %v19392_v9 = vsub.s32 2, %v18640_v42 }
 0x8a2   :  { %15315 = vmatpush2.bf16.msra.mxu1 %v18096_v2  ;;  %v12060_v2 = vrot.slane %v19216_v44, %v19392_v9 }
 0x8a3   :  { %15316 = vmatprep.subr.bf16.mxu1 %v18089_v27  ;;  %18236 = vmatpush3.bf16.msra.mxu0 %v18328_v0 }
 0x8a4   :  { %18237 = vmatprep.subr.bf16.mxu0 %v18329_v25  ;;  %v14856_v27 = vadd.f32 %v19241_v12, %v12060_v2  ;;  %v18311_v25 = vld [vmem:[#allocation11 + $0xc8] sm:$0xff]   ;;  %v18314_v12 = vld [vmem:[#allocation11 + $0x80] sm:$0xff]  }
 0x8a6   :  { %15317 = vmatpush2.bf16.msra.mxu1 %v18088_v33  ;;  %v14899_v60 = vadd.f32 %v19243_v1, %v14856_v27  ;;  %v18332_v1 = vld [vmem:[#allocation11 + $0x1b8] sm:$0xff]  }
 0x8a7   :  { %15318 = vmatprep.subr.bf16.mxu1 %v18081_v16  ;;  %18238 = vmatpush3.bf16.msra.mxu0 %v18330_v35  ;;  %v18312_v16 = vld [vmem:[#allocation11 + $0x88] sm:$0xff]  }
 0x8a8   :  { %v14942_v35 = vadd.f32 %v19251_v55, %v14899_v60  ;;  %v18335_v55 = vld [vmem:[#allocation11 + $0x1e8] sm:$0xff]  }
 0x8aa   :  { %15319 = vmatpush2.bf16.msra.mxu1 %v18080_v47  ;;  %v14985_v45 = vadd.f32 %v19253_v63, %v14942_v35  ;;  %v18333_v47 = vld [vmem:[#allocation11 + $0x1f0] sm:$0xff]   ;;  %v18337_v63 = vld [vmem:[#allocation11 + $0x1e0] sm:$0xff]  }
 0x8ab   :  { %15320 = vmatprep.subr.bf16.mxu1 %v18073_v3  ;;  %v18334_v3 = vld [vmem:[#allocation11 + $0x1b0] sm:$0xff]   ;;  %v18345_v35 = vld [vmem:[#allocation11 + $0x1c0] sm:$0xff]  }
 0x8ac   :  { %v15339_v23 = vmax.f32 %v14985_v45, 0.0 }
 0x8ae   :  { %15321 = vmatpush2.bf16.msra.mxu1 %v18072_v62 }
 0x8af   :  { %15322 = vmatprep.subr.bf16.mxu1 %v18065_v21  ;;  %v15033_v21 = vpop.f32.mrf.mxu0 }
 0x8b1   :  { %v15113_v24 = vpop.f32.mrf.mxu0 }
 0x8b2   :  { %15323 = vmatpush2.bf16.msra.mxu1 %v18064_v17 }
 0x8b3   :  { %15324 = vmatprep.subr.bf16.mxu1 %v18057_v38  ;;  %v15115_v17 = vpop.f32.mrf.mxu0  ;;  %v15030_v38 = vadd.f32 %v15029_v20, %v12072_v10 }
 0x8b5   :  { %v15117_v52 = vpop.f32.mrf.mxu0 }
 0x8b6   :  { %15325 = vmatpush2.bf16.msra.mxu1 %v18056_v22  ;;  %v15034_v22 = vadd.f32 %v15033_v21, %v12072_v10 }
 0x8b7   :  { %18201 = vmatprep.subr.bf16.mxu1 %v18299_v59 }
 0x8b9   :  { %15327 = vmatmul.mubr.bf16.vlgmr.msra.gmra.mxu1 %v19176_v46  ;;  %v14860_v46 = vadd.f32 %v19247_v28, %v12060_v2  ;;  %v18313_v28 = vld [vmem:[#allocation11 + $0xc0] sm:$0xff]   ;;  %v15070_v62 = vpop.f32.mrf.mxu1 }
 0x8ba   :  { %18202 = vmatpush3.bf16.msra.mxu1 %v18300_v26  ;;  %15953 = vmatprep.mubr.bf16.mxu1 %v15356_v7  ;;  %v15071_v26 = vadd.f32 %v15070_v62, %v15028_v54 }
 0x8bb   :  { %18203 = vmatprep.subr.bf16.mxu1 %v18301_v5  ;;  %v14903_v0 = vadd.f32 %v19249_v37, %v14860_v46  ;;  %v18331_v37 = vld [vmem:[#allocation11 + $0x1f8] sm:$0xff]   ;;  %v15072_v11 = vpop.f32.mrf.mxu1 }
 0x8bc   :  { %v15073_v59 = vadd.f32 %v15072_v11, %v15030_v38 }
 0x8bd   :  { %v14946_v33 = vadd.f32 %v14945_v4, %v14903_v0  ;;  %v18339_v4 = vld [vmem:[#allocation11 + $0x1d8] sm:$0xff]   ;;  %v15074_v40 = vpop.f32.mrf.mxu1 }
 0x8be   :  { %18204 = vmatpush3.bf16.msra.mxu1 %v18302_v43  ;;  %v15075_v58 = vadd.f32 %v15074_v40, %v15032_v14  ;;  %v18341_v43 = vld [vmem:[#allocation11 + $0x1d0] sm:$0xff]  }
 0x8bf   :  { %18205 = vmatprep.subr.bf16.mxu1 %v18303_v13  ;;  %v14989_v50 = vadd.f32 %v14988_v53, %v14946_v33  ;;  %v18340_v53 = vld [vmem:[#allocation11 + $0x198] sm:$0xff]   ;;  %v15076_v41 = vpop.f32.mrf.mxu1 }
 0x8c0   :  { %v15077_v7 = vadd.f32 %v15076_v41, %v15034_v22 }
 0x8c1   :  { %v15347_v30 = vmax.f32 %v14989_v50, 0.0 }
 0x8c2   :  { %18206 = vmatpush3.bf16.msra.mxu1 %v18304_v34  ;;  %v15116_v34 = vadd.f32 %v15115_v17, %v15073_v59 }
 0x8c3   :  { %18207 = vmatprep.subr.bf16.mxu1 %v18305_v32  ;;  %v15355_v48 = vpack.c.bf16 %v15347_v30, %v15339_v23  ;;  %v15118_v32 = vadd.f32 %v15117_v52, %v15075_v58 }
 0x8c6   :  { %18208 = vmatpush3.bf16.msra.mxu1 %v18306_v51  ;;  %v15119_v51 = vpop.f32.mrf.mxu0 }
 0x8c7   :  { %18209 = vmatprep.subr.bf16.mxu1 %v18307_v39  ;;  %v15114_v39 = vadd.f32 %v15113_v24, %v15071_v26  ;;  %v15120_v46 = vadd.f32 %v15119_v51, %v15077_v7 }
 0x8ca   :  { %18210 = vmatpush3.bf16.msra.mxu1 %v18308_v57 }
 0x8cb   :  { %18211 = vmatprep.subr.bf16.mxu1 %v18309_v18  ;;  %v18343_v18 = vld [vmem:[#allocation11 + $0x1c8] sm:$0xff]  }
 0x8ce   :  { %18212 = vmatpush3.bf16.msra.mxu1 %v18310_v49  ;;  %v18344_v49 = vld [vmem:[#allocation11 + $0x188] sm:$0xff]  }
 0x8cf   :  { %18213 = vmatprep.subr.bf16.mxu1 %v18311_v25 }
 0x8d2   :  { %18214 = vmatpush3.bf16.msra.mxu1 %v18312_v16 }
 0x8d3   :  { %18215 = vmatprep.subr.bf16.mxu1 %v18313_v28  ;;  %v18346_v28 = vld [vmem:[#allocation11 + $0x180] sm:$0xff]  }
 0x8d6   :  { %18216 = vmatpush3.bf16.msra.mxu1 %v18314_v12 }
 0x8d7   :  { %18245 = vmatprep.subr.bf16.mxu1 %v18331_v37 }
 0x8d9   :  { %15954 = vmatmul.mubr.bf16.vlgmr.msra.gmra.mxu1 %v15355_v48 }
 0x8da   :  { %18246 = vmatpush3.bf16.msra.mxu1 %v18332_v1 }
 0x8db   :  { %18247 = vmatprep.subr.bf16.mxu1 %v18333_v47 }
 0x8de   :  { %18248 = vmatpush3.bf16.msra.mxu1 %v18334_v3 }
 0x8df   :  { %18249 = vmatprep.subr.bf16.mxu1 %v18335_v55  ;;  %v12080_v55 = vrot.slane %v19216_v44, %v1757_v61 }
 0x8e2   :  { %18250 = vmatpush3.bf16.msra.mxu1 %v18336_v15  ;;  %v12076_v15 = vrot.slane %v19216_v44, %v1753_v8 }
 0x8e3   :  { %18251 = vmatprep.subr.bf16.mxu1 %v18337_v63 }
 0x8e6   :  { %18252 = vmatpush3.bf16.msra.mxu1 %v18338_v31 }
 0x8e7   :  { %18253 = vmatprep.subr.bf16.mxu1 %v18339_v4 }
 0x8ea   :  { %18254 = vmatpush3.bf16.msra.mxu1 %v18340_v53  ;;  %v15199_v30 = vpop.f32.mrf.mxu0 }
 0x8eb   :  { %18255 = vmatprep.subr.bf16.mxu1 %v18341_v43  ;;  %v15200_v53 = vadd.f32 %v15199_v30, %v12076_v15 }
 0x8ec   :  { %v15201_v37 = vpop.f32.mrf.mxu0 }
 0x8ed   :  { %v15202_v36 = vadd.f32 %v15201_v37, %v12080_v55 }
 0x8ee   :  { %18256 = vmatpush3.bf16.msra.mxu1 %v18342_v19  ;;  %v15203_v23 = vpop.f32.mrf.mxu0 }
 0x8ef   :  { %18257 = vmatprep.subr.bf16.mxu1 %v18343_v18  ;;  %v15204_v4 = vadd.f32 %v15203_v23, %v12076_v15 }
 0x8f0   :  { %v15205_v48 = vpop.f32.mrf.mxu0 }
 0x8f1   :  { %v15206_v56 = vadd.f32 %v15205_v48, %v12080_v55 }
 0x8f2   :  { %18258 = vmatpush3.bf16.msra.mxu1 %v18344_v49 }
 0x8f3   :  { %18259 = vmatprep.subr.bf16.mxu1 %v18345_v35 }
 0x8f6   :  { %18260 = vmatpush3.bf16.msra.mxu1 %v18346_v28 }
 0x8f9   :  { %v15156_v5 = vpop.f32.mrf.mxu1 }
 0x8fa   :  { %v15157_v27 = vadd.f32 %v15156_v5, %v15114_v39 }
 0x8fb   :  { %v15158_v13 = vpop.f32.mrf.mxu1 }
 0x8fc   :  { %v15159_v2 = vadd.f32 %v15158_v13, %v15116_v34  ;;  %v15341_v50 = vmax.f32 %v15157_v27, 0.0 }
 0x8fd   :  { %v15160_v9 = vpop.f32.mrf.mxu1 }
 0x8fe   :  { %v15161_v57 = vadd.f32 %v15160_v9, %v15118_v32  ;;  %v15342_v33 = vmax.f32 %v15159_v2, 0.0 }
 0x8ff   :  { %v15162_v0 = vpop.f32.mrf.mxu1 }
 0x900   :  { %v15163_v60 = vadd.f32 %v15162_v0, %v15120_v46  ;;  %v15349_v25 = vmax.f32 %v15161_v57, 0.0  ;;  %v18114_v46 = vld [vmem:[#allocation13] ss:$0 sm:$0xff] }
 0x902   :  { %v15350_v16 = vmax.f32 %v15163_v60, 0.0  ;;  %v15357_v12 = vpack.c.bf16 %v15349_v25, %v15341_v50 }
 0x904   :  { %v15358_v45 = vpack.c.bf16 %v15350_v16, %v15342_v33 }
 0x906   :  { %15994 = vmatprep.mubr.bf16.mxu0 %v15358_v45 }
 0x907   :  { %15995 = vmatmul.mubr.bf16.vlgmr.msra.gmra.mxu0 %v15357_v12 }
 0x92a   :  { %v15285_v3 = vpop.f32.mrf.mxu0 }
 0x92c   :  { %v15287_v31 = vpop.f32.mrf.mxu0 }
 0x92e   :  { %v15289_v11 = vpop.f32.mrf.mxu0 }
 0x930   :  { %v15291_v17 = vpop.f32.mrf.mxu0 }
 0x939   :  { %v15242_v1 = vpop.f32.mrf.mxu1 }
 0x93a   :  { %v15243_v24 = vadd.f32 %v15242_v1, %v15200_v53 }
 0x93b   :  { %v15244_v47 = vpop.f32.mrf.mxu1 }
 0x93c   :  { %v15245_v62 = vadd.f32 %v15244_v47, %v15202_v36  ;;  %v15286_v42 = vadd.f32 %v15285_v3, %v15243_v24 }
 0x93d   :  { %v15246_v63 = vpop.f32.mrf.mxu1 }
 0x93e   :  { %v15247_v21 = vadd.f32 %v15246_v63, %v15204_v4  ;;  %v15288_v40 = vadd.f32 %v15287_v31, %v15245_v62 }
 0x93f   :  { %v15248_v20 = vpop.f32.mrf.mxu1 }
 0x940   :  { %v15249_v6 = vadd.f32 %v15248_v20, %v15206_v56  ;;  %v15290_v61 = vadd.f32 %v15289_v11, %v15247_v21 }
 0x942   :  { %v15292_v14 = vadd.f32 %v15291_v17, %v15249_v6 }
 0x94a   :  { %v18195_v43 = vpop.f32.mrf.mxu0 }
 0x94c   :  { %v18196_v13 = vpop.f32.mrf.mxu0 }
 0x94d   :  { %v18197_v57 = vadd.f32 %v18196_v13, %v18195_v43 }
 0x94e   :  { %v18198_v19 = vpop.f32.mrf.mxu0 }
 0x94f   :  { %v15915_v49 = vadd.f32 %v18197_v57, %v18114_v46 }
 0x950   :  { %v18199_v34 = vpop.f32.mrf.mxu0 }
 0x951   :  { %v18200_v60 = vadd.f32 %v18199_v34, %v18198_v19 }
 0x953   :  { %v15918_v45 = vadd.f32 %v18200_v60, %v18114_v46 }
 0x979   :  { %v15328_v10 = vpop.f32.mrf.mxu1 }
 0x97a   :  { %v15329_v54 = vadd.f32 %v15328_v10, %v15286_v42 }
 0x97b   :  { %v15330_v29 = vpop.f32.mrf.mxu1 }
 0x97c   :  { %v15331_v8 = vadd.f32 %v15330_v29, %v15288_v40  ;;  %v15343_v26 = vmax.f32 %v15329_v54, 0.0 }
 0x97d   :  { %v15332_v38 = vpop.f32.mrf.mxu1 }
 0x97e   :  { %v15333_v44 = vadd.f32 %v15332_v38, %v15290_v61  ;;  %v15344_v58 = vmax.f32 %v15331_v8, 0.0 }
 0x97f   :  { %v15334_v41 = vpop.f32.mrf.mxu1 }
 0x980   :  { %v15335_v22 = vadd.f32 %v15334_v41, %v15292_v14  ;;  %v15351_v59 = vmax.f32 %v15333_v44, 0.0 }
 0x982   :  { %v15352_v52 = vmax.f32 %v15335_v22, 0.0  ;;  %v15359_v7 = vpack.c.bf16 %v15351_v59, %v15343_v26 }
 0x984   :  { %v15360_v5 = vpack.c.bf16 %v15352_v52, %v15344_v58 }
 0x986   :  { %16035 = vmatprep.mubr.bf16.mxu1 %v15360_v5 }
 0x987   :  { %16036 = vmatmul.mubr.bf16.vlgmr.msra.gmra.mxu1 %v15359_v7 }
 0x999   :  { %v18217_v32 = vpop.f32.mrf.mxu1 }
 0x99b   :  { %v18218_v39 = vpop.f32.mrf.mxu1 }
 0x99c   :  { %v18219_v27 = vadd.f32 %v18218_v39, %v18217_v32 }
 0x99d   :  { %v18220_v2 = vpop.f32.mrf.mxu1 }
 0x99e   :  { %v15956_v35 = vadd.f32 %v18219_v27, %v15915_v49 }
 0x99f   :  { %v18221_v0 = vpop.f32.mrf.mxu1 }
 0x9a0   :  { %v18222_v50 = vadd.f32 %v18221_v0, %v18220_v2 }
 0x9a2   :  { %v15959_v1 = vadd.f32 %v18222_v50, %v15918_v45 }
 0x9c7   :  { %v18239_v51 = vpop.f32.mrf.mxu0 }
 0x9c9   :  { %v18240_v9 = vpop.f32.mrf.mxu0 }
 0x9ca   :  { %v18241_v25 = vadd.f32 %v18240_v9, %v18239_v51 }
 0x9cb   :  { %v18242_v18 = vpop.f32.mrf.mxu0 }
 0x9cc   :  { %v15997_v12 = vadd.f32 %v18241_v25, %v15956_v35 }
 0x9cd   :  { %v18243_v33 = vpop.f32.mrf.mxu0 }
 0x9ce   :  { %v18244_v30 = vadd.f32 %v18243_v33, %v18242_v18 }
 0x9d0   :  { %v16000_v3 = vadd.f32 %v18244_v30, %v15959_v1 }
 0xa47   :  { %v18261_v16 = vpop.f32.mrf.mxu1 }
 0xa49   :  { %v18262_v28 = vpop.f32.mrf.mxu1 }
 0xa4a   :  { %v18263_v37 = vadd.f32 %v18262_v28, %v18261_v16 }
 0xa4b   :  { %v18264_v23 = vpop.f32.mrf.mxu1 }
 0xa4c   :  { %v16038_v48 = vadd.f32 %v18263_v37, %v15997_v12 }
 0xa4d   :  { %v18265_v47 = vpop.f32.mrf.mxu1 }
 0xa4e   :  { %16044 = vst [vmem:[#allocation14] sm:$0xff] %v16038_v48  ;;  %v18266_v55 = vadd.f32 %v18265_v47, %v18264_v23 }
 0xa50   :  { %v16041_v15 = vadd.f32 %v18266_v55, %v16000_v3 }
 0xa52   :  { %16045 = vst [vmem:[#allocation14 + $0x8] sm:$0xff] %v16041_v15 }
 0xa53   :  { %18502 = shalt.err (!%p18499_p11)
}
 0xa54   :  { %s18535_s1 = smov 128   ;;  %s18536_s16 = smov 8  }
 0xa55   :  { %16057 = dma.vmem_to_hbm [thread:$0]  %s16052_s6, 256, %s19291_s7, [#allocation4], %s18535_s1, %s18535_s1, %s18536_s16  }
 0xa56   :  { %18519 = dma.done.wait [#allocation4], 256  }
 0xa57   :  { %18520 = vsyncadd [#allocation4], 4294967040 }
 0xa58   :  { %16061 = vsyncpa [#allocation3], 1 }
 0xa59   :  { %16062 = vsyncpa [#allocation6], 1 }
 0xa5a   :  { %16063 = vsyncpa [#allocation9], 1 }
 0xa5b   :  { %16064 = vsyncpa [#allocation12], 1 }
 0xa5c   :  { %16065 = vsyncpa [#allocation4], 1 }

</bundles_post_ra>
